<compile_context>
chip_gen: v6e
topology: v6e:2x2x1
jax: 0.10.0
libtpu: 0.0.40
codegen_flags: <defaults>
</compile_context>

<pallas_src>
import functools

import jax
import jax.numpy as jnp
from jax.experimental import pallas as pl
from jax.experimental.pallas import tpu as pltpu

NUM_CLASSES = 21

_VMEM_LIMIT = 32 * 1024 * 1024  # leave headroom on v7x (64 MiB physical per TensorCore)


# ---------------------------------------------------------------------------
# Fused Conv2d -> ReLU -> MaxPool2d(2,2) Pallas kernel (one image per grid step)
# ---------------------------------------------------------------------------
def _conv_relu_pool_kernel(x_ref, w_ref, b_ref, o_ref, *, kh, kw):
    """
    x_ref : (1, H, CIN, W)       bf16  input feature map, "NHCW" layout
    w_ref : (KH, KW, COUT, CIN)  bf16  conv weights
    b_ref : (COUT, 1)            f32   conv bias
    o_ref : (1, OHP, COUT, OWP)  bf16  ReLU'd + 2x2-max-pooled output, "NHCW"
    """
    cout = w_ref.shape[2]
    ohp = o_ref.shape[1]
    owp = o_ref.shape[3]
    ow = 2 * owp

    # 0/1 selection matrices: column-pair pooling done as two MXU "gathers"
    # (no lane-strided ops needed; selection is exact, max applied afterwards).
    r_ids = jax.lax.broadcasted_iota(jnp.int32, (ow, owp), 0)
    c_ids = jax.lax.broadcasted_iota(jnp.int32, (ow, owp), 1)
    sel_even = (r_ids == 2 * c_ids).astype(jnp.bfloat16)
    sel_odd = (r_ids == 2 * c_ids + 1).astype(jnp.bfloat16)

    bias = b_ref[...]                                     # (COUT, 1) f32

    @pl.loop(0, ohp)
    def _(pr):                                            # one pooled output row
        r0 = 2 * pr                                       # first conv row of the pair
        acc0 = jnp.zeros((cout, ow), jnp.float32)         # conv row 2*pr
        acc1 = jnp.zeros((cout, ow), jnp.float32)         # conv row 2*pr + 1
        for ii in range(kh + 1):                          # the kh+1 input rows of the pair
            row = x_ref[0, r0 + ii, :, :]                 # (CIN, W) bf16 — major-axis index
            for j in range(kw):                           # static kernel-column loop
                piece = row[:, j:j + ow]                  # (CIN, OW)
                if ii < kh:
                    acc0 += jnp.dot(w_ref[ii, j], piece,
                                    preferred_element_type=jnp.float32)
                if ii >= 1:
                    acc1 += jnp.dot(w_ref[ii - 1, j], piece,
                                    preferred_element_type=jnp.float32)
        # bias + ReLU + row-pair max (ReLU commutes with max; bias shared by the pair)
        m = jnp.maximum(jnp.maximum(acc0, acc1) + bias, 0.0).astype(jnp.bfloat16)
        # column-pair max via the two selection matmuls
        pooled = jnp.maximum(
            jnp.dot(m, sel_even, preferred_element_type=jnp.float32),
            jnp.dot(m, sel_odd, preferred_element_type=jnp.float32))
        o_ref[0, pr, :, :] = pooled.astype(o_ref.dtype)


def conv_relu_pool(x, w, b, *, kh, kw):
    """x: (N, H, CIN, W) bf16, w: (KH, KW, COUT, CIN) bf16, b: (COUT,) f32.
    Returns (N, (H-KH+1)//2, COUT, (W-KW+1)//2) bf16 ("NHCW")."""
    n, h, cin, w_in = x.shape
    cout = w.shape[2]
    oh, ow = h - kh + 1, w_in - kw + 1
    ohp, owp = oh // 2, ow // 2
    kernel = functools.partial(_conv_relu_pool_kernel, kh=kh, kw=kw)
    return pl.pallas_call(
        kernel,
        out_shape=jax.ShapeDtypeStruct((n, ohp, cout, owp), jnp.bfloat16),
        grid=(n,),
        in_specs=[
            pl.BlockSpec((1, h, cin, w_in), lambda i: (i, 0, 0, 0)),
            pl.BlockSpec((kh, kw, cout, cin), lambda i: (0, 0, 0, 0)),
            pl.BlockSpec((cout, 1), lambda i: (0, 0)),
        ],
        out_specs=pl.BlockSpec((1, ohp, cout, owp), lambda i: (i, 0, 0, 0)),
        compiler_params=pltpu.CompilerParams(
            dimension_semantics=("parallel",),
            vmem_limit_bytes=_VMEM_LIMIT,
        ),
    )(x, w, b.reshape(cout, 1))


# ---------------------------------------------------------------------------
# Fused fc1 -> ReLU -> fc2 -> ReLU -> fc3 Pallas kernel (single call, weights in VMEM)
# ---------------------------------------------------------------------------
def _mlp_kernel(x_ref, w1_ref, b1_ref, w2_ref, b2_ref, w3_ref, b3_ref, o_ref):
    h = jnp.dot(x_ref[...], w1_ref[...], preferred_element_type=jnp.float32)
    h = jnp.maximum(h + b1_ref[...], 0.0).astype(jnp.bfloat16)
    h = jnp.dot(h, w2_ref[...], preferred_element_type=jnp.float32)
    h = jnp.maximum(h + b2_ref[...], 0.0).astype(jnp.bfloat16)
    h = jnp.dot(h, w3_ref[...], preferred_element_type=jnp.float32)
    o_ref[...] = (h + b3_ref[...]).astype(o_ref.dtype)


def mlp_head(x, w1, b1, w2, b2, w3, b3):
    n = x.shape[0]
    return pl.pallas_call(
        _mlp_kernel,
        out_shape=jax.ShapeDtypeStruct((n, w3.shape[1]), jnp.float32),
        compiler_params=pltpu.CompilerParams(vmem_limit_bytes=_VMEM_LIMIT),
    )(x, w1, b1.reshape(1, -1), w2, b2.reshape(1, -1), w3, b3.reshape(1, -1))


# ---------------------------------------------------------------------------
# Parameters (PyTorch layouts) + one-time re-layout for the kernels
# ---------------------------------------------------------------------------
def init_params(key):
    """Deterministic synthetic parameters with the shapes/layouts of the nn.Module."""
    def conv(key, cout, cin, k):
        kw_, kb_ = jax.random.split(key)
        fan_in = cin * k * k
        w = jax.random.normal(kw_, (cout, cin, k, k), jnp.float32) / jnp.sqrt(fan_in)
        b = jax.random.normal(kb_, (cout,), jnp.float32) * 0.01
        return w, b

    def linear(key, fin, fout):
        kw_, kb_ = jax.random.split(key)
        w = jax.random.normal(kw_, (fin, fout), jnp.float32) / jnp.sqrt(fin)
        b = jax.random.normal(kb_, (fout,), jnp.float32) * 0.01
        return w, b

    ks = jax.random.split(key, 6)
    p = {}
    p["conv1_w"], p["conv1_b"] = conv(ks[0], 64, 3, 5)
    p["conv2_w"], p["conv2_b"] = conv(ks[1], 32, 64, 3)
    p["conv3_w"], p["conv3_b"] = conv(ks[2], 16, 32, 3)
    p["fc1_w"], p["fc1_b"] = linear(ks[3], 16 * 26 * 26, 120)
    p["fc2_w"], p["fc2_b"] = linear(ks[4], 120, 84)
    p["fc3_w"], p["fc3_b"] = linear(ks[5], 84, NUM_CLASSES)
    return p


def prepare_params(p):
    """One-time re-layout / bf16 cast of the PyTorch-style parameters."""
    q = {}
    # conv1: fold the KW taps into the channel axis (matches the kw-unfolded input):
    #   w[i, 0, co, j*CIN + ci] = torch_w[co, ci, i, j]
    w = p["conv1_w"]                                          # (64, 3, 5, 5)
    cout1, cin1, k1h, k1w = w.shape
    w = jnp.transpose(w, (2, 0, 3, 1)).reshape(k1h, cout1, k1w * cin1)
    q["c1_w"] = w[:, None, :, :].astype(jnp.bfloat16)         # (5, 1, 64, 15)
    q["c1_b"] = p["conv1_b"]
    # conv2 / conv3: (COUT, CIN, KH, KW) -> (KH, KW, COUT, CIN)
    q["c2_w"] = jnp.transpose(p["conv2_w"], (2, 3, 0, 1)).astype(jnp.bfloat16)
    q["c2_b"] = p["conv2_b"]
    q["c3_w"] = jnp.transpose(p["conv3_w"], (2, 3, 0, 1)).astype(jnp.bfloat16)
    q["c3_b"] = p["conv3_b"]
    # fc1: torch flattens (C, H, W); our activations flatten as (H, C, W) ("NHCW"),
    # so permute the weight rows once here instead of transposing activations.
    w1 = p["fc1_w"].reshape(16, 26, 26, 120)                  # (C, H, W, out)
    w1 = jnp.transpose(w1, (1, 0, 2, 3)).reshape(16 * 26 * 26, 120)
    q["fc1_w"] = w1.astype(jnp.bfloat16)
    q["fc1_b"] = p["fc1_b"]
    q["fc2_w"] = p["fc2_w"].astype(jnp.bfloat16)
    q["fc2_b"] = p["fc2_b"]
    q["fc3_w"] = p["fc3_w"].astype(jnp.bfloat16)
    q["fc3_b"] = p["fc3_b"]
    return q


# ---------------------------------------------------------------------------
# Forward pass (matches MySimpleClassifier.forward)
# ---------------------------------------------------------------------------
def my_simple_classifier_forward(prep, x_nchw):
    """x_nchw: (N, 3, 224, 224) float32 -> logits (N, 21) float32."""
    n, cin, h, w = x_nchw.shape
    kw1 = 5
    ow1 = w - kw1 + 1                                          # 220
    xb = x_nchw.astype(jnp.bfloat16)
    # Tiny kw-only unfold for conv1 (Cin=3 -> contraction K=15); ~1.5 MB/image of glue,
    # replacing the old ~29 MB HBM im2col.  Result layout: (N, H, KW*CIN, OW) "NHCW".
    u = jnp.stack([xb[:, :, :, j:j + ow1] for j in range(kw1)], axis=1)   # (N,5,3,H,220)
    u = jnp.transpose(u, (0, 3, 1, 2, 4)).reshape(n, h, kw1 * cin, ow1)   # (N,224,15,220)

    y = conv_relu_pool(u, prep["c1_w"], prep["c1_b"], kh=5, kw=1)   # (N, 110, 64, 110)
    y = conv_relu_pool(y, prep["c2_w"], prep["c2_b"], kh=3, kw=3)   # (N,  54, 32,  54)
    y = conv_relu_pool(y, prep["c3_w"], prep["c3_b"], kh=3, kw=3)   # (N,  26, 16,  26)

    # NHCW flatten (contiguous reshape); fc1 weight rows were permuted to match.
    y = y.reshape(n, 26 * 16 * 26)                                   # (N, 10816)
    return mlp_head(y, prep["fc1_w"], prep["fc1_b"],
                    prep["fc2_w"], prep["fc2_b"],
                    prep["fc3_w"], prep["fc3_b"])


# ---------------------------------------------------------------------------
if __name__ == "__main__":
    key = jax.random.PRNGKey(0)
    k_param, k_x = jax.random.split(key)
    params = init_params(k_param)
    prep = prepare_params(params)
    # Spatial size 224 is required by Linear(in_features=16*26*26); batch kept small.
    x = jax.random.normal(k_x, (2, 3, 224, 224), jnp.float32)

    fwd = jax.jit(my_simple_classifier_forward)
    logits = jax.block_until_ready(fwd(prep, x))

    assert logits.shape == (2, NUM_CLASSES), logits.shape
    assert logits.dtype == jnp.float32
    assert bool(jnp.all(jnp.isfinite(logits)))
    print("KERNEL_OK")
</pallas_src>

<mosaic_0001>
module attributes {stable_mosaic.version = 11 : i64} {
  func.func @_conv_relu_pool_kernel(%arg0: i32, %arg1: memref<1x224x15x220xbf16, #tpu.memory_space<vmem>>, %arg2: memref<5x1x64x15xbf16, #tpu.memory_space<vmem>>, %arg3: memref<64x1xf32, #tpu.memory_space<vmem>>, %arg4: memref<1x110x64x110xbf16, #tpu.memory_space<vmem>>) attributes {dimension_semantics = [#tpu.dimension_semantics<parallel>], iteration_bounds = array<i64: 2>, scalar_prefetch = 0 : i64, scratch_operands = 0 : i64, tpu.core_type = #tpu.core_type<tc>, window_params = [{transform_indices = @transform_0, window_bounds = array<i64: 1, 224, 15, 220>}, {pipeline_mode = #tpu.pipeline_mode<synchronous>, transform_indices = @transform_1, window_bounds = array<i64: 5, 1, 64, 15>}, {pipeline_mode = #tpu.pipeline_mode<synchronous>, transform_indices = @transform_2, window_bounds = array<i64: 64, 1>}, {transform_indices = @transform_3, window_bounds = array<i64: 1, 110, 64, 110>}]} {
    %0 = tpu.iota {dimensions = array<i32: 0>} : vector<220x110xi32>
    %1 = tpu.iota {dimensions = array<i32: 1>} : vector<220x110xi32>
    %c2_i32 = arith.constant 2 : i32
    %2 = vector.broadcast %c2_i32 : i32 to vector<220x110xi32>
    %3 = arith.muli %2, %1 : vector<220x110xi32>
    %4 = arith.cmpi eq, %0, %3 : vector<220x110xi32>
    %5 = arith.extui %4 : vector<220x110xi1> to vector<220x110xi32>
    %6 = arith.sitofp %5 : vector<220x110xi32> to vector<220x110xf32>
    %7 = arith.truncf %6 : vector<220x110xf32> to vector<220x110xbf16>
    %c2_i32_0 = arith.constant 2 : i32
    %8 = vector.broadcast %c2_i32_0 : i32 to vector<220x110xi32>
    %9 = arith.muli %8, %1 : vector<220x110xi32>
    %c1_i32 = arith.constant 1 : i32
    %10 = vector.broadcast %c1_i32 : i32 to vector<220x110xi32>
    %11 = arith.addi %9, %10 : vector<220x110xi32>
    %12 = arith.cmpi eq, %0, %11 : vector<220x110xi32>
    %13 = arith.extui %12 : vector<220x110xi1> to vector<220x110xi32>
    %14 = arith.sitofp %13 : vector<220x110xi32> to vector<220x110xf32>
    %15 = arith.truncf %14 : vector<220x110xf32> to vector<220x110xbf16>
    %c0 = arith.constant 0 : index
    %c0_1 = arith.constant 0 : index
    %16 = vector.load %arg3[%c0, %c0_1] : memref<64x1xf32, #tpu.memory_space<vmem>>, vector<64x1xf32>
    %c0_i32 = arith.constant 0 : i32
    %c110_i32 = arith.constant 110 : i32
    %17 = arith.addi %c0_i32, %c110_i32 : i32
    %c1_i32_2 = arith.constant 1 : i32
    scf.for %arg5 = %c0_i32 to %17 step %c1_i32_2  : i32 {
      %c1_i32_4 = arith.constant 1 : i32
      %18 = arith.muli %arg5, %c1_i32_4 : i32
      %c0_i32_5 = arith.constant 0 : i32
      %19 = arith.addi %c0_i32_5, %18 : i32
      %c2_i32_6 = arith.constant 2 : i32
      %20 = arith.muli %c2_i32_6, %19 : i32
      %cst = arith.constant 0.000000e+00 : f32
      %21 = vector.broadcast %cst : f32 to vector<64x220xf32>
      %cst_7 = arith.constant 0.000000e+00 : f32
      %22 = vector.broadcast %cst_7 : f32 to vector<64x220xf32>
      %c0_i32_8 = arith.constant 0 : i32
      %23 = arith.addi %20, %c0_i32_8 : i32
      %c0_9 = arith.constant 0 : index
      %24 = arith.index_cast %23 : i32 to index
      %c0_10 = arith.constant 0 : index
      %c0_11 = arith.constant 0 : index
      %25 = vector.load %arg1[%c0_9, %24, %c0_10, %c0_11] : memref<1x224x15x220xbf16, #tpu.memory_space<vmem>>, vector<1x1x15x220xbf16>
      %26 = vector.shape_cast %25 : vector<1x1x15x220xbf16> to vector<15x220xbf16>
      %c0_12 = arith.constant 0 : index
      %c0_13 = arith.constant 0 : index
      %c0_14 = arith.constant 0 : index
      %c0_15 = arith.constant 0 : index
      %27 = vector.load %arg2[%c0_12, %c0_13, %c0_14, %c0_15] : memref<5x1x64x15xbf16, #tpu.memory_space<vmem>>, vector<1x1x64x15xbf16>
      %28 = vector.shape_cast %27 : vector<1x1x64x15xbf16> to vector<64x15xbf16>
      %cst_16 = arith.constant dense<0.000000e+00> : vector<64x220xf32>
      %29 = tpu.matmul %28, %26, %cst_16 {dimension_numbers = #tpu.dot_dimension_numbers<[1], [0], [0], [1], [0, 0, 1, 1], [], []>} : vector<64x15xbf16>, vector<15x220xbf16>, vector<64x220xf32> -> vector<64x220xf32>
      %30 = arith.addf %21, %29 : vector<64x220xf32>
      %c1_i32_17 = arith.constant 1 : i32
      %31 = arith.addi %20, %c1_i32_17 : i32
      %c0_18 = arith.constant 0 : index
      %32 = arith.index_cast %31 : i32 to index
      %c0_19 = arith.constant 0 : index
      %c0_20 = arith.constant 0 : index
      %33 = vector.load %arg1[%c0_18, %32, %c0_19, %c0_20] : memref<1x224x15x220xbf16, #tpu.memory_space<vmem>>, vector<1x1x15x220xbf16>
      %34 = vector.shape_cast %33 : vector<1x1x15x220xbf16> to vector<15x220xbf16>
      %c1 = arith.constant 1 : index
      %c0_21 = arith.constant 0 : index
      %c0_22 = arith.constant 0 : index
      %c0_23 = arith.constant 0 : index
      %35 = vector.load %arg2[%c1, %c0_21, %c0_22, %c0_23] : memref<5x1x64x15xbf16, #tpu.memory_space<vmem>>, vector<1x1x64x15xbf16>
      %36 = vector.shape_cast %35 : vector<1x1x64x15xbf16> to vector<64x15xbf16>
      %cst_24 = arith.constant dense<0.000000e+00> : vector<64x220xf32>
      %37 = tpu.matmul %36, %34, %cst_24 {dimension_numbers = #tpu.dot_dimension_numbers<[1], [0], [0], [1], [0, 0, 1, 1], [], []>} : vector<64x15xbf16>, vector<15x220xbf16>, vector<64x220xf32> -> vector<64x220xf32>
      %38 = arith.addf %30, %37 : vector<64x220xf32>
      %c0_25 = arith.constant 0 : index
      %c0_26 = arith.constant 0 : index
      %c0_27 = arith.constant 0 : index
      %c0_28 = arith.constant 0 : index
      %39 = vector.load %arg2[%c0_25, %c0_26, %c0_27, %c0_28] : memref<5x1x64x15xbf16, #tpu.memory_space<vmem>>, vector<1x1x64x15xbf16>
      %40 = vector.shape_cast %39 : vector<1x1x64x15xbf16> to vector<64x15xbf16>
      %cst_29 = arith.constant dense<0.000000e+00> : vector<64x220xf32>
      %41 = tpu.matmul %40, %34, %cst_29 {dimension_numbers = #tpu.dot_dimension_numbers<[1], [0], [0], [1], [0, 0, 1, 1], [], []>} : vector<64x15xbf16>, vector<15x220xbf16>, vector<64x220xf32> -> vector<64x220xf32>
      %42 = arith.addf %22, %41 : vector<64x220xf32>
      %c2_i32_30 = arith.constant 2 : i32
      %43 = arith.addi %20, %c2_i32_30 : i32
      %c0_31 = arith.constant 0 : index
      %44 = arith.index_cast %43 : i32 to index
      %c0_32 = arith.constant 0 : index
      %c0_33 = arith.constant 0 : index
      %45 = vector.load %arg1[%c0_31, %44, %c0_32, %c0_33] : memref<1x224x15x220xbf16, #tpu.memory_space<vmem>>, vector<1x1x15x220xbf16>
      %46 = vector.shape_cast %45 : vector<1x1x15x220xbf16> to vector<15x220xbf16>
      %c2 = arith.constant 2 : index
      %c0_34 = arith.constant 0 : index
      %c0_35 = arith.constant 0 : index
      %c0_36 = arith.constant 0 : index
      %47 = vector.load %arg2[%c2, %c0_34, %c0_35, %c0_36] : memref<5x1x64x15xbf16, #tpu.memory_space<vmem>>, vector<1x1x64x15xbf16>
      %48 = vector.shape_cast %47 : vector<1x1x64x15xbf16> to vector<64x15xbf16>
      %cst_37 = arith.constant dense<0.000000e+00> : vector<64x220xf32>
      %49 = tpu.matmul %48, %46, %cst_37 {dimension_numbers = #tpu.dot_dimension_numbers<[1], [0], [0], [1], [0, 0, 1, 1], [], []>} : vector<64x15xbf16>, vector<15x220xbf16>, vector<64x220xf32> -> vector<64x220xf32>
      %50 = arith.addf %38, %49 : vector<64x220xf32>
      %c1_38 = arith.constant 1 : index
      %c0_39 = arith.constant 0 : index
      %c0_40 = arith.constant 0 : index
      %c0_41 = arith.constant 0 : index
      %51 = vector.load %arg2[%c1_38, %c0_39, %c0_40, %c0_41] : memref<5x1x64x15xbf16, #tpu.memory_space<vmem>>, vector<1x1x64x15xbf16>
      %52 = vector.shape_cast %51 : vector<1x1x64x15xbf16> to vector<64x15xbf16>
      %cst_42 = arith.constant dense<0.000000e+00> : vector<64x220xf32>
      %53 = tpu.matmul %52, %46, %cst_42 {dimension_numbers = #tpu.dot_dimension_numbers<[1], [0], [0], [1], [0, 0, 1, 1], [], []>} : vector<64x15xbf16>, vector<15x220xbf16>, vector<64x220xf32> -> vector<64x220xf32>
      %54 = arith.addf %42, %53 : vector<64x220xf32>
      %c3_i32 = arith.constant 3 : i32
      %55 = arith.addi %20, %c3_i32 : i32
      %c0_43 = arith.constant 0 : index
      %56 = arith.index_cast %55 : i32 to index
      %c0_44 = arith.constant 0 : index
      %c0_45 = arith.constant 0 : index
      %57 = vector.load %arg1[%c0_43, %56, %c0_44, %c0_45] : memref<1x224x15x220xbf16, #tpu.memory_space<vmem>>, vector<1x1x15x220xbf16>
      %58 = vector.shape_cast %57 : vector<1x1x15x220xbf16> to vector<15x220xbf16>
      %c3 = arith.constant 3 : index
      %c0_46 = arith.constant 0 : index
      %c0_47 = arith.constant 0 : index
      %c0_48 = arith.constant 0 : index
      %59 = vector.load %arg2[%c3, %c0_46, %c0_47, %c0_48] : memref<5x1x64x15xbf16, #tpu.memory_space<vmem>>, vector<1x1x64x15xbf16>
      %60 = vector.shape_cast %59 : vector<1x1x64x15xbf16> to vector<64x15xbf16>
      %cst_49 = arith.constant dense<0.000000e+00> : vector<64x220xf32>
      %61 = tpu.matmul %60, %58, %cst_49 {dimension_numbers = #tpu.dot_dimension_numbers<[1], [0], [0], [1], [0, 0, 1, 1], [], []>} : vector<64x15xbf16>, vector<15x220xbf16>, vector<64x220xf32> -> vector<64x220xf32>
      %62 = arith.addf %50, %61 : vector<64x220xf32>
      %c2_50 = arith.constant 2 : index
      %c0_51 = arith.constant 0 : index
      %c0_52 = arith.constant 0 : index
      %c0_53 = arith.constant 0 : index
      %63 = vector.load %arg2[%c2_50, %c0_51, %c0_52, %c0_53] : memref<5x1x64x15xbf16, #tpu.memory_space<vmem>>, vector<1x1x64x15xbf16>
      %64 = vector.shape_cast %63 : vector<1x1x64x15xbf16> to vector<64x15xbf16>
      %cst_54 = arith.constant dense<0.000000e+00> : vector<64x220xf32>
      %65 = tpu.matmul %64, %58, %cst_54 {dimension_numbers = #tpu.dot_dimension_numbers<[1], [0], [0], [1], [0, 0, 1, 1], [], []>} : vector<64x15xbf16>, vector<15x220xbf16>, vector<64x220xf32> -> vector<64x220xf32>
      %66 = arith.addf %54, %65 : vector<64x220xf32>
      %c4_i32 = arith.constant 4 : i32
      %67 = arith.addi %20, %c4_i32 : i32
      %c0_55 = arith.constant 0 : index
      %68 = arith.index_cast %67 : i32 to index
      %c0_56 = arith.constant 0 : index
      %c0_57 = arith.constant 0 : index
      %69 = vector.load %arg1[%c0_55, %68, %c0_56, %c0_57] : memref<1x224x15x220xbf16, #tpu.memory_space<vmem>>, vector<1x1x15x220xbf16>
      %70 = vector.shape_cast %69 : vector<1x1x15x220xbf16> to vector<15x220xbf16>
      %c4 = arith.constant 4 : index
      %c0_58 = arith.constant 0 : index
      %c0_59 = arith.constant 0 : index
      %c0_60 = arith.constant 0 : index
      %71 = vector.load %arg2[%c4, %c0_58, %c0_59, %c0_60] : memref<5x1x64x15xbf16, #tpu.memory_space<vmem>>, vector<1x1x64x15xbf16>
      %72 = vector.shape_cast %71 : vector<1x1x64x15xbf16> to vector<64x15xbf16>
      %cst_61 = arith.constant dense<0.000000e+00> : vector<64x220xf32>
      %73 = tpu.matmul %72, %70, %cst_61 {dimension_numbers = #tpu.dot_dimension_numbers<[1], [0], [0], [1], [0, 0, 1, 1], [], []>} : vector<64x15xbf16>, vector<15x220xbf16>, vector<64x220xf32> -> vector<64x220xf32>
      %74 = arith.addf %62, %73 : vector<64x220xf32>
      %c3_62 = arith.constant 3 : index
      %c0_63 = arith.constant 0 : index
      %c0_64 = arith.constant 0 : index
      %c0_65 = arith.constant 0 : index
      %75 = vector.load %arg2[%c3_62, %c0_63, %c0_64, %c0_65] : memref<5x1x64x15xbf16, #tpu.memory_space<vmem>>, vector<1x1x64x15xbf16>
      %76 = vector.shape_cast %75 : vector<1x1x64x15xbf16> to vector<64x15xbf16>
      %cst_66 = arith.constant dense<0.000000e+00> : vector<64x220xf32>
      %77 = tpu.matmul %76, %70, %cst_66 {dimension_numbers = #tpu.dot_dimension_numbers<[1], [0], [0], [1], [0, 0, 1, 1], [], []>} : vector<64x15xbf16>, vector<15x220xbf16>, vector<64x220xf32> -> vector<64x220xf32>
      %78 = arith.addf %66, %77 : vector<64x220xf32>
      %c5_i32 = arith.constant 5 : i32
      %79 = arith.addi %20, %c5_i32 : i32
      %c0_67 = arith.constant 0 : index
      %80 = arith.index_cast %79 : i32 to index
      %c0_68 = arith.constant 0 : index
      %c0_69 = arith.constant 0 : index
      %81 = vector.load %arg1[%c0_67, %80, %c0_68, %c0_69] : memref<1x224x15x220xbf16, #tpu.memory_space<vmem>>, vector<1x1x15x220xbf16>
      %82 = vector.shape_cast %81 : vector<1x1x15x220xbf16> to vector<15x220xbf16>
      %c4_70 = arith.constant 4 : index
      %c0_71 = arith.constant 0 : index
      %c0_72 = arith.constant 0 : index
      %c0_73 = arith.constant 0 : index
      %83 = vector.load %arg2[%c4_70, %c0_71, %c0_72, %c0_73] : memref<5x1x64x15xbf16, #tpu.memory_space<vmem>>, vector<1x1x64x15xbf16>
      %84 = vector.shape_cast %83 : vector<1x1x64x15xbf16> to vector<64x15xbf16>
      %cst_74 = arith.constant dense<0.000000e+00> : vector<64x220xf32>
      %85 = tpu.matmul %84, %82, %cst_74 {dimension_numbers = #tpu.dot_dimension_numbers<[1], [0], [0], [1], [0, 0, 1, 1], [], []>} : vector<64x15xbf16>, vector<15x220xbf16>, vector<64x220xf32> -> vector<64x220xf32>
      %86 = arith.addf %78, %85 : vector<64x220xf32>
      %87 = arith.maximumf %74, %86 : vector<64x220xf32>
      %88 = vector.broadcast %16 : vector<64x1xf32> to vector<64x220xf32>
      %89 = arith.addf %87, %88 : vector<64x220xf32>
      %cst_75 = arith.constant 0.000000e+00 : f32
      %90 = vector.broadcast %cst_75 : f32 to vector<64x220xf32>
      %91 = arith.maximumf %89, %90 : vector<64x220xf32>
      %92 = arith.truncf %91 : vector<64x220xf32> to vector<64x220xbf16>
      %cst_76 = arith.constant dense<0.000000e+00> : vector<64x110xf32>
      %93 = tpu.matmul %92, %7, %cst_76 {dimension_numbers = #tpu.dot_dimension_numbers<[1], [0], [0], [1], [0, 0, 1, 1], [], []>} : vector<64x220xbf16>, vector<220x110xbf16>, vector<64x110xf32> -> vector<64x110xf32>
      %cst_77 = arith.constant dense<0.000000e+00> : vector<64x110xf32>
      %94 = tpu.matmul %92, %15, %cst_77 {dimension_numbers = #tpu.dot_dimension_numbers<[1], [0], [0], [1], [0, 0, 1, 1], [], []>} : vector<64x220xbf16>, vector<220x110xbf16>, vector<64x110xf32> -> vector<64x110xf32>
      %95 = arith.maximumf %93, %94 : vector<64x110xf32>
      %96 = arith.truncf %95 : vector<64x110xf32> to vector<64x110xbf16>
      %c0_78 = arith.constant 0 : index
      %97 = arith.index_cast %19 : i32 to index
      %c0_79 = arith.constant 0 : index
      %c0_80 = arith.constant 0 : index
      %98 = vector.load %arg4[%c0_78, %97, %c0_79, %c0_80] : memref<1x110x64x110xbf16, #tpu.memory_space<vmem>>, vector<1x1x64x110xbf16>
      %99 = vector.shape_cast %98 : vector<1x1x64x110xbf16> to vector<64x110xbf16>
      %100 = vector.shape_cast %96 : vector<64x110xbf16> to vector<1x1x64x110xbf16>
      tpu.vector_store %arg4[%c0_78, %97, %c0_79, %c0_80], %100 {strides = array<i32>} : memref<1x110x64x110xbf16, #tpu.memory_space<vmem>>, vector<1x1x64x110xbf16>,
    }
    %c110_i32_3 = arith.constant 110 : i32
    return
  }
  func.func @transform_0(%arg0: i32) -> (i32, i32, i32, i32) {
    %c0_i32 = arith.constant 0 : i32
    %c0_i32_0 = arith.constant 0 : i32
    %c0_i32_1 = arith.constant 0 : i32
    %c0_i32_2 = arith.constant 0 : i32
    return %arg0, %c0_i32, %c0_i32_0, %c0_i32_1 : i32, i32, i32, i32
  }
  func.func @transform_1(%arg0: i32) -> (i32, i32, i32, i32) {
    %c0_i32 = arith.constant 0 : i32
    %c0_i32_0 = arith.constant 0 : i32
    %c0_i32_1 = arith.constant 0 : i32
    %c0_i32_2 = arith.constant 0 : i32
    %c0_i32_3 = arith.constant 0 : i32
    return %c0_i32, %c0_i32_0, %c0_i32_1, %c0_i32_2 : i32, i32, i32, i32
  }
  func.func @transform_2(%arg0: i32) -> (i32, i32) {
    %c0_i32 = arith.constant 0 : i32
    %c0_i32_0 = arith.constant 0 : i32
    %c0_i32_1 = arith.constant 0 : i32
    return %c0_i32, %c0_i32_0 : i32, i32
  }
  func.func @transform_3(%arg0: i32) -> (i32, i32, i32, i32) {
    %c0_i32 = arith.constant 0 : i32
    %c0_i32_0 = arith.constant 0 : i32
    %c0_i32_1 = arith.constant 0 : i32
    %c0_i32_2 = arith.constant 0 : i32
    return %arg0, %c0_i32, %c0_i32_0, %c0_i32_1 : i32, i32, i32, i32
  }
}

module attributes {stable_mosaic.version = 11 : i64} {
  func.func @_conv_relu_pool_kernel(%arg0: i32, %arg1: memref<1x110x64x110xbf16, #tpu.memory_space<vmem>>, %arg2: memref<3x3x32x64xbf16, #tpu.memory_space<vmem>>, %arg3: memref<32x1xf32, #tpu.memory_space<vmem>>, %arg4: memref<1x54x32x54xbf16, #tpu.memory_space<vmem>>) attributes {dimension_semantics = [#tpu.dimension_semantics<parallel>], iteration_bounds = array<i64: 2>, scalar_prefetch = 0 : i64, scratch_operands = 0 : i64, tpu.core_type = #tpu.core_type<tc>, window_params = [{transform_indices = @transform_0, window_bounds = array<i64: 1, 110, 64, 110>}, {pipeline_mode = #tpu.pipeline_mode<synchronous>, transform_indices = @transform_1, window_bounds = array<i64: 3, 3, 32, 64>}, {pipeline_mode = #tpu.pipeline_mode<synchronous>, transform_indices = @transform_2, window_bounds = array<i64: 32, 1>}, {transform_indices = @transform_3, window_bounds = array<i64: 1, 54, 32, 54>}]} {
    %0 = tpu.iota {dimensions = array<i32: 0>} : vector<108x54xi32>
    %1 = tpu.iota {dimensions = array<i32: 1>} : vector<108x54xi32>
    %c2_i32 = arith.constant 2 : i32
    %2 = vector.broadcast %c2_i32 : i32 to vector<108x54xi32>
    %3 = arith.muli %2, %1 : vector<108x54xi32>
    %4 = arith.cmpi eq, %0, %3 : vector<108x54xi32>
    %5 = arith.extui %4 : vector<108x54xi1> to vector<108x54xi32>
    %6 = arith.sitofp %5 : vector<108x54xi32> to vector<108x54xf32>
    %7 = arith.truncf %6 : vector<108x54xf32> to vector<108x54xbf16>
    %c2_i32_0 = arith.constant 2 : i32
    %8 = vector.broadcast %c2_i32_0 : i32 to vector<108x54xi32>
    %9 = arith.muli %8, %1 : vector<108x54xi32>
    %c1_i32 = arith.constant 1 : i32
    %10 = vector.broadcast %c1_i32 : i32 to vector<108x54xi32>
    %11 = arith.addi %9, %10 : vector<108x54xi32>
    %12 = arith.cmpi eq, %0, %11 : vector<108x54xi32>
    %13 = arith.extui %12 : vector<108x54xi1> to vector<108x54xi32>
    %14 = arith.sitofp %13 : vector<108x54xi32> to vector<108x54xf32>
    %15 = arith.truncf %14 : vector<108x54xf32> to vector<108x54xbf16>
    %c0 = arith.constant 0 : index
    %c0_1 = arith.constant 0 : index
    %16 = vector.load %arg3[%c0, %c0_1] : memref<32x1xf32, #tpu.memory_space<vmem>>, vector<32x1xf32>
    %c0_i32 = arith.constant 0 : i32
    %c54_i32 = arith.constant 54 : i32
    %17 = arith.addi %c0_i32, %c54_i32 : i32
    %c1_i32_2 = arith.constant 1 : i32
    scf.for %arg5 = %c0_i32 to %17 step %c1_i32_2  : i32 {
      %c1_i32_4 = arith.constant 1 : i32
      %18 = arith.muli %arg5, %c1_i32_4 : i32
      %c0_i32_5 = arith.constant 0 : i32
      %19 = arith.addi %c0_i32_5, %18 : i32
      %c2_i32_6 = arith.constant 2 : i32
      %20 = arith.muli %c2_i32_6, %19 : i32
      %cst = arith.constant 0.000000e+00 : f32
      %21 = vector.broadcast %cst : f32 to vector<32x108xf32>
      %cst_7 = arith.constant 0.000000e+00 : f32
      %22 = vector.broadcast %cst_7 : f32 to vector<32x108xf32>
      %c0_i32_8 = arith.constant 0 : i32
      %23 = arith.addi %20, %c0_i32_8 : i32
      %c0_9 = arith.constant 0 : index
      %24 = arith.index_cast %23 : i32 to index
      %c0_10 = arith.constant 0 : index
      %c0_11 = arith.constant 0 : index
      %25 = vector.load %arg1[%c0_9, %24, %c0_10, %c0_11] : memref<1x110x64x110xbf16, #tpu.memory_space<vmem>>, vector<1x1x64x110xbf16>
      %26 = vector.shape_cast %25 : vector<1x1x64x110xbf16> to vector<64x110xbf16>
      %27 = vector.extract_strided_slice %26 {offsets = [0, 0], sizes = [64, 108], strides = [1, 1]} : vector<64x110xbf16> to vector<64x108xbf16>
      %c0_12 = arith.constant 0 : index
      %c0_13 = arith.constant 0 : index
      %c0_14 = arith.constant 0 : index
      %c0_15 = arith.constant 0 : index
      %28 = vector.load %arg2[%c0_12, %c0_13, %c0_14, %c0_15] : memref<3x3x32x64xbf16, #tpu.memory_space<vmem>>, vector<1x1x32x64xbf16>
      %29 = vector.shape_cast %28 : vector<1x1x32x64xbf16> to vector<32x64xbf16>
      %cst_16 = arith.constant dense<0.000000e+00> : vector<32x108xf32>
      %30 = tpu.matmul %29, %27, %cst_16 {dimension_numbers = #tpu.dot_dimension_numbers<[1], [0], [0], [1], [0, 0, 1, 1], [], []>} : vector<32x64xbf16>, vector<64x108xbf16>, vector<32x108xf32> -> vector<32x108xf32>
      %31 = arith.addf %21, %30 : vector<32x108xf32>
      %32 = vector.extract_strided_slice %26 {offsets = [0, 1], sizes = [64, 108], strides = [1, 1]} : vector<64x110xbf16> to vector<64x108xbf16>
      %c0_17 = arith.constant 0 : index
      %c1 = arith.constant 1 : index
      %c0_18 = arith.constant 0 : index
      %c0_19 = arith.constant 0 : index
      %33 = vector.load %arg2[%c0_17, %c1, %c0_18, %c0_19] : memref<3x3x32x64xbf16, #tpu.memory_space<vmem>>, vector<1x1x32x64xbf16>
      %34 = vector.shape_cast %33 : vector<1x1x32x64xbf16> to vector<32x64xbf16>
      %cst_20 = arith.constant dense<0.000000e+00> : vector<32x108xf32>
      %35 = tpu.matmul %34, %32, %cst_20 {dimension_numbers = #tpu.dot_dimension_numbers<[1], [0], [0], [1], [0, 0, 1, 1], [], []>} : vector<32x64xbf16>, vector<64x108xbf16>, vector<32x108xf32> -> vector<32x108xf32>
      %36 = arith.addf %31, %35 : vector<32x108xf32>
      %37 = vector.extract_strided_slice %26 {offsets = [0, 2], sizes = [64, 108], strides = [1, 1]} : vector<64x110xbf16> to vector<64x108xbf16>
      %c0_21 = arith.constant 0 : index
      %c2 = arith.constant 2 : index
      %c0_22 = arith.constant 0 : index
      %c0_23 = arith.constant 0 : index
      %38 = vector.load %arg2[%c0_21, %c2, %c0_22, %c0_23] : memref<3x3x32x64xbf16, #tpu.memory_space<vmem>>, vector<1x1x32x64xbf16>
      %39 = vector.shape_cast %38 : vector<1x1x32x64xbf16> to vector<32x64xbf16>
      %cst_24 = arith.constant dense<0.000000e+00> : vector<32x108xf32>
      %40 = tpu.matmul %39, %37, %cst_24 {dimension_numbers = #tpu.dot_dimension_numbers<[1], [0], [0], [1], [0, 0, 1, 1], [], []>} : vector<32x64xbf16>, vector<64x108xbf16>, vector<32x108xf32> -> vector<32x108xf32>
      %41 = arith.addf %36, %40 : vector<32x108xf32>
      %c1_i32_25 = arith.constant 1 : i32
      %42 = arith.addi %20, %c1_i32_25 : i32
      %c0_26 = arith.constant 0 : index
      %43 = arith.index_cast %42 : i32 to index
      %c0_27 = arith.constant 0 : index
      %c0_28 = arith.constant 0 : index
      %44 = vector.load %arg1[%c0_26, %43, %c0_27, %c0_28] : memref<1x110x64x110xbf16, #tpu.memory_space<vmem>>, vector<1x1x64x110xbf16>
      %45 = vector.shape_cast %44 : vector<1x1x64x110xbf16> to vector<64x110xbf16>
      %46 = vector.extract_strided_slice %45 {offsets = [0, 0], sizes = [64, 108], strides = [1, 1]} : vector<64x110xbf16> to vector<64x108xbf16>
      %c1_29 = arith.constant 1 : index
      %c0_30 = arith.constant 0 : index
      %c0_31 = arith.constant 0 : index
      %c0_32 = arith.constant 0 : index
      %47 = vector.load %arg2[%c1_29, %c0_30, %c0_31, %c0_32] : memref<3x3x32x64xbf16, #tpu.memory_space<vmem>>, vector<1x1x32x64xbf16>
      %48 = vector.shape_cast %47 : vector<1x1x32x64xbf16> to vector<32x64xbf16>
      %cst_33 = arith.constant dense<0.000000e+00> : vector<32x108xf32>
      %49 = tpu.matmul %48, %46, %cst_33 {dimension_numbers = #tpu.dot_dimension_numbers<[1], [0], [0], [1], [0, 0, 1, 1], [], []>} : vector<32x64xbf16>, vector<64x108xbf16>, vector<32x108xf32> -> vector<32x108xf32>
      %50 = arith.addf %41, %49 : vector<32x108xf32>
      %c0_34 = arith.constant 0 : index
      %c0_35 = arith.constant 0 : index
      %c0_36 = arith.constant 0 : index
      %c0_37 = arith.constant 0 : index
      %51 = vector.load %arg2[%c0_34, %c0_35, %c0_36, %c0_37] : memref<3x3x32x64xbf16, #tpu.memory_space<vmem>>, vector<1x1x32x64xbf16>
      %52 = vector.shape_cast %51 : vector<1x1x32x64xbf16> to vector<32x64xbf16>
      %cst_38 = arith.constant dense<0.000000e+00> : vector<32x108xf32>
      %53 = tpu.matmul %52, %46, %cst_38 {dimension_numbers = #tpu.dot_dimension_numbers<[1], [0], [0], [1], [0, 0, 1, 1], [], []>} : vector<32x64xbf16>, vector<64x108xbf16>, vector<32x108xf32> -> vector<32x108xf32>
      %54 = arith.addf %22, %53 : vector<32x108xf32>
      %55 = vector.extract_strided_slice %45 {offsets = [0, 1], sizes = [64, 108], strides = [1, 1]} : vector<64x110xbf16> to vector<64x108xbf16>
      %c1_39 = arith.constant 1 : index
      %c1_40 = arith.constant 1 : index
      %c0_41 = arith.constant 0 : index
      %c0_42 = arith.constant 0 : index
      %56 = vector.load %arg2[%c1_39, %c1_40, %c0_41, %c0_42] : memref<3x3x32x64xbf16, #tpu.memory_space<vmem>>, vector<1x1x32x64xbf16>
      %57 = vector.shape_cast %56 : vector<1x1x32x64xbf16> to vector<32x64xbf16>
      %cst_43 = arith.constant dense<0.000000e+00> : vector<32x108xf32>
      %58 = tpu.matmul %57, %55, %cst_43 {dimension_numbers = #tpu.dot_dimension_numbers<[1], [0], [0], [1], [0, 0, 1, 1], [], []>} : vector<32x64xbf16>, vector<64x108xbf16>, vector<32x108xf32> -> vector<32x108xf32>
      %59 = arith.addf %50, %58 : vector<32x108xf32>
      %c0_44 = arith.constant 0 : index
      %c1_45 = arith.constant 1 : index
      %c0_46 = arith.constant 0 : index
      %c0_47 = arith.constant 0 : index
      %60 = vector.load %arg2[%c0_44, %c1_45, %c0_46, %c0_47] : memref<3x3x32x64xbf16, #tpu.memory_space<vmem>>, vector<1x1x32x64xbf16>
      %61 = vector.shape_cast %60 : vector<1x1x32x64xbf16> to vector<32x64xbf16>
      %cst_48 = arith.constant dense<0.000000e+00> : vector<32x108xf32>
      %62 = tpu.matmul %61, %55, %cst_48 {dimension_numbers = #tpu.dot_dimension_numbers<[1], [0], [0], [1], [0, 0, 1, 1], [], []>} : vector<32x64xbf16>, vector<64x108xbf16>, vector<32x108xf32> -> vector<32x108xf32>
      %63 = arith.addf %54, %62 : vector<32x108xf32>
      %64 = vector.extract_strided_slice %45 {offsets = [0, 2], sizes = [64, 108], strides = [1, 1]} : vector<64x110xbf16> to vector<64x108xbf16>
      %c1_49 = arith.constant 1 : index
      %c2_50 = arith.constant 2 : index
      %c0_51 = arith.constant 0 : index
      %c0_52 = arith.constant 0 : index
      %65 = vector.load %arg2[%c1_49, %c2_50, %c0_51, %c0_52] : memref<3x3x32x64xbf16, #tpu.memory_space<vmem>>, vector<1x1x32x64xbf16>
      %66 = vector.shape_cast %65 : vector<1x1x32x64xbf16> to vector<32x64xbf16>
      %cst_53 = arith.constant dense<0.000000e+00> : vector<32x108xf32>
      %67 = tpu.matmul %66, %64, %cst_53 {dimension_numbers = #tpu.dot_dimension_numbers<[1], [0], [0], [1], [0, 0, 1, 1], [], []>} : vector<32x64xbf16>, vector<64x108xbf16>, vector<32x108xf32> -> vector<32x108xf32>
      %68 = arith.addf %59, %67 : vector<32x108xf32>
      %c0_54 = arith.constant 0 : index
      %c2_55 = arith.constant 2 : index
      %c0_56 = arith.constant 0 : index
      %c0_57 = arith.constant 0 : index
      %69 = vector.load %arg2[%c0_54, %c2_55, %c0_56, %c0_57] : memref<3x3x32x64xbf16, #tpu.memory_space<vmem>>, vector<1x1x32x64xbf16>
      %70 = vector.shape_cast %69 : vector<1x1x32x64xbf16> to vector<32x64xbf16>
      %cst_58 = arith.constant dense<0.000000e+00> : vector<32x108xf32>
      %71 = tpu.matmul %70, %64, %cst_58 {dimension_numbers = #tpu.dot_dimension_numbers<[1], [0], [0], [1], [0, 0, 1, 1], [], []>} : vector<32x64xbf16>, vector<64x108xbf16>, vector<32x108xf32> -> vector<32x108xf32>
      %72 = arith.addf %63, %71 : vector<32x108xf32>
      %c2_i32_59 = arith.constant 2 : i32
      %73 = arith.addi %20, %c2_i32_59 : i32
      %c0_60 = arith.constant 0 : index
      %74 = arith.index_cast %73 : i32 to index
      %c0_61 = arith.constant 0 : index
      %c0_62 = arith.constant 0 : index
      %75 = vector.load %arg1[%c0_60, %74, %c0_61, %c0_62] : memref<1x110x64x110xbf16, #tpu.memory_space<vmem>>, vector<1x1x64x110xbf16>
      %76 = vector.shape_cast %75 : vector<1x1x64x110xbf16> to vector<64x110xbf16>
      %77 = vector.extract_strided_slice %76 {offsets = [0, 0], sizes = [64, 108], strides = [1, 1]} : vector<64x110xbf16> to vector<64x108xbf16>
      %c2_63 = arith.constant 2 : index
      %c0_64 = arith.constant 0 : index
      %c0_65 = arith.constant 0 : index
      %c0_66 = arith.constant 0 : index
      %78 = vector.load %arg2[%c2_63, %c0_64, %c0_65, %c0_66] : memref<3x3x32x64xbf16, #tpu.memory_space<vmem>>, vector<1x1x32x64xbf16>
      %79 = vector.shape_cast %78 : vector<1x1x32x64xbf16> to vector<32x64xbf16>
      %cst_67 = arith.constant dense<0.000000e+00> : vector<32x108xf32>
      %80 = tpu.matmul %79, %77, %cst_67 {dimension_numbers = #tpu.dot_dimension_numbers<[1], [0], [0], [1], [0, 0, 1, 1], [], []>} : vector<32x64xbf16>, vector<64x108xbf16>, vector<32x108xf32> -> vector<32x108xf32>
      %81 = arith.addf %68, %80 : vector<32x108xf32>
      %c1_68 = arith.constant 1 : index
      %c0_69 = arith.constant 0 : index
      %c0_70 = arith.constant 0 : index
      %c0_71 = arith.constant 0 : index
      %82 = vector.load %arg2[%c1_68, %c0_69, %c0_70, %c0_71] : memref<3x3x32x64xbf16, #tpu.memory_space<vmem>>, vector<1x1x32x64xbf16>
      %83 = vector.shape_cast %82 : vector<1x1x32x64xbf16> to vector<32x64xbf16>
      %cst_72 = arith.constant dense<0.000000e+00> : vector<32x108xf32>
      %84 = tpu.matmul %83, %77, %cst_72 {dimension_numbers = #tpu.dot_dimension_numbers<[1], [0], [0], [1], [0, 0, 1, 1], [], []>} : vector<32x64xbf16>, vector<64x108xbf16>, vector<32x108xf32> -> vector<32x108xf32>
      %85 = arith.addf %72, %84 : vector<32x108xf32>
      %86 = vector.extract_strided_slice %76 {offsets = [0, 1], sizes = [64, 108], strides = [1, 1]} : vector<64x110xbf16> to vector<64x108xbf16>
      %c2_73 = arith.constant 2 : index
      %c1_74 = arith.constant 1 : index
      %c0_75 = arith.constant 0 : index
      %c0_76 = arith.constant 0 : index
      %87 = vector.load %arg2[%c2_73, %c1_74, %c0_75, %c0_76] : memref<3x3x32x64xbf16, #tpu.memory_space<vmem>>, vector<1x1x32x64xbf16>
      %88 = vector.shape_cast %87 : vector<1x1x32x64xbf16> to vector<32x64xbf16>
      %cst_77 = arith.constant dense<0.000000e+00> : vector<32x108xf32>
      %89 = tpu.matmul %88, %86, %cst_77 {dimension_numbers = #tpu.dot_dimension_numbers<[1], [0], [0], [1], [0, 0, 1, 1], [], []>} : vector<32x64xbf16>, vector<64x108xbf16>, vector<32x108xf32> -> vector<32x108xf32>
      %90 = arith.addf %81, %89 : vector<32x108xf32>
      %c1_78 = arith.constant 1 : index
      %c1_79 = arith.constant 1 : index
      %c0_80 = arith.constant 0 : index
      %c0_81 = arith.constant 0 : index
      %91 = vector.load %arg2[%c1_78, %c1_79, %c0_80, %c0_81] : memref<3x3x32x64xbf16, #tpu.memory_space<vmem>>, vector<1x1x32x64xbf16>
      %92 = vector.shape_cast %91 : vector<1x1x32x64xbf16> to vector<32x64xbf16>
      %cst_82 = arith.constant dense<0.000000e+00> : vector<32x108xf32>
      %93 = tpu.matmul %92, %86, %cst_82 {dimension_numbers = #tpu.dot_dimension_numbers<[1], [0], [0], [1], [0, 0, 1, 1], [], []>} : vector<32x64xbf16>, vector<64x108xbf16>, vector<32x108xf32> -> vector<32x108xf32>
      %94 = arith.addf %85, %93 : vector<32x108xf32>
      %95 = vector.extract_strided_slice %76 {offsets = [0, 2], sizes = [64, 108], strides = [1, 1]} : vector<64x110xbf16> to vector<64x108xbf16>
      %c2_83 = arith.constant 2 : index
      %c2_84 = arith.constant 2 : index
      %c0_85 = arith.constant 0 : index
      %c0_86 = arith.constant 0 : index
      %96 = vector.load %arg2[%c2_83, %c2_84, %c0_85, %c0_86] : memref<3x3x32x64xbf16, #tpu.memory_space<vmem>>, vector<1x1x32x64xbf16>
      %97 = vector.shape_cast %96 : vector<1x1x32x64xbf16> to vector<32x64xbf16>
      %cst_87 = arith.constant dense<0.000000e+00> : vector<32x108xf32>
      %98 = tpu.matmul %97, %95, %cst_87 {dimension_numbers = #tpu.dot_dimension_numbers<[1], [0], [0], [1], [0, 0, 1, 1], [], []>} : vector<32x64xbf16>, vector<64x108xbf16>, vector<32x108xf32> -> vector<32x108xf32>
      %99 = arith.addf %90, %98 : vector<32x108xf32>
      %c1_88 = arith.constant 1 : index
      %c2_89 = arith.constant 2 : index
      %c0_90 = arith.constant 0 : index
      %c0_91 = arith.constant 0 : index
      %100 = vector.load %arg2[%c1_88, %c2_89, %c0_90, %c0_91] : memref<3x3x32x64xbf16, #tpu.memory_space<vmem>>, vector<1x1x32x64xbf16>
      %101 = vector.shape_cast %100 : vector<1x1x32x64xbf16> to vector<32x64xbf16>
      %cst_92 = arith.constant dense<0.000000e+00> : vector<32x108xf32>
      %102 = tpu.matmul %101, %95, %cst_92 {dimension_numbers = #tpu.dot_dimension_numbers<[1], [0], [0], [1], [0, 0, 1, 1], [], []>} : vector<32x64xbf16>, vector<64x108xbf16>, vector<32x108xf32> -> vector<32x108xf32>
      %103 = arith.addf %94, %102 : vector<32x108xf32>
      %c3_i32 = arith.constant 3 : i32
      %104 = arith.addi %20, %c3_i32 : i32
      %c0_93 = arith.constant 0 : index
      %105 = arith.index_cast %104 : i32 to index
      %c0_94 = arith.constant 0 : index
      %c0_95 = arith.constant 0 : index
      %106 = vector.load %arg1[%c0_93, %105, %c0_94, %c0_95] : memref<1x110x64x110xbf16, #tpu.memory_space<vmem>>, vector<1x1x64x110xbf16>
      %107 = vector.shape_cast %106 : vector<1x1x64x110xbf16> to vector<64x110xbf16>
      %108 = vector.extract_strided_slice %107 {offsets = [0, 0], sizes = [64, 108], strides = [1, 1]} : vector<64x110xbf16> to vector<64x108xbf16>
      %c2_96 = arith.constant 2 : index
      %c0_97 = arith.constant 0 : index
      %c0_98 = arith.constant 0 : index
      %c0_99 = arith.constant 0 : index
      %109 = vector.load %arg2[%c2_96, %c0_97, %c0_98, %c0_99] : memref<3x3x32x64xbf16, #tpu.memory_space<vmem>>, vector<1x1x32x64xbf16>
      %110 = vector.shape_cast %109 : vector<1x1x32x64xbf16> to vector<32x64xbf16>
      %cst_100 = arith.constant dense<0.000000e+00> : vector<32x108xf32>
      %111 = tpu.matmul %110, %108, %cst_100 {dimension_numbers = #tpu.dot_dimension_numbers<[1], [0], [0], [1], [0, 0, 1, 1], [], []>} : vector<32x64xbf16>, vector<64x108xbf16>, vector<32x108xf32> -> vector<32x108xf32>
      %112 = arith.addf %103, %111 : vector<32x108xf32>
      %113 = vector.extract_strided_slice %107 {offsets = [0, 1], sizes = [64, 108], strides = [1, 1]} : vector<64x110xbf16> to vector<64x108xbf16>
      %c2_101 = arith.constant 2 : index
      %c1_102 = arith.constant 1 : index
      %c0_103 = arith.constant 0 : index
      %c0_104 = arith.constant 0 : index
      %114 = vector.load %arg2[%c2_101, %c1_102, %c0_103, %c0_104] : memref<3x3x32x64xbf16, #tpu.memory_space<vmem>>, vector<1x1x32x64xbf16>
      %115 = vector.shape_cast %114 : vector<1x1x32x64xbf16> to vector<32x64xbf16>
      %cst_105 = arith.constant dense<0.000000e+00> : vector<32x108xf32>
      %116 = tpu.matmul %115, %113, %cst_105 {dimension_numbers = #tpu.dot_dimension_numbers<[1], [0], [0], [1], [0, 0, 1, 1], [], []>} : vector<32x64xbf16>, vector<64x108xbf16>, vector<32x108xf32> -> vector<32x108xf32>
      %117 = arith.addf %112, %116 : vector<32x108xf32>
      %118 = vector.extract_strided_slice %107 {offsets = [0, 2], sizes = [64, 108], strides = [1, 1]} : vector<64x110xbf16> to vector<64x108xbf16>
      %c2_106 = arith.constant 2 : index
      %c2_107 = arith.constant 2 : index
      %c0_108 = arith.constant 0 : index
      %c0_109 = arith.constant 0 : index
      %119 = vector.load %arg2[%c2_106, %c2_107, %c0_108, %c0_109] : memref<3x3x32x64xbf16, #tpu.memory_space<vmem>>, vector<1x1x32x64xbf16>
      %120 = vector.shape_cast %119 : vector<1x1x32x64xbf16> to vector<32x64xbf16>
      %cst_110 = arith.constant dense<0.000000e+00> : vector<32x108xf32>
      %121 = tpu.matmul %120, %118, %cst_110 {dimension_numbers = #tpu.dot_dimension_numbers<[1], [0], [0], [1], [0, 0, 1, 1], [], []>} : vector<32x64xbf16>, vector<64x108xbf16>, vector<32x108xf32> -> vector<32x108xf32>
      %122 = arith.addf %117, %121 : vector<32x108xf32>
      %123 = arith.maximumf %99, %122 : vector<32x108xf32>
      %124 = vector.broadcast %16 : vector<32x1xf32> to vector<32x108xf32>
      %125 = arith.addf %123, %124 : vector<32x108xf32>
      %cst_111 = arith.constant 0.000000e+00 : f32
      %126 = vector.broadcast %cst_111 : f32 to vector<32x108xf32>
      %127 = arith.maximumf %125, %126 : vector<32x108xf32>
      %128 = arith.truncf %127 : vector<32x108xf32> to vector<32x108xbf16>
      %cst_112 = arith.constant dense<0.000000e+00> : vector<32x54xf32>
      %129 = tpu.matmul %128, %7, %cst_112 {dimension_numbers = #tpu.dot_dimension_numbers<[1], [0], [0], [1], [0, 0, 1, 1], [], []>} : vector<32x108xbf16>, vector<108x54xbf16>, vector<32x54xf32> -> vector<32x54xf32>
      %cst_113 = arith.constant dense<0.000000e+00> : vector<32x54xf32>
      %130 = tpu.matmul %128, %15, %cst_113 {dimension_numbers = #tpu.dot_dimension_numbers<[1], [0], [0], [1], [0, 0, 1, 1], [], []>} : vector<32x108xbf16>, vector<108x54xbf16>, vector<32x54xf32> -> vector<32x54xf32>
      %131 = arith.maximumf %129, %130 : vector<32x54xf32>
      %132 = arith.truncf %131 : vector<32x54xf32> to vector<32x54xbf16>
      %c0_114 = arith.constant 0 : index
      %133 = arith.index_cast %19 : i32 to index
      %c0_115 = arith.constant 0 : index
      %c0_116 = arith.constant 0 : index
      %134 = vector.load %arg4[%c0_114, %133, %c0_115, %c0_116] : memref<1x54x32x54xbf16, #tpu.memory_space<vmem>>, vector<1x1x32x54xbf16>
      %135 = vector.shape_cast %134 : vector<1x1x32x54xbf16> to vector<32x54xbf16>
      %136 = vector.shape_cast %132 : vector<32x54xbf16> to vector<1x1x32x54xbf16>
      tpu.vector_store %arg4[%c0_114, %133, %c0_115, %c0_116], %136 {strides = array<i32>} : memref<1x54x32x54xbf16, #tpu.memory_space<vmem>>, vector<1x1x32x54xbf16>,
    }
    %c54_i32_3 = arith.constant 54 : i32
    return
  }
  func.func @transform_0(%arg0: i32) -> (i32, i32, i32, i32) {
    %c0_i32 = arith.constant 0 : i32
    %c0_i32_0 = arith.constant 0 : i32
    %c0_i32_1 = arith.constant 0 : i32
    %c0_i32_2 = arith.constant 0 : i32
    return %arg0, %c0_i32, %c0_i32_0, %c0_i32_1 : i32, i32, i32, i32
  }
  func.func @transform_1(%arg0: i32) -> (i32, i32, i32, i32) {
    %c0_i32 = arith.constant 0 : i32
    %c0_i32_0 = arith.constant 0 : i32
    %c0_i32_1 = arith.constant 0 : i32
    %c0_i32_2 = arith.constant 0 : i32
    %c0_i32_3 = arith.constant 0 : i32
    return %c0_i32, %c0_i32_0, %c0_i32_1, %c0_i32_2 : i32, i32, i32, i32
  }
  func.func @transform_2(%arg0: i32) -> (i32, i32) {
    %c0_i32 = arith.constant 0 : i32
    %c0_i32_0 = arith.constant 0 : i32
    %c0_i32_1 = arith.constant 0 : i32
    return %c0_i32, %c0_i32_0 : i32, i32
  }
  func.func @transform_3(%arg0: i32) -> (i32, i32, i32, i32) {
    %c0_i32 = arith.constant 0 : i32
    %c0_i32_0 = arith.constant 0 : i32
    %c0_i32_1 = arith.constant 0 : i32
    %c0_i32_2 = arith.constant 0 : i32
    return %arg0, %c0_i32, %c0_i32_0, %c0_i32_1 : i32, i32, i32, i32
  }
}

module attributes {stable_mosaic.version = 11 : i64} {
  func.func @_conv_relu_pool_kernel(%arg0: i32, %arg1: memref<1x54x32x54xbf16, #tpu.memory_space<vmem>>, %arg2: memref<3x3x16x32xbf16, #tpu.memory_space<vmem>>, %arg3: memref<16x1xf32, #tpu.memory_space<vmem>>, %arg4: memref<1x26x16x26xbf16, #tpu.memory_space<vmem>>) attributes {dimension_semantics = [#tpu.dimension_semantics<parallel>], iteration_bounds = array<i64: 2>, scalar_prefetch = 0 : i64, scratch_operands = 0 : i64, tpu.core_type = #tpu.core_type<tc>, window_params = [{transform_indices = @transform_0, window_bounds = array<i64: 1, 54, 32, 54>}, {pipeline_mode = #tpu.pipeline_mode<synchronous>, transform_indices = @transform_1, window_bounds = array<i64: 3, 3, 16, 32>}, {pipeline_mode = #tpu.pipeline_mode<synchronous>, transform_indices = @transform_2, window_bounds = array<i64: 16, 1>}, {transform_indices = @transform_3, window_bounds = array<i64: 1, 26, 16, 26>}]} {
    %0 = tpu.iota {dimensions = array<i32: 0>} : vector<52x26xi32>
    %1 = tpu.iota {dimensions = array<i32: 1>} : vector<52x26xi32>
    %c2_i32 = arith.constant 2 : i32
    %2 = vector.broadcast %c2_i32 : i32 to vector<52x26xi32>
    %3 = arith.muli %2, %1 : vector<52x26xi32>
    %4 = arith.cmpi eq, %0, %3 : vector<52x26xi32>
    %5 = arith.extui %4 : vector<52x26xi1> to vector<52x26xi32>
    %6 = arith.sitofp %5 : vector<52x26xi32> to vector<52x26xf32>
    %7 = arith.truncf %6 : vector<52x26xf32> to vector<52x26xbf16>
    %c2_i32_0 = arith.constant 2 : i32
    %8 = vector.broadcast %c2_i32_0 : i32 to vector<52x26xi32>
    %9 = arith.muli %8, %1 : vector<52x26xi32>
    %c1_i32 = arith.constant 1 : i32
    %10 = vector.broadcast %c1_i32 : i32 to vector<52x26xi32>
    %11 = arith.addi %9, %10 : vector<52x26xi32>
    %12 = arith.cmpi eq, %0, %11 : vector<52x26xi32>
    %13 = arith.extui %12 : vector<52x26xi1> to vector<52x26xi32>
    %14 = arith.sitofp %13 : vector<52x26xi32> to vector<52x26xf32>
    %15 = arith.truncf %14 : vector<52x26xf32> to vector<52x26xbf16>
    %c0 = arith.constant 0 : index
    %c0_1 = arith.constant 0 : index
    %16 = vector.load %arg3[%c0, %c0_1] : memref<16x1xf32, #tpu.memory_space<vmem>>, vector<16x1xf32>
    %c0_i32 = arith.constant 0 : i32
    %c26_i32 = arith.constant 26 : i32
    %17 = arith.addi %c0_i32, %c26_i32 : i32
    %c1_i32_2 = arith.constant 1 : i32
    scf.for %arg5 = %c0_i32 to %17 step %c1_i32_2  : i32 {
      %c1_i32_4 = arith.constant 1 : i32
      %18 = arith.muli %arg5, %c1_i32_4 : i32
      %c0_i32_5 = arith.constant 0 : i32
      %19 = arith.addi %c0_i32_5, %18 : i32
      %c2_i32_6 = arith.constant 2 : i32
      %20 = arith.muli %c2_i32_6, %19 : i32
      %cst = arith.constant 0.000000e+00 : f32
      %21 = vector.broadcast %cst : f32 to vector<16x52xf32>
      %cst_7 = arith.constant 0.000000e+00 : f32
      %22 = vector.broadcast %cst_7 : f32 to vector<16x52xf32>
      %c0_i32_8 = arith.constant 0 : i32
      %23 = arith.addi %20, %c0_i32_8 : i32
      %c0_9 = arith.constant 0 : index
      %24 = arith.index_cast %23 : i32 to index
      %c0_10 = arith.constant 0 : index
      %c0_11 = arith.constant 0 : index
      %25 = vector.load %arg1[%c0_9, %24, %c0_10, %c0_11] : memref<1x54x32x54xbf16, #tpu.memory_space<vmem>>, vector<1x1x32x54xbf16>
      %26 = vector.shape_cast %25 : vector<1x1x32x54xbf16> to vector<32x54xbf16>
      %27 = vector.extract_strided_slice %26 {offsets = [0, 0], sizes = [32, 52], strides = [1, 1]} : vector<32x54xbf16> to vector<32x52xbf16>
      %c0_12 = arith.constant 0 : index
      %c0_13 = arith.constant 0 : index
      %c0_14 = arith.constant 0 : index
      %c0_15 = arith.constant 0 : index
      %28 = vector.load %arg2[%c0_12, %c0_13, %c0_14, %c0_15] : memref<3x3x16x32xbf16, #tpu.memory_space<vmem>>, vector<1x1x16x32xbf16>
      %29 = vector.shape_cast %28 : vector<1x1x16x32xbf16> to vector<16x32xbf16>
      %cst_16 = arith.constant dense<0.000000e+00> : vector<16x52xf32>
      %30 = tpu.matmul %29, %27, %cst_16 {dimension_numbers = #tpu.dot_dimension_numbers<[1], [0], [0], [1], [0, 0, 1, 1], [], []>} : vector<16x32xbf16>, vector<32x52xbf16>, vector<16x52xf32> -> vector<16x52xf32>
      %31 = arith.addf %21, %30 : vector<16x52xf32>
      %32 = vector.extract_strided_slice %26 {offsets = [0, 1], sizes = [32, 52], strides = [1, 1]} : vector<32x54xbf16> to vector<32x52xbf16>
      %c0_17 = arith.constant 0 : index
      %c1 = arith.constant 1 : index
      %c0_18 = arith.constant 0 : index
      %c0_19 = arith.constant 0 : index
      %33 = vector.load %arg2[%c0_17, %c1, %c0_18, %c0_19] : memref<3x3x16x32xbf16, #tpu.memory_space<vmem>>, vector<1x1x16x32xbf16>
      %34 = vector.shape_cast %33 : vector<1x1x16x32xbf16> to vector<16x32xbf16>
      %cst_20 = arith.constant dense<0.000000e+00> : vector<16x52xf32>
      %35 = tpu.matmul %34, %32, %cst_20 {dimension_numbers = #tpu.dot_dimension_numbers<[1], [0], [0], [1], [0, 0, 1, 1], [], []>} : vector<16x32xbf16>, vector<32x52xbf16>, vector<16x52xf32> -> vector<16x52xf32>
      %36 = arith.addf %31, %35 : vector<16x52xf32>
      %37 = vector.extract_strided_slice %26 {offsets = [0, 2], sizes = [32, 52], strides = [1, 1]} : vector<32x54xbf16> to vector<32x52xbf16>
      %c0_21 = arith.constant 0 : index
      %c2 = arith.constant 2 : index
      %c0_22 = arith.constant 0 : index
      %c0_23 = arith.constant 0 : index
      %38 = vector.load %arg2[%c0_21, %c2, %c0_22, %c0_23] : memref<3x3x16x32xbf16, #tpu.memory_space<vmem>>, vector<1x1x16x32xbf16>
      %39 = vector.shape_cast %38 : vector<1x1x16x32xbf16> to vector<16x32xbf16>
      %cst_24 = arith.constant dense<0.000000e+00> : vector<16x52xf32>
      %40 = tpu.matmul %39, %37, %cst_24 {dimension_numbers = #tpu.dot_dimension_numbers<[1], [0], [0], [1], [0, 0, 1, 1], [], []>} : vector<16x32xbf16>, vector<32x52xbf16>, vector<16x52xf32> -> vector<16x52xf32>
      %41 = arith.addf %36, %40 : vector<16x52xf32>
      %c1_i32_25 = arith.constant 1 : i32
      %42 = arith.addi %20, %c1_i32_25 : i32
      %c0_26 = arith.constant 0 : index
      %43 = arith.index_cast %42 : i32 to index
      %c0_27 = arith.constant 0 : index
      %c0_28 = arith.constant 0 : index
      %44 = vector.load %arg1[%c0_26, %43, %c0_27, %c0_28] : memref<1x54x32x54xbf16, #tpu.memory_space<vmem>>, vector<1x1x32x54xbf16>
      %45 = vector.shape_cast %44 : vector<1x1x32x54xbf16> to vector<32x54xbf16>
      %46 = vector.extract_strided_slice %45 {offsets = [0, 0], sizes = [32, 52], strides = [1, 1]} : vector<32x54xbf16> to vector<32x52xbf16>
      %c1_29 = arith.constant 1 : index
      %c0_30 = arith.constant 0 : index
      %c0_31 = arith.constant 0 : index
      %c0_32 = arith.constant 0 : index
      %47 = vector.load %arg2[%c1_29, %c0_30, %c0_31, %c0_32] : memref<3x3x16x32xbf16, #tpu.memory_space<vmem>>, vector<1x1x16x32xbf16>
      %48 = vector.shape_cast %47 : vector<1x1x16x32xbf16> to vector<16x32xbf16>
      %cst_33 = arith.constant dense<0.000000e+00> : vector<16x52xf32>
      %49 = tpu.matmul %48, %46, %cst_33 {dimension_numbers = #tpu.dot_dimension_numbers<[1], [0], [0], [1], [0, 0, 1, 1], [], []>} : vector<16x32xbf16>, vector<32x52xbf16>, vector<16x52xf32> -> vector<16x52xf32>
      %50 = arith.addf %41, %49 : vector<16x52xf32>
      %c0_34 = arith.constant 0 : index
      %c0_35 = arith.constant 0 : index
      %c0_36 = arith.constant 0 : index
      %c0_37 = arith.constant 0 : index
      %51 = vector.load %arg2[%c0_34, %c0_35, %c0_36, %c0_37] : memref<3x3x16x32xbf16, #tpu.memory_space<vmem>>, vector<1x1x16x32xbf16>
      %52 = vector.shape_cast %51 : vector<1x1x16x32xbf16> to vector<16x32xbf16>
      %cst_38 = arith.constant dense<0.000000e+00> : vector<16x52xf32>
      %53 = tpu.matmul %52, %46, %cst_38 {dimension_numbers = #tpu.dot_dimension_numbers<[1], [0], [0], [1], [0, 0, 1, 1], [], []>} : vector<16x32xbf16>, vector<32x52xbf16>, vector<16x52xf32> -> vector<16x52xf32>
      %54 = arith.addf %22, %53 : vector<16x52xf32>
      %55 = vector.extract_strided_slice %45 {offsets = [0, 1], sizes = [32, 52], strides = [1, 1]} : vector<32x54xbf16> to vector<32x52xbf16>
      %c1_39 = arith.constant 1 : index
      %c1_40 = arith.constant 1 : index
      %c0_41 = arith.constant 0 : index
      %c0_42 = arith.constant 0 : index
      %56 = vector.load %arg2[%c1_39, %c1_40, %c0_41, %c0_42] : memref<3x3x16x32xbf16, #tpu.memory_space<vmem>>, vector<1x1x16x32xbf16>
      %57 = vector.shape_cast %56 : vector<1x1x16x32xbf16> to vector<16x32xbf16>
      %cst_43 = arith.constant dense<0.000000e+00> : vector<16x52xf32>
      %58 = tpu.matmul %57, %55, %cst_43 {dimension_numbers = #tpu.dot_dimension_numbers<[1], [0], [0], [1], [0, 0, 1, 1], [], []>} : vector<16x32xbf16>, vector<32x52xbf16>, vector<16x52xf32> -> vector<16x52xf32>
      %59 = arith.addf %50, %58 : vector<16x52xf32>
      %c0_44 = arith.constant 0 : index
      %c1_45 = arith.constant 1 : index
      %c0_46 = arith.constant 0 : index
      %c0_47 = arith.constant 0 : index
      %60 = vector.load %arg2[%c0_44, %c1_45, %c0_46, %c0_47] : memref<3x3x16x32xbf16, #tpu.memory_space<vmem>>, vector<1x1x16x32xbf16>
      %61 = vector.shape_cast %60 : vector<1x1x16x32xbf16> to vector<16x32xbf16>
      %cst_48 = arith.constant dense<0.000000e+00> : vector<16x52xf32>
      %62 = tpu.matmul %61, %55, %cst_48 {dimension_numbers = #tpu.dot_dimension_numbers<[1], [0], [0], [1], [0, 0, 1, 1], [], []>} : vector<16x32xbf16>, vector<32x52xbf16>, vector<16x52xf32> -> vector<16x52xf32>
      %63 = arith.addf %54, %62 : vector<16x52xf32>
      %64 = vector.extract_strided_slice %45 {offsets = [0, 2], sizes = [32, 52], strides = [1, 1]} : vector<32x54xbf16> to vector<32x52xbf16>
      %c1_49 = arith.constant 1 : index
      %c2_50 = arith.constant 2 : index
      %c0_51 = arith.constant 0 : index
      %c0_52 = arith.constant 0 : index
      %65 = vector.load %arg2[%c1_49, %c2_50, %c0_51, %c0_52] : memref<3x3x16x32xbf16, #tpu.memory_space<vmem>>, vector<1x1x16x32xbf16>
      %66 = vector.shape_cast %65 : vector<1x1x16x32xbf16> to vector<16x32xbf16>
      %cst_53 = arith.constant dense<0.000000e+00> : vector<16x52xf32>
      %67 = tpu.matmul %66, %64, %cst_53 {dimension_numbers = #tpu.dot_dimension_numbers<[1], [0], [0], [1], [0, 0, 1, 1], [], []>} : vector<16x32xbf16>, vector<32x52xbf16>, vector<16x52xf32> -> vector<16x52xf32>
      %68 = arith.addf %59, %67 : vector<16x52xf32>
      %c0_54 = arith.constant 0 : index
      %c2_55 = arith.constant 2 : index
      %c0_56 = arith.constant 0 : index
      %c0_57 = arith.constant 0 : index
      %69 = vector.load %arg2[%c0_54, %c2_55, %c0_56, %c0_57] : memref<3x3x16x32xbf16, #tpu.memory_space<vmem>>, vector<1x1x16x32xbf16>
      %70 = vector.shape_cast %69 : vector<1x1x16x32xbf16> to vector<16x32xbf16>
      %cst_58 = arith.constant dense<0.000000e+00> : vector<16x52xf32>
      %71 = tpu.matmul %70, %64, %cst_58 {dimension_numbers = #tpu.dot_dimension_numbers<[1], [0], [0], [1], [0, 0, 1, 1], [], []>} : vector<16x32xbf16>, vector<32x52xbf16>, vector<16x52xf32> -> vector<16x52xf32>
      %72 = arith.addf %63, %71 : vector<16x52xf32>
      %c2_i32_59 = arith.constant 2 : i32
      %73 = arith.addi %20, %c2_i32_59 : i32
      %c0_60 = arith.constant 0 : index
      %74 = arith.index_cast %73 : i32 to index
      %c0_61 = arith.constant 0 : index
      %c0_62 = arith.constant 0 : index
      %75 = vector.load %arg1[%c0_60, %74, %c0_61, %c0_62] : memref<1x54x32x54xbf16, #tpu.memory_space<vmem>>, vector<1x1x32x54xbf16>
      %76 = vector.shape_cast %75 : vector<1x1x32x54xbf16> to vector<32x54xbf16>
      %77 = vector.extract_strided_slice %76 {offsets = [0, 0], sizes = [32, 52], strides = [1, 1]} : vector<32x54xbf16> to vector<32x52xbf16>
      %c2_63 = arith.constant 2 : index
      %c0_64 = arith.constant 0 : index
      %c0_65 = arith.constant 0 : index
      %c0_66 = arith.constant 0 : index
      %78 = vector.load %arg2[%c2_63, %c0_64, %c0_65, %c0_66] : memref<3x3x16x32xbf16, #tpu.memory_space<vmem>>, vector<1x1x16x32xbf16>
      %79 = vector.shape_cast %78 : vector<1x1x16x32xbf16> to vector<16x32xbf16>
      %cst_67 = arith.constant dense<0.000000e+00> : vector<16x52xf32>
      %80 = tpu.matmul %79, %77, %cst_67 {dimension_numbers = #tpu.dot_dimension_numbers<[1], [0], [0], [1], [0, 0, 1, 1], [], []>} : vector<16x32xbf16>, vector<32x52xbf16>, vector<16x52xf32> -> vector<16x52xf32>
      %81 = arith.addf %68, %80 : vector<16x52xf32>
      %c1_68 = arith.constant 1 : index
      %c0_69 = arith.constant 0 : index
      %c0_70 = arith.constant 0 : index
      %c0_71 = arith.constant 0 : index
      %82 = vector.load %arg2[%c1_68, %c0_69, %c0_70, %c0_71] : memref<3x3x16x32xbf16, #tpu.memory_space<vmem>>, vector<1x1x16x32xbf16>
      %83 = vector.shape_cast %82 : vector<1x1x16x32xbf16> to vector<16x32xbf16>
      %cst_72 = arith.constant dense<0.000000e+00> : vector<16x52xf32>
      %84 = tpu.matmul %83, %77, %cst_72 {dimension_numbers = #tpu.dot_dimension_numbers<[1], [0], [0], [1], [0, 0, 1, 1], [], []>} : vector<16x32xbf16>, vector<32x52xbf16>, vector<16x52xf32> -> vector<16x52xf32>
      %85 = arith.addf %72, %84 : vector<16x52xf32>
      %86 = vector.extract_strided_slice %76 {offsets = [0, 1], sizes = [32, 52], strides = [1, 1]} : vector<32x54xbf16> to vector<32x52xbf16>
      %c2_73 = arith.constant 2 : index
      %c1_74 = arith.constant 1 : index
      %c0_75 = arith.constant 0 : index
      %c0_76 = arith.constant 0 : index
      %87 = vector.load %arg2[%c2_73, %c1_74, %c0_75, %c0_76] : memref<3x3x16x32xbf16, #tpu.memory_space<vmem>>, vector<1x1x16x32xbf16>
      %88 = vector.shape_cast %87 : vector<1x1x16x32xbf16> to vector<16x32xbf16>
      %cst_77 = arith.constant dense<0.000000e+00> : vector<16x52xf32>
      %89 = tpu.matmul %88, %86, %cst_77 {dimension_numbers = #tpu.dot_dimension_numbers<[1], [0], [0], [1], [0, 0, 1, 1], [], []>} : vector<16x32xbf16>, vector<32x52xbf16>, vector<16x52xf32> -> vector<16x52xf32>
      %90 = arith.addf %81, %89 : vector<16x52xf32>
      %c1_78 = arith.constant 1 : index
      %c1_79 = arith.constant 1 : index
      %c0_80 = arith.constant 0 : index
      %c0_81 = arith.constant 0 : index
      %91 = vector.load %arg2[%c1_78, %c1_79, %c0_80, %c0_81] : memref<3x3x16x32xbf16, #tpu.memory_space<vmem>>, vector<1x1x16x32xbf16>
      %92 = vector.shape_cast %91 : vector<1x1x16x32xbf16> to vector<16x32xbf16>
      %cst_82 = arith.constant dense<0.000000e+00> : vector<16x52xf32>
      %93 = tpu.matmul %92, %86, %cst_82 {dimension_numbers = #tpu.dot_dimension_numbers<[1], [0], [0], [1], [0, 0, 1, 1], [], []>} : vector<16x32xbf16>, vector<32x52xbf16>, vector<16x52xf32> -> vector<16x52xf32>
      %94 = arith.addf %85, %93 : vector<16x52xf32>
      %95 = vector.extract_strided_slice %76 {offsets = [0, 2], sizes = [32, 52], strides = [1, 1]} : vector<32x54xbf16> to vector<32x52xbf16>
      %c2_83 = arith.constant 2 : index
      %c2_84 = arith.constant 2 : index
      %c0_85 = arith.constant 0 : index
      %c0_86 = arith.constant 0 : index
      %96 = vector.load %arg2[%c2_83, %c2_84, %c0_85, %c0_86] : memref<3x3x16x32xbf16, #tpu.memory_space<vmem>>, vector<1x1x16x32xbf16>
      %97 = vector.shape_cast %96 : vector<1x1x16x32xbf16> to vector<16x32xbf16>
      %cst_87 = arith.constant dense<0.000000e+00> : vector<16x52xf32>
      %98 = tpu.matmul %97, %95, %cst_87 {dimension_numbers = #tpu.dot_dimension_numbers<[1], [0], [0], [1], [0, 0, 1, 1], [], []>} : vector<16x32xbf16>, vector<32x52xbf16>, vector<16x52xf32> -> vector<16x52xf32>
      %99 = arith.addf %90, %98 : vector<16x52xf32>
      %c1_88 = arith.constant 1 : index
      %c2_89 = arith.constant 2 : index
      %c0_90 = arith.constant 0 : index
      %c0_91 = arith.constant 0 : index
      %100 = vector.load %arg2[%c1_88, %c2_89, %c0_90, %c0_91] : memref<3x3x16x32xbf16, #tpu.memory_space<vmem>>, vector<1x1x16x32xbf16>
      %101 = vector.shape_cast %100 : vector<1x1x16x32xbf16> to vector<16x32xbf16>
      %cst_92 = arith.constant dense<0.000000e+00> : vector<16x52xf32>
      %102 = tpu.matmul %101, %95, %cst_92 {dimension_numbers = #tpu.dot_dimension_numbers<[1], [0], [0], [1], [0, 0, 1, 1], [], []>} : vector<16x32xbf16>, vector<32x52xbf16>, vector<16x52xf32> -> vector<16x52xf32>
      %103 = arith.addf %94, %102 : vector<16x52xf32>
      %c3_i32 = arith.constant 3 : i32
      %104 = arith.addi %20, %c3_i32 : i32
      %c0_93 = arith.constant 0 : index
      %105 = arith.index_cast %104 : i32 to index
      %c0_94 = arith.constant 0 : index
      %c0_95 = arith.constant 0 : index
      %106 = vector.load %arg1[%c0_93, %105, %c0_94, %c0_95] : memref<1x54x32x54xbf16, #tpu.memory_space<vmem>>, vector<1x1x32x54xbf16>
      %107 = vector.shape_cast %106 : vector<1x1x32x54xbf16> to vector<32x54xbf16>
      %108 = vector.extract_strided_slice %107 {offsets = [0, 0], sizes = [32, 52], strides = [1, 1]} : vector<32x54xbf16> to vector<32x52xbf16>
      %c2_96 = arith.constant 2 : index
      %c0_97 = arith.constant 0 : index
      %c0_98 = arith.constant 0 : index
      %c0_99 = arith.constant 0 : index
      %109 = vector.load %arg2[%c2_96, %c0_97, %c0_98, %c0_99] : memref<3x3x16x32xbf16, #tpu.memory_space<vmem>>, vector<1x1x16x32xbf16>
      %110 = vector.shape_cast %109 : vector<1x1x16x32xbf16> to vector<16x32xbf16>
      %cst_100 = arith.constant dense<0.000000e+00> : vector<16x52xf32>
      %111 = tpu.matmul %110, %108, %cst_100 {dimension_numbers = #tpu.dot_dimension_numbers<[1], [0], [0], [1], [0, 0, 1, 1], [], []>} : vector<16x32xbf16>, vector<32x52xbf16>, vector<16x52xf32> -> vector<16x52xf32>
      %112 = arith.addf %103, %111 : vector<16x52xf32>
      %113 = vector.extract_strided_slice %107 {offsets = [0, 1], sizes = [32, 52], strides = [1, 1]} : vector<32x54xbf16> to vector<32x52xbf16>
      %c2_101 = arith.constant 2 : index
      %c1_102 = arith.constant 1 : index
      %c0_103 = arith.constant 0 : index
      %c0_104 = arith.constant 0 : index
      %114 = vector.load %arg2[%c2_101, %c1_102, %c0_103, %c0_104] : memref<3x3x16x32xbf16, #tpu.memory_space<vmem>>, vector<1x1x16x32xbf16>
      %115 = vector.shape_cast %114 : vector<1x1x16x32xbf16> to vector<16x32xbf16>
      %cst_105 = arith.constant dense<0.000000e+00> : vector<16x52xf32>
      %116 = tpu.matmul %115, %113, %cst_105 {dimension_numbers = #tpu.dot_dimension_numbers<[1], [0], [0], [1], [0, 0, 1, 1], [], []>} : vector<16x32xbf16>, vector<32x52xbf16>, vector<16x52xf32> -> vector<16x52xf32>
      %117 = arith.addf %112, %116 : vector<16x52xf32>
      %118 = vector.extract_strided_slice %107 {offsets = [0, 2], sizes = [32, 52], strides = [1, 1]} : vector<32x54xbf16> to vector<32x52xbf16>
      %c2_106 = arith.constant 2 : index
      %c2_107 = arith.constant 2 : index
      %c0_108 = arith.constant 0 : index
      %c0_109 = arith.constant 0 : index
      %119 = vector.load %arg2[%c2_106, %c2_107, %c0_108, %c0_109] : memref<3x3x16x32xbf16, #tpu.memory_space<vmem>>, vector<1x1x16x32xbf16>
      %120 = vector.shape_cast %119 : vector<1x1x16x32xbf16> to vector<16x32xbf16>
      %cst_110 = arith.constant dense<0.000000e+00> : vector<16x52xf32>
      %121 = tpu.matmul %120, %118, %cst_110 {dimension_numbers = #tpu.dot_dimension_numbers<[1], [0], [0], [1], [0, 0, 1, 1], [], []>} : vector<16x32xbf16>, vector<32x52xbf16>, vector<16x52xf32> -> vector<16x52xf32>
      %122 = arith.addf %117, %121 : vector<16x52xf32>
      %123 = arith.maximumf %99, %122 : vector<16x52xf32>
      %124 = vector.broadcast %16 : vector<16x1xf32> to vector<16x52xf32>
      %125 = arith.addf %123, %124 : vector<16x52xf32>
      %cst_111 = arith.constant 0.000000e+00 : f32
      %126 = vector.broadcast %cst_111 : f32 to vector<16x52xf32>
      %127 = arith.maximumf %125, %126 : vector<16x52xf32>
      %128 = arith.truncf %127 : vector<16x52xf32> to vector<16x52xbf16>
      %cst_112 = arith.constant dense<0.000000e+00> : vector<16x26xf32>
      %129 = tpu.matmul %128, %7, %cst_112 {dimension_numbers = #tpu.dot_dimension_numbers<[1], [0], [0], [1], [0, 0, 1, 1], [], []>} : vector<16x52xbf16>, vector<52x26xbf16>, vector<16x26xf32> -> vector<16x26xf32>
      %cst_113 = arith.constant dense<0.000000e+00> : vector<16x26xf32>
      %130 = tpu.matmul %128, %15, %cst_113 {dimension_numbers = #tpu.dot_dimension_numbers<[1], [0], [0], [1], [0, 0, 1, 1], [], []>} : vector<16x52xbf16>, vector<52x26xbf16>, vector<16x26xf32> -> vector<16x26xf32>
      %131 = arith.maximumf %129, %130 : vector<16x26xf32>
      %132 = arith.truncf %131 : vector<16x26xf32> to vector<16x26xbf16>
      %c0_114 = arith.constant 0 : index
      %133 = arith.index_cast %19 : i32 to index
      %c0_115 = arith.constant 0 : index
      %c0_116 = arith.constant 0 : index
      %134 = vector.load %arg4[%c0_114, %133, %c0_115, %c0_116] : memref<1x26x16x26xbf16, #tpu.memory_space<vmem>>, vector<1x1x16x26xbf16>
      %135 = vector.shape_cast %134 : vector<1x1x16x26xbf16> to vector<16x26xbf16>
      %136 = vector.shape_cast %132 : vector<16x26xbf16> to vector<1x1x16x26xbf16>
      tpu.vector_store %arg4[%c0_114, %133, %c0_115, %c0_116], %136 {strides = array<i32>} : memref<1x26x16x26xbf16, #tpu.memory_space<vmem>>, vector<1x1x16x26xbf16>,
    }
    %c26_i32_3 = arith.constant 26 : i32
    return
  }
  func.func @transform_0(%arg0: i32) -> (i32, i32, i32, i32) {
    %c0_i32 = arith.constant 0 : i32
    %c0_i32_0 = arith.constant 0 : i32
    %c0_i32_1 = arith.constant 0 : i32
    %c0_i32_2 = arith.constant 0 : i32
    return %arg0, %c0_i32, %c0_i32_0, %c0_i32_1 : i32, i32, i32, i32
  }
  func.func @transform_1(%arg0: i32) -> (i32, i32, i32, i32) {
    %c0_i32 = arith.constant 0 : i32
    %c0_i32_0 = arith.constant 0 : i32
    %c0_i32_1 = arith.constant 0 : i32
    %c0_i32_2 = arith.constant 0 : i32
    %c0_i32_3 = arith.constant 0 : i32
    return %c0_i32, %c0_i32_0, %c0_i32_1, %c0_i32_2 : i32, i32, i32, i32
  }
  func.func @transform_2(%arg0: i32) -> (i32, i32) {
    %c0_i32 = arith.constant 0 : i32
    %c0_i32_0 = arith.constant 0 : i32
    %c0_i32_1 = arith.constant 0 : i32
    return %c0_i32, %c0_i32_0 : i32, i32
  }
  func.func @transform_3(%arg0: i32) -> (i32, i32, i32, i32) {
    %c0_i32 = arith.constant 0 : i32
    %c0_i32_0 = arith.constant 0 : i32
    %c0_i32_1 = arith.constant 0 : i32
    %c0_i32_2 = arith.constant 0 : i32
    return %arg0, %c0_i32, %c0_i32_0, %c0_i32_1 : i32, i32, i32, i32
  }
}

module attributes {stable_mosaic.version = 11 : i64} {
  func.func @_mlp_kernel(%arg0: memref<2x10816xbf16, #tpu.memory_space<vmem>>, %arg1: memref<10816x120xbf16, #tpu.memory_space<vmem>>, %arg2: memref<1x120xf32, #tpu.memory_space<vmem>>, %arg3: memref<120x84xbf16, #tpu.memory_space<vmem>>, %arg4: memref<1x84xf32, #tpu.memory_space<vmem>>, %arg5: memref<84x21xbf16, #tpu.memory_space<vmem>>, %arg6: memref<1x21xf32, #tpu.memory_space<vmem>>, %arg7: memref<2x21xf32, #tpu.memory_space<vmem>>) attributes {dimension_semantics = [], scalar_prefetch = 0 : i64, scratch_operands = 0 : i64, tpu.core_type = #tpu.core_type<tc>} {
    %c0 = arith.constant 0 : index
    %c0_0 = arith.constant 0 : index
    %0 = vector.load %arg0[%c0, %c0_0] : memref<2x10816xbf16, #tpu.memory_space<vmem>>, vector<2x10816xbf16>
    %c0_1 = arith.constant 0 : index
    %c0_2 = arith.constant 0 : index
    %1 = vector.load %arg1[%c0_1, %c0_2] : memref<10816x120xbf16, #tpu.memory_space<vmem>>, vector<10816x120xbf16>
    %cst = arith.constant dense<0.000000e+00> : vector<2x120xf32>
    %2 = tpu.matmul %0, %1, %cst {dimension_numbers = #tpu.dot_dimension_numbers<[1], [0], [0], [1], [0, 0, 1, 1], [], []>} : vector<2x10816xbf16>, vector<10816x120xbf16>, vector<2x120xf32> -> vector<2x120xf32>
    %c0_3 = arith.constant 0 : index
    %c0_4 = arith.constant 0 : index
    %3 = vector.load %arg2[%c0_3, %c0_4] : memref<1x120xf32, #tpu.memory_space<vmem>>, vector<1x120xf32>
    %4 = vector.broadcast %3 : vector<1x120xf32> to vector<2x120xf32>
    %5 = arith.addf %2, %4 : vector<2x120xf32>
    %cst_5 = arith.constant 0.000000e+00 : f32
    %6 = vector.broadcast %cst_5 : f32 to vector<2x120xf32>
    %7 = arith.maximumf %5, %6 : vector<2x120xf32>
    %8 = arith.truncf %7 : vector<2x120xf32> to vector<2x120xbf16>
    %c0_6 = arith.constant 0 : index
    %c0_7 = arith.constant 0 : index
    %9 = vector.load %arg3[%c0_6, %c0_7] : memref<120x84xbf16, #tpu.memory_space<vmem>>, vector<120x84xbf16>
    %cst_8 = arith.constant dense<0.000000e+00> : vector<2x84xf32>
    %10 = tpu.matmul %8, %9, %cst_8 {dimension_numbers = #tpu.dot_dimension_numbers<[1], [0], [0], [1], [0, 0, 1, 1], [], []>} : vector<2x120xbf16>, vector<120x84xbf16>, vector<2x84xf32> -> vector<2x84xf32>
    %c0_9 = arith.constant 0 : index
    %c0_10 = arith.constant 0 : index
    %11 = vector.load %arg4[%c0_9, %c0_10] : memref<1x84xf32, #tpu.memory_space<vmem>>, vector<1x84xf32>
    %12 = vector.broadcast %11 : vector<1x84xf32> to vector<2x84xf32>
    %13 = arith.addf %10, %12 : vector<2x84xf32>
    %cst_11 = arith.constant 0.000000e+00 : f32
    %14 = vector.broadcast %cst_11 : f32 to vector<2x84xf32>
    %15 = arith.maximumf %13, %14 : vector<2x84xf32>
    %16 = arith.truncf %15 : vector<2x84xf32> to vector<2x84xbf16>
    %c0_12 = arith.constant 0 : index
    %c0_13 = arith.constant 0 : index
    %17 = vector.load %arg5[%c0_12, %c0_13] : memref<84x21xbf16, #tpu.memory_space<vmem>>, vector<84x21xbf16>
    %cst_14 = arith.constant dense<0.000000e+00> : vector<2x21xf32>
    %18 = tpu.matmul %16, %17, %cst_14 {dimension_numbers = #tpu.dot_dimension_numbers<[1], [0], [0], [1], [0, 0, 1, 1], [], []>} : vector<2x84xbf16>, vector<84x21xbf16>, vector<2x21xf32> -> vector<2x21xf32>
    %c0_15 = arith.constant 0 : index
    %c0_16 = arith.constant 0 : index
    %19 = vector.load %arg6[%c0_15, %c0_16] : memref<1x21xf32, #tpu.memory_space<vmem>>, vector<1x21xf32>
    %20 = vector.broadcast %19 : vector<1x21xf32> to vector<2x21xf32>
    %21 = arith.addf %18, %20 : vector<2x21xf32>
    %c0_17 = arith.constant 0 : index
    %c0_18 = arith.constant 0 : index
    %22 = vector.load %arg7[%c0_17, %c0_18] : memref<2x21xf32, #tpu.memory_space<vmem>>, vector<2x21xf32>
    tpu.vector_store %arg7[%c0_17, %c0_18], %21 {strides = array<i32>} : memref<2x21xf32, #tpu.memory_space<vmem>>, vector<2x21xf32>,
    return
  }
}

</mosaic_0001>

<bundles_post_ra>
// kernel: my_simple_classifier_forward.6
= control target key start
LH: loop header
LB: loop body
LE: loop exit
PB: predicated region body
PF: predicated region fallthrough
CT: control target
= control target key end

     0   :  { %s1875_s12 = smov 0   ;;  %s2235_s0 = inlined_call_operand.vmem [shape: bf16[2,54,32,54], index: 0, kind: input, shape index: {}]   ;;  %s2236_s1 = inlined_call_operand.vmem [shape: bf16[3,3,16,32], index: 1, kind: input, shape index: {}]   ;;  %s2237_s2 = inlined_call_operand.vmem [shape: f32[16,1], index: 2, kind: input, shape index: {}]   ;;  %s2238_s3 = inlined_call_operand.vmem [shape: bf16[2,26,16,26], index: 3, kind: output, shape index: {}]  }
   0x1 LB: > { %s1436_s13 = sadd.s32 4294967295, %s1842_s12   ;;  %p1440_p0 = scmp.ge.s32.totalorder %s1842_s12, 1  ;;  %s1842_s12 = sphi %s1875_s12, %s13_s12  }
   0x2   : > { %p137_p1 = scmp.lt.s32.totalorder %s1842_s12, 3 }
   0x4   : > { %p138_p2 = pnand %p1440_p0, %p137_p1 }
   0x5   : > { %p161_p3 = scmp.lt.s32.totalorder (!%p138_p2), %s1436_s13, 1  ;;  %s1960_s26 = smov (!%p138_p2), 0  }
   0x6   : > { %141 = sbr.rel (%p138_p2) target bundleno = 625 (0x271), region = 32 }
   0xb   : > { %v172_v0 = vlaneseq  ;;  %v1886_v1 = vld [vmem:[%s2237_s2] sm:$0xff]  ;;  %v1891_v2 = vld [vmem:[%s2237_s2 + $0x8] sm:$0xff]  ;;  %s2240_s13 = smov (!%p161_p3, %s1436_s13), 1  ;;  %v1848_v13 = vmov 0.0  }
   0xc   : > { %s1788_s18 = smul.u32 864, %s2240_s13 }
   0xd   : > { %v1893_v3 = vshrl.u32 %v172_v0, 7  ;;  %v181_v4 = vand.u32 127, %v172_v0  ;;  %s1789_s19 = smul.u32 208, %s2240_s13 }
   0xe   : > { %s1916_s22 = scalar_lea.vmem %s2235_s0, %s1788_s18 }
   0xf   : > { %v1896_v5 = vadd.s32 8, %v1893_v3  ;;  %v1899_v6 = vadd.s32 16, %v1893_v3  ;;  %v1902_v7 = vadd.s32 24, %v1893_v3  ;;  %v1905_v8 = vadd.s32 32, %v1893_v3  ;;  %s1921_s25 = scalar_lea.vmem %s2238_s3, %s1789_s19 }
  0x10   : > { %v1908_v9 = vadd.s32 40, %v1893_v3  ;;  %v179_v10 = vadd.s32 48, %v1893_v3  ;;  %v1911_v11 = vmul.u32 2, %v181_v4 }
  0x12   : > { %vm183_vm0 = vcmp.eq.s32.totalorder %v1893_v3, %v1911_v11  ;;  %vm184_vm1 = vcmp.eq.s32.totalorder %v1896_v5, %v1911_v11  ;;  %vm185_vm2 = vcmp.eq.s32.totalorder %v1899_v6, %v1911_v11  ;;  %vm186_vm3 = vcmp.eq.s32.totalorder %v1902_v7, %v1911_v11 }
  0x13   : > { %vm187_vm4 = vcmp.eq.s32.totalorder %v1905_v8, %v1911_v11  ;;  %vm188_vm5 = vcmp.eq.s32.totalorder %v1908_v9, %v1911_v11  ;;  %vm189_vm6 = vcmp.eq.s32.totalorder %v179_v10, %v1911_v11  ;;  %v1937_v12 = vadd.s32 1, %v1911_v11 }
  0x14   : > { %v1939_v14 = vsel %vm189_vm6, 1.0, %v1848_v13 }
  0x15   : > { %v207_v15 = vpack.c.bf16 %v1939_v14, %v1939_v14  ;;  %vm209_vm7 = vcmp.eq.s32.totalorder %v1893_v3, %v1937_v12  ;;  %vm210_vm8 = vcmp.eq.s32.totalorder %v1896_v5, %v1937_v12  ;;  %vm211_vm9 = vcmp.eq.s32.totalorder %v1899_v6, %v1937_v12 }
  0x16   : > { %vm212_vm10 = vcmp.eq.s32.totalorder %v1902_v7, %v1937_v12  ;;  %vm213_vm11 = vcmp.eq.s32.totalorder %v1905_v8, %v1937_v12  ;;  %vm214_vm12 = vcmp.eq.s32.totalorder %v1908_v9, %v1937_v12  ;;  %vm215_vm13 = vcmp.eq.s32.totalorder %v179_v10, %v1937_v12 }
  0x17   : > { %v1956_v16 = vsel %vm215_vm13, 1.0, %v1848_v13 }
  0x18   : > { %v233_v17 = vpack.c.bf16 %v1956_v16, %v1956_v16 }
  0x19 LB: >> { %v1849_v18 = vmov 0.0   ;;  %vm1850_vm14 = vmmov 0   ;;  %s1549_s27 = sshll.u32 %s1846_s26, 5  ;;  %s1851_s29 = smov 127   ;;  %v1991_v23 = vld [vmem:[%s2236_s1] sm:$0xff]   ;;  %vm276_vm15 = vcmask 261120   ;;  %vm1529_vm13 = vmpackc.low %vm188_vm5, %vm187_vm4  ;;  %s1846_s26 = sphi %s1960_s26, %s241_s26  }
  0x1a   : >> { %1628 = vmatprep.subr.bf16.mxu1 %v1849_v18  ;;  %1632 = vmatprep.mubr.msk.bf16.mxu1 %vm1850_vm14, %v1849_v18  ;;  %s1973_s28 = scalar_lea.vmem %s1916_s22, %s1549_s27  ;;  %s1852_s30 = smov 126   ;;  %v2017_v26 = vld [vmem:[%s2236_s1 + $0x18] sm:$0xff]   ;;  %v1853_v29 = vmov 0   ;;  %v1824_v34 = vld [vmem:[%s2236_s1 + $0x8] sm:$0xff]   ;;  %v1826_v37 = vld [vmem:[%s2236_s1 + $0x10] sm:$0xff]   ;;  %vm1256_vm6 = vcmask 1041408  }
  0x1b   : >> { %1620 = vmatprep.subr.bf16.mxu0 %v1849_v18  ;;  %1624 = vmatprep.mubr.msk.bf16.mxu0 %vm1850_vm14, %v1849_v18  ;;  %v1815_v19 = vld [vmem:[%s1973_s28 + $0x8] sm:$0xff]   ;;  %v1816_v20 = vld [vmem:[%s1973_s28] sm:$0xff]   ;;  %v1981_v21 = vld [vmem:[%s1973_s28 + $0x18] sm:$0xff]   ;;  %v1258_v61 = vsel %vm1256_vm6, %v207_v15, 0  ;;  %v1302_v62 = vsel %vm1256_vm6, %v233_v17, 0  ;;  %s1555_s24 = sshll.u32 %s1846_s26, 3 }
  0x1c   : >> { %272 = vrot.lane.b32.xlu0 %v1815_v19, %s1851_s29  ;;  %382 = vrot.lane.b32.xlu1 %v1815_v19, %s1852_s30  ;;  %v1986_v22 = vld [vmem:[%s1973_s28 + $0x10] sm:$0xff]   ;;  %v2009_v24 = vld [vmem:[%s1973_s28 + $0x28] sm:$0xff]   ;;  %v1854_v63 = vmov 1.0|1.0   ;;  %vm1538_vm6 = vmpackc.low %vm212_vm10, %vm211_vm9  ;;  %s1356_s27 = scalar_lea.vmem %s1921_s25, %s1555_s24  ;;  %s241_s26 = sadd.s32 1, %s1846_s26  }
  0x1d   : >> { %1629 = vmatpush3.bf16.msra.mxu1 %v1815_v19  ;;  %v2012_v25 = vld [vmem:[%s1973_s28 + $0x20] sm:$0xff]   ;;  %v2034_v27 = vld [vmem:[%s1973_s28 + $0x38] sm:$0xff]   ;;  %v2041_v28 = vld [vmem:[%s1973_s28 + $0x30] sm:$0xff]   ;;  %1813 = vset.pattern.permute.xlu0 %v1853_v29  ;;  %p238_p4 = scmp.ge.s32.totalorder %s241_s26, 26  }
  0x1e   : >> { %1630 = vmatprep.subr.bf16.mxu1 %v1849_v18  ;;  %1814 = vset.pattern.permute.xlu1 %v1853_v29  ;;  %v1827_v40 = vld [vmem:[%s2236_s1 + $0x20] sm:$0xff]   ;;  %v2078_v41 = vld [vmem:[%s2236_s1 + $0x28] sm:$0xff]   ;;  %v1829_v42 = vld [vmem:[%s2236_s1 + $0x30] sm:$0xff]  }
  0x1f   : >> { %v1830_v45 = vld [vmem:[%s2236_s1 + $0x38] sm:$0xff]   ;;  %v1831_v48 = vld [vmem:[%s2236_s1 + $0x40] sm:$0xff]  }
  0x20   : >> { %270 = vrot.lane.b32.xlu0 %v1816_v20, %s1851_s29  ;;  %380 = vrot.lane.b32.xlu1 %v1816_v20, %s1852_s30 }
  0x21   : >> { %1631 = vmatpush3.bf16.msra.mxu1 %v1816_v20 }
  0x22   : >> { %1644 = vmatprep.subr.bf16.mxu1 %v1849_v18 }
  0x24   : >> { %516 = vrot.lane.b32.xlu0 %v1981_v21, %s1851_s29  ;;  %514 = vrot.lane.b32.xlu1 %v1986_v22, %s1851_s29 }
  0x25   : >> { %1633 = vmatmul.mubr.msk.bf16.vlgmr.msra.gmra.mxu1 %vm276_vm15, %v1991_v23 }
  0x26   : >> { %1645 = vmatpush3.bf16.msra.mxu1 %v1981_v21  ;;  %1648 = vmatprep.mubr.msk.bf16.mxu1 %vm1850_vm14, %v1849_v18 }
  0x27   : >> { %1646 = vmatprep.subr.bf16.mxu1 %v1849_v18 }
  0x28   : >> { %658 = vrot.lane.b32.xlu0 %v1981_v21, %s1852_s30  ;;  %656 = vrot.lane.b32.xlu1 %v1986_v22, %s1852_s30 }
  0x2a   : >> { %1647 = vmatpush3.bf16.msra.mxu1 %v1986_v22 }
  0x2b   : >> { %1660 = vmatprep.subr.bf16.mxu1 %v1849_v18 }
  0x2c   : >> { %878 = vrot.lane.b32.xlu0 %v2009_v24, %s1851_s29  ;;  %876 = vrot.lane.b32.xlu1 %v2012_v25, %s1851_s29 }
  0x2d   : >> { %1649 = vmatmul.mubr.msk.bf16.vlgmr.msra.gmra.mxu1 %vm276_vm15, %v2017_v26 }
  0x2e   : >> { %1664 = vmatprep.mubr.msk.bf16.mxu1 %vm1850_vm14, %v1849_v18 }
  0x30   : >> { %981 = vrot.lane.b32.xlu0 %v2009_v24, %s1852_s30  ;;  %979 = vrot.lane.b32.xlu1 %v2012_v25, %s1852_s30 }
  0x34   : >> { %1188 = vrot.lane.b32.xlu1 %v2034_v27, %s1852_s30  ;;  %1139 = vrot.lane.b32.xlu0 %v2034_v27, %s1851_s29 }
  0x38   : >> { %1186 = vrot.lane.b32.xlu1 %v2041_v28, %s1852_s30  ;;  %1137 = vrot.lane.b32.xlu0 %v2041_v28, %s1851_s29 }
  0x3c   : >> { %1239 = vperm.xlu0 %1813, %v1886_v1   ;;  %1244 = vperm.xlu1 %1814, %v1891_v2  }
  0x8e   : >> { %v273_v30 = vpop.permute.xlu0 %272  ;;  %v383_v31 = vpop.permute.xlu1 %382 }
  0x8f   : >> { %1621 = vmatpush3.bf16.msra.mxu0 %v273_v30 }
  0x90   : >> { %1622 = vmatprep.subr.bf16.mxu0 %v1849_v18 }
  0x92   : >> { %v271_v32 = vpop.permute.xlu0 %270  ;;  %v381_v33 = vpop.permute.xlu1 %380 }
  0x93   : >> { %1623 = vmatpush3.bf16.msra.mxu0 %v271_v32 }
  0x94   : >> { %1636 = vmatprep.subr.bf16.mxu0 %v1849_v18 }
  0x96   : >> { %1625 = vmatmul.mubr.msk.bf16.vlgmr.msra.gmra.mxu0 %vm276_vm15, %v1824_v34  ;;  %v517_v35 = vpop.permute.xlu0 %516  ;;  %v515_v36 = vpop.permute.xlu1 %514 }
  0x97   : >> { %1637 = vmatpush3.bf16.msra.mxu0 %v383_v31  ;;  %1661 = vmatpush3.bf16.msra.mxu1 %v517_v35 }
  0x98   : >> { %1638 = vmatprep.subr.bf16.mxu0 %v1849_v18  ;;  %1662 = vmatprep.subr.bf16.mxu1 %v1849_v18 }
  0x99   : >> { %1640 = vmatprep.mubr.msk.bf16.mxu0 %vm1850_vm14, %v1849_v18 }
  0x9a   : >> { %v659_v38 = vpop.permute.xlu0 %658  ;;  %v657_v39 = vpop.permute.xlu1 %656 }
  0x9b   : >> { %1639 = vmatpush3.bf16.msra.mxu0 %v381_v33  ;;  %1663 = vmatpush3.bf16.msra.mxu1 %v515_v36 }
  0x9c   : >> { %1652 = vmatprep.subr.bf16.mxu0 %v1849_v18  ;;  %1676 = vmatprep.subr.bf16.mxu1 %v1849_v18 }
  0x9e   : >> { %1641 = vmatmul.mubr.msk.bf16.vlgmr.msra.gmra.mxu0 %vm276_vm15, %v1826_v37  ;;  %1665 = vmatmul.mubr.msk.bf16.vlgmr.msra.gmra.mxu1 %vm276_vm15, %v1824_v34  ;;  %v879_v43 = vpop.permute.xlu0 %878  ;;  %v877_v44 = vpop.permute.xlu1 %876 }
  0x9f   : >> { %1653 = vmatpush3.bf16.msra.mxu0 %v517_v35  ;;  %1677 = vmatpush3.bf16.msra.mxu1 %v659_v38 }
  0xa0   : >> { %1654 = vmatprep.subr.bf16.mxu0 %v1849_v18  ;;  %1678 = vmatprep.subr.bf16.mxu1 %v1849_v18 }
  0xa1   : >> { %1656 = vmatprep.mubr.msk.bf16.mxu0 %vm1850_vm14, %v1849_v18  ;;  %1680 = vmatprep.mubr.msk.bf16.mxu1 %vm1850_vm14, %v1849_v18 }
  0xa2   : >> { %v982_v46 = vpop.permute.xlu0 %981  ;;  %v980_v47 = vpop.permute.xlu1 %979 }
  0xa3   : >> { %1655 = vmatpush3.bf16.msra.mxu0 %v515_v36  ;;  %1679 = vmatpush3.bf16.msra.mxu1 %v657_v39 }
  0xa4   : >> { %1668 = vmatprep.subr.bf16.mxu0 %v1849_v18  ;;  %1692 = vmatprep.subr.bf16.mxu1 %v1849_v18 }
  0xa6   : >> { %1657 = vmatmul.mubr.msk.bf16.vlgmr.msra.gmra.mxu0 %vm276_vm15, %v1827_v40  ;;  %1681 = vmatmul.mubr.msk.bf16.vlgmr.msra.gmra.mxu1 %vm276_vm15, %v2078_v41  ;;  %v1189_v49 = vpop.permute.xlu1 %1188  ;;  %v1140_v51 = vpop.permute.xlu0 %1139 }
  0xa7   : >> { %1669 = vmatpush3.bf16.msra.mxu0 %v1981_v21  ;;  %1693 = vmatpush3.bf16.msra.mxu1 %v2009_v24 }
  0xa8   : >> { %1670 = vmatprep.subr.bf16.mxu0 %v1849_v18  ;;  %1694 = vmatprep.subr.bf16.mxu1 %v1849_v18 }
  0xa9   : >> { %1672 = vmatprep.mubr.msk.bf16.mxu0 %vm1850_vm14, %v1849_v18  ;;  %1696 = vmatprep.mubr.msk.bf16.mxu1 %vm1850_vm14, %v1849_v18 }
  0xaa   : >> { %v1187_v50 = vpop.permute.xlu1 %1186  ;;  %v1138_v52 = vpop.permute.xlu0 %1137 }
  0xab   : >> { %1671 = vmatpush3.bf16.msra.mxu0 %v1986_v22  ;;  %1695 = vmatpush3.bf16.msra.mxu1 %v2012_v25 }
  0xac   : >> { %1684 = vmatprep.subr.bf16.mxu0 %v1849_v18  ;;  %1708 = vmatprep.subr.bf16.mxu1 %v1849_v18 }
  0xae   : >> { %1673 = vmatmul.mubr.msk.bf16.vlgmr.msra.gmra.mxu0 %vm276_vm15, %v1991_v23  ;;  %1697 = vmatmul.mubr.msk.bf16.vlgmr.msra.gmra.mxu1 %vm276_vm15, %v1829_v42 }
  0xaf   : >> { %1685 = vmatpush3.bf16.msra.mxu0 %v659_v38  ;;  %1709 = vmatpush3.bf16.msra.mxu1 %v879_v43 }
  0xb0   : >> { %1686 = vmatprep.subr.bf16.mxu0 %v1849_v18  ;;  %1710 = vmatprep.subr.bf16.mxu1 %v1849_v18 }
  0xb1   : >> { %1688 = vmatprep.mubr.msk.bf16.mxu0 %vm1850_vm14, %v1849_v18  ;;  %1712 = vmatprep.mubr.msk.bf16.mxu1 %vm1850_vm14, %v1849_v18 }
  0xb3   : >> { %1687 = vmatpush3.bf16.msra.mxu0 %v657_v39  ;;  %1711 = vmatpush3.bf16.msra.mxu1 %v877_v44 }
  0xb4   : >> { %1700 = vmatprep.subr.bf16.mxu0 %v1849_v18  ;;  %1724 = vmatprep.subr.bf16.mxu1 %v1849_v18 }
  0xb6   : >> { %1689 = vmatmul.mubr.msk.bf16.vlgmr.msra.gmra.mxu0 %vm276_vm15, %v1826_v37  ;;  %1713 = vmatmul.mubr.msk.bf16.vlgmr.msra.gmra.mxu1 %vm276_vm15, %v1830_v45 }
  0xb7   : >> { %1701 = vmatpush3.bf16.msra.mxu0 %v2009_v24  ;;  %1725 = vmatpush3.bf16.msra.mxu1 %v982_v46 }
  0xb8   : >> { %1702 = vmatprep.subr.bf16.mxu0 %v1849_v18  ;;  %1726 = vmatprep.subr.bf16.mxu1 %v1849_v18 }
  0xb9   : >> { %1704 = vmatprep.mubr.msk.bf16.mxu0 %vm1850_vm14, %v1849_v18  ;;  %1728 = vmatprep.mubr.msk.bf16.mxu1 %vm1850_vm14, %v1849_v18 }
  0xbb   : >> { %1703 = vmatpush3.bf16.msra.mxu0 %v2012_v25  ;;  %1727 = vmatpush3.bf16.msra.mxu1 %v980_v47 }
  0xbc   : >> { %1716 = vmatprep.subr.bf16.mxu0 %v1849_v18  ;;  %1740 = vmatprep.subr.bf16.mxu1 %v1849_v18 }
  0xbe   : >> { %1705 = vmatmul.mubr.msk.bf16.vlgmr.msra.gmra.mxu0 %vm276_vm15, %v2017_v26  ;;  %1729 = vmatmul.mubr.msk.bf16.vlgmr.msra.gmra.mxu1 %vm276_vm15, %v1831_v48 }
  0xbf   : >> { %1717 = vmatpush3.bf16.msra.mxu0 %v879_v43  ;;  %1741 = vmatpush3.bf16.msra.mxu1 %v2034_v27 }
  0xc0   : >> { %1718 = vmatprep.subr.bf16.mxu0 %v1849_v18  ;;  %1720 = vmatprep.mubr.msk.bf16.mxu0 %vm1850_vm14, %v1849_v18 }
  0xc1   : >> { %1742 = vmatprep.subr.bf16.mxu1 %v1849_v18  ;;  %1744 = vmatprep.mubr.msk.bf16.mxu1 %vm1850_vm14, %v1849_v18 }
  0xc3   : >> { %1719 = vmatpush3.bf16.msra.mxu0 %v877_v44  ;;  %1743 = vmatpush3.bf16.msra.mxu1 %v2041_v28 }
  0xc4   : >> { %1732 = vmatprep.subr.bf16.mxu0 %v1849_v18  ;;  %1756 = vmatprep.subr.bf16.mxu1 %v1849_v18 }
  0xc6   : >> { %1721 = vmatmul.mubr.msk.bf16.vlgmr.msra.gmra.mxu0 %vm276_vm15, %v1827_v40  ;;  %1745 = vmatmul.mubr.msk.bf16.vlgmr.msra.gmra.mxu1 %vm276_vm15, %v1829_v42 }
  0xc7   : >> { %1733 = vmatpush3.bf16.msra.mxu0 %v982_v46  ;;  %1757 = vmatpush3.bf16.msra.mxu1 %v1189_v49 }
  0xc8   : >> { %1734 = vmatprep.subr.bf16.mxu0 %v1849_v18  ;;  %1736 = vmatprep.mubr.msk.bf16.mxu0 %vm1850_vm14, %v1849_v18 }
  0xc9   : >> { %1758 = vmatprep.subr.bf16.mxu1 %v1849_v18  ;;  %1760 = vmatprep.mubr.msk.bf16.mxu1 %vm1850_vm14, %v1849_v18 }
  0xcb   : >> { %1735 = vmatpush3.bf16.msra.mxu0 %v980_v47  ;;  %1759 = vmatpush3.bf16.msra.mxu1 %v1187_v50 }
  0xcc   : >> { %1748 = vmatprep.subr.bf16.mxu0 %v1849_v18  ;;  %1776 = vmatprep.subr.bf16.mxu1 %v1849_v18 }
  0xce   : >> { %1737 = vmatmul.mubr.msk.bf16.vlgmr.msra.gmra.mxu0 %vm276_vm15, %v2078_v41  ;;  %1761 = vmatmul.mubr.msk.bf16.vlgmr.msra.gmra.mxu1 %vm276_vm15, %v1831_v48 }
  0xcf   : >> { %1749 = vmatpush3.bf16.msra.mxu0 %v1140_v51  ;;  %1752 = vmatprep.mubr.msk.bf16.mxu0 %vm1850_vm14, %v1849_v18 }
  0xd0   : >> { %1750 = vmatprep.subr.bf16.mxu0 %v1849_v18  ;;  %1784 = vmatprep.mubr.msk.bf16.mxu1 %vm1850_vm14, %v1849_v18 }
  0xd1   : >> { %1777 = vmatpush3.bf16.msra.mxu1 %v1302_v62 }
  0xd2   : >> { %1778 = vmatprep.subr.bf16.mxu1 %v1849_v18 }
  0xd3   : >> { %1751 = vmatpush3.bf16.msra.mxu0 %v1138_v52 }
  0xd4   : >> { %1764 = vmatprep.subr.bf16.mxu0 %v1849_v18 }
  0xd6   : >> { %1753 = vmatmul.mubr.msk.bf16.vlgmr.msra.gmra.mxu0 %vm276_vm15, %v1830_v45  ;;  %vm1531_vm15 = vmpackc.low %vm186_vm3, %vm185_vm2 }
  0xd7   : >> { %1772 = vmatprep.mubr.msk.bf16.mxu0 %vm1850_vm14, %v1849_v18  ;;  %1765 = vmatpush3.bf16.msra.mxu0 %v1258_v61  ;;  %vm1536_vm14 = vmpackc.low %vm214_vm12, %vm213_vm11 }
  0xd8   : >> { %1766 = vmatprep.subr.bf16.mxu0 %v1849_v18  ;;  %1779 = vmatpush3.bf16.msk.msra.mxu1 %vm1536_vm14, %v1854_v63  ;;  %vm1540_vm14 = vmpackc.low %vm210_vm8, %vm209_vm7 }
  0xd9   : >> { %1780 = vmatprep.subr.bf16.mxu1 %v1849_v18 }
  0xdb   : >> { %1767 = vmatpush3.bf16.msk.msra.mxu0 %vm1529_vm13, %v1854_v63  ;;  %vm1533_vm13 = vmpackc.low %vm184_vm1, %vm183_vm0 }
  0xdc   : >> { %1768 = vmatprep.subr.bf16.mxu0 %v1849_v18  ;;  %1781 = vmatpush3.bf16.msk.msra.mxu1 %vm1538_vm6, %v1854_v63  ;;  %vm1357_vm6 = vcmask 207872  }
  0xdd   : >> { %1782 = vmatprep.subr.bf16.mxu1 %v1849_v18 }
  0xdf   : >> { %1769 = vmatpush3.bf16.msk.msra.mxu0 %vm1531_vm15, %v1854_v63  ;;  %vm1252_vm15 = vcmask 424960  }
  0xe0   : >> { %1770 = vmatprep.subr.bf16.mxu0 %v1849_v18  ;;  %1783 = vmatpush3.bf16.msk.msra.mxu1 %vm1540_vm14, %v1854_v63 }
  0xe3   : >> { %1771 = vmatpush3.bf16.msk.msra.mxu0 %vm1533_vm13, %v1854_v63 }
  0xe5   : >> { %v2164_v53 = vpop.f32.mrf.mxu1 }
  0xe7   : >> { %v1634_v54 = vpop.f32.mrf.mxu1 }
  0xe9   : >> { %v2166_v55 = vpop.f32.mrf.mxu1 }
  0xeb   : >> { %v1635_v56 = vpop.f32.mrf.mxu1 }
  0xed   : >> { %v2168_v57 = vpop.f32.mrf.mxu1 }
  0xef   : >> { %v1650_v58 = vpop.f32.mrf.mxu1 }
  0xf1   : >> { %v2170_v59 = vpop.f32.mrf.mxu1 }
  0xf3   : >> { %v1651_v60 = vpop.f32.mrf.mxu1 }
 0x156   : >> { %v314_v0 = vpop.f32.mrf.mxu0 }
 0x158   : >> { %v1626_v4 = vpop.f32.mrf.mxu0 }
 0x159   : >> { %v366_v4 = vadd.f32 %v2164_v53, %v314_v0 }
 0x15a   : >> { %v317_v10 = vpop.f32.mrf.mxu0 }
 0x15c   : >> { %v1627_v13 = vpop.f32.mrf.mxu0 }
 0x15e   : >> { %v423_v18 = vpop.f32.mrf.mxu0  ;;  %v600_v19 = vpop.f32.mrf.mxu1 }
 0x160   : >> { %v1642_v20 = vpop.f32.mrf.mxu0  ;;  %v1666_v21 = vpop.f32.mrf.mxu1 }
 0x161   : >> { %v430_v21 = vadd.f32 %v423_v18, %v366_v4 }
 0x162   : >> { %v426_v22 = vpop.f32.mrf.mxu0  ;;  %v603_v23 = vpop.f32.mrf.mxu1 }
 0x164   : >> { %v1643_v24 = vpop.f32.mrf.mxu0  ;;  %v1667_v25 = vpop.f32.mrf.mxu1 }
 0x166   : >> { %v557_v26 = vpop.f32.mrf.mxu0  ;;  %v699_v27 = vpop.f32.mrf.mxu1 }
 0x168   : >> { %v1658_v28 = vpop.f32.mrf.mxu0  ;;  %v1682_v29 = vpop.f32.mrf.mxu1 }
 0x169   : >> { %v369_v29 = vadd.f32 %v2166_v55, %v317_v10 }
 0x16a   : >> { %v560_v30 = vpop.f32.mrf.mxu0  ;;  %v2220_v31 = vpop.f32.mrf.mxu1 }
 0x16c   : >> { %v1659_v32 = vpop.f32.mrf.mxu0  ;;  %v1683_v33 = vpop.f32.mrf.mxu1 }
 0x16e   : >> { %v641_v34 = vpop.f32.mrf.mxu0  ;;  %v816_v35 = vpop.f32.mrf.mxu1 }
 0x16f   : >> { %v642_v24 = vadd.f32 %v641_v34, %v600_v19 }
 0x170   : >> { %v1674_v36 = vpop.f32.mrf.mxu0  ;;  %v1698_v37 = vpop.f32.mrf.mxu1 }
 0x171   : >> { %v431_v37 = vadd.f32 %v426_v22, %v369_v29 }
 0x172   : >> { %v644_v38 = vpop.f32.mrf.mxu0  ;;  %v819_v39 = vpop.f32.mrf.mxu1 }
 0x173   : >> { %v505_v19 = vadd.f32 %v2170_v59, %v431_v37 }
 0x174   : >> { %v1675_v40 = vpop.f32.mrf.mxu0  ;;  %v1699_v41 = vpop.f32.mrf.mxu1 }
 0x175   : >> { %v504_v40 = vadd.f32 %v2168_v57, %v430_v21  ;;  %v645_v41 = vadd.f32 %v644_v38, %v603_v23 }
 0x176   : >> { %v742_v42 = vpop.f32.mrf.mxu0  ;;  %v919_v43 = vpop.f32.mrf.mxu1 }
 0x177   : >> { %v749_v32 = vadd.f32 %v742_v42, %v642_v24 }
 0x178   : >> { %v1690_v44 = vpop.f32.mrf.mxu0  ;;  %v1714_v45 = vpop.f32.mrf.mxu1 }
 0x17a   : >> { %v745_v46 = vpop.f32.mrf.mxu0  ;;  %v922_v47 = vpop.f32.mrf.mxu1 }
 0x17b   : >> { %v750_v53 = vadd.f32 %v745_v46, %v645_v41 }
 0x17c   : >> { %v1691_v48 = vpop.f32.mrf.mxu0  ;;  %v1715_v49 = vpop.f32.mrf.mxu1 }
 0x17d   : >> { %v564_v49 = vadd.f32 %v557_v26, %v504_v40 }
 0x17e   : >> { %v859_v50 = vpop.f32.mrf.mxu0  ;;  %v1022_v51 = vpop.f32.mrf.mxu1 }
 0x17f   : >> { %v866_v44 = vadd.f32 %v859_v50, %v749_v32  ;;  %v706_v42 = vadd.f32 %v699_v27, %v564_v49  ;;  %v1240_v32 = vpop.permute.xlu0 %1239 }
 0x180   : >> { %v1706_v52 = vpop.f32.mrf.mxu0  ;;  %v1730_v54 = vpop.f32.mrf.mxu1 }
 0x181   : >> { %v823_v23 = vadd.f32 %v816_v35, %v706_v42 }
 0x182   : >> { %v862_v56 = vpop.f32.mrf.mxu0  ;;  %v1025_v58 = vpop.f32.mrf.mxu1 }
 0x183   : >> { %v867_v34 = vadd.f32 %v862_v56, %v750_v53  ;;  %v926_v46 = vadd.f32 %v919_v43, %v823_v23 }
 0x184   : >> { %v1707_v60 = vpop.f32.mrf.mxu0  ;;  %v1731_v61 = vpop.f32.mrf.mxu1 }
 0x185   : >> { %v565_v60 = vadd.f32 %v560_v30, %v505_v19  ;;  %v1029_v59 = vadd.f32 %v1022_v51, %v926_v46 }
 0x186   : >> { %v962_v62 = vpop.f32.mrf.mxu0  ;;  %v1128_v63 = vpop.f32.mrf.mxu1 }
 0x187   : >> { %v969_v0 = vadd.f32 %v962_v62, %v866_v44  ;;  %v707_v26 = vadd.f32 %v2220_v31, %v565_v60 }
 0x188   : >> { %v1722_v13 = vpop.f32.mrf.mxu0  ;;  %v1746_v20 = vpop.f32.mrf.mxu1 }
 0x189   : >> { %v824_v20 = vadd.f32 %v819_v39, %v707_v26 }
 0x18a   : >> { %v965_v25 = vpop.f32.mrf.mxu0  ;;  %v1131_v28 = vpop.f32.mrf.mxu1 }
 0x18b   : >> { %v970_v22 = vadd.f32 %v965_v25, %v867_v34  ;;  %v927_v29 = vadd.f32 %v922_v47, %v824_v20 }
 0x18c   : >> { %v1723_v33 = vpop.f32.mrf.mxu0  ;;  %v1747_v36 = vpop.f32.mrf.mxu1 }
 0x18d   : >> { %v1030_v35 = vadd.f32 %v1025_v58, %v927_v29  ;;  %v1245_v33 = vpop.permute.xlu1 %1244 }
 0x18e   : >> { %v1065_v45 = vpop.f32.mrf.mxu0  ;;  %v1226_v48 = vpop.f32.mrf.mxu1 }
 0x18f   : >> { %v1072_v54 = vadd.f32 %v1065_v45, %v969_v0 }
 0x190   : >> { %v1738_v52 = vpop.f32.mrf.mxu0  ;;  %v1762_v18 = vpop.f32.mrf.mxu1 }
 0x191   : >> { %v1135_v50 = vadd.f32 %v1128_v63, %v1072_v54 }
 0x192   : >> { %v1068_v55 = vpop.f32.mrf.mxu0  ;;  %v1229_v10 = vpop.f32.mrf.mxu1 }
 0x193   : >> { %v1073_v38 = vadd.f32 %v1068_v55, %v970_v22 }
 0x194   : >> { %v1739_v61 = vpop.f32.mrf.mxu0  ;;  %v1763_v57 = vpop.f32.mrf.mxu1 }
 0x195   : >> { %v1136_v21 = vadd.f32 %v1131_v28, %v1073_v38 }
 0x196   : >> { %v1177_v4 = vpop.f32.mrf.mxu0 }
 0x197   : >> { %v1184_v62 = vadd.f32 %v1177_v4, %v1135_v50 }
 0x198   : >> { %v1754_v13 = vpop.f32.mrf.mxu0 }
 0x199   : >> { %v1233_v56 = vadd.f32 %v1226_v48, %v1184_v62 }
 0x19a   : >> { %v1180_v24 = vpop.f32.mrf.mxu0 }
 0x19b   : >> { %v1185_v27 = vadd.f32 %v1180_v24, %v1136_v21  ;;  %v1235_v30 = vmax.f32 %v1029_v59, %v1233_v56 }
 0x19c   : >> { %v1755_v25 = vpop.f32.mrf.mxu0 }
 0x19d   : >> { %v1234_v63 = vadd.f32 %v1229_v10, %v1185_v27  ;;  %v1247_v36 = vadd.f32 %v1240_v32, %v1235_v30 }
 0x19f   : >> { %v1236_v31 = vmax.f32 %v1030_v35, %v1234_v63  ;;  %v1249_v37 = vmax.f32 %v1247_v36, 0.0 }
 0x1a1   : >> { %v1248_v43 = vadd.f32 %v1245_v33, %v1236_v31 }
 0x1a3   : >> { %v1250_v40 = vmax.f32 %v1248_v43, 0.0 }
 0x1a5   : >> { %v1251_v39 = vpack.c.bf16 %v1250_v40, %v1249_v37 }
 0x1a7   : >> { %1773 = vmatmul.mubr.msk.bf16.vlgmr.msra.gmra.mxu0 %vm1252_vm15, %v1251_v39  ;;  %1785 = vmatmul.mubr.msk.bf16.vlgmr.msra.gmra.mxu1 %vm1252_vm15, %v1251_v39 }
 0x267   : >> { %v1294_v47 = vpop.f32.mrf.mxu0  ;;  %v1338_v51 = vpop.f32.mrf.mxu1 }
 0x268   : >> { %v1345_v28 = vmax.f32 %v1294_v47, %v1338_v51 }
 0x269   : >> { %v1774_v41 = vpop.f32.mrf.mxu0  ;;  %v1786_v58 = vpop.f32.mrf.mxu1 }
 0x26a   : >> { %v1553_v44 = vpack.c.bf16 %v1345_v28, %v1345_v28 }
 0x26b   : >> { %v1297_v45 = vpop.f32.mrf.mxu0  ;;  %v1341_v48 = vpop.f32.mrf.mxu1 }
 0x26c   : >> { %1358 = vst.msk [vmem:[%s1356_s27] sm:$0xf] %vm1357_vm6, %v1553_v44  ;;  %v1346_v49 = vmax.f32 %v1297_v45, %v1341_v48  ;;  %240 = sbr.rel (!%p238_p4) target bundleno = 25 (0x19), region = 82 }
 0x26d   : >> { %v1775_v53 = vpop.f32.mrf.mxu0  ;;  %v1787_v0 = vpop.f32.mrf.mxu1 }
 0x26e   : >> { %v1554_v52 = vpack.c.bf16 %v1346_v49, %v1346_v49 }
 0x270   : >> { %1359 = vst.msk [vmem:[%s1356_s27 + $0x4] sm:$0xf] %vm1357_vm6, %v1554_v52 }
 0x271 PF: > { %s13_s12 = sadd.s32 1, %s1842_s12  }
 0x272   : > { %p10_p5 = scmp.ge.s32.totalorder %s13_s12, 4  }
 0x274   :  { %12 = sbr.rel (!%p10_p5) target bundleno = 1 (0x1), region = 93 }

// kernel: my_simple_classifier_forward.5
= control target key start
LH: loop header
LB: loop body
LE: loop exit
PB: predicated region body
PF: predicated region fallthrough
CT: control target
= control target key end

     0   :  { %s2612_s12 = smov 0   ;;  %s3227_s0 = inlined_call_operand.vmem [shape: bf16[2,110,64,110], index: 0, kind: input, shape index: {}]   ;;  %s3228_s1 = inlined_call_operand.vmem [shape: bf16[3,3,32,64], index: 1, kind: input, shape index: {}]   ;;  %s3229_s2 = inlined_call_operand.vmem [shape: f32[32,1], index: 2, kind: input, shape index: {}]   ;;  %s3230_s3 = inlined_call_operand.vmem [shape: bf16[2,54,32,54], index: 3, kind: output, shape index: {}]  }
   0x1 LB: > { %s1916_s13 = sadd.s32 4294967295, %s2581_s12   ;;  %p1920_p0 = scmp.ge.s32.totalorder %s2581_s12, 1  ;;  %s2581_s12 = sphi %s2612_s12, %s13_s12  }
   0x2   : > { %p137_p1 = scmp.lt.s32.totalorder %s2581_s12, 3 }
   0x4   : > { %p138_p2 = pnand %p1920_p0, %p137_p1 }
   0x5   : > { %p161_p3 = scmp.lt.s32.totalorder (!%p138_p2), %s1916_s13, 1  ;;  %s2748_s30 = smov (!%p138_p2), 0  }
   0x6   : > { %141 = sbr.rel (%p138_p2) target bundleno = 709 (0x2c5), region = 32 }
   0xb   : > { %v172_v0 = vlaneseq  ;;  %v2623_v1 = vld [vmem:[%s3229_s2] sm:$0xff]  ;;  %v2628_v2 = vld [vmem:[%s3229_s2 + $0x8] sm:$0xff]  ;;  %v2633_v3 = vld [vmem:[%s3229_s2 + $0x10] sm:$0xff]  ;;  %s3343_s13 = smov (!%p161_p3, %s1916_s13), 1  ;;  %v2587_v22 = vmov 0.0  }
   0xc   : > { %3261 = vst [vmem:[#allocation2_spill] sm:$0xff] %v2623_v1  ;;  %3262 = vst [vmem:[#allocation3_spill] sm:$0xff] %v2628_v2  ;;  %v2638_v4 = vld [vmem:[%s3229_s2 + $0x18] sm:$0xff]  ;;  %s2512_s22 = smul.u32 3520, %s3343_s13 }
   0xd   : > { %3263 = vst [vmem:[#allocation4_spill] sm:$0xff] %v2633_v3  ;;  %3264 = vst [vmem:[#allocation5_spill] sm:$0xff] %v2638_v4  ;;  %v2640_v5 = vshrl.u32 %v172_v0, 7  ;;  %v188_v6 = vand.u32 127, %v172_v0  ;;  %s2513_s23 = smul.u32 864, %s3343_s13 }
   0xe   : > { %s2657_s26 = scalar_lea.vmem %s3227_s0, %s2512_s22 }
   0xf   : > { %3265 = vst [vmem:[#allocation6_spill] sm:$0xff] %v2640_v5  ;;  %v2643_v7 = vadd.s32 8, %v2640_v5  ;;  %v2646_v8 = vadd.s32 16, %v2640_v5  ;;  %v2649_v9 = vadd.s32 24, %v2640_v5  ;;  %v2652_v10 = vadd.s32 32, %v2640_v5  ;;  %s2674_s29 = scalar_lea.vmem %s3230_s3, %s2513_s23 }
  0x10   : > { %v2660_v11 = vadd.s32 40, %v2640_v5  ;;  %v2663_v12 = vadd.s32 48, %v2640_v5  ;;  %v2666_v13 = vadd.s32 56, %v2640_v5  ;;  %v2669_v14 = vadd.s32 64, %v2640_v5 }
  0x11   : > { %3266 = vst [vmem:[#allocation7_spill] sm:$0xff] %v2643_v7  ;;  %3267 = vst [vmem:[#allocation8_spill] sm:$0xff] %v2646_v8  ;;  %v2677_v15 = vadd.s32 72, %v2640_v5  ;;  %v2680_v16 = vadd.s32 80, %v2640_v5  ;;  %v2683_v17 = vadd.s32 88, %v2640_v5  ;;  %v2685_v18 = vmul.u32 2, %v188_v6 }
  0x12   : > { %3268 = vst [vmem:[#allocation9_spill] sm:$0xff] %v2649_v9  ;;  %3269 = vst [vmem:[#allocation10_spill] sm:$0xff] %v2652_v10  ;;  %v185_v19 = vadd.s32 96, %v2640_v5  ;;  %v186_v20 = vadd.s32 104, %v2640_v5 }
  0x13   : > { %3270 = vst [vmem:[#allocation11_spill] sm:$0xff] %v2660_v11  ;;  %3271 = vst [vmem:[#allocation12_spill] sm:$0xff] %v2663_v12  ;;  %vm198_vm8 = vcmp.eq.s32.totalorder %v2669_v14, %v2685_v18  ;;  %vm199_vm9 = vcmp.eq.s32.totalorder %v2677_v15, %v2685_v18  ;;  %vm200_vm10 = vcmp.eq.s32.totalorder %v2680_v16, %v2685_v18  ;;  %v2716_v21 = vadd.s32 1, %v2685_v18 }
  0x14   : > { %3272 = vst [vmem:[#allocation13_spill] sm:$0xff] %v2666_v13  ;;  %3273 = vst [vmem:[#allocation14_spill] sm:$0xff] %v2669_v14  ;;  %vm201_vm11 = vcmp.eq.s32.totalorder %v2683_v17, %v2685_v18  ;;  %vm202_vm12 = vcmp.eq.s32.totalorder %v185_v19, %v2685_v18  ;;  %vm203_vm13 = vcmp.eq.s32.totalorder %v186_v20, %v2685_v18 }
  0x15   : > { %3274 = vst [vmem:[#allocation15_spill] sm:$0xff] %v2677_v15  ;;  %3275 = vst [vmem:[#allocation16_spill] sm:$0xff] %v2680_v16  ;;  %v1935_v23 = vsel %vm202_vm12, 1.0, %v2587_v22  ;;  %v1936_v24 = vsel %vm203_vm13, 1.0, %v2587_v22  ;;  %vm246_vm13 = vcmp.eq.s32.totalorder %v2663_v12, %v2716_v21  ;;  %vm247_vm14 = vcmp.eq.s32.totalorder %v2666_v13, %v2716_v21 }
  0x16   : > { %3276 = vst [vmem:[#allocation17_spill] sm:$0xff] %v2683_v17  ;;  %3277 = vst [vmem:[#allocation18_spill] sm:$0xff] %v2685_v18  ;;  %v2718_v25 = vpack.c.bf16 %v1936_v24, %v1935_v23  ;;  %vm248_vm15 = vcmp.eq.s32.totalorder %v2669_v14, %v2716_v21  ;;  %vm252_vm12 = vcmp.eq.s32.totalorder %v185_v19, %v2716_v21 }
  0x17   : > { %3278 = vst [vmem:[#allocation19_spill] sm:$0xff] %v2716_v21  ;;  %vm253_vm3 = vcmp.eq.s32.totalorder %v186_v20, %v2716_v21  ;;  %v1949_v26 = vsel %vm252_vm12, 1.0, %v2587_v22 }
  0x18   : > { %3279 = vst [vmem:[#allocation20_spill] sm:$0xff] %v2718_v25  ;;  %v1950_v27 = vsel %vm253_vm3, 1.0, %v2587_v22 }
  0x19   : > { %v2746_v28 = vpack.c.bf16 %v1950_v27, %v1949_v26 }
  0x1b   : > { %3280 = vst [vmem:[#allocation21_spill] sm:$0xff] %v2746_v28 }
  0x1c LB: >> { %v3286_v16 = vld [vmem:[#allocation16_spill] sm:$0xff]  ;;  %v3287_v15 = vld [vmem:[#allocation15_spill] sm:$0xff]  ;;  %v3289_v13 = vld [vmem:[#allocation13_spill] sm:$0xff]  ;;  %vm362_vm5 = vcmask 523264   ;;  %s2123_s6 = sshll.u32 %s2585_s30, 6  ;;  %s2588_s8 = smov 127   ;;  %s2585_s30 = sphi %s2748_s30, %s298_s30  }
  0x1d   : >> { %v3284_v18 = vld [vmem:[#allocation18_spill] sm:$0xff]  ;;  %v3285_v17 = vld [vmem:[#allocation17_spill] sm:$0xff]  ;;  %v3290_v12 = vld [vmem:[#allocation12_spill] sm:$0xff]  ;;  %s2760_s7 = scalar_lea.vmem %s2657_s26, %s2123_s6  ;;  %s2589_s9 = smov 126   ;;  %vm1707_vm3 = vcmask 1045504  }
  0x1e   : >> { %v3283_v21 = vld [vmem:[#allocation19_spill] sm:$0xff]  ;;  %v3292_v10 = vld [vmem:[#allocation10_spill] sm:$0xff]  ;;  %v3293_v9 = vld [vmem:[#allocation9_spill] sm:$0xff]  ;;  %vm3304_vm6 = vcmp.eq.s32.totalorder %v3290_v12, %v3284_v18  ;;  %vm3305_vm7 = vcmp.eq.s32.totalorder %v3289_v13, %v3284_v18  ;;  %s2131_s22 = sshll.u32 %s2585_s30, 4  ;;  %s298_s30 = sadd.s32 1, %s2585_s30  }
  0x1f   : >> { %v3282_v25 = vld [vmem:[#allocation20_spill] sm:$0xff]  ;;  %v3291_v11 = vld [vmem:[#allocation11_spill] sm:$0xff]  ;;  %v3296_v5 = vld [vmem:[#allocation6_spill] sm:$0xff]  ;;  %vm3301_vm0 = vcmp.eq.s32.totalorder %v3286_v16, %v3283_v21  ;;  %vm3302_vm2 = vcmp.eq.s32.totalorder %v3285_v17, %v3283_v21  ;;  %vm3303_vm1 = vcmp.eq.s32.totalorder %v3287_v15, %v3283_v21  ;;  %vm3306_vm4 = vcmp.eq.s32.totalorder %v3292_v10, %v3284_v18  ;;  %s1834_s23 = scalar_lea.vmem %s2674_s29, %s2131_s22  ;;  %p295_p4 = scmp.ge.s32.totalorder %s298_s30, 54  }
  0x20   : >> { %v3294_v8 = vld [vmem:[#allocation8_spill] sm:$0xff]  ;;  %v3295_v7 = vld [vmem:[#allocation7_spill] sm:$0xff]  ;;  %v2756_v29 = vld [vmem:[%s3228_s1] sm:$0xff]  }
  0x21   : >> { %2278 = vmatprep.mubr.msk.bf16.mxu1 %vm362_vm5, %v2756_v29  ;;  %v2537_v30 = vld [vmem:[%s2760_s7 + $0x18] sm:$0xff]   ;;  %v2538_v31 = vld [vmem:[%s2760_s7 + $0x10] sm:$0xff]   ;;  %v2539_v32 = vld [vmem:[%s2760_s7 + $0x8] sm:$0xff]  }
  0x22   : >> { %v3281_v28 = vld [vmem:[#allocation21_spill] sm:$0xff]  ;;  %356 = vrot.lane.b32.xlu0 %v2537_v30, %s2588_s8  ;;  %2270 = vmatprep.subr.bf16.mxu1 %v2537_v30  ;;  %v2540_v33 = vld [vmem:[%s2760_s7] sm:$0xff]   ;;  %v2777_v34 = vld [vmem:[%s3228_s1 + $0x8] sm:$0xff]  }
  0x23   : >> { %2271 = vmatpush3.bf16.msra.mxu1 %v2537_v30  ;;  %352 = vrot.lane.b32.xlu1 %v2539_v32, %s2588_s8  ;;  %v2781_v35 = vld [vmem:[%s2760_s7 + $0x38] sm:$0xff]   ;;  %v2553_v36 = vld [vmem:[%s3228_s1 + $0x10] sm:$0xff]   ;;  %v2800_v39 = vld [vmem:[%s2760_s7 + $0x28] sm:$0xff]  }
  0x24   : >> { %2272 = vmatprep.subr.bf16.mxu1 %v2538_v31  ;;  %v2789_v37 = vld [vmem:[%s3228_s1 + $0x30] sm:$0xff]   ;;  %2266 = vmatprep.mubr.msk.bf16.mxu0 %vm362_vm5, %v2553_v36  ;;  %v2810_v40 = vld [vmem:[%s2760_s7 + $0x20] sm:$0xff]   ;;  %v2828_v41 = vld [vmem:[%s2760_s7 + $0x58] sm:$0xff]  }
  0x25   : >> { %v2793_v38 = vld [vmem:[%s2760_s7 + $0x30] sm:$0xff]   ;;  %v2833_v42 = vld [vmem:[%s3228_s1 + $0x38] sm:$0xff]   ;;  %v2844_v44 = vld [vmem:[%s2760_s7 + $0x48] sm:$0xff]  }
  0x26   : >> { %354 = vrot.lane.b32.xlu0 %v2538_v31, %s2588_s8  ;;  %v2839_v43 = vld [vmem:[%s2760_s7 + $0x50] sm:$0xff]   ;;  %v2852_v45 = vld [vmem:[%s2760_s7 + $0x40] sm:$0xff]   ;;  %v2867_v46 = vld [vmem:[%s2760_s7 + $0x78] sm:$0xff]  }
  0x27   : >> { %2273 = vmatpush3.bf16.msra.mxu1 %v2538_v31  ;;  %350 = vrot.lane.b32.xlu1 %v2540_v33, %s2588_s8  ;;  %v2874_v47 = vld [vmem:[%s2760_s7 + $0x70] sm:$0xff]   ;;  %v2881_v48 = vld [vmem:[%s2760_s7 + $0x68] sm:$0xff]   ;;  %v2888_v49 = vld [vmem:[%s2760_s7 + $0x60] sm:$0xff]  }
  0x28   : >> { %2274 = vmatprep.subr.bf16.mxu1 %v2539_v32  ;;  %v2554_v57 = vld [vmem:[%s3228_s1 + $0x18] sm:$0xff]   ;;  %v2900_v60 = vld [vmem:[%s3228_s1 + $0x20] sm:$0xff]   ;;  %v2908_v6 = vld [vmem:[%s3228_s1 + $0x28] sm:$0xff]  }
  0x29   : >> { %v2913_v20 = vld [vmem:[%s3228_s1 + $0x40] sm:$0xff]   ;;  %v2918_v22 = vld [vmem:[%s3228_s1 + $0x50] sm:$0xff]   ;;  %v2930_v26 = vld [vmem:[%s3228_s1 + $0x48] sm:$0xff]  }
  0x2a   : >> { %508 = vrot.lane.b32.xlu0 %v2537_v30, %s2589_s9  ;;  %v2935_v27 = vld [vmem:[%s3228_s1 + $0x58] sm:$0xff]   ;;  %v2942_v30 = vld [vmem:[%s3228_s1 + $0x60] sm:$0xff]   ;;  %v3297_v2 = vld [vmem:[#allocation3_spill] sm:$0xff] }
  0x2b   : >> { %2275 = vmatpush3.bf16.msra.mxu1 %v2539_v32  ;;  %506 = vrot.lane.b32.xlu1 %v2538_v31, %s2589_s9  ;;  %v2969_v31 = vld [vmem:[%s3228_s1 + $0x68] sm:$0xff]   ;;  %v3298_v1 = vld [vmem:[#allocation2_spill] sm:$0xff]  ;;  %v3299_v3 = vld [vmem:[#allocation4_spill] sm:$0xff] }
  0x2c   : >> { %2276 = vmatprep.subr.bf16.mxu1 %v2540_v33  ;;  %v3300_v4 = vld [vmem:[#allocation5_spill] sm:$0xff]  ;;  %vm2086_vm12 = vmpackc.low %vm201_vm11, %vm200_vm10 }
  0x2e   : >> { %504 = vrot.lane.b32.xlu0 %v2539_v32, %s2589_s9 }
  0x2f   : >> { %2277 = vmatpush3.bf16.msra.mxu1 %v2540_v33  ;;  %502 = vrot.lane.b32.xlu1 %v2540_v33, %s2589_s9  ;;  %v2979_v33 = vld [vmem:[%s3228_s1 + $0x70] sm:$0xff]  }
  0x30   : >> { %2294 = vmatprep.subr.bf16.mxu1 %v2781_v35 }
  0x32   : >> { %704 = vrot.lane.b32.xlu0 %v2781_v35, %s2588_s8  ;;  %2279 = vmatmul.mubr.msk.bf16.vlgmr.msra.gmra.mxu1 %vm362_vm5, %v2777_v34 }
  0x33   : >> { %2295 = vmatpush3.bf16.msra.mxu1 %v2781_v35  ;;  %2302 = vmatprep.mubr.msk.bf16.mxu1 %vm362_vm5, %v2789_v37 }
  0x34   : >> { %702 = vrot.lane.b32.xlu1 %v2793_v38, %s2588_s8  ;;  %2296 = vmatprep.subr.bf16.mxu1 %v2793_v38 }
  0x36   : >> { %700 = vrot.lane.b32.xlu0 %v2800_v39, %s2588_s8 }
  0x37   : >> { %2297 = vmatpush3.bf16.msra.mxu1 %v2793_v38 }
  0x38   : >> { %698 = vrot.lane.b32.xlu1 %v2810_v40, %s2588_s8  ;;  %2298 = vmatprep.subr.bf16.mxu1 %v2800_v39 }
  0x3a   : >> { %888 = vrot.lane.b32.xlu0 %v2781_v35, %s2589_s9 }
  0x3b   : >> { %2299 = vmatpush3.bf16.msra.mxu1 %v2800_v39 }
  0x3c   : >> { %886 = vrot.lane.b32.xlu1 %v2793_v38, %s2589_s9  ;;  %2300 = vmatprep.subr.bf16.mxu1 %v2810_v40 }
  0x3e   : >> { %884 = vrot.lane.b32.xlu0 %v2800_v39, %s2589_s9 }
  0x3f   : >> { %2301 = vmatpush3.bf16.msra.mxu1 %v2810_v40 }
  0x40   : >> { %882 = vrot.lane.b32.xlu1 %v2810_v40, %s2589_s9 }
  0x42   : >> { %1190 = vrot.lane.b32.xlu0 %v2828_v41, %s2588_s8  ;;  %2303 = vmatmul.mubr.msk.bf16.vlgmr.msra.gmra.mxu1 %vm362_vm5, %v2833_v42 }
  0x43   : >> { %2326 = vmatprep.mubr.msk.bf16.mxu1 %vm362_vm5, %v2553_v36 }
  0x44   : >> { %1188 = vrot.lane.b32.xlu1 %v2839_v43, %s2588_s8 }
  0x46   : >> { %1186 = vrot.lane.b32.xlu0 %v2844_v44, %s2588_s8 }
  0x48   : >> { %1184 = vrot.lane.b32.xlu1 %v2852_v45, %s2588_s8 }
  0x4a   : >> { %1329 = vrot.lane.b32.xlu0 %v2828_v41, %s2589_s9 }
  0x4c   : >> { %1327 = vrot.lane.b32.xlu1 %v2839_v43, %s2589_s9 }
  0x4e   : >> { %1325 = vrot.lane.b32.xlu0 %v2844_v44, %s2589_s9 }
  0x50   : >> { %1323 = vrot.lane.b32.xlu1 %v2852_v45, %s2589_s9 }
  0x52   : >> { %1542 = vrot.lane.b32.xlu0 %v2867_v46, %s2588_s8 }
  0x54   : >> { %1607 = vrot.lane.b32.xlu1 %v2867_v46, %s2589_s9 }
  0x56   : >> { %1540 = vrot.lane.b32.xlu0 %v2874_v47, %s2588_s8 }
  0x58   : >> { %1605 = vrot.lane.b32.xlu1 %v2874_v47, %s2589_s9 }
  0x5a   : >> { %1538 = vrot.lane.b32.xlu0 %v2881_v48, %s2588_s8 }
  0x5c   : >> { %1603 = vrot.lane.b32.xlu1 %v2881_v48, %s2589_s9 }
  0x5e   : >> { %1536 = vrot.lane.b32.xlu0 %v2888_v49, %s2588_s8 }
  0x60   : >> { %1601 = vrot.lane.b32.xlu1 %v2888_v49, %s2589_s9 }
  0x94   : >> { %v357_v50 = vpop.permute.xlu0 %356 }
  0x95   : >> { %2258 = vmatprep.subr.bf16.mxu0 %v357_v50  ;;  %v353_v51 = vpop.permute.xlu1 %352 }
  0x96   : >> { %2259 = vmatpush3.bf16.msra.mxu0 %v357_v50 }
  0x98   : >> { %v355_v52 = vpop.permute.xlu0 %354 }
  0x99   : >> { %2260 = vmatprep.subr.bf16.mxu0 %v355_v52  ;;  %v351_v53 = vpop.permute.xlu1 %350 }
  0x9a   : >> { %2261 = vmatpush3.bf16.msra.mxu0 %v355_v52  ;;  %v1709_v52 = vsel %vm1707_vm3, %v3282_v25, 0 }
  0x9b   : >> { %2262 = vmatprep.subr.bf16.mxu0 %v353_v51 }
  0x9c   : >> { %v509_v54 = vpop.permute.xlu0 %508 }
  0x9d   : >> { %v507_v55 = vpop.permute.xlu1 %506 }
  0x9e   : >> { %2263 = vmatpush3.bf16.msra.mxu0 %v353_v51 }
  0x9f   : >> { %2264 = vmatprep.subr.bf16.mxu0 %v351_v53 }
  0xa0   : >> { %v505_v56 = vpop.permute.xlu0 %504 }
  0xa1   : >> { %v503_v58 = vpop.permute.xlu1 %502 }
  0xa2   : >> { %2265 = vmatpush3.bf16.msra.mxu0 %v351_v53  ;;  %v1761_v53 = vsel %vm1707_vm3, %v3281_v28, 0 }
  0xa3   : >> { %2282 = vmatprep.subr.bf16.mxu0 %v509_v54 }
  0xa4   : >> { %v705_v59 = vpop.permute.xlu0 %704 }
  0xa5   : >> { %2267 = vmatmul.mubr.msk.bf16.vlgmr.msra.gmra.mxu0 %vm362_vm5, %v2554_v57  ;;  %2318 = vmatprep.subr.bf16.mxu1 %v705_v59 }
  0xa6   : >> { %2283 = vmatpush3.bf16.msra.mxu0 %v509_v54  ;;  %2319 = vmatpush3.bf16.msra.mxu1 %v705_v59  ;;  %v703_v61 = vpop.permute.xlu1 %702  ;;  %v2591_v54 = vmov 1.0|1.0  }
  0xa7   : >> { %2284 = vmatprep.subr.bf16.mxu0 %v507_v55  ;;  %2320 = vmatprep.subr.bf16.mxu1 %v703_v61 }
  0xa8   : >> { %v701_v62 = vpop.permute.xlu0 %700  ;;  %2290 = vmatprep.mubr.msk.bf16.mxu0 %vm362_vm5, %v2900_v60 }
  0xaa   : >> { %2285 = vmatpush3.bf16.msra.mxu0 %v507_v55  ;;  %2321 = vmatpush3.bf16.msra.mxu1 %v703_v61  ;;  %v699_v63 = vpop.permute.xlu1 %698 }
  0xab   : >> { %2286 = vmatprep.subr.bf16.mxu0 %v505_v56  ;;  %2322 = vmatprep.subr.bf16.mxu1 %v701_v62 }
  0xac   : >> { %v889_v0 = vpop.permute.xlu0 %888 }
  0xae   : >> { %2287 = vmatpush3.bf16.msra.mxu0 %v505_v56  ;;  %2323 = vmatpush3.bf16.msra.mxu1 %v701_v62  ;;  %v887_v19 = vpop.permute.xlu1 %886 }
  0xaf   : >> { %2288 = vmatprep.subr.bf16.mxu0 %v503_v58  ;;  %2324 = vmatprep.subr.bf16.mxu1 %v699_v63 }
  0xb0   : >> { %v885_v23 = vpop.permute.xlu0 %884 }
  0xb2   : >> { %2289 = vmatpush3.bf16.msra.mxu0 %v503_v58  ;;  %2325 = vmatpush3.bf16.msra.mxu1 %v699_v63  ;;  %v883_v24 = vpop.permute.xlu1 %882 }
  0xb3   : >> { %2306 = vmatprep.subr.bf16.mxu0 %v705_v59  ;;  %2342 = vmatprep.subr.bf16.mxu1 %v889_v0 }
  0xb5   : >> { %2291 = vmatmul.mubr.msk.bf16.vlgmr.msra.gmra.mxu0 %vm362_vm5, %v2908_v6  ;;  %2327 = vmatmul.mubr.msk.bf16.vlgmr.msra.gmra.mxu1 %vm362_vm5, %v2554_v57 }
  0xb6   : >> { %2307 = vmatpush3.bf16.msra.mxu0 %v705_v59  ;;  %2343 = vmatpush3.bf16.msra.mxu1 %v889_v0  ;;  %v2974_v32 = vpop.permute.xlu1 %1188 }
  0xb7   : >> { %2308 = vmatprep.subr.bf16.mxu0 %v703_v61  ;;  %2344 = vmatprep.subr.bf16.mxu1 %v887_v19 }
  0xb8   : >> { %2314 = vmatprep.mubr.msk.bf16.mxu0 %vm362_vm5, %v2913_v20  ;;  %2350 = vmatprep.mubr.msk.bf16.mxu1 %vm362_vm5, %v2918_v22 }
  0xba   : >> { %2309 = vmatpush3.bf16.msra.mxu0 %v703_v61  ;;  %2345 = vmatpush3.bf16.msra.mxu1 %v887_v19 }
  0xbb   : >> { %2310 = vmatprep.subr.bf16.mxu0 %v701_v62  ;;  %2346 = vmatprep.subr.bf16.mxu1 %v885_v23 }
  0xbe   : >> { %2311 = vmatpush3.bf16.msra.mxu0 %v701_v62  ;;  %2347 = vmatpush3.bf16.msra.mxu1 %v885_v23 }
  0xbf   : >> { %2312 = vmatprep.subr.bf16.mxu0 %v699_v63  ;;  %2348 = vmatprep.subr.bf16.mxu1 %v883_v24 }
  0xc2   : >> { %2313 = vmatpush3.bf16.msra.mxu0 %v699_v63  ;;  %2349 = vmatpush3.bf16.msra.mxu1 %v883_v24 }
  0xc3   : >> { %2330 = vmatprep.subr.bf16.mxu0 %v2781_v35  ;;  %2366 = vmatprep.subr.bf16.mxu1 %v2828_v41 }
  0xc5   : >> { %2315 = vmatmul.mubr.msk.bf16.vlgmr.msra.gmra.mxu0 %vm362_vm5, %v2930_v26  ;;  %2351 = vmatmul.mubr.msk.bf16.vlgmr.msra.gmra.mxu1 %vm362_vm5, %v2935_v27 }
  0xc6   : >> { %2331 = vmatpush3.bf16.msra.mxu0 %v2781_v35  ;;  %2367 = vmatpush3.bf16.msra.mxu1 %v2828_v41 }
  0xc7   : >> { %2332 = vmatprep.subr.bf16.mxu0 %v2793_v38  ;;  %2368 = vmatprep.subr.bf16.mxu1 %v2839_v43 }
  0xc8   : >> { %2338 = vmatprep.mubr.msk.bf16.mxu0 %vm362_vm5, %v2756_v29  ;;  %2374 = vmatprep.mubr.msk.bf16.mxu1 %vm362_vm5, %v2942_v30  ;;  %v2964_v29 = vpop.permute.xlu0 %1190 }
  0xca   : >> { %2333 = vmatpush3.bf16.msra.mxu0 %v2793_v38  ;;  %2369 = vmatpush3.bf16.msra.mxu1 %v2839_v43  ;;  %v2995_v38 = vld [vmem:[%s3228_s1 + $0x78] sm:$0xff]  }
  0xcb   : >> { %2334 = vmatprep.subr.bf16.mxu0 %v2800_v39  ;;  %2370 = vmatprep.subr.bf16.mxu1 %v2844_v44 }
  0xcc   : >> { %v1187_v35 = vpop.permute.xlu0 %1186 }
  0xce   : >> { %2335 = vmatpush3.bf16.msra.mxu0 %v2800_v39  ;;  %2371 = vmatpush3.bf16.msra.mxu1 %v2844_v44 }
  0xcf   : >> { %2336 = vmatprep.subr.bf16.mxu0 %v2810_v40  ;;  %2372 = vmatprep.subr.bf16.mxu1 %v2852_v45 }
  0xd0   : >> { %v1330_v36 = vpop.permute.xlu0 %1329 }
  0xd2   : >> { %2337 = vmatpush3.bf16.msra.mxu0 %v2810_v40  ;;  %2373 = vmatpush3.bf16.msra.mxu1 %v2852_v45  ;;  %v2569_v40 = vld [vmem:[%s3228_s1 + $0x80] sm:$0xff]  }
  0xd3   : >> { %2354 = vmatprep.subr.bf16.mxu0 %v889_v0  ;;  %2390 = vmatprep.subr.bf16.mxu1 %v2964_v29 }
  0xd4   : >> { %v1326_v50 = vpop.permute.xlu0 %1325 }
  0xd5   : >> { %2339 = vmatmul.mubr.msk.bf16.vlgmr.msra.gmra.mxu0 %vm362_vm5, %v2777_v34  ;;  %2375 = vmatmul.mubr.msk.bf16.vlgmr.msra.gmra.mxu1 %vm362_vm5, %v2969_v31  ;;  %v1185_v34 = vpop.permute.xlu1 %1184 }
  0xd6   : >> { %2355 = vmatpush3.bf16.msra.mxu0 %v889_v0  ;;  %2391 = vmatpush3.bf16.msra.mxu1 %v2964_v29 }
  0xd7   : >> { %2356 = vmatprep.subr.bf16.mxu0 %v887_v19  ;;  %2392 = vmatprep.subr.bf16.mxu1 %v2974_v32 }
  0xd8   : >> { %2362 = vmatprep.mubr.msk.bf16.mxu0 %vm362_vm5, %v2900_v60  ;;  %2398 = vmatprep.mubr.msk.bf16.mxu1 %vm362_vm5, %v2979_v33 }
  0xd9   : >> { %v2998_v39 = vpop.permute.xlu1 %1327 }
  0xda   : >> { %2357 = vmatpush3.bf16.msra.mxu0 %v887_v19  ;;  %2393 = vmatpush3.bf16.msra.mxu1 %v2974_v32 }
  0xdb   : >> { %2358 = vmatprep.subr.bf16.mxu0 %v885_v23  ;;  %2394 = vmatprep.subr.bf16.mxu1 %v1187_v35 }
  0xdd   : >> { %v1324_v51 = vpop.permute.xlu1 %1323 }
  0xde   : >> { %2359 = vmatpush3.bf16.msra.mxu0 %v885_v23  ;;  %2395 = vmatpush3.bf16.msra.mxu1 %v1187_v35 }
  0xdf   : >> { %2360 = vmatprep.subr.bf16.mxu0 %v883_v24  ;;  %2396 = vmatprep.subr.bf16.mxu1 %v1185_v34 }
  0xe2   : >> { %2361 = vmatpush3.bf16.msra.mxu0 %v883_v24  ;;  %2397 = vmatpush3.bf16.msra.mxu1 %v1185_v34 }
  0xe3   : >> { %2378 = vmatprep.subr.bf16.mxu0 %v2828_v41  ;;  %2414 = vmatprep.subr.bf16.mxu1 %v1330_v36 }
  0xe5   : >> { %2363 = vmatmul.mubr.msk.bf16.vlgmr.msra.gmra.mxu0 %vm362_vm5, %v2908_v6  ;;  %2399 = vmatmul.mubr.msk.bf16.vlgmr.msra.gmra.mxu1 %vm362_vm5, %v2995_v38 }
  0xe6   : >> { %2379 = vmatpush3.bf16.msra.mxu0 %v2828_v41  ;;  %2415 = vmatpush3.bf16.msra.mxu1 %v1330_v36  ;;  %v2590_v41 = vmov 0  }
  0xe7   : >> { %2380 = vmatprep.subr.bf16.mxu0 %v2839_v43  ;;  %2416 = vmatprep.subr.bf16.mxu1 %v2998_v39 }
  0xe8   : >> { %2386 = vmatprep.mubr.msk.bf16.mxu0 %vm362_vm5, %v2789_v37  ;;  %2422 = vmatprep.mubr.msk.bf16.mxu1 %vm362_vm5, %v2569_v40  ;;  %v2570_v37 = vld [vmem:[%s3228_s1 + $0x88] sm:$0xff]  }
  0xe9   : >> { %2536 = vset.pattern.permute.xlu1 %v2590_v41  ;;  %2535 = vset.pattern.permute.xlu0 %v2590_v41 }
  0xea   : >> { %2381 = vmatpush3.bf16.msra.mxu0 %v2839_v43  ;;  %2417 = vmatpush3.bf16.msra.mxu1 %v2998_v39 }
  0xeb   : >> { %2382 = vmatprep.subr.bf16.mxu0 %v2844_v44  ;;  %2418 = vmatprep.subr.bf16.mxu1 %v1326_v50 }
  0xec   : >> { %1677 = vperm.xlu1 %2536, %v3297_v2   ;;  %1672 = vperm.xlu0 %2535, %v3298_v1  }
  0xee   : >> { %2383 = vmatpush3.bf16.msra.mxu0 %v2844_v44  ;;  %2419 = vmatpush3.bf16.msra.mxu1 %v1326_v50 }
  0xef   : >> { %2384 = vmatprep.subr.bf16.mxu0 %v2852_v45  ;;  %2420 = vmatprep.subr.bf16.mxu1 %v1324_v51 }
  0xf0   : >> { %1682 = vperm.xlu1 %2536, %v3299_v3   ;;  %1687 = vperm.xlu0 %2535, %v3300_v4  }
  0xf2   : >> { %2385 = vmatpush3.bf16.msra.mxu0 %v2852_v45  ;;  %2421 = vmatpush3.bf16.msra.mxu1 %v1324_v51  ;;  %v1543_v45 = vpop.permute.xlu0 %1542  ;;  %v3113_v55 = vpop.f32.mrf.mxu1 }
  0xf3   : >> { %2402 = vmatprep.subr.bf16.mxu0 %v2964_v29  ;;  %2438 = vmatprep.subr.bf16.mxu1 %v2867_v46 }
  0xf4   : >> { %v3127_v56 = vpop.f32.mrf.mxu1 }
  0xf5   : >> { %2387 = vmatmul.mubr.msk.bf16.vlgmr.msra.gmra.mxu0 %vm362_vm5, %v2833_v42  ;;  %2423 = vmatmul.mubr.msk.bf16.vlgmr.msra.gmra.mxu1 %vm362_vm5, %v2570_v37  ;;  %v1608_v42 = vpop.permute.xlu1 %1607 }
  0xf6   : >> { %2403 = vmatpush3.bf16.msra.mxu0 %v2964_v29  ;;  %2439 = vmatpush3.bf16.msra.mxu1 %v2867_v46  ;;  %v2281_v58 = vpop.f32.mrf.mxu1 }
  0xf7   : >> { %2404 = vmatprep.subr.bf16.mxu0 %v2974_v32  ;;  %2410 = vmatprep.mubr.msk.bf16.mxu0 %vm362_vm5, %v2913_v20 }
  0xf8   : >> { %2440 = vmatprep.subr.bf16.mxu1 %v2874_v47  ;;  %2446 = vmatprep.mubr.msk.bf16.mxu1 %vm362_vm5, %v2942_v30  ;;  %v475_v60 = vpop.f32.mrf.mxu1 }
  0xf9   : >> { %v1606_v43 = vpop.permute.xlu1 %1605 }
  0xfa   : >> { %2405 = vmatpush3.bf16.msra.mxu0 %v2974_v32  ;;  %2441 = vmatpush3.bf16.msra.mxu1 %v2874_v47  ;;  %v1541_v47 = vpop.permute.xlu0 %1540 }
  0xfb   : >> { %2406 = vmatprep.subr.bf16.mxu0 %v1187_v35  ;;  %2442 = vmatprep.subr.bf16.mxu1 %v2881_v48 }
  0xfd   : >> { %v1604_v44 = vpop.permute.xlu1 %1603 }
  0xfe   : >> { %2407 = vmatpush3.bf16.msra.mxu0 %v1187_v35  ;;  %2443 = vmatpush3.bf16.msra.mxu1 %v2881_v48  ;;  %v1539_v48 = vpop.permute.xlu0 %1538 }
  0xff   : >> { %2408 = vmatprep.subr.bf16.mxu0 %v1185_v34  ;;  %2444 = vmatprep.subr.bf16.mxu1 %v2888_v49 }
 0x101   : >> { %v1602_v46 = vpop.permute.xlu1 %1601 }
 0x102   : >> { %2409 = vmatpush3.bf16.msra.mxu0 %v1185_v34  ;;  %2445 = vmatpush3.bf16.msra.mxu1 %v2888_v49  ;;  %v1537_v49 = vpop.permute.xlu0 %1536  ;;  %v3143_v62 = vpop.f32.mrf.mxu1 }
 0x103   : >> { %2426 = vmatprep.subr.bf16.mxu0 %v1330_v36  ;;  %2462 = vmatprep.subr.bf16.mxu1 %v1608_v42 }
 0x104   : >> { %v3145_v0 = vpop.f32.mrf.mxu1 }
 0x105   : >> { %2411 = vmatmul.mubr.msk.bf16.vlgmr.msra.gmra.mxu0 %vm362_vm5, %v2930_v26  ;;  %2447 = vmatmul.mubr.msk.bf16.vlgmr.msra.gmra.mxu1 %vm362_vm5, %v2969_v31 }
 0x106   : >> { %2427 = vmatpush3.bf16.msra.mxu0 %v1330_v36  ;;  %2463 = vmatpush3.bf16.msra.mxu1 %v1608_v42  ;;  %v3147_v19 = vpop.f32.mrf.mxu1 }
 0x107   : >> { %2428 = vmatprep.subr.bf16.mxu0 %v2998_v39  ;;  %2434 = vmatprep.mubr.msk.bf16.mxu0 %vm362_vm5, %v2918_v22 }
 0x108   : >> { %2464 = vmatprep.subr.bf16.mxu1 %v1606_v43  ;;  %2470 = vmatprep.mubr.msk.bf16.mxu1 %vm362_vm5, %v2569_v40  ;;  %v3149_v22 = vpop.f32.mrf.mxu1 }
 0x10a   : >> { %2429 = vmatpush3.bf16.msra.mxu0 %v2998_v39  ;;  %2465 = vmatpush3.bf16.msra.mxu1 %v1606_v43 }
 0x10b   : >> { %2430 = vmatprep.subr.bf16.mxu0 %v1326_v50  ;;  %2466 = vmatprep.subr.bf16.mxu1 %v1604_v44 }
 0x10e   : >> { %2431 = vmatpush3.bf16.msra.mxu0 %v1326_v50  ;;  %2467 = vmatpush3.bf16.msra.mxu1 %v1604_v44 }
 0x10f   : >> { %2432 = vmatprep.subr.bf16.mxu0 %v1324_v51  ;;  %2468 = vmatprep.subr.bf16.mxu1 %v1602_v46 }
 0x112   : >> { %2433 = vmatpush3.bf16.msra.mxu0 %v1324_v51  ;;  %2469 = vmatpush3.bf16.msra.mxu1 %v1602_v46 }
 0x113   : >> { %2450 = vmatprep.subr.bf16.mxu0 %v1543_v45  ;;  %2511 = vmatprep.subr.msk.bf16.mxu1 %vm1707_vm3, %v3281_v28 }
 0x115   : >> { %2435 = vmatmul.mubr.msk.bf16.vlgmr.msra.gmra.mxu0 %vm362_vm5, %v2935_v27  ;;  %2471 = vmatmul.mubr.msk.bf16.vlgmr.msra.gmra.mxu1 %vm362_vm5, %v2570_v37 }
 0x116   : >> { %2451 = vmatpush3.bf16.msra.mxu0 %v1543_v45  ;;  %2458 = vmatprep.mubr.msk.bf16.mxu0 %vm362_vm5, %v2979_v33 }
 0x117   : >> { %2452 = vmatprep.subr.bf16.mxu0 %v1541_v47  ;;  %2493 = vmatpush3.bf16.msra.mxu1 %v1761_v53 }
 0x11a   : >> { %2453 = vmatpush3.bf16.msra.mxu0 %v1541_v47 }
 0x11b   : >> { %2454 = vmatprep.subr.bf16.mxu0 %v1539_v48 }
 0x11e   : >> { %2455 = vmatpush3.bf16.msra.mxu0 %v1539_v48 }
 0x11f   : >> { %2456 = vmatprep.subr.bf16.mxu0 %v1537_v49 }
 0x122   : >> { %2457 = vmatpush3.bf16.msra.mxu0 %v1537_v49 }
 0x123   : >> { %2510 = vmatprep.subr.msk.bf16.mxu0 %vm1707_vm3, %v3282_v25  ;;  %vm2088_vm3 = vmpackc.low %vm199_vm9, %vm198_vm8 }
 0x125   : >> { %2459 = vmatmul.mubr.msk.bf16.vlgmr.msra.gmra.mxu0 %vm362_vm5, %v2995_v38  ;;  %vm2100_vm5 = vmpackc.low %vm3302_vm2, %vm3301_vm0  ;;  %vm3309_vm2 = vcmp.eq.s32.totalorder %v3291_v11, %v3283_v21 }
 0x126   : >> { %2475 = vmatpush3.bf16.msra.mxu0 %v1709_v52  ;;  %2494 = vmatprep.subr.msk.bf16.mxu1 %vm2100_vm5, %v2591_v54  ;;  %vm2102_vm0 = vmpackc.low %vm3303_vm1, %vm248_vm15  ;;  %vm3308_vm1 = vcmp.eq.s32.totalorder %v3292_v10, %v3283_v21 }
 0x127   : >> { %2476 = vmatprep.subr.msk.bf16.mxu0 %vm2086_vm12, %v2591_v54  ;;  %2495 = vmatpush3.bf16.msk.msra.mxu1 %vm2100_vm5, %v2591_v54  ;;  %vm2104_vm5 = vmpackc.low %vm247_vm14, %vm246_vm13 }
 0x128   : >> { %2496 = vmatprep.subr.msk.bf16.mxu1 %vm2102_vm0, %v2591_v54 }
 0x12a   : >> { %2477 = vmatpush3.bf16.msk.msra.mxu0 %vm2086_vm12, %v2591_v54  ;;  %vm2090_vm12 = vmpackc.low %vm3305_vm7, %vm3304_vm6  ;;  %vm3313_vm7 = vcmp.eq.s32.totalorder %v3293_v9, %v3283_v21 }
 0x12b   : >> { %2478 = vmatprep.subr.msk.bf16.mxu0 %vm2088_vm3, %v2591_v54  ;;  %2497 = vmatpush3.bf16.msk.msra.mxu1 %vm2102_vm0, %v2591_v54  ;;  %vm3307_vm0 = vcmp.eq.s32.totalorder %v3291_v11, %v3284_v18  ;;  %vm2106_vm6 = vmpackc.low %vm3309_vm2, %vm3308_vm1  ;;  %vm3314_vm2 = vcmp.eq.s32.totalorder %v3296_v5, %v3284_v18 }
 0x12c   : >> { %2498 = vmatprep.subr.msk.bf16.mxu1 %vm2104_vm5, %v2591_v54 }
 0x12e   : >> { %2479 = vmatpush3.bf16.msk.msra.mxu0 %vm2088_vm3, %v2591_v54  ;;  %vm2092_vm3 = vmpackc.low %vm3307_vm0, %vm3306_vm4  ;;  %vm3312_vm4 = vcmp.eq.s32.totalorder %v3294_v8, %v3283_v21 }
 0x12f   : >> { %2480 = vmatprep.subr.msk.bf16.mxu0 %vm2090_vm12, %v2591_v54  ;;  %2499 = vmatpush3.bf16.msk.msra.mxu1 %vm2104_vm5, %v2591_v54  ;;  %vm3311_vm5 = vcmp.eq.s32.totalorder %v3293_v9, %v3284_v18  ;;  %vm2108_vm1 = vmpackc.low %vm3313_vm7, %vm3312_vm4  ;;  %vm3317_vm4 = vcmp.eq.s32.totalorder %v3295_v7, %v3283_v21 }
 0x130   : >> { %2500 = vmatprep.subr.msk.bf16.mxu1 %vm2106_vm6, %v2591_v54 }
 0x132   : >> { %2481 = vmatpush3.bf16.msk.msra.mxu0 %vm2090_vm12, %v2591_v54  ;;  %vm3310_vm12 = vcmp.eq.s32.totalorder %v3294_v8, %v3284_v18 }
 0x133   : >> { %2482 = vmatprep.subr.msk.bf16.mxu0 %vm2092_vm3, %v2591_v54  ;;  %2501 = vmatpush3.bf16.msk.msra.mxu1 %vm2106_vm6, %v2591_v54  ;;  %vm2094_vm0 = vmpackc.low %vm3311_vm5, %vm3310_vm12  ;;  %vm3315_vm6 = vcmp.eq.s32.totalorder %v3295_v7, %v3284_v18  ;;  %vm3316_vm12 = vcmp.eq.s32.totalorder %v3296_v5, %v3283_v21  ;;  %vm1700_vm5 = vcmask 883712  }
 0x134   : >> { %2502 = vmatprep.subr.msk.bf16.mxu1 %vm2108_vm1, %v2591_v54  ;;  %vm2110_vm7 = vmpackc.low %vm3317_vm4, %vm3316_vm12 }
 0x136   : >> { %2483 = vmatpush3.bf16.msk.msra.mxu0 %vm2092_vm3, %v2591_v54  ;;  %vm2096_vm3 = vmpackc.low %vm3315_vm6, %vm3314_vm2 }
 0x137   : >> { %2484 = vmatprep.subr.msk.bf16.mxu0 %vm2094_vm0, %v2591_v54  ;;  %2503 = vmatpush3.bf16.msk.msra.mxu1 %vm2108_vm1, %v2591_v54 }
 0x138   : >> { %2504 = vmatprep.subr.msk.bf16.mxu1 %vm2110_vm7, %v2591_v54 }
 0x13a   : >> { %2485 = vmatpush3.bf16.msk.msra.mxu0 %vm2094_vm0, %v2591_v54  ;;  %vm1835_vm0 = vcmask 437248  }
 0x13b   : >> { %2486 = vmatprep.subr.msk.bf16.mxu0 %vm2096_vm3, %v2591_v54  ;;  %2505 = vmatpush3.bf16.msk.msra.mxu1 %vm2110_vm7, %v2591_v54 }
 0x13e   : >> { %2487 = vmatpush3.bf16.msk.msra.mxu0 %vm2096_vm3, %v2591_v54 }
 0x165   : >> { %v3135_v57 = vpop.f32.mrf.mxu0 }
 0x166   : >> { %v481_v21 = vadd.f32 %v3113_v55, %v3135_v57 }
 0x167   : >> { %v403_v59 = vpop.f32.mrf.mxu0 }
 0x168   : >> { %v473_v15 = vadd.f32 %v3127_v56, %v403_v59 }
 0x169   : >> { %v2269_v61 = vpop.f32.mrf.mxu0 }
 0x16a   : >> { %v484_v25 = vadd.f32 %v2281_v58, %v2269_v61 }
 0x16b   : >> { %v406_v63 = vpop.f32.mrf.mxu0 }
 0x175   : >> { %v2292_v6 = vpop.f32.mrf.mxu0  ;;  %v2328_v24 = vpop.f32.mrf.mxu1 }
 0x177   : >> { %v554_v20 = vpop.f32.mrf.mxu0  ;;  %v803_v27 = vpop.f32.mrf.mxu1 }
 0x178   : >> { %v569_v28 = vadd.f32 %v554_v20, %v473_v15 }
 0x179   : >> { %v2293_v23 = vpop.f32.mrf.mxu0  ;;  %v2329_v29 = vpop.f32.mrf.mxu1 }
 0x17a   : >> { %v679_v56 = vadd.f32 %v3145_v0, %v569_v28 }
 0x17b   : >> { %v557_v26 = vpop.f32.mrf.mxu0  ;;  %v806_v32 = vpop.f32.mrf.mxu1 }
 0x185   : >> { %v3151_v30 = vpop.f32.mrf.mxu0  ;;  %v3155_v35 = vpop.f32.mrf.mxu1 }
 0x187   : >> { %v750_v31 = vpop.f32.mrf.mxu0  ;;  %v3159_v36 = vpop.f32.mrf.mxu1 }
 0x188   : >> { %v765_v15 = vadd.f32 %v750_v31, %v679_v56 }
 0x189   : >> { %v3153_v33 = vpop.f32.mrf.mxu0  ;;  %v3161_v39 = vpop.f32.mrf.mxu1 }
 0x18a   : >> { %v949_v0 = vadd.f32 %v3159_v36, %v765_v15  ;;  %v1678_v36 = vpop.permute.xlu1 %1677 }
 0x18b   : >> { %v3157_v34 = vpop.f32.mrf.mxu0  ;;  %v3163_v50 = vpop.f32.mrf.mxu1 }
 0x18c   : >> { %3318 = vst [vmem:[#allocation22_spill] sm:$0xff] %v3163_v50 }
 0x195   : >> { %v2340_v38 = vpop.f32.mrf.mxu0  ;;  %v3165_v41 = vpop.f32.mrf.mxu1 }
 0x196   : >> { %3319 = vst [vmem:[#allocation23_spill] sm:$0xff] %v3165_v41  ;;  %v861_v18 = vadd.f32 %v2340_v38, %v2328_v24 }
 0x197   : >> { %v852_v40 = vpop.f32.mrf.mxu0  ;;  %v3167_v42 = vpop.f32.mrf.mxu1 }
 0x199   : >> { %v2341_v51 = vpop.f32.mrf.mxu0  ;;  %v3169_v44 = vpop.f32.mrf.mxu1 }
 0x19a   : >> { %3320 = vst [vmem:[#allocation24_spill] sm:$0xff] %v3169_v44 }
 0x19b   : >> { %v855_v37 = vpop.f32.mrf.mxu0  ;;  %v3171_v46 = vpop.f32.mrf.mxu1 }
 0x19c   : >> { %3321 = vst [vmem:[#allocation25_spill] sm:$0xff] %v3171_v46  ;;  %v864_v46 = vadd.f32 %v2341_v51, %v2329_v29  ;;  %v856_v59 = vadd.f32 %v855_v37, %v806_v32 }
 0x1a1   : >> { %v3332_v31 = vld [vmem:[#allocation24_spill] sm:$0xff] }
 0x1a5   : >> { %v2364_v43 = vpop.f32.mrf.mxu0  ;;  %v3173_v48 = vpop.f32.mrf.mxu1 }
 0x1a6   : >> { %3322 = vst [vmem:[#allocation26_spill] sm:$0xff] %v3173_v48 }
 0x1a7   : >> { %v987_v45 = vpop.f32.mrf.mxu0  ;;  %v3175_v52 = vpop.f32.mrf.mxu1 }
 0x1a8   : >> { %3323 = vst [vmem:[#allocation27_spill] sm:$0xff] %v3175_v52 }
 0x1a9   : >> { %v2365_v47 = vpop.f32.mrf.mxu0  ;;  %v3177_v54 = vpop.f32.mrf.mxu1 }
 0x1aa   : >> { %3324 = vst [vmem:[#allocation28_spill] sm:$0xff] %v3177_v54  ;;  %v572_v54 = vadd.f32 %v2293_v23, %v484_v25  ;;  %v1005_v24 = vadd.f32 %v2365_v47, %v864_v46 }
 0x1ab   : >> { %v990_v49 = vpop.f32.mrf.mxu0  ;;  %v3179_v2 = vpop.f32.mrf.mxu1 }
 0x1ac   : >> { %3325 = vst [vmem:[#allocation29_spill] sm:$0xff] %v3179_v2  ;;  %v1004_v2 = vadd.f32 %v2364_v43, %v861_v18  ;;  %v682_v18 = vadd.f32 %v3147_v19, %v572_v54  ;;  %v1003_v25 = vadd.f32 %v990_v49, %v856_v59 }
 0x1ad   : >> { %v3335_v51 = vld [vmem:[#allocation26_spill] sm:$0xff] }
 0x1b1   : >> { %v3336_v37 = vld [vmem:[#allocation28_spill] sm:$0xff] }
 0x1b5   : >> { %v2388_v53 = vpop.f32.mrf.mxu0  ;;  %v3181_v4 = vpop.f32.mrf.mxu1 }
 0x1b6   : >> { %3326 = vst [vmem:[#allocation30_spill] sm:$0xff] %v3181_v4  ;;  %v853_v4 = vadd.f32 %v852_v40, %v803_v27  ;;  %v1167_v44 = vadd.f32 %v2388_v53, %v1004_v2  ;;  %v3334_v40 = vld [vmem:[#allocation25_spill] sm:$0xff] }
 0x1b7   : >> { %v1150_v1 = vpop.f32.mrf.mxu0  ;;  %v3183_v7 = vpop.f32.mrf.mxu1  ;;  %v3338_v53 = vld [vmem:[#allocation29_spill] sm:$0xff] }
 0x1b8   : >> { %3327 = vst [vmem:[#allocation31_spill] sm:$0xff] %v3183_v7  ;;  %v476_v7 = vadd.f32 %v475_v60, %v406_v63  ;;  %v1002_v52 = vadd.f32 %v987_v45, %v853_v4  ;;  %v768_v4 = vadd.f32 %v3153_v33, %v682_v18  ;;  %v1673_v33 = vpop.permute.xlu0 %1672 }
 0x1b9   : >> { %v2389_v3 = vpop.f32.mrf.mxu0  ;;  %v3185_v9 = vpop.f32.mrf.mxu1 }
 0x1ba   : >> { %3328 = vst [vmem:[#allocation32_spill] sm:$0xff] %v3185_v9  ;;  %v571_v9 = vadd.f32 %v2292_v6, %v481_v21  ;;  %v570_v41 = vadd.f32 %v557_v26, %v476_v7  ;;  %v1165_v38 = vadd.f32 %v1150_v1, %v1002_v52  ;;  %v1168_v58 = vadd.f32 %v2389_v3, %v1005_v24 }
 0x1bb   : >> { %v1153_v5 = vpop.f32.mrf.mxu0  ;;  %v3187_v11 = vpop.f32.mrf.mxu1 }
 0x1bc   : >> { %3329 = vst [vmem:[#allocation33_spill] sm:$0xff] %v3187_v11  ;;  %v681_v55 = vadd.f32 %v3143_v62, %v571_v9  ;;  %v680_v7 = vadd.f32 %v3149_v22, %v570_v41  ;;  %v1166_v1 = vadd.f32 %v1153_v5, %v1003_v25  ;;  %v1112_v22 = vadd.f32 %v3167_v42, %v949_v0 }
 0x1bd   : >> { %v3339_v56 = vld [vmem:[#allocation30_spill] sm:$0xff] }
 0x1be   : >> { %v767_v2 = vadd.f32 %v3151_v30, %v681_v55  ;;  %v766_v9 = vadd.f32 %v3157_v34, %v680_v7  ;;  %v3331_v30 = vld [vmem:[#allocation23_spill] sm:$0xff] }
 0x1bf   : >> { %v3337_v45 = vld [vmem:[#allocation31_spill] sm:$0xff] }
 0x1c5   : >> { %v2412_v8 = vpop.f32.mrf.mxu0  ;;  %v2448_v13 = vpop.f32.mrf.mxu1 }
 0x1c6   : >> { %v1306_v50 = vadd.f32 %v2412_v8, %v1167_v44 }
 0x1c7   : >> { %v1289_v10 = vpop.f32.mrf.mxu0  ;;  %v1517_v16 = vpop.f32.mrf.mxu1 }
 0x1c8   : >> { %v1304_v60 = vadd.f32 %v1289_v10, %v1165_v38  ;;  %v951_v10 = vadd.f32 %v3155_v35, %v767_v2 }
 0x1c9   : >> { %v2413_v12 = vpop.f32.mrf.mxu0  ;;  %v2449_v48 = vpop.f32.mrf.mxu1 }
 0x1ca   : >> { %v1307_v8 = vadd.f32 %v2413_v12, %v1168_v58  ;;  %v1114_v29 = vadd.f32 %v3331_v30, %v951_v10  ;;  %v1688_v58 = vpop.permute.xlu0 %1687 }
 0x1cb   : >> { %v1292_v14 = vpop.f32.mrf.mxu0  ;;  %v1520_v57 = vpop.f32.mrf.mxu1 }
 0x1cc   : >> { %v1305_v6 = vadd.f32 %v1292_v14, %v1166_v1  ;;  %v1253_v41 = vadd.f32 %v3335_v51, %v1114_v29 }
 0x1ce   : >> { %v1392_v59 = vadd.f32 %v3339_v56, %v1253_v41 }
 0x1d5   : >> { %v2436_v17 = vpop.f32.mrf.mxu0  ;;  %v2472_v28 = vpop.f32.mrf.mxu1 }
 0x1d6   : >> { %v1445_v61 = vadd.f32 %v2436_v17, %v1306_v50  ;;  %v952_v17 = vadd.f32 %v3161_v39, %v768_v4  ;;  %v1683_v4 = vpop.permute.xlu1 %1682 }
 0x1d7   : >> { %v1428_v11 = vpop.f32.mrf.mxu0  ;;  %v1647_v20 = vpop.f32.mrf.mxu1 }
 0x1d8   : >> { %v1443_v63 = vadd.f32 %v1428_v11, %v1304_v60  ;;  %v1534_v3 = vadd.f32 %v2448_v13, %v1445_v61  ;;  %v3330_v11 = vld [vmem:[#allocation22_spill] sm:$0xff]  ;;  %v1115_v32 = vadd.f32 %v3332_v31, %v952_v17  ;;  %v3333_v13 = vld [vmem:[#allocation27_spill] sm:$0xff]  ;;  %v3341_v60 = vld [vmem:[#allocation33_spill] sm:$0xff] }
 0x1d9   : >> { %v2437_v21 = vpop.f32.mrf.mxu0  ;;  %v950_v27 = vadd.f32 %v3330_v11, %v766_v9  ;;  %v1251_v34 = vadd.f32 %v3333_v13, %v1112_v22  ;;  %v2473_v43 = vpop.f32.mrf.mxu1 }
 0x1da   : >> { %v1446_v19 = vadd.f32 %v2437_v21, %v1307_v8  ;;  %v1532_v12 = vadd.f32 %v1517_v16, %v1443_v63  ;;  %v1254_v42 = vadd.f32 %v3336_v37, %v1115_v32 }
 0x1db   : >> { %v1431_v62 = vpop.f32.mrf.mxu0  ;;  %v1113_v50 = vadd.f32 %v3334_v40, %v950_v27  ;;  %v1390_v46 = vadd.f32 %v3337_v45, %v1251_v34  ;;  %v1650_v21 = vpop.f32.mrf.mxu1 }
 0x1dc   : >> { %v1444_v26 = vadd.f32 %v1431_v62, %v1305_v6  ;;  %v1535_v39 = vadd.f32 %v2449_v48, %v1446_v19  ;;  %v3340_v48 = vld [vmem:[#allocation32_spill] sm:$0xff] }
 0x1dd   : >> { %v1252_v54 = vadd.f32 %v3338_v53, %v1113_v50  ;;  %v1393_v38 = vadd.f32 %v3340_v48, %v1254_v42 }
 0x1de   : >> { %v1533_v52 = vadd.f32 %v1520_v57, %v1444_v26 }
 0x1df   : >> { %v1391_v61 = vadd.f32 %v3341_v60, %v1252_v54 }
 0x1e5   : >> { %v2460_v23 = vpop.f32.mrf.mxu0 }
 0x1e6   : >> { %v1599_v5 = vadd.f32 %v2460_v23, %v1534_v3 }
 0x1e7   : >> { %v1582_v14 = vpop.f32.mrf.mxu0 }
 0x1e8   : >> { %v1597_v35 = vadd.f32 %v1582_v14, %v1532_v12  ;;  %v1664_v16 = vadd.f32 %v2472_v28, %v1599_v5 }
 0x1e9   : >> { %v2461_v44 = vpop.f32.mrf.mxu0 }
 0x1ea   : >> { %v1662_v47 = vadd.f32 %v1647_v20, %v1597_v35  ;;  %v1600_v49 = vadd.f32 %v2461_v44, %v1535_v39  ;;  %v1668_v25 = vmax.f32 %v1392_v59, %v1664_v16 }
 0x1eb   : >> { %v1585_v24 = vpop.f32.mrf.mxu0 }
 0x1ec   : >> { %v1665_v55 = vadd.f32 %v2473_v43, %v1600_v49  ;;  %v1666_v15 = vmax.f32 %v1390_v46, %v1662_v47  ;;  %v1598_v18 = vadd.f32 %v1585_v24, %v1533_v52  ;;  %v1692_v8 = vadd.f32 %v1683_v4, %v1668_v25 }
 0x1ee   : >> { %v1663_v2 = vadd.f32 %v1650_v21, %v1598_v18  ;;  %v1669_v7 = vmax.f32 %v1393_v38, %v1665_v55  ;;  %v1690_v28 = vadd.f32 %v1673_v33, %v1666_v15  ;;  %v1696_v6 = vmax.f32 %v1692_v8, 0.0 }
 0x1f0   : >> { %v1667_v57 = vmax.f32 %v1391_v61, %v1663_v2  ;;  %v1693_v1 = vadd.f32 %v1688_v58, %v1669_v7  ;;  %v1694_v62 = vmax.f32 %v1690_v28, 0.0 }
 0x1f2   : >> { %v1691_v63 = vadd.f32 %v1678_v36, %v1667_v57  ;;  %v1697_v9 = vmax.f32 %v1693_v1, 0.0 }
 0x1f4   : >> { %v1695_v0 = vmax.f32 %v1691_v63, 0.0  ;;  %v1699_v3 = vpack.c.bf16 %v1697_v9, %v1696_v6 }
 0x1f6   : >> { %v1698_v19 = vpack.c.bf16 %v1695_v0, %v1694_v62 }
 0x1f8   : >> { %2488 = vmatprep.mubr.msk.bf16.mxu0 %vm1700_vm5, %v1698_v19  ;;  %2506 = vmatprep.mubr.msk.bf16.mxu1 %vm1700_vm5, %v1698_v19 }
 0x1f9   : >> { %2489 = vmatmul.mubr.msk.bf16.vlgmr.msra.gmra.mxu0 %vm1700_vm5, %v1699_v3  ;;  %2507 = vmatmul.mubr.msk.bf16.vlgmr.msra.gmra.mxu1 %vm1700_vm5, %v1699_v3 }
 0x2b9   : >> { %v2490_v10 = vpop.f32.mrf.mxu0  ;;  %v2508_v17 = vpop.f32.mrf.mxu1 }
 0x2ba   : >> { %v1814_v20 = vmax.f32 %v2490_v10, %v2508_v17 }
 0x2bb   : >> { %v1745_v23 = vpop.f32.mrf.mxu0  ;;  %v1797_v22 = vpop.f32.mrf.mxu1 }
 0x2bc   : >> { %v2129_v26 = vpack.c.bf16 %v1814_v20, %v1814_v20  ;;  %v1812_v5 = vmax.f32 %v1745_v23, %v1797_v22 }
 0x2bd   : >> { %v2491_v12 = vpop.f32.mrf.mxu0  ;;  %v2509_v11 = vpop.f32.mrf.mxu1 }
 0x2be   : >> { %1838 = vst.msk [vmem:[%s1834_s23 + $0x8] sm:$0xf] %vm1835_vm0, %v2129_v26  ;;  %v2127_v27 = vpack.c.bf16 %v1812_v5, %v1812_v5  ;;  %v1815_v30 = vmax.f32 %v2491_v12, %v2509_v11 }
 0x2bf   : >> { %v1748_v29 = vpop.f32.mrf.mxu0  ;;  %v1800_v31 = vpop.f32.mrf.mxu1 }
 0x2c0   : >> { %1836 = vst.msk [vmem:[%s1834_s23] sm:$0xf] %vm1835_vm0, %v2127_v27  ;;  %v2130_v32 = vpack.c.bf16 %v1815_v30, %v1815_v30  ;;  %v1813_v14 = vmax.f32 %v1748_v29, %v1800_v31  ;;  %297 = sbr.rel (!%p295_p4) target bundleno = 28 (0x1c), region = 82 }
 0x2c2   : >> { %1839 = vst.msk [vmem:[%s1834_s23 + $0xc] sm:$0xf] %vm1835_vm0, %v2130_v32  ;;  %v2128_v33 = vpack.c.bf16 %v1813_v14, %v1813_v14 }
 0x2c4   : >> { %1837 = vst.msk [vmem:[%s1834_s23 + $0x4] sm:$0xf] %vm1835_vm0, %v2128_v33 }
 0x2c5 PF: > { %s13_s12 = sadd.s32 1, %s2581_s12  }
 0x2c6   : > { %p10_p5 = scmp.ge.s32.totalorder %s13_s12, 4  }
 0x2c8   :  { %12 = sbr.rel (!%p10_p5) target bundleno = 1 (0x1), region = 93 }

// kernel: my_simple_classifier_forward.4
= control target key start
LH: loop header
LB: loop body
LE: loop exit
PB: predicated region body
PF: predicated region fallthrough
CT: control target
= control target key end

     0   :  { %s2332_s12 = smov 0   ;;  %s3271_s0 = inlined_call_operand.vmem [shape: bf16[2,224,15,220], index: 0, kind: input, shape index: {}]   ;;  %s3272_s1 = inlined_call_operand.vmem [shape: bf16[5,1,64,15], index: 1, kind: input, shape index: {}]   ;;  %s3273_s2 = inlined_call_operand.vmem [shape: f32[64,1], index: 2, kind: input, shape index: {}]   ;;  %s3274_s3 = inlined_call_operand.vmem [shape: bf16[2,110,64,110], index: 3, kind: output, shape index: {}]  }
   0x1 LB: > { %s1952_s13 = sadd.s32 4294967295, %s2302_s12   ;;  %p1956_p0 = scmp.ge.s32.totalorder %s2302_s12, 1  ;;  %s2302_s12 = sphi %s2332_s12, %s13_s12  }
   0x2   : > { %p137_p1 = scmp.lt.s32.totalorder %s2302_s12, 3 }
   0x4   : > { %p138_p2 = pnand %p1956_p0, %p137_p1 }
   0x5   : > { %p161_p3 = scmp.lt.s32.totalorder (!%p138_p2), %s1952_s13, 1  ;;  %s2602_s11 = smov (!%p138_p2), 0  }
   0x6   : > { %141 = sbr.rel (%p138_p2) target bundleno = 619 (0x26b), region = 32 }
   0xb   : > { %v172_v0 = vlaneseq  ;;  %v2343_v1 = vld [vmem:[%s3273_s2] sm:$0xff]  ;;  %v2348_v2 = vld [vmem:[%s3273_s2 + $0x8] sm:$0xff]  ;;  %v2353_v3 = vld [vmem:[%s3273_s2 + $0x10] sm:$0xff]  ;;  %s3511_s13 = smov (!%p161_p3, %s1952_s13), 1  ;;  %v2308_v39 = vmov 0.0  }
   0xc   : > { %3335 = vst [vmem:[#allocation2_spill] sm:$0xff] %v2343_v1  ;;  %3336 = vst [vmem:[#allocation3_spill] sm:$0xff] %v2348_v2  ;;  %v2358_v4 = vld [vmem:[%s3273_s2 + $0x18] sm:$0xff]  ;;  %v2363_v5 = vld [vmem:[%s3273_s2 + $0x20] sm:$0xff]  ;;  %s2230_s30 = smul.u32 3584, %s3511_s13 }
   0xd   : > { %3337 = vst [vmem:[#allocation4_spill] sm:$0xff] %v2353_v3  ;;  %3338 = vst [vmem:[#allocation5_spill] sm:$0xff] %v2358_v4  ;;  %v2368_v6 = vld [vmem:[%s3273_s2 + $0x28] sm:$0xff]  ;;  %v2373_v7 = vld [vmem:[%s3273_s2 + $0x30] sm:$0xff]  ;;  %v2380_v9 = vshrl.u32 %v172_v0, 7  ;;  %v202_v10 = vand.u32 127, %v172_v0 }
   0xe   : > { %3339 = vst [vmem:[#allocation6_spill] sm:$0xff] %v2363_v5  ;;  %3340 = vst [vmem:[#allocation7_spill] sm:$0xff] %v2368_v6  ;;  %v2378_v8 = vld [vmem:[%s3273_s2 + $0x38] sm:$0xff]  ;;  %s2231_s4 = smul.u32 3520, %s3511_s13  ;;  %s2397_s7 = scalar_lea.vmem %s3271_s0, %s2230_s30 }
   0xf   : > { %3341 = vst [vmem:[#allocation8_spill] sm:$0xff] %v2373_v7  ;;  %3342 = vst [vmem:[#allocation9_spill] sm:$0xff] %v2378_v8  ;;  %v2383_v11 = vadd.s32 8, %v2380_v9  ;;  %v2386_v12 = vadd.s32 16, %v2380_v9  ;;  %v2389_v13 = vadd.s32 24, %v2380_v9  ;;  %v2392_v14 = vadd.s32 32, %v2380_v9 }
  0x10   : > { %3343 = vst [vmem:[#allocation10_spill] sm:$0xff] %v2380_v9  ;;  %v2400_v15 = vadd.s32 40, %v2380_v9  ;;  %v2403_v16 = vadd.s32 48, %v2380_v9  ;;  %v2406_v17 = vadd.s32 56, %v2380_v9  ;;  %v2409_v18 = vadd.s32 64, %v2380_v9  ;;  %s2414_s10 = scalar_lea.vmem %s3274_s3, %s2231_s4 }
  0x11   : > { %3344 = vst [vmem:[#allocation11_spill] sm:$0xff] %v2383_v11  ;;  %3345 = vst [vmem:[#allocation12_spill] sm:$0xff] %v2386_v12  ;;  %v2417_v19 = vadd.s32 72, %v2380_v9  ;;  %v2420_v20 = vadd.s32 80, %v2380_v9  ;;  %v2423_v21 = vadd.s32 88, %v2380_v9  ;;  %v2426_v22 = vadd.s32 96, %v2380_v9 }
  0x12   : > { %3346 = vst [vmem:[#allocation13_spill] sm:$0xff] %v2389_v13  ;;  %3347 = vst [vmem:[#allocation14_spill] sm:$0xff] %v2392_v14  ;;  %v2429_v23 = vadd.s32 104, %v2380_v9  ;;  %v2432_v24 = vadd.s32 112, %v2380_v9  ;;  %v2435_v25 = vadd.s32 120, %v2380_v9  ;;  %v2438_v26 = vadd.s32 128, %v2380_v9 }
  0x13   : > { %3348 = vst [vmem:[#allocation15_spill] sm:$0xff] %v2400_v15  ;;  %3349 = vst [vmem:[#allocation16_spill] sm:$0xff] %v2403_v16  ;;  %v2441_v27 = vadd.s32 136, %v2380_v9  ;;  %v2444_v28 = vadd.s32 144, %v2380_v9  ;;  %v2447_v29 = vadd.s32 152, %v2380_v9  ;;  %v2450_v30 = vadd.s32 160, %v2380_v9 }
  0x14   : > { %3350 = vst [vmem:[#allocation17_spill] sm:$0xff] %v2406_v17  ;;  %3351 = vst [vmem:[#allocation18_spill] sm:$0xff] %v2409_v18  ;;  %v2453_v31 = vadd.s32 168, %v2380_v9  ;;  %v2456_v32 = vadd.s32 176, %v2380_v9  ;;  %v2459_v33 = vadd.s32 184, %v2380_v9  ;;  %v2461_v34 = vmul.u32 2, %v202_v10 }
  0x15   : > { %3352 = vst [vmem:[#allocation19_spill] sm:$0xff] %v2417_v19  ;;  %3353 = vst [vmem:[#allocation20_spill] sm:$0xff] %v2420_v20  ;;  %v2464_v35 = vadd.s32 192, %v2380_v9  ;;  %v2467_v36 = vadd.s32 200, %v2380_v9  ;;  %v2470_v37 = vadd.s32 208, %v2380_v9  ;;  %v2473_v38 = vadd.s32 216, %v2380_v9 }
  0x16   : > { %3354 = vst [vmem:[#allocation21_spill] sm:$0xff] %v2423_v21  ;;  %3355 = vst [vmem:[#allocation22_spill] sm:$0xff] %v2426_v22  ;;  %vm214_vm10 = vcmp.eq.s32.totalorder %v2420_v20, %v2461_v34  ;;  %vm216_vm12 = vcmp.eq.s32.totalorder %v2426_v22, %v2461_v34  ;;  %vm217_vm13 = vcmp.eq.s32.totalorder %v2429_v23, %v2461_v34  ;;  %v2536_v42 = vadd.s32 1, %v2461_v34 }
  0x17   : > { %3356 = vst [vmem:[#allocation23_spill] sm:$0xff] %v2429_v23  ;;  %3357 = vst [vmem:[#allocation24_spill] sm:$0xff] %v2432_v24  ;;  %vm218_vm14 = vcmp.eq.s32.totalorder %v2432_v24, %v2461_v34  ;;  %vm219_vm15 = vcmp.eq.s32.totalorder %v2435_v25, %v2461_v34  ;;  %vm230_vm2 = vcmp.eq.s32.totalorder %v2470_v37, %v2461_v34 }
  0x18   : > { %3358 = vst [vmem:[#allocation25_spill] sm:$0xff] %v2435_v25  ;;  %3359 = vst [vmem:[#allocation26_spill] sm:$0xff] %v2438_v26  ;;  %vm231_vm5 = vcmp.eq.s32.totalorder %v2473_v38, %v2461_v34  ;;  %v2531_v40 = vsel %vm230_vm2, 1.0, %v2308_v39  ;;  %vm318_vm6 = vcmp.eq.s32.totalorder %v2435_v25, %v2536_v42  ;;  %vm325_vm11 = vcmp.eq.s32.totalorder %v2456_v32, %v2536_v42 }
  0x19   : > { %3360 = vst [vmem:[#allocation27_spill] sm:$0xff] %v2441_v27  ;;  %3361 = vst [vmem:[#allocation28_spill] sm:$0xff] %v2444_v28  ;;  %v2533_v41 = vsel %vm231_vm5, 1.0, %v2308_v39  ;;  %vm327_vm1 = vcmp.eq.s32.totalorder %v2464_v35, %v2536_v42  ;;  %vm328_vm9 = vcmp.eq.s32.totalorder %v2467_v36, %v2536_v42  ;;  %vm329_vm8 = vcmp.eq.s32.totalorder %v2470_v37, %v2536_v42 }
  0x1a   : > { %3362 = vst [vmem:[#allocation29_spill] sm:$0xff] %v2447_v29  ;;  %3363 = vst [vmem:[#allocation30_spill] sm:$0xff] %v2450_v30  ;;  %vm330_vm5 = vcmp.eq.s32.totalorder %v2473_v38, %v2536_v42  ;;  %v2596_v44 = vsel %vm329_vm8, 1.0, %v2308_v39 }
  0x1b   : > { %3364 = vst [vmem:[#allocation31_spill] sm:$0xff] %v2453_v31  ;;  %3365 = vst [vmem:[#allocation32_spill] sm:$0xff] %v2456_v32  ;;  %v2598_v45 = vsel %vm330_vm5, 1.0, %v2308_v39 }
  0x1c   : > { %3366 = vst [vmem:[#allocation33_spill] sm:$0xff] %v2459_v33  ;;  %3367 = vst [vmem:[#allocation34_spill] sm:$0xff] %v2461_v34 }
  0x1d   : > { %3368 = vst [vmem:[#allocation35_spill] sm:$0xff] %v2464_v35  ;;  %3369 = vst [vmem:[#allocation36_spill] sm:$0xff] %v2467_v36 }
  0x1e   : > { %3370 = vst [vmem:[#allocation37_spill] sm:$0xff] %v2531_v40  ;;  %3371 = vst [vmem:[#allocation38_spill] sm:$0xff] %v2533_v41 }
  0x1f   : > { %3372 = vst [vmem:[#allocation39_spill] sm:$0xff] %v2536_v42  ;;  %3373 = vst [vmem:[#allocation40_spill] sm:$0xff] %v2596_v44 }
  0x20   : > { %3374 = vst [vmem:[#allocation41_spill] sm:$0xff] %v2598_v45 }
  0x21 LB: >> { %v3382_v30 = vld [vmem:[#allocation30_spill] sm:$0xff]  ;;  %v3383_v29 = vld [vmem:[#allocation29_spill] sm:$0xff]  ;;  %v3384_v28 = vld [vmem:[#allocation28_spill] sm:$0xff]  ;;  %vm485_vm2 = vcmask 1046528   ;;  %vm486_vm7 = vcmask 1047552   ;;  %v2309_v47 = vmov 65535   ;;  %s2306_s11 = sphi %s2602_s11, %s414_s11  }
  0x22   : >> { %v3380_v32 = vld [vmem:[#allocation32_spill] sm:$0xff]  ;;  %v3381_v31 = vld [vmem:[#allocation31_spill] sm:$0xff]  ;;  %v3386_v26 = vld [vmem:[#allocation26_spill] sm:$0xff]  ;;  %v487_v48 = vsel %vm485_vm2, 4294967295, %v2309_v47  ;;  %v2310_v49 = vmov 0   ;;  %s2215_s13 = sshll.u32 %s2306_s11, 5 }
  0x23   : >> { %v3378_v34 = vld [vmem:[#allocation34_spill] sm:$0xff]  ;;  %v3379_v33 = vld [vmem:[#allocation33_spill] sm:$0xff]  ;;  %v3385_v27 = vld [vmem:[#allocation27_spill] sm:$0xff]  ;;  %527 = vmatprep.mubr.bf16.mxu0 %v2310_v49  ;;  %646 = vmatprep.mubr.bf16.mxu1 %v2310_v49  ;;  %s2615_s14 = scalar_lea.vmem %s2397_s7, %s2215_s13  ;;  %v2617_v50 = vsel %vm486_vm7, %v487_v48, 0  ;;  %vm472_vm7 = vcmask 121856   ;;  %s3247_s6 = scalar_lea.vmem %s2414_s10, %s2215_s13 }
  0x24   : >> { %v3376_v36 = vld [vmem:[#allocation36_spill] sm:$0xff]  ;;  %v3377_v35 = vld [vmem:[#allocation35_spill] sm:$0xff]  ;;  %v3390_v22 = vld [vmem:[#allocation22_spill] sm:$0xff]  ;;  %2252 = vset.pattern.permute.xlu0 %v2310_v49  ;;  %2253 = vset.pattern.permute.xlu1 %v2310_v49  ;;  %s414_s11 = sadd.s32 1, %s2306_s11  }
  0x25   : >> { %v3388_v24 = vld [vmem:[#allocation24_spill] sm:$0xff]  ;;  %v3389_v23 = vld [vmem:[#allocation23_spill] sm:$0xff]  ;;  %v3391_v21 = vld [vmem:[#allocation21_spill] sm:$0xff]  ;;  %p411_p4 = scmp.ge.s32.totalorder %s414_s11, 110  }
  0x26   : >> { %v3375_v42 = vld [vmem:[#allocation39_spill] sm:$0xff]  ;;  %v3392_v20 = vld [vmem:[#allocation20_spill] sm:$0xff]  ;;  %v3394_v18 = vld [vmem:[#allocation18_spill] sm:$0xff] }
  0x27   : >> { %v3393_v19 = vld [vmem:[#allocation19_spill] sm:$0xff]  ;;  %v3395_v17 = vld [vmem:[#allocation17_spill] sm:$0xff]  ;;  %v3396_v16 = vld [vmem:[#allocation16_spill] sm:$0xff]  ;;  %vm3411_vm4 = vcmp.eq.s32.totalorder %v3388_v24, %v3375_v42  ;;  %vm3412_vm3 = vcmp.eq.s32.totalorder %v3390_v22, %v3375_v42  ;;  %vm3413_vm0 = vcmp.eq.s32.totalorder %v3389_v23, %v3375_v42 }
  0x28   : >> { %v3397_v15 = vld [vmem:[#allocation15_spill] sm:$0xff]  ;;  %v3398_v14 = vld [vmem:[#allocation14_spill] sm:$0xff]  ;;  %v3399_v13 = vld [vmem:[#allocation13_spill] sm:$0xff] }
  0x29   : >> { %v3400_v12 = vld [vmem:[#allocation12_spill] sm:$0xff]  ;;  %v3401_v11 = vld [vmem:[#allocation11_spill] sm:$0xff]  ;;  %v3402_v9 = vld [vmem:[#allocation10_spill] sm:$0xff] }
  0x2a   : >> { %v3403_v1 = vld [vmem:[#allocation2_spill] sm:$0xff]  ;;  %v3404_v3 = vld [vmem:[#allocation4_spill] sm:$0xff]  ;;  %v3405_v2 = vld [vmem:[#allocation3_spill] sm:$0xff] }
  0x2b   : >> { %1588 = vperm.xlu0 %2252, %v3403_v1   ;;  %1598 = vperm.xlu1 %2253, %v3404_v3   ;;  %v2254_v51 = vld [vmem:[%s2615_s14 + $0x14] ss:$8 sps:$4 sm:$0xff]   ;;  %v2256_v52 = vld [vmem:[%s2615_s14 + $0x4] ss:$8 sps:$4 sm:$0xff]   ;;  %v2258_v54 = vld [vmem:[%s2615_s14 + $0x10] ss:$8 sps:$4 sm:$0xff]  }
  0x2c   : >> { %v493_v53 = vand.u32 %v2254_v51, %v2617_v50  ;;  %v2259_v55 = vld [vmem:[%s2615_s14] ss:$8 sps:$4 sm:$0xff]   ;;  %v612_v56 = vand.u32 %v2256_v52, %v2617_v50  ;;  %v2264_v58 = vld [vmem:[%s2615_s14 + $0x24] ss:$8 sps:$4 sm:$0xff]   ;;  %v3406_v4 = vld [vmem:[#allocation5_spill] sm:$0xff]  ;;  %v490_v59 = vand.u32 %v2258_v54, %v2617_v50 }
  0x2d   : >> { %v2262_v57 = vld [vmem:[%s2615_s14 + $0x20] ss:$8 sps:$4 sm:$0xff]   ;;  %v609_v60 = vand.u32 %v2259_v55, %v2617_v50  ;;  %v746_v63 = vand.u32 %v2264_v58, %v2617_v50  ;;  %v2274_v10 = vld [vmem:[%s2615_s14 + $0x34] ss:$8 sps:$4 sm:$0xff]   ;;  %vm2142_vm8 = vmpackc.low %vm219_vm15, %vm218_vm14 }
  0x2e   : >> { %509 = vmatprep.subr.bf16.mxu0 %v493_v53  ;;  %v2260_v61 = vld [vmem:[%s3272_s1 + $0x20] sm:$0xff]   ;;  %628 = vmatprep.subr.bf16.mxu1 %v612_v56  ;;  %v743_v0 = vand.u32 %v2262_v57, %v2617_v50  ;;  %v3408_v6 = vld [vmem:[#allocation7_spill] sm:$0xff]  ;;  %v3409_v7 = vld [vmem:[#allocation8_spill] sm:$0xff]  ;;  %v1042_v39 = vand.u32 %v2274_v10, %v2617_v50 }
  0x2f   : >> { %1593 = vperm.xlu0 %2252, %v3405_v2   ;;  %1603 = vperm.xlu1 %2253, %v3406_v4   ;;  %v2639_v62 = vld [vmem:[%s3272_s1] sm:$0xff]   ;;  %v2265_v37 = vld [vmem:[%s3272_s1 + $0x28] sm:$0xff]   ;;  %v3410_v8 = vld [vmem:[#allocation9_spill] sm:$0xff] }
  0x30   : >> { %510 = vmatpush1.bf16.msra.mxu0 %v490_v59  ;;  %629 = vmatpush1.bf16.msra.mxu1 %v609_v60  ;;  %v3407_v5 = vld [vmem:[#allocation6_spill] sm:$0xff]  ;;  %v2658_v38 = vld [vmem:[%s3272_s1 + $0x8] sm:$0xff]   ;;  %v2267_v51 = vld [vmem:[%s3272_s1 + $0x30] sm:$0xff]  }
  0x31   : >> { %762 = vmatprep.subr.bf16.mxu0 %v746_v63  ;;  %851 = vmatprep.subr.bf16.mxu1 %v746_v63  ;;  %v2279_v47 = vld [vmem:[%s2615_s14 + $0x40] ss:$8 sps:$4 sm:$0xff]   ;;  %v2268_v52 = vld [vmem:[%s3272_s1 + $0x10] sm:$0xff]   ;;  %v2269_v57 = vld [vmem:[%s3272_s1 + $0x38] sm:$0xff]  }
  0x32   : >> { %v2669_v48 = vand.u32 %v2279_v47, %v2617_v50  ;;  %v2288_v54 = vld [vmem:[%s2615_s14 + $0x54] ss:$8 sps:$4 sm:$0xff]   ;;  %v2272_v60 = vld [vmem:[%s2615_s14 + $0x30] ss:$8 sps:$4 sm:$0xff]   ;;  %v2281_v63 = vld [vmem:[%s2615_s14 + $0x44] ss:$8 sps:$4 sm:$0xff]  }
  0x33   : >> { %1608 = vperm.xlu0 %2252, %v3407_v5   ;;  %1613 = vperm.xlu1 %2253, %v3408_v6   ;;  %v1479_v55 = vand.u32 %v2288_v54, %v2617_v50  ;;  %v2270_v58 = vld [vmem:[%s3272_s1 + $0x18] sm:$0xff]   ;;  %v1039_v10 = vand.u32 %v2272_v60, %v2617_v50  ;;  %v1281_v47 = vand.u32 %v2281_v63, %v2617_v50  ;;  %v2275_v54 = vld [vmem:[%s3272_s1 + $0x48] sm:$0xff]   ;;  %vm2172_vm2 = vmpackc.low %vm318_vm6, %vm3411_vm4 }
  0x34   : >> { %2036 = vmatmul.mubr.msk.bf16.vlgmr.msra.gmra.mxu0 %vm472_vm7, %v2260_v61  ;;  %2046 = vmatmul.mubr.msk.bf16.vlgmr.msra.gmra.mxu1 %vm472_vm7, %v2639_v62  ;;  %vm2144_vm5 = vmpackc.low %vm217_vm13, %vm216_vm12  ;;  %vm3419_vm4 = vcmp.eq.s32.totalorder %v3394_v18, %v3375_v42  ;;  %v3437_v41 = vld [vmem:[#allocation38_spill] sm:$0xff]  ;;  %v3438_v40 = vld [vmem:[#allocation37_spill] sm:$0xff] }
  0x35   : >> { %763 = vmatpush1.bf16.msra.mxu0 %v743_v0  ;;  %852 = vmatpush1.bf16.msra.mxu1 %v743_v0  ;;  %v2271_v0 = vld [vmem:[%s3272_s1 + $0x40] sm:$0xff]   ;;  %v3439_v43 = vpack.c.bf16 %v3437_v41, %v3438_v40  ;;  %v3440_v45 = vld [vmem:[#allocation41_spill] sm:$0xff]  ;;  %v3441_v44 = vld [vmem:[#allocation40_spill] sm:$0xff] }
  0x36   : >> { %537 = vmatprep.mubr.bf16.mxu0 %v2310_v49  ;;  %656 = vmatprep.mubr.bf16.mxu1 %v2310_v49  ;;  %v3442_v46 = vpack.c.bf16 %v3440_v45, %v3441_v44 }
  0x37   : >> { %924 = vmatprep.subr.bf16.mxu0 %v493_v53  ;;  %1618 = vperm.xlu0 %2252, %v3409_v7   ;;  %v2678_v53 = vld [vmem:[%s2615_s14 + $0x50] ss:$8 sps:$4 sm:$0xff]  }
  0x38   : >> { %1623 = vperm.xlu1 %2253, %v3410_v8   ;;  %1058 = vmatprep.subr.bf16.mxu1 %v1042_v39  ;;  %v1476_v56 = vand.u32 %v2678_v53, %v2617_v50  ;;  %v2290_v50 = vld [vmem:[%s3272_s1 + $0x90] sm:$0xff]   ;;  %v2311_v53 = vmov 1.0|1.0  }
  0x3c   : >> { %2037 = vmatmul.mubr.msk.bf16.gmra.mxu0 %vm472_vm7, %v2265_v37  ;;  %2047 = vmatmul.mubr.msk.bf16.gmra.mxu1 %vm472_vm7, %v2658_v38 }
  0x3d   : >> { %547 = vmatprep.mubr.bf16.mxu0 %v2310_v49  ;;  %666 = vmatprep.mubr.bf16.mxu1 %v2310_v49 }
  0x44   : >> { %2038 = vmatmul.mubr.msk.bf16.gmra.mxu0 %vm472_vm7, %v2267_v51  ;;  %2048 = vmatmul.mubr.msk.bf16.gmra.mxu1 %vm472_vm7, %v2268_v52 }
  0x45   : >> { %557 = vmatprep.mubr.bf16.mxu0 %v2310_v49  ;;  %676 = vmatprep.mubr.bf16.mxu1 %v2310_v49 }
  0x4c   : >> { %2039 = vmatmul.mubr.msk.bf16.gmra.mxu0 %vm472_vm7, %v2269_v57  ;;  %2049 = vmatmul.mubr.msk.bf16.gmra.mxu1 %vm472_vm7, %v2270_v58 }
  0x4d   : >> { %780 = vmatprep.mubr.bf16.mxu0 %v2310_v49  ;;  %869 = vmatprep.mubr.bf16.mxu1 %v2310_v49 }
  0x54   : >> { %2068 = vmatmul.mubr.msk.bf16.vlgmr.msra.gmra.mxu0 %vm472_vm7, %v2271_v0  ;;  %2072 = vmatmul.mubr.msk.bf16.vlgmr.msra.gmra.mxu1 %vm472_vm7, %v2260_v61  ;;  %v2277_v61 = vld [vmem:[%s3272_s1 + $0x58] sm:$0xff]  }
  0x55   : >> { %925 = vmatpush1.bf16.msra.mxu0 %v490_v59  ;;  %1059 = vmatpush1.bf16.msra.mxu1 %v1039_v10  ;;  %v2276_v59 = vld [vmem:[%s3272_s1 + $0x50] sm:$0xff]  }
  0x56   : >> { %790 = vmatprep.mubr.bf16.mxu0 %v2310_v49  ;;  %879 = vmatprep.mubr.bf16.mxu1 %v2310_v49 }
  0x57   : >> { %1147 = vmatprep.subr.bf16.mxu0 %v1042_v39  ;;  %1297 = vmatprep.subr.bf16.mxu1 %v1281_v47  ;;  %v2282_v39 = vld [vmem:[%s3272_s1 + $0x68] sm:$0xff]  }
  0x5c   : >> { %2069 = vmatmul.mubr.msk.bf16.gmra.mxu0 %vm472_vm7, %v2275_v54  ;;  %2073 = vmatmul.mubr.msk.bf16.gmra.mxu1 %vm472_vm7, %v2265_v37  ;;  %v2278_v37 = vld [vmem:[%s3272_s1 + $0x60] sm:$0xff]  }
  0x5d   : >> { %800 = vmatprep.mubr.bf16.mxu0 %v2310_v49  ;;  %889 = vmatprep.mubr.bf16.mxu1 %v2310_v49 }
  0x64   : >> { %2070 = vmatmul.mubr.msk.bf16.gmra.mxu0 %vm472_vm7, %v2276_v59  ;;  %2074 = vmatmul.mubr.msk.bf16.gmra.mxu1 %vm472_vm7, %v2267_v51  ;;  %v2285_v51 = vld [vmem:[%s3272_s1 + $0x80] sm:$0xff]  }
  0x65   : >> { %810 = vmatprep.mubr.bf16.mxu0 %v2310_v49  ;;  %899 = vmatprep.mubr.bf16.mxu1 %v2310_v49 }
  0x6c   : >> { %2071 = vmatmul.mubr.msk.bf16.gmra.mxu0 %vm472_vm7, %v2277_v61  ;;  %2075 = vmatmul.mubr.msk.bf16.gmra.mxu1 %vm472_vm7, %v2269_v57 }
  0x6d   : >> { %942 = vmatprep.mubr.bf16.mxu0 %v2310_v49  ;;  %1076 = vmatprep.mubr.bf16.mxu1 %v2310_v49 }
  0x74   : >> { %2076 = vmatmul.mubr.msk.bf16.vlgmr.msra.gmra.mxu0 %vm472_vm7, %v2639_v62  ;;  %2098 = vmatmul.mubr.msk.bf16.vlgmr.msra.gmra.mxu1 %vm472_vm7, %v2278_v37  ;;  %v2283_v62 = vld [vmem:[%s3272_s1 + $0x70] sm:$0xff]  }
  0x75   : >> { %1148 = vmatpush1.bf16.msra.mxu0 %v1039_v10  ;;  %1298 = vmatpush1.bf16.msra.mxu1 %v2669_v48 }
  0x76   : >> { %952 = vmatprep.mubr.bf16.mxu0 %v2310_v49  ;;  %1086 = vmatprep.mubr.bf16.mxu1 %v2310_v49 }
  0x77   : >> { %1386 = vmatprep.subr.bf16.mxu0 %v1281_v47  ;;  %1495 = vmatprep.subr.bf16.mxu1 %v1479_v55 }
  0x7c   : >> { %2077 = vmatmul.mubr.msk.bf16.gmra.mxu0 %vm472_vm7, %v2658_v38  ;;  %2099 = vmatmul.mubr.msk.bf16.gmra.mxu1 %vm472_vm7, %v2282_v39  ;;  %v2284_v38 = vld [vmem:[%s3272_s1 + $0x78] sm:$0xff]  }
  0x7d   : >> { %962 = vmatprep.mubr.bf16.mxu0 %v2310_v49  ;;  %1096 = vmatprep.mubr.bf16.mxu1 %v2310_v49 }
  0x84   : >> { %2078 = vmatmul.mubr.msk.bf16.gmra.mxu0 %vm472_vm7, %v2268_v52  ;;  %2100 = vmatmul.mubr.msk.bf16.gmra.mxu1 %vm472_vm7, %v2283_v62  ;;  %v2289_v52 = vld [vmem:[%s3272_s1 + $0x88] sm:$0xff]  }
  0x85   : >> { %972 = vmatprep.mubr.bf16.mxu0 %v2310_v49  ;;  %1106 = vmatprep.mubr.bf16.mxu1 %v2310_v49 }
  0x8c   : >> { %2079 = vmatmul.mubr.msk.bf16.gmra.mxu0 %vm472_vm7, %v2270_v58  ;;  %2101 = vmatmul.mubr.msk.bf16.gmra.mxu1 %vm472_vm7, %v2284_v38 }
  0x8d   : >> { %1165 = vmatprep.mubr.bf16.mxu0 %v2310_v49  ;;  %1315 = vmatprep.mubr.bf16.mxu1 %v2310_v49 }
  0x94   : >> { %2102 = vmatmul.mubr.msk.bf16.vlgmr.msra.gmra.mxu0 %vm472_vm7, %v2271_v0  ;;  %2124 = vmatmul.mubr.msk.bf16.vlgmr.msra.gmra.mxu1 %vm472_vm7, %v2285_v51 }
  0x95   : >> { %1387 = vmatpush1.bf16.msra.mxu0 %v2669_v48  ;;  %1496 = vmatpush1.bf16.msra.mxu1 %v1476_v56  ;;  %v2291_v48 = vld [vmem:[%s3272_s1 + $0x98] sm:$0xff]  }
  0x96   : >> { %1175 = vmatprep.mubr.bf16.mxu0 %v2310_v49  ;;  %1325 = vmatprep.mubr.bf16.mxu1 %v2310_v49 }
  0x97   : >> { %1683 = vmatprep.subr.bf16.mxu0 %v2310_v49  ;;  %1751 = vmatprep.subr.bf16.mxu1 %v2310_v49 }
  0x9c   : >> { %2103 = vmatmul.mubr.msk.bf16.gmra.mxu0 %vm472_vm7, %v2275_v54  ;;  %2125 = vmatmul.mubr.msk.bf16.gmra.mxu1 %vm472_vm7, %v2289_v52 }
  0x9d   : >> { %1185 = vmatprep.mubr.bf16.mxu0 %v2310_v49  ;;  %1335 = vmatprep.mubr.bf16.mxu1 %v2310_v49 }
  0xa4   : >> { %2104 = vmatmul.mubr.msk.bf16.gmra.mxu0 %vm472_vm7, %v2276_v59  ;;  %2126 = vmatmul.mubr.msk.bf16.gmra.mxu1 %vm472_vm7, %v2290_v50 }
  0xa5   : >> { %1195 = vmatprep.mubr.bf16.mxu0 %v2310_v49  ;;  %1345 = vmatprep.mubr.bf16.mxu1 %v2310_v49 }
  0xac   : >> { %2105 = vmatmul.mubr.msk.bf16.gmra.mxu0 %vm472_vm7, %v2277_v61  ;;  %2127 = vmatmul.mubr.msk.bf16.gmra.mxu1 %vm472_vm7, %v2291_v48 }
  0xad   : >> { %1404 = vmatprep.mubr.bf16.mxu0 %v2310_v49  ;;  %1513 = vmatprep.mubr.bf16.mxu1 %v2310_v49 }
  0xb4   : >> { %2128 = vmatmul.mubr.msk.bf16.vlgmr.msra.gmra.mxu0 %vm472_vm7, %v2278_v37  ;;  %2138 = vmatmul.mubr.msk.bf16.vlgmr.msra.gmra.mxu1 %vm472_vm7, %v2285_v51 }
  0xb5   : >> { %1414 = vmatprep.mubr.bf16.mxu0 %v2310_v49  ;;  %1523 = vmatprep.mubr.bf16.mxu1 %v2310_v49 }
  0xb6   : >> { %2143 = vmatpush1.bf16.msk.msra.mxu0 %vm2142_vm8, %v2311_v53  ;;  %2173 = vmatpush1.bf16.msk.msra.mxu1 %vm2172_vm2, %v2311_v53  ;;  %vm3414_vm8 = vcmp.eq.s32.totalorder %v3391_v21, %v3378_v34 }
  0xb7   : >> { %1685 = vmatprep.subr.bf16.mxu0 %v2310_v49  ;;  %1753 = vmatprep.subr.bf16.mxu1 %v2310_v49  ;;  %vm2146_vm2 = vmpackc.low %vm3414_vm8, %vm214_vm10  ;;  %vm3418_vm8 = vcmp.eq.s32.totalorder %v3393_v19, %v3378_v34 }
  0xba   : >> { %2145 = vmatpush1.bf16.msk.msra.mxu0 %vm2144_vm5, %v2311_v53  ;;  %vm3415_vm5 = vcmp.eq.s32.totalorder %v3392_v20, %v3375_v42 }
  0xbb   : >> { %1687 = vmatprep.subr.bf16.mxu0 %v2310_v49 }
  0xbc   : >> { %2129 = vmatmul.mubr.msk.bf16.gmra.mxu0 %vm472_vm7, %v2282_v39  ;;  %2139 = vmatmul.mubr.msk.bf16.gmra.mxu1 %vm472_vm7, %v2289_v52 }
  0xbd   : >> { %1424 = vmatprep.mubr.bf16.mxu0 %v2310_v49  ;;  %1533 = vmatprep.mubr.bf16.mxu1 %v2310_v49 }
  0xbe   : >> { %2147 = vmatpush1.bf16.msk.msra.mxu0 %vm2146_vm2, %v2311_v53 }
  0xbf   : >> { %1689 = vmatprep.subr.bf16.mxu0 %v2310_v49 }
  0xc4   : >> { %2130 = vmatmul.mubr.msk.bf16.gmra.mxu0 %vm472_vm7, %v2283_v62  ;;  %2140 = vmatmul.mubr.msk.bf16.gmra.mxu1 %vm472_vm7, %v2290_v50 }
  0xc5   : >> { %1434 = vmatprep.mubr.bf16.mxu0 %v2310_v49  ;;  %1543 = vmatprep.mubr.bf16.mxu1 %v2310_v49 }
  0xcc   : >> { %2131 = vmatmul.mubr.msk.bf16.gmra.mxu0 %vm472_vm7, %v2284_v38  ;;  %2141 = vmatmul.mubr.msk.bf16.gmra.mxu1 %vm472_vm7, %v2291_v48  ;;  %vm2174_vm7 = vmpackc.low %vm3413_vm0, %vm3412_vm3  ;;  %vm3416_vm0 = vcmp.eq.s32.totalorder %v3391_v21, %v3375_v42  ;;  %vm3417_vm3 = vcmp.eq.s32.totalorder %v3394_v18, %v3378_v34 }
  0xcd   : >> { %2175 = vmatpush1.bf16.msk.msra.mxu1 %vm2174_vm7, %v2311_v53  ;;  %vm2176_vm7 = vmpackc.low %vm3416_vm0, %vm3415_vm5  ;;  %vm3420_vm0 = vcmp.eq.s32.totalorder %v3393_v19, %v3375_v42 }
  0xce   : >> { %1755 = vmatprep.subr.bf16.mxu1 %v2310_v49  ;;  %vm2148_vm2 = vmpackc.low %vm3418_vm8, %vm3417_vm3  ;;  %vm3422_vm3 = vcmp.eq.s32.totalorder %v3395_v17, %v3378_v34 }
  0xcf   : >> { %2149 = vmatpush1.bf16.msk.msra.mxu0 %vm2148_vm2, %v2311_v53  ;;  %vm2178_vm5 = vmpackc.low %vm3420_vm0, %vm3419_vm4  ;;  %vm3423_vm2 = vcmp.eq.s32.totalorder %v3396_v16, %v3375_v42  ;;  %vm3424_vm4 = vcmp.eq.s32.totalorder %v3395_v17, %v3375_v42 }
  0xd0   : >> { %1691 = vmatprep.subr.bf16.mxu0 %v2310_v49  ;;  %vm2180_vm0 = vmpackc.low %vm3424_vm4, %vm3423_vm2  ;;  %vm3428_vm2 = vcmp.eq.s32.totalorder %v3397_v15, %v3375_v42 }
  0xd1   : >> { %2177 = vmatpush1.bf16.msk.msra.mxu1 %vm2176_vm7, %v2311_v53  ;;  %vm3421_vm7 = vcmp.eq.s32.totalorder %v3396_v16, %v3378_v34 }
  0xd2   : >> { %1757 = vmatprep.subr.bf16.mxu1 %v2310_v49  ;;  %vm2150_vm8 = vmpackc.low %vm3422_vm3, %vm3421_vm7  ;;  %vm3426_vm7 = vcmp.eq.s32.totalorder %v3397_v15, %v3378_v34 }
  0xd3   : >> { %2151 = vmatpush1.bf16.msk.msra.mxu0 %vm2150_vm8, %v2311_v53  ;;  %vm3427_vm8 = vcmp.eq.s32.totalorder %v3398_v14, %v3375_v42 }
  0xd4   : >> { %1693 = vmatprep.subr.bf16.mxu0 %v2310_v49  ;;  %vm2182_vm4 = vmpackc.low %vm3428_vm2, %vm3427_vm8  ;;  %vm3432_vm8 = vcmp.eq.s32.totalorder %v3399_v13, %v3375_v42 }
  0xd5   : >> { %2179 = vmatpush1.bf16.msk.msra.mxu1 %vm2178_vm5, %v2311_v53  ;;  %vm3425_vm5 = vcmp.eq.s32.totalorder %v3398_v14, %v3378_v34 }
  0xd6   : >> { %1759 = vmatprep.subr.bf16.mxu1 %v2310_v49  ;;  %vm2152_vm3 = vmpackc.low %vm3426_vm7, %vm3425_vm5  ;;  %vm3430_vm5 = vcmp.eq.s32.totalorder %v3399_v13, %v3378_v34 }
  0xd7   : >> { %2153 = vmatpush1.bf16.msk.msra.mxu0 %vm2152_vm3, %v2311_v53  ;;  %vm3431_vm3 = vcmp.eq.s32.totalorder %v3400_v12, %v3375_v42 }
  0xd8   : >> { %1695 = vmatprep.subr.bf16.mxu0 %v2310_v49  ;;  %vm2184_vm2 = vmpackc.low %vm3432_vm8, %vm3431_vm3  ;;  %vm3436_vm3 = vcmp.eq.s32.totalorder %v3401_v11, %v3375_v42 }
  0xd9   : >> { %2181 = vmatpush1.bf16.msk.msra.mxu1 %vm2180_vm0, %v2311_v53  ;;  %vm3429_vm0 = vcmp.eq.s32.totalorder %v3400_v12, %v3378_v34 }
  0xda   : >> { %1761 = vmatprep.subr.bf16.mxu1 %v2310_v49  ;;  %vm2154_vm7 = vmpackc.low %vm3430_vm5, %vm3429_vm0  ;;  %vm3434_vm0 = vcmp.eq.s32.totalorder %v3401_v11, %v3378_v34 }
  0xdb   : >> { %2155 = vmatpush1.bf16.msk.msra.mxu0 %vm2154_vm7, %v2311_v53  ;;  %vm3435_vm7 = vcmp.eq.s32.totalorder %v3402_v9, %v3375_v42 }
  0xdc   : >> { %1697 = vmatprep.subr.bf16.mxu0 %v2310_v49  ;;  %vm2186_vm8 = vmpackc.low %vm3436_vm3, %vm3435_vm7  ;;  %vm3445_vm3 = vcmp.eq.s32.totalorder %v3380_v32, %v3378_v34 }
  0xdd   : >> { %2183 = vmatpush1.bf16.msk.msra.mxu1 %vm2182_vm4, %v2311_v53  ;;  %vm3433_vm4 = vcmp.eq.s32.totalorder %v3402_v9, %v3378_v34  ;;  %vm2188_vm7 = vmpackc.low %vm328_vm9, %vm327_vm1 }
  0xde   : >> { %1763 = vmatprep.subr.bf16.mxu1 %v2310_v49  ;;  %vm2156_vm5 = vmpackc.low %vm3434_vm0, %vm3433_vm4  ;;  %vm3443_vm4 = vcmp.eq.s32.totalorder %v3377_v35, %v3378_v34  ;;  %vm3444_vm0 = vcmp.eq.s32.totalorder %v3376_v36, %v3378_v34 }
  0xdf   : >> { %2157 = vmatpush1.bf16.msk.msra.mxu0 %vm2156_vm5, %v2311_v53  ;;  %vm2158_vm5 = vmpackc.low %vm3444_vm0, %vm3443_vm4  ;;  %vm3447_vm4 = vcmp.eq.s32.totalorder %v3379_v33, %v3375_v42 }
  0xe0   : >> { %1703 = vmatprep.subr.bf16.mxu0 %v2310_v49  ;;  %vm2190_vm0 = vmpackc.low %vm3447_vm4, %vm325_vm11 }
  0xe1   : >> { %2185 = vmatpush1.bf16.msk.msra.mxu1 %vm2184_vm2, %v2311_v53  ;;  %vm1679_vm2 = vcmask 1045504  }
  0xe2   : >> { %1765 = vmatprep.subr.bf16.mxu1 %v2310_v49  ;;  %v1681_v55 = vsel %vm1679_vm2, %v3439_v43, 0  ;;  %v1749_v56 = vsel %vm1679_vm2, %v3442_v46, 0 }
  0xe3   : >> { %1704 = vmatpush2.bf16.msra.mxu0 %v1681_v55 }
  0xe4   : >> { %1705 = vmatprep.subr.bf16.mxu0 %v2310_v49 }
  0xe5   : >> { %2187 = vmatpush1.bf16.msk.msra.mxu1 %vm2186_vm8, %v2311_v53  ;;  %vm3446_vm8 = vcmp.eq.s32.totalorder %v3379_v33, %v3378_v34 }
  0xe6   : >> { %1771 = vmatprep.subr.bf16.mxu1 %v2310_v49  ;;  %vm2160_vm2 = vmpackc.low %vm3446_vm8, %vm3445_vm3  ;;  %vm3450_vm8 = vcmp.eq.s32.totalorder %v3382_v30, %v3375_v42 }
  0xe7   : >> { %2159 = vmatpush2.bf16.msk.msra.mxu0 %vm2158_vm5, %v2311_v53  ;;  %vm3448_vm5 = vcmp.eq.s32.totalorder %v3382_v30, %v3378_v34 }
  0xe8   : >> { %1707 = vmatprep.subr.bf16.mxu0 %v2310_v49 }
  0xe9   : >> { %1772 = vmatpush2.bf16.msra.mxu1 %v1749_v56 }
  0xea   : >> { %1773 = vmatprep.subr.bf16.mxu1 %v2310_v49 }
  0xeb   : >> { %2161 = vmatpush2.bf16.msk.msra.mxu0 %vm2160_vm2, %v2311_v53  ;;  %vm3451_vm2 = vcmp.eq.s32.totalorder %v3381_v31, %v3375_v42 }
  0xec   : >> { %1709 = vmatprep.subr.bf16.mxu0 %v2310_v49  ;;  %vm2192_vm4 = vmpackc.low %vm3451_vm2, %vm3450_vm8  ;;  %vm3455_vm8 = vcmp.eq.s32.totalorder %v3383_v29, %v3375_v42 }
  0xed   : >> { %2189 = vmatpush2.bf16.msk.msra.mxu1 %vm2188_vm7, %v2311_v53  ;;  %vm3449_vm7 = vcmp.eq.s32.totalorder %v3381_v31, %v3378_v34 }
  0xee   : >> { %1775 = vmatprep.subr.bf16.mxu1 %v2310_v49  ;;  %vm2162_vm3 = vmpackc.low %vm3449_vm7, %vm3448_vm5  ;;  %vm3453_vm5 = vcmp.eq.s32.totalorder %v3383_v29, %v3378_v34 }
  0xef   : >> { %2163 = vmatpush2.bf16.msk.msra.mxu0 %vm2162_vm3, %v2311_v53  ;;  %vm3454_vm3 = vcmp.eq.s32.totalorder %v3384_v28, %v3375_v42 }
  0xf0   : >> { %1711 = vmatprep.subr.bf16.mxu0 %v2310_v49  ;;  %vm2194_vm2 = vmpackc.low %vm3455_vm8, %vm3454_vm3  ;;  %vm3459_vm3 = vcmp.eq.s32.totalorder %v3385_v27, %v3375_v42 }
  0xf1   : >> { %2191 = vmatpush2.bf16.msk.msra.mxu1 %vm2190_vm0, %v2311_v53  ;;  %vm3452_vm0 = vcmp.eq.s32.totalorder %v3384_v28, %v3378_v34 }
  0xf2   : >> { %1777 = vmatprep.subr.bf16.mxu1 %v2310_v49  ;;  %vm2164_vm7 = vmpackc.low %vm3453_vm5, %vm3452_vm0  ;;  %vm3457_vm0 = vcmp.eq.s32.totalorder %v3385_v27, %v3378_v34 }
  0xf3   : >> { %2165 = vmatpush2.bf16.msk.msra.mxu0 %vm2164_vm7, %v2311_v53  ;;  %vm3458_vm7 = vcmp.eq.s32.totalorder %v3386_v26, %v3375_v42 }
  0xf4   : >> { %v529_v57 = vpop.f32.mrf.mxu0  ;;  %v648_v58 = vpop.f32.mrf.mxu1  ;;  %1713 = vmatprep.subr.bf16.mxu0 %v2310_v49  ;;  %vm2196_vm8 = vmpackc.low %vm3459_vm3, %vm3458_vm7 }
  0xf5   : >> { %v2951_v60 = vadd.f32 %v648_v58, %v529_v57  ;;  %2193 = vmatpush2.bf16.msk.msra.mxu1 %vm2192_vm4, %v2311_v53  ;;  %vm3456_vm4 = vcmp.eq.s32.totalorder %v3386_v26, %v3378_v34 }
  0xf6   : >> { %v531_v63 = vpop.f32.mrf.mxu0  ;;  %v650_v0 = vpop.f32.mrf.mxu1  ;;  %1779 = vmatprep.subr.bf16.mxu1 %v2310_v49  ;;  %vm2166_vm5 = vmpackc.low %vm3457_vm0, %vm3456_vm4  ;;  %vm1859_vm4 = vcmask 896000  }
  0xf7   : >> { %v2962_v10 = vadd.f32 %v650_v0, %v531_v63  ;;  %2167 = vmatpush2.bf16.msk.msra.mxu0 %vm2166_vm5, %v2311_v53 }
  0xf8   : >> { %v533_v47 = vpop.f32.mrf.mxu0  ;;  %v652_v54 = vpop.f32.mrf.mxu1 }
  0xf9   : >> { %v2971_v59 = vadd.f32 %v652_v54, %v533_v47  ;;  %2195 = vmatpush2.bf16.msk.msra.mxu1 %vm2194_vm2, %v2311_v53  ;;  %vm1666_vm2 = vcmask 752640  }
  0xfa   : >> { %v535_v61 = vpop.f32.mrf.mxu0  ;;  %v654_v37 = vpop.f32.mrf.mxu1  ;;  %1781 = vmatprep.subr.bf16.mxu1 %v2310_v49 }
  0xfb   : >> { %v2982_v39 = vadd.f32 %v654_v37, %v535_v61 }
  0xfc   : >> { %v539_v62 = vpop.f32.mrf.mxu0  ;;  %v658_v38 = vpop.f32.mrf.mxu1 }
  0xfd   : >> { %v2985_v51 = vadd.f32 %v658_v38, %v539_v62  ;;  %2197 = vmatpush2.bf16.msk.msra.mxu1 %vm2196_vm8, %v2311_v53 }
  0xfe   : >> { %v541_v52 = vpop.f32.mrf.mxu0  ;;  %v660_v50 = vpop.f32.mrf.mxu1 }
  0xff   : >> { %v661_v48 = vadd.f32 %v660_v50, %v541_v52 }
 0x100   : >> { %v543_v55 = vpop.f32.mrf.mxu0  ;;  %v662_v56 = vpop.f32.mrf.mxu1 }
 0x101   : >> { %v663_v57 = vadd.f32 %v662_v56, %v543_v55 }
 0x102   : >> { %v545_v58 = vpop.f32.mrf.mxu0  ;;  %v664_v63 = vpop.f32.mrf.mxu1 }
 0x103   : >> { %v665_v0 = vadd.f32 %v664_v63, %v545_v58 }
 0x104   : >> { %v549_v47 = vpop.f32.mrf.mxu0  ;;  %v668_v54 = vpop.f32.mrf.mxu1 }
 0x105   : >> { %v669_v61 = vadd.f32 %v668_v54, %v549_v47 }
 0x106   : >> { %v551_v37 = vpop.f32.mrf.mxu0  ;;  %v670_v62 = vpop.f32.mrf.mxu1 }
 0x107   : >> { %v671_v49 = vadd.f32 %v670_v62, %v551_v37 }
 0x108   : >> { %v553_v38 = vpop.f32.mrf.mxu0  ;;  %v672_v52 = vpop.f32.mrf.mxu1 }
 0x109   : >> { %v673_v50 = vadd.f32 %v672_v52, %v553_v38 }
 0x10a   : >> { %v555_v55 = vpop.f32.mrf.mxu0  ;;  %v674_v56 = vpop.f32.mrf.mxu1 }
 0x10b   : >> { %v675_v58 = vadd.f32 %v674_v56, %v555_v55 }
 0x10c   : >> { %v559_v63 = vpop.f32.mrf.mxu0  ;;  %v678_v47 = vpop.f32.mrf.mxu1 }
 0x10d   : >> { %v679_v54 = vadd.f32 %v678_v47, %v559_v63 }
 0x10e   : >> { %v561_v43 = vpop.f32.mrf.mxu0  ;;  %v680_v46 = vpop.f32.mrf.mxu1 }
 0x10f   : >> { %v681_v1 = vadd.f32 %v680_v46, %v561_v43 }
 0x110   : >> { %v563_v2 = vpop.f32.mrf.mxu0  ;;  %v682_v3 = vpop.f32.mrf.mxu1 }
 0x111   : >> { %v683_v4 = vadd.f32 %v682_v3, %v563_v2 }
 0x112   : >> { %v565_v5 = vpop.f32.mrf.mxu0  ;;  %v684_v6 = vpop.f32.mrf.mxu1 }
 0x113   : >> { %v685_v37 = vadd.f32 %v684_v6, %v565_v5 }
 0x114   : >> { %v782_v62 = vpop.f32.mrf.mxu0  ;;  %v871_v53 = vpop.f32.mrf.mxu1 }
 0x115   : >> { %v821_v7 = vadd.f32 %v782_v62, %v2951_v60 }
 0x116   : >> { %v784_v38 = vpop.f32.mrf.mxu0  ;;  %v873_v52 = vpop.f32.mrf.mxu1 }
 0x117   : >> { %v822_v55 = vadd.f32 %v784_v38, %v2962_v10 }
 0x118   : >> { %v786_v56 = vpop.f32.mrf.mxu0  ;;  %v3035_v8 = vpop.f32.mrf.mxu1 }
 0x119   : >> { %v823_v63 = vadd.f32 %v786_v56, %v2971_v59 }
 0x11a   : >> { %v788_v43 = vpop.f32.mrf.mxu0  ;;  %v3038_v46 = vpop.f32.mrf.mxu1 }
 0x11b   : >> { %v3041_v2 = vadd.f32 %v788_v43, %v2982_v39 }
 0x11c   : >> { %v792_v3 = vpop.f32.mrf.mxu0  ;;  %v881_v5 = vpop.f32.mrf.mxu1 }
 0x11d   : >> { %v825_v6 = vadd.f32 %v792_v3, %v2985_v51 }
 0x11e   : >> { %v794_v60 = vpop.f32.mrf.mxu0  ;;  %v883_v47 = vpop.f32.mrf.mxu1 }
 0x11f   : >> { %v826_v62 = vadd.f32 %v794_v60, %v661_v48 }
 0x120   : >> { %v796_v9 = vpop.f32.mrf.mxu0  ;;  %v885_v10 = vpop.f32.mrf.mxu1 }
 0x121   : >> { %v827_v38 = vadd.f32 %v796_v9, %v663_v57 }
 0x122   : >> { %v798_v11 = vpop.f32.mrf.mxu0  ;;  %v3044_v12 = vpop.f32.mrf.mxu1 }
 0x123   : >> { %v3046_v59 = vadd.f32 %v798_v11, %v665_v0 }
 0x124   : >> { %v802_v56 = vpop.f32.mrf.mxu0  ;;  %v891_v13 = vpop.f32.mrf.mxu1 }
 0x125   : >> { %v829_v14 = vadd.f32 %v802_v56, %v669_v61 }
 0x126   : >> { %v804_v39 = vpop.f32.mrf.mxu0  ;;  %v893_v43 = vpop.f32.mrf.mxu1 }
 0x127   : >> { %v830_v15 = vadd.f32 %v804_v39, %v671_v49 }
 0x128   : >> { %v806_v16 = vpop.f32.mrf.mxu0  ;;  %v895_v17 = vpop.f32.mrf.mxu1 }
 0x129   : >> { %v831_v51 = vadd.f32 %v806_v16, %v673_v50 }
 0x12a   : >> { %v808_v3 = vpop.f32.mrf.mxu0  ;;  %v3048_v18 = vpop.f32.mrf.mxu1 }
 0x12b   : >> { %v3050_v48 = vadd.f32 %v808_v3, %v675_v58 }
 0x12c   : >> { %v812_v9 = vpop.f32.mrf.mxu0  ;;  %v901_v57 = vpop.f32.mrf.mxu1 }
 0x12d   : >> { %v833_v60 = vadd.f32 %v812_v9, %v679_v54 }
 0x12e   : >> { %v814_v19 = vpop.f32.mrf.mxu0  ;;  %v903_v11 = vpop.f32.mrf.mxu1 }
 0x12f   : >> { %v834_v0 = vadd.f32 %v814_v19, %v681_v1 }
 0x130   : >> { %v816_v20 = vpop.f32.mrf.mxu0  ;;  %v905_v21 = vpop.f32.mrf.mxu1 }
 0x131   : >> { %v835_v61 = vadd.f32 %v816_v20, %v683_v4 }
 0x132   : >> { %v818_v56 = vpop.f32.mrf.mxu0  ;;  %v3052_v22 = vpop.f32.mrf.mxu1 }
 0x133   : >> { %v3054_v49 = vadd.f32 %v818_v56, %v685_v37 }
 0x134   : >> { %v944_v16 = vpop.f32.mrf.mxu0  ;;  %v1078_v50 = vpop.f32.mrf.mxu1 }
 0x135   : >> { %3460 = vst [vmem:[#allocation42_spill] sm:$0xff] %v3054_v49  ;;  %v3056_v39 = vadd.f32 %v944_v16, %v871_v53  ;;  %v3058_v58 = vadd.f32 %v1078_v50, %v821_v7 }
 0x136   : >> { %v946_v3 = vpop.f32.mrf.mxu0  ;;  %v1080_v23 = vpop.f32.mrf.mxu1 }
 0x137   : >> { %v3060_v54 = vadd.f32 %v946_v3, %v873_v52  ;;  %v3062_v9 = vadd.f32 %v1080_v23, %v822_v55 }
 0x138   : >> { %v3064_v1 = vpop.f32.mrf.mxu0  ;;  %v1082_v4 = vpop.f32.mrf.mxu1 }
 0x139   : >> { %v3066_v19 = vadd.f32 %v1082_v4, %v823_v63 }
 0x13a   : >> { %v3068_v20 = vpop.f32.mrf.mxu0  ;;  %v3070_v37 = vpop.f32.mrf.mxu1 }
 0x13c   : >> { %v954_v56 = vpop.f32.mrf.mxu0  ;;  %v1088_v53 = vpop.f32.mrf.mxu1 }
 0x13d   : >> { %v3072_v16 = vadd.f32 %v954_v56, %v881_v5  ;;  %v3074_v7 = vadd.f32 %v1088_v53, %v825_v6 }
 0x13e   : >> { %v956_v50 = vpop.f32.mrf.mxu0  ;;  %v1090_v52 = vpop.f32.mrf.mxu1 }
 0x13f   : >> { %v3076_v3 = vadd.f32 %v956_v50, %v883_v47  ;;  %v3078_v23 = vadd.f32 %v1090_v52, %v826_v62 }
 0x140   : >> { %v958_v55 = vpop.f32.mrf.mxu0  ;;  %v1092_v24 = vpop.f32.mrf.mxu1 }
 0x141   : >> { %v3080_v63 = vadd.f32 %v958_v55, %v885_v10  ;;  %v3082_v4 = vadd.f32 %v1092_v24, %v827_v38 }
 0x142   : >> { %v3084_v25 = vpop.f32.mrf.mxu0  ;;  %v3086_v26 = vpop.f32.mrf.mxu1 }
 0x144   : >> { %v964_v5 = vpop.f32.mrf.mxu0  ;;  %v1098_v56 = vpop.f32.mrf.mxu1 }
 0x145   : >> { %v3088_v6 = vadd.f32 %v964_v5, %v891_v13  ;;  %v3090_v53 = vadd.f32 %v1098_v56, %v829_v14 }
 0x146   : >> { %v966_v47 = vpop.f32.mrf.mxu0  ;;  %v1100_v50 = vpop.f32.mrf.mxu1 }
 0x147   : >> { %v3092_v62 = vadd.f32 %v966_v47, %v893_v43  ;;  %v3094_v52 = vadd.f32 %v1100_v50, %v830_v15 }
 0x148   : >> { %v968_v10 = vpop.f32.mrf.mxu0  ;;  %v1102_v55 = vpop.f32.mrf.mxu1 }
 0x149   : >> { %3461 = vst [vmem:[#allocation43_spill] sm:$0xff] %v3094_v52  ;;  %v3096_v24 = vadd.f32 %v968_v10, %v895_v17  ;;  %v3098_v38 = vadd.f32 %v1102_v55, %v831_v51 }
 0x14a   : >> { %v3100_v27 = vpop.f32.mrf.mxu0  ;;  %v3102_v28 = vpop.f32.mrf.mxu1 }
 0x14b   : >> { %3462 = vst [vmem:[#allocation44_spill] sm:$0xff] %v3096_v24  ;;  %3463 = vst [vmem:[#allocation45_spill] sm:$0xff] %v3098_v38  ;;  %v1589_v24 = vpop.permute.xlu0 %1588 }
 0x14c   : >> { %v974_v13 = vpop.f32.mrf.mxu0  ;;  %v1108_v5 = vpop.f32.mrf.mxu1 }
 0x14d   : >> { %v3104_v14 = vadd.f32 %v974_v13, %v901_v57  ;;  %v3106_v56 = vadd.f32 %v1108_v5, %v833_v60 }
 0x14e   : >> { %v976_v43 = vpop.f32.mrf.mxu0  ;;  %v1110_v47 = vpop.f32.mrf.mxu1 }
 0x14f   : >> { %3464 = vst [vmem:[#allocation46_spill] sm:$0xff] %v3104_v14  ;;  %3465 = vst [vmem:[#allocation47_spill] sm:$0xff] %v3106_v56  ;;  %v3108_v15 = vadd.f32 %v976_v43, %v903_v11  ;;  %v3110_v50 = vadd.f32 %v1110_v47, %v834_v0 }
 0x150   : >> { %v978_v17 = vpop.f32.mrf.mxu0  ;;  %v1112_v10 = vpop.f32.mrf.mxu1 }
 0x151   : >> { %3466 = vst [vmem:[#allocation48_spill] sm:$0xff] %v3108_v15  ;;  %3467 = vst [vmem:[#allocation49_spill] sm:$0xff] %v3110_v50  ;;  %v3112_v51 = vadd.f32 %v978_v17, %v905_v21  ;;  %v3114_v55 = vadd.f32 %v1112_v10, %v835_v61 }
 0x152   : >> { %v3116_v29 = vpop.f32.mrf.mxu0  ;;  %v3118_v30 = vpop.f32.mrf.mxu1 }
 0x153   : >> { %3468 = vst [vmem:[#allocation50_spill] sm:$0xff] %v3112_v51  ;;  %3469 = vst [vmem:[#allocation51_spill] sm:$0xff] %v3114_v55 }
 0x154   : >> { %3470 = vst [vmem:[#allocation52_spill] sm:$0xff] %v3118_v30  ;;  %v1167_v57 = vpop.f32.mrf.mxu0  ;;  %v1317_v13 = vpop.f32.mrf.mxu1 }
 0x156   : >> { %v1169_v60 = vpop.f32.mrf.mxu0  ;;  %v1319_v5 = vpop.f32.mrf.mxu1 }
 0x158   : >> { %v1171_v31 = vpop.f32.mrf.mxu0  ;;  %v1321_v32 = vpop.f32.mrf.mxu1 }
 0x15a   : >> { %v1173_v11 = vpop.f32.mrf.mxu0  ;;  %v1323_v43 = vpop.f32.mrf.mxu1 }
 0x15c   : >> { %v1177_v0 = vpop.f32.mrf.mxu0  ;;  %v3120_v47 = vpop.f32.mrf.mxu1 }
 0x15e   : >> { %v1179_v33 = vpop.f32.mrf.mxu0  ;;  %v3122_v21 = vpop.f32.mrf.mxu1 }
 0x160   : >> { %v3124_v61 = vpop.f32.mrf.mxu0  ;;  %v3126_v17 = vpop.f32.mrf.mxu1 }
 0x162   : >> { %v3128_v10 = vpop.f32.mrf.mxu0  ;;  %v3130_v34 = vpop.f32.mrf.mxu1 }
 0x164   : >> { %v3132_v35 = vpop.f32.mrf.mxu0  ;;  %v3134_v36 = vpop.f32.mrf.mxu1 }
 0x166   : >> { %v3136_v40 = vpop.f32.mrf.mxu0  ;;  %v3138_v41 = vpop.f32.mrf.mxu1 }
 0x167   : >> { %3471 = vst [vmem:[#allocation53_spill] sm:$0xff] %v3136_v40  ;;  %3472 = vst [vmem:[#allocation54_spill] sm:$0xff] %v3138_v41 }
 0x168   : >> { %v3140_v42 = vpop.f32.mrf.mxu0  ;;  %v3142_v44 = vpop.f32.mrf.mxu1 }
 0x169   : >> { %3473 = vst [vmem:[#allocation55_spill] sm:$0xff] %v3140_v42  ;;  %3474 = vst [vmem:[#allocation56_spill] sm:$0xff] %v3142_v44  ;;  %v1206_v44 = vadd.f32 %v1167_v57, %v3056_v39  ;;  %v1357_v39 = vadd.f32 %v1319_v5, %v3062_v9  ;;  %v1124_v9 = vadd.f32 %v3086_v26, %v3046_v59 }
 0x16a   : >> { %v3144_v45 = vpop.f32.mrf.mxu0  ;;  %v3146_v55 = vpop.f32.mrf.mxu1 }
 0x16b   : >> { %3475 = vst [vmem:[#allocation57_spill] sm:$0xff] %v3144_v45  ;;  %3476 = vst [vmem:[#allocation58_spill] sm:$0xff] %v3146_v55 }
 0x16c   : >> { %v3148_v50 = vpop.f32.mrf.mxu0  ;;  %v3150_v51 = vpop.f32.mrf.mxu1 }
 0x16d   : >> { %3477 = vst [vmem:[#allocation59_spill] sm:$0xff] %v3148_v50  ;;  %3478 = vst [vmem:[#allocation60_spill] sm:$0xff] %v3150_v51  ;;  %v949_v50 = vadd.f32 %v3064_v1, %v3035_v8  ;;  %v1207_v51 = vadd.f32 %v1169_v60, %v3060_v54 }
 0x16e   : >> { %v3152_v15 = vpop.f32.mrf.mxu0  ;;  %v3154_v56 = vpop.f32.mrf.mxu1 }
 0x16f   : >> { %3479 = vst [vmem:[#allocation61_spill] sm:$0xff] %v3152_v15  ;;  %3480 = vst [vmem:[#allocation62_spill] sm:$0xff] %v3154_v56  ;;  %v951_v56 = vadd.f32 %v3068_v20, %v3038_v46 }
 0x170   : >> { %v3156_v14 = vpop.f32.mrf.mxu0  ;;  %v3158_v38 = vpop.f32.mrf.mxu1 }
 0x171   : >> { %3481 = vst [vmem:[#allocation63_spill] sm:$0xff] %v3156_v14  ;;  %3482 = vst [vmem:[#allocation64_spill] sm:$0xff] %v3158_v38  ;;  %v1356_v38 = vadd.f32 %v1317_v13, %v3058_v58  ;;  %v1209_v40 = vadd.f32 %v1173_v11, %v951_v56  ;;  %v1599_v56 = vpop.permute.xlu1 %1598  ;;  %v1214_v11 = vadd.f32 %v3132_v35, %v3088_v6  ;;  %v3485_v6 = vld [vmem:[#allocation53_spill] sm:$0xff] }
 0x172   : >> { %v3160_v30 = vpop.f32.mrf.mxu0  ;;  %v3162_v49 = vpop.f32.mrf.mxu1 }
 0x173   : >> { %3483 = vst [vmem:[#allocation65_spill] sm:$0xff] %v3160_v30  ;;  %3484 = vst [vmem:[#allocation66_spill] sm:$0xff] %v3162_v49  ;;  %v1208_v30 = vadd.f32 %v1171_v31, %v949_v50  ;;  %v1358_v31 = vadd.f32 %v1321_v32, %v3066_v19  ;;  %v1594_v32 = vpop.permute.xlu0 %1593  ;;  %v1361_v50 = vadd.f32 %v3122_v21, %v3078_v23 }
 0x174   : >> { %v1406_v45 = vpop.f32.mrf.mxu0  ;;  %v1515_v55 = vpop.f32.mrf.mxu1 }
 0x175   : >> { %v1445_v15 = vadd.f32 %v1406_v45, %v1206_v44  ;;  %v1120_v44 = vadd.f32 %v3070_v37, %v3041_v2  ;;  %v961_v45 = vadd.f32 %v3084_v25, %v3044_v12  ;;  %v1211_v25 = vadd.f32 %v1179_v33, %v3076_v3 }
 0x176   : >> { %v1408_v14 = vpop.f32.mrf.mxu0  ;;  %v1517_v42 = vpop.f32.mrf.mxu1 }
 0x177   : >> { %v1554_v49 = vadd.f32 %v1515_v55, %v1445_v15  ;;  %v1446_v41 = vadd.f32 %v1408_v14, %v1207_v51  ;;  %v1359_v12 = vadd.f32 %v1323_v43, %v1120_v44 }
 0x178   : >> { %v1410_v57 = vpop.f32.mrf.mxu0  ;;  %v1519_v52 = vpop.f32.mrf.mxu1 }
 0x179   : >> { %v1570_v8 = vmax.f32 %v1356_v38, %v1554_v49  ;;  %v1555_v1 = vadd.f32 %v1517_v42, %v1446_v41  ;;  %v1447_v54 = vadd.f32 %v1410_v57, %v1208_v30  ;;  %v3181_v41 = vadd.f32 %v3100_v27, %v3048_v18 }
 0x17a   : >> { %v1412_v46 = vpop.f32.mrf.mxu0  ;;  %v1521_v58 = vpop.f32.mrf.mxu1  ;;  %v1210_v30 = vadd.f32 %v1177_v0, %v3072_v16  ;;  %v1360_v18 = vadd.f32 %v3120_v47, %v3074_v7  ;;  %v1363_v57 = vadd.f32 %v3130_v34, %v1124_v9 }
 0x17b   : >> { %v1571_v20 = vmax.f32 %v1357_v39, %v1555_v1  ;;  %v1556_v14 = vadd.f32 %v1519_v52, %v1447_v54  ;;  %v1448_v15 = vadd.f32 %v1412_v46, %v1209_v40  ;;  %v1626_v42 = vadd.f32 %v1589_v24, %v1570_v8 }
 0x17c   : >> { %v1416_v2 = vpop.f32.mrf.mxu0  ;;  %v1525_v49 = vpop.f32.mrf.mxu1  ;;  %v3187_v40 = vadd.f32 %v3102_v28, %v3050_v48  ;;  %v1212_v52 = vadd.f32 %v3124_v61, %v3080_v63  ;;  %v1362_v28 = vadd.f32 %v3126_v17, %v3082_v4  ;;  %v1213_v63 = vadd.f32 %v3128_v10, %v961_v45 }
 0x17d   : >> { %v1572_v19 = vmax.f32 %v1358_v31, %v1556_v14  ;;  %v1557_v37 = vadd.f32 %v1521_v58, %v1448_v15  ;;  %v1627_v26 = vadd.f32 %v1589_v24, %v1571_v20  ;;  %v1449_v27 = vadd.f32 %v1416_v2, %v1210_v30  ;;  %v1604_v45 = vpop.permute.xlu1 %1603  ;;  %v3486_v31 = vld [vmem:[#allocation43_spill] sm:$0xff]  ;;  %v3487_v20 = vld [vmem:[#allocation54_spill] sm:$0xff] }
 0x17e   : >> { %v1418_v59 = vpop.f32.mrf.mxu0  ;;  %v1527_v16 = vpop.f32.mrf.mxu1  ;;  %v1642_v48 = vmax.f32 %v1626_v42, 0.0  ;;  %v3202_v39 = vadd.f32 %v3116_v29, %v3052_v22  ;;  %v1364_v10 = vadd.f32 %v3134_v36, %v3090_v53  ;;  %v1215_v54 = vadd.f32 %v3485_v6, %v3092_v62  ;;  %v3488_v22 = vld [vmem:[#allocation44_spill] sm:$0xff]  ;;  %v3489_v29 = vld [vmem:[#allocation55_spill] sm:$0xff]  ;;  %v3490_v62 = vld [vmem:[#allocation57_spill] sm:$0xff] }
 0x17f   : >> { %v1628_v38 = vadd.f32 %v1594_v32, %v1572_v19  ;;  %v1573_v33 = vmax.f32 %v1359_v12, %v1557_v37  ;;  %v1450_v3 = vadd.f32 %v1418_v59, %v1211_v25  ;;  %v1558_v51 = vadd.f32 %v1525_v49, %v1449_v27  ;;  %v3491_v59 = vld [vmem:[#allocation42_spill] sm:$0xff] }
 0x180   : >> { %v1420_v7 = vpop.f32.mrf.mxu0  ;;  %v1529_v24 = vpop.f32.mrf.mxu1  ;;  %v1643_v43 = vmax.f32 %v1627_v26, 0.0  ;;  %v1365_v14 = vadd.f32 %v3487_v20, %v3486_v31  ;;  %v1216_v15 = vadd.f32 %v3489_v29, %v3488_v22  ;;  %v1217_v49 = vadd.f32 %v3490_v62, %v3181_v41  ;;  %v3503_v31 = vld [vmem:[#allocation63_spill] sm:$0xff] }
 0x181   : >> { %v1644_v55 = vmax.f32 %v1628_v38, 0.0  ;;  %v1629_v13 = vadd.f32 %v1594_v32, %v1573_v33  ;;  %v1559_v60 = vadd.f32 %v1527_v16, %v1450_v3  ;;  %v1451_v5 = vadd.f32 %v1420_v7, %v1212_v52  ;;  %v3492_v16 = vld [vmem:[#allocation52_spill] sm:$0xff]  ;;  %v3493_v38 = vld [vmem:[#allocation45_spill] sm:$0xff] }
 0x182   : >> { %v1574_v0 = vmax.f32 %v1360_v18, %v1558_v51  ;;  %v1422_v47 = vpop.f32.mrf.mxu0  ;;  %v1531_v23 = vpop.f32.mrf.mxu1  ;;  %v1132_v52 = vadd.f32 %v3492_v16, %v3491_v59  ;;  %v3494_v33 = vld [vmem:[#allocation56_spill] sm:$0xff] }
 0x183   : >> { %v1658_v21 = vpack.c.bf16 %v1644_v55, %v1642_v48  ;;  %v1645_v61 = vmax.f32 %v1629_v13, 0.0  ;;  %v1575_v4 = vmax.f32 %v1361_v50, %v1559_v60  ;;  %v1560_v17 = vadd.f32 %v1529_v24, %v1451_v5  ;;  %v3496_v13 = vld [vmem:[#allocation46_spill] sm:$0xff]  ;;  %v3497_v60 = vld [vmem:[#allocation59_spill] sm:$0xff] }
 0x184   : >> { %v1452_v8 = vadd.f32 %v1422_v47, %v1213_v63  ;;  %v1426_v1 = vpop.f32.mrf.mxu0  ;;  %v1535_v35 = vpop.f32.mrf.mxu1  ;;  %v1630_v34 = vadd.f32 %v1599_v56, %v1574_v0  ;;  %v1366_v3 = vadd.f32 %v3494_v33, %v3493_v38  ;;  %v1218_v5 = vadd.f32 %v3497_v60, %v3496_v13 }
 0x185   : >> { %v1659_v44 = vpack.c.bf16 %v1645_v61, %v1643_v43  ;;  %v1576_v46 = vmax.f32 %v1362_v28, %v1560_v17  ;;  %v1453_v58 = vadd.f32 %v1426_v1, %v1214_v11  ;;  %v1631_v12 = vadd.f32 %v1599_v56, %v1575_v4  ;;  %v3495_v56 = vld [vmem:[#allocation58_spill] sm:$0xff]  ;;  %v3500_v4 = vld [vmem:[#allocation48_spill] sm:$0xff]  ;;  %v3501_v17 = vld [vmem:[#allocation61_spill] sm:$0xff] }
 0x186   : >> { %v1561_v9 = vadd.f32 %v1531_v23, %v1452_v8  ;;  %v1428_v30 = vpop.f32.mrf.mxu0  ;;  %v1537_v36 = vpop.f32.mrf.mxu1  ;;  %v1646_v50 = vmax.f32 %v1630_v34, 0.0  ;;  %v1367_v51 = vadd.f32 %v3495_v56, %v3187_v40  ;;  %v3498_v23 = vld [vmem:[#allocation47_spill] sm:$0xff]  ;;  %v3505_v34 = vld [vmem:[#allocation62_spill] sm:$0xff] }
 0x187   : >> { %v1632_v53 = vadd.f32 %v1604_v45, %v1576_v46  ;;  %v1562_v42 = vadd.f32 %v1535_v35, %v1453_v58  ;;  %v1454_v2 = vadd.f32 %v1428_v30, %v1215_v54  ;;  %2168 = vmatprep.mubr.msk.bf16.mxu0 %vm1666_vm2, %v1659_v44  ;;  %2198 = vmatprep.mubr.msk.bf16.mxu1 %vm1666_vm2, %v1659_v44  ;;  %v1647_v63 = vmax.f32 %v1631_v12, 0.0  ;;  %v1614_v8 = vpop.permute.xlu1 %1613  ;;  %v3502_v58 = vld [vmem:[#allocation50_spill] sm:$0xff]  ;;  %v3506_v30 = vld [vmem:[#allocation65_spill] sm:$0xff] }
 0x188   : >> { %v1577_v25 = vmax.f32 %v1363_v57, %v1561_v9  ;;  %v1430_v32 = vpop.f32.mrf.mxu0  ;;  %v1539_v19 = vpop.f32.mrf.mxu1  ;;  %1716 = vmatmul.mubr.bf16.vlgmr.msra.gmra.mxu0 %v1658_v21  ;;  %1784 = vmatmul.mubr.bf16.vlgmr.msra.gmra.mxu1 %v1658_v21  ;;  %v3499_v21 = vld [vmem:[#allocation60_spill] sm:$0xff]  ;;  %v1219_v57 = vadd.f32 %v3501_v17, %v3500_v4  ;;  %v1220_v20 = vadd.f32 %v3503_v31, %v3502_v58 }
 0x189   : >> { %v1648_v37 = vmax.f32 %v1632_v53, 0.0  ;;  %v1578_v18 = vmax.f32 %v1364_v10, %v1562_v42  ;;  %v1563_v26 = vadd.f32 %v1537_v36, %v1454_v2  ;;  %v1455_v27 = vadd.f32 %v1430_v32, %v1216_v15  ;;  %v1609_v10 = vpop.permute.xlu0 %1608  ;;  %v3504_v15 = vld [vmem:[#allocation49_spill] sm:$0xff]  ;;  %v3507_v32 = vld [vmem:[#allocation51_spill] sm:$0xff] }
 0x18a   : >> { %v1633_v28 = vadd.f32 %v1604_v45, %v1577_v25  ;;  %v1432_v48 = vpop.f32.mrf.mxu0  ;;  %v1541_v41 = vpop.f32.mrf.mxu1  ;;  %v1368_v61 = vadd.f32 %v3499_v21, %v3498_v23  ;;  %v1369_v9 = vadd.f32 %v3505_v34, %v3504_v15  ;;  %v1221_v36 = vadd.f32 %v3506_v30, %v3202_v39 }
 0x18b   : >> { %v1579_v7 = vmax.f32 %v1365_v14, %v1563_v26  ;;  %v1564_v24 = vadd.f32 %v1539_v19, %v1455_v27  ;;  %v1456_v55 = vadd.f32 %v1432_v48, %v1217_v49  ;;  %v1660_v47 = vpack.c.bf16 %v1648_v37, %v1646_v50  ;;  %v3508_v19 = vld [vmem:[#allocation64_spill] sm:$0xff] }
 0x18c   : >> { %v1649_v11 = vmax.f32 %v1633_v28, 0.0  ;;  %v1436_v43 = vpop.f32.mrf.mxu0  ;;  %v1545_v0 = vpop.f32.mrf.mxu1  ;;  %v1634_v6 = vadd.f32 %v1609_v10, %v1578_v18  ;;  %v1370_v37 = vadd.f32 %v3508_v19, %v3507_v32 }
 0x18d   : >> { %v1580_v40 = vmax.f32 %v1366_v3, %v1564_v24  ;;  %v1565_v1 = vadd.f32 %v1541_v41, %v1456_v55  ;;  %v1635_v54 = vadd.f32 %v1609_v10, %v1579_v7  ;;  %v1457_v44 = vadd.f32 %v1436_v43, %v1218_v5  ;;  %v3509_v3 = vld [vmem:[#allocation66_spill] sm:$0xff]  ;;  %v1619_v28 = vpop.permute.xlu0 %1618  ;;  %v1624_v55 = vpop.permute.xlu1 %1623 }
 0x18e   : >> { %v1661_v35 = vpack.c.bf16 %v1649_v11, %v1647_v63  ;;  %v1438_v45 = vpop.f32.mrf.mxu0  ;;  %v1547_v46 = vpop.f32.mrf.mxu1  ;;  %v1650_v18 = vmax.f32 %v1634_v6, 0.0  ;;  %v1371_v50 = vadd.f32 %v3509_v3, %v1132_v52 }
 0x18f   : >> { %v1636_v14 = vadd.f32 %v1614_v8, %v1580_v40  ;;  %v1581_v22 = vmax.f32 %v1367_v51, %v1565_v1  ;;  %v1458_v29 = vadd.f32 %v1438_v45, %v1219_v57  ;;  %v1566_v53 = vadd.f32 %v1545_v0, %v1457_v44 }
 0x190   : >> { %2169 = vmatprep.mubr.msk.bf16.mxu0 %vm1666_vm2, %v1661_v35  ;;  %2199 = vmatprep.mubr.msk.bf16.mxu1 %vm1666_vm2, %v1661_v35  ;;  %v1440_v42 = vpop.f32.mrf.mxu0  ;;  %v1549_v2 = vpop.f32.mrf.mxu1  ;;  %v1651_v26 = vmax.f32 %v1635_v54, 0.0 }
 0x191   : >> { %v1652_v62 = vmax.f32 %v1636_v14, 0.0  ;;  %v1637_v49 = vadd.f32 %v1614_v8, %v1581_v22  ;;  %v1567_v12 = vadd.f32 %v1547_v46, %v1458_v29  ;;  %v1459_v25 = vadd.f32 %v1440_v42, %v1220_v20  ;;  %1724 = vmatmul.mubr.bf16.gmra.mxu0 %v1660_v47  ;;  %1792 = vmatmul.mubr.bf16.gmra.mxu1 %v1660_v47 }
 0x192   : >> { %v1582_v27 = vmax.f32 %v1368_v61, %v1566_v53  ;;  %v1442_v39 = vpop.f32.mrf.mxu0  ;;  %v1551_v48 = vpop.f32.mrf.mxu1 }
 0x193   : >> { %v1653_v59 = vmax.f32 %v1637_v49, 0.0  ;;  %v1583_v16 = vmax.f32 %v1369_v9, %v1567_v12  ;;  %v1568_v38 = vadd.f32 %v1549_v2, %v1459_v25  ;;  %v1460_v33 = vadd.f32 %v1442_v39, %v1221_v36 }
 0x194   : >> { %v1662_v41 = vpack.c.bf16 %v1652_v62, %v1650_v18  ;;  %v1638_v51 = vadd.f32 %v1619_v28, %v1582_v27 }
 0x195   : >> { %v1663_v56 = vpack.c.bf16 %v1653_v59, %v1651_v26  ;;  %v1584_v7 = vmax.f32 %v1370_v37, %v1568_v38  ;;  %v1569_v24 = vadd.f32 %v1551_v48, %v1460_v33  ;;  %v1639_v13 = vadd.f32 %v1619_v28, %v1583_v16 }
 0x196   : >> { %v1654_v63 = vmax.f32 %v1638_v51, 0.0 }
 0x197   : >> { %v1640_v60 = vadd.f32 %v1624_v55, %v1584_v7  ;;  %v1585_v5 = vmax.f32 %v1371_v50, %v1569_v24  ;;  %2170 = vmatprep.mubr.msk.bf16.mxu0 %vm1666_vm2, %v1663_v56  ;;  %2200 = vmatprep.mubr.msk.bf16.mxu1 %vm1666_vm2, %v1663_v56  ;;  %v1655_v43 = vmax.f32 %v1639_v13, 0.0 }
 0x199   : >> { %v1656_v11 = vmax.f32 %v1640_v60, 0.0  ;;  %v1641_v52 = vadd.f32 %v1624_v55, %v1585_v5  ;;  %1732 = vmatmul.mubr.bf16.gmra.mxu0 %v1662_v41  ;;  %1800 = vmatmul.mubr.bf16.gmra.mxu1 %v1662_v41 }
 0x19b   : >> { %v1657_v0 = vmax.f32 %v1641_v52, 0.0  ;;  %v1664_v47 = vpack.c.bf16 %v1656_v11, %v1654_v63 }
 0x19d   : >> { %v1665_v23 = vpack.c.bf16 %v1657_v0, %v1655_v43 }
 0x19f   : >> { %2171 = vmatprep.mubr.msk.bf16.mxu0 %vm1666_vm2, %v1665_v23  ;;  %2201 = vmatprep.mubr.msk.bf16.mxu1 %vm1666_vm2, %v1665_v23 }
 0x1a1   : >> { %1740 = vmatmul.mubr.bf16.gmra.mxu0 %v1664_v47  ;;  %1808 = vmatmul.mubr.bf16.gmra.mxu1 %v1664_v47 }
 0x248   : >> { %v1717_v21 = vpop.f32.mrf.mxu0  ;;  %v1785_v61 = vpop.f32.mrf.mxu1 }
 0x249   : >> { %v1816_v4 = vmax.f32 %v1717_v21, %v1785_v61 }
 0x24a   : >> { %v1719_v17 = vpop.f32.mrf.mxu0  ;;  %v1787_v57 = vpop.f32.mrf.mxu1 }
 0x24b   : >> { %v2221_v10 = vpack.c.bf16 %v1816_v4, %v1816_v4 }
 0x24c   : >> { %v1720_v8 = vpop.f32.mrf.mxu0  ;;  %v1788_v40 = vpop.f32.mrf.mxu1 }
 0x24d   : >> { %1860 = vst.msk [vmem:[%s3247_s6] sm:$0xf] %vm1859_vm4, %v2221_v10  ;;  %v1817_v1 = vmax.f32 %v1720_v8, %v1788_v40 }
 0x24e   : >> { %v1722_v35 = vpop.f32.mrf.mxu0  ;;  %v1790_v6 = vpop.f32.mrf.mxu1 }
 0x24f   : >> { %v2222_v54 = vpack.c.bf16 %v1817_v1, %v1817_v1 }
 0x251   : >> { %1861 = vst.msk [vmem:[%s3247_s6 + $0x4] sm:$0xf] %vm1859_vm4, %v2222_v54  ;;  %v1725_v44 = vpop.f32.mrf.mxu0  ;;  %v1793_v45 = vpop.f32.mrf.mxu1 }
 0x252   : >> { %v1818_v46 = vmax.f32 %v1725_v44, %v1793_v45 }
 0x253   : >> { %v1727_v58 = vpop.f32.mrf.mxu0  ;;  %v1795_v31 = vpop.f32.mrf.mxu1 }
 0x254   : >> { %v2223_v20 = vpack.c.bf16 %v1818_v46, %v1818_v46 }
 0x255   : >> { %v1728_v14 = vpop.f32.mrf.mxu0  ;;  %v1796_v22 = vpop.f32.mrf.mxu1 }
 0x256   : >> { %1862 = vst.msk [vmem:[%s3247_s6 + $0x8] sm:$0xf] %vm1859_vm4, %v2223_v20  ;;  %v1819_v29 = vmax.f32 %v1728_v14, %v1796_v22 }
 0x257   : >> { %v1730_v15 = vpop.f32.mrf.mxu0  ;;  %v1798_v34 = vpop.f32.mrf.mxu1 }
 0x258   : >> { %v2224_v9 = vpack.c.bf16 %v1819_v29, %v1819_v29 }
 0x259   : >> { %v1733_v30 = vpop.f32.mrf.mxu0  ;;  %v1801_v36 = vpop.f32.mrf.mxu1 }
 0x25a   : >> { %1863 = vst.msk [vmem:[%s3247_s6 + $0xc] sm:$0xf] %vm1859_vm4, %v2224_v9  ;;  %v1820_v53 = vmax.f32 %v1733_v30, %v1801_v36 }
 0x25b   : >> { %v1735_v42 = vpop.f32.mrf.mxu0  ;;  %v1803_v2 = vpop.f32.mrf.mxu1 }
 0x25c   : >> { %v2225_v62 = vpack.c.bf16 %v1820_v53, %v1820_v53 }
 0x25d   : >> { %v1736_v49 = vpop.f32.mrf.mxu0  ;;  %v1804_v12 = vpop.f32.mrf.mxu1 }
 0x25e   : >> { %1864 = vst.msk [vmem:[%s3247_s6 + $0x10] sm:$0xf] %vm1859_vm4, %v2225_v62  ;;  %v1821_v25 = vmax.f32 %v1736_v49, %v1804_v12 }
 0x25f   : >> { %v1738_v32 = vpop.f32.mrf.mxu0  ;;  %v1806_v19 = vpop.f32.mrf.mxu1 }
 0x260   : >> { %v2226_v37 = vpack.c.bf16 %v1821_v25, %v1821_v25 }
 0x261   : >> { %v1741_v18 = vpop.f32.mrf.mxu0  ;;  %v1809_v26 = vpop.f32.mrf.mxu1 }
 0x262   : >> { %1865 = vst.msk [vmem:[%s3247_s6 + $0x14] sm:$0xf] %vm1859_vm4, %v2226_v37  ;;  %v1822_v27 = vmax.f32 %v1741_v18, %v1809_v26 }
 0x263   : >> { %v1743_v39 = vpop.f32.mrf.mxu0  ;;  %v1811_v59 = vpop.f32.mrf.mxu1 }
 0x264   : >> { %v2227_v16 = vpack.c.bf16 %v1822_v27, %v1822_v27 }
 0x265   : >> { %v1744_v38 = vpop.f32.mrf.mxu0  ;;  %v1812_v33 = vpop.f32.mrf.mxu1 }
 0x266   : >> { %1866 = vst.msk [vmem:[%s3247_s6 + $0x18] sm:$0xf] %vm1859_vm4, %v2227_v16  ;;  %v1823_v3 = vmax.f32 %v1744_v38, %v1812_v33  ;;  %413 = sbr.rel (!%p411_p4) target bundleno = 33 (0x21), region = 80 }
 0x267   : >> { %v1746_v50 = vpop.f32.mrf.mxu0  ;;  %v1814_v28 = vpop.f32.mrf.mxu1 }
 0x268   : >> { %v2228_v48 = vpack.c.bf16 %v1823_v3, %v1823_v3 }
 0x26a   : >> { %1867 = vst.msk [vmem:[%s3247_s6 + $0x1c] sm:$0xf] %vm1859_vm4, %v2228_v48 }
 0x26b PF: > { %s13_s12 = sadd.s32 1, %s2302_s12  }
 0x26c   : > { %p10_p5 = scmp.ge.s32.totalorder %s13_s12, 4  }
 0x26e   :  { %12 = sbr.rel (!%p10_p5) target bundleno = 1 (0x1), region = 91 }

// kernel: my_simple_classifier_forward.7
= control target key start
LH: loop header
LB: loop body
LE: loop exit
PB: predicated region body
PF: predicated region fallthrough
CT: control target
= control target key end

     0   :  { %v1413_v27 = vlaneseq  ;;  %v10452_v35 = vmov 1966171168   ;;  %vm10454_vm0 = vmmov 0   ;;  %s12794_s0 = inlined_call_operand.vmem [shape: bf16[2,10816], index: 0, kind: input, shape index: {}]   ;;  %s12795_s1 = inlined_call_operand.vmem [shape: bf16[10816,120], index: 1, kind: input, shape index: {}]   ;;  %s12796_s2 = inlined_call_operand.vmem [shape: f32[1,120], index: 2, kind: input, shape index: {}]   ;;  %s12797_s3 = inlined_call_operand.vmem [shape: bf16[120,84], index: 3, kind: input, shape index: {}]   ;;  %s12798_s4 = inlined_call_operand.vmem [shape: f32[1,84], index: 4, kind: input, shape index: {}]   ;;  %s12799_s5 = inlined_call_operand.vmem [shape: bf16[84,21], index: 5, kind: input, shape index: {}]   ;;  %s12800_s6 = inlined_call_operand.vmem [shape: f32[1,21], index: 6, kind: input, shape index: {}]   ;;  %s12801_s7 = inlined_call_operand.hbm [shape: f32[2,21], index: 7, kind: output, shape index: {}]  }
   0x1   :  { %v9729_v0 = vld [vmem:[%s12795_s1 + $0x78] sm:$0xff]   ;;  %v9733_v4 = vld [vmem:[%s12795_s1 + $0x70] sm:$0xff]   ;;  %v9737_v8 = vld [vmem:[%s12795_s1 + $0x68] sm:$0xff]   ;;  %v1411_v36 = vunpack.c.l.s4 %v10452_v35 }
   0x2   :  { %v9730_v1 = vld [vmem:[%s12795_s1 + $0x38] sm:$0xff]   ;;  %8732 = vmatprep.subr.bf16.mxu0 %v9729_v0  ;;  %v9734_v5 = vld [vmem:[%s12795_s1 + $0x30] sm:$0xff]   ;;  %v9738_v9 = vld [vmem:[%s12795_s1 + $0x28] sm:$0xff]   ;;  %v1414_v32 = vshrl.u32 %v1413_v27, 7 }
   0x3   :  { %v9731_v2 = vld [vmem:[%s12795_s1 + $0xf8] sm:$0xff]   ;;  %8733 = vmatpush3.bf16.msra.mxu0 %v9730_v1  ;;  %v9735_v6 = vld [vmem:[%s12795_s1 + $0xf0] sm:$0xff]   ;;  %v9739_v10 = vld [vmem:[%s12795_s1 + $0xe8] sm:$0xff]   ;;  %v1412_v39 = vunpack.c.0.s8 %v1411_v36 }
   0x4   :  { %v9732_v3 = vld [vmem:[%s12795_s1 + $0xb8] sm:$0xff]   ;;  %8754 = vmatprep.subr.bf16.mxu1 %v9731_v2  ;;  %8734 = vmatprep.subr.bf16.mxu0 %v9733_v4  ;;  %v9736_v7 = vld [vmem:[%s12795_s1 + $0xb0] sm:$0xff]   ;;  %v9740_v11 = vld [vmem:[%s12795_s1 + $0xa8] sm:$0xff]  }
   0x5   :  { %8755 = vmatpush3.bf16.msra.mxu1 %v9732_v3  ;;  %v9741_v12 = vld [vmem:[%s12795_s1 + $0x60] sm:$0xff]   ;;  %v9745_v16 = vld [vmem:[%s12795_s1 + $0x58] sm:$0xff]   ;;  %v9749_v20 = vld [vmem:[%s12795_s1 + $0x50] sm:$0xff]   ;;  %v10601_v41 = vsub.s32 %v1412_v39, %v1414_v32 }
   0x6   :  { %8756 = vmatprep.subr.bf16.mxu1 %v9735_v6  ;;  %v9742_v13 = vld [vmem:[%s12795_s1 + $0x20] sm:$0xff]   ;;  %v9746_v17 = vld [vmem:[%s12795_s1 + $0x18] sm:$0xff]   ;;  %v9750_v21 = vld [vmem:[%s12795_s1 + $0x10] sm:$0xff]  }
   0x7   :  { %8735 = vmatpush3.bf16.msra.mxu0 %v9734_v5  ;;  %v9743_v14 = vld [vmem:[%s12795_s1 + $0xe0] sm:$0xff]   ;;  %v9747_v18 = vld [vmem:[%s12795_s1 + $0xd8] sm:$0xff]   ;;  %v9751_v22 = vld [vmem:[%s12795_s1 + $0xd0] sm:$0xff]  }
   0x8   :  { %8736 = vmatprep.subr.bf16.mxu0 %v9737_v8  ;;  %v9744_v15 = vld [vmem:[%s12795_s1 + $0xa0] sm:$0xff]   ;;  %v9748_v19 = vld [vmem:[%s12795_s1 + $0x98] sm:$0xff]   ;;  %v9752_v23 = vld [vmem:[%s12795_s1 + $0x90] sm:$0xff]  }
   0x9   :  { %8757 = vmatpush3.bf16.msra.mxu1 %v9736_v7  ;;  %v9753_v24 = vld [vmem:[%s12795_s1 + $0x48] sm:$0xff]   ;;  %v9757_v29 = vld [vmem:[%s12795_s1 + $0x40] sm:$0xff]   ;;  %v9762_v37 = vld [vmem:[%s12795_s1 + $0x178] sm:$0xff]  }
   0xa   :  { %8758 = vmatprep.subr.bf16.mxu1 %v9739_v10  ;;  %v9754_v25 = vld [vmem:[%s12795_s1 + $0x8] sm:$0xff]   ;;  %v9758_v30 = vld [vmem:[%s12795_s1] sm:$0xff]   ;;  %v9764_v40 = vld [vmem:[%s12795_s1 + $0x1f8] sm:$0xff]  }
   0xb   :  { %8737 = vmatpush3.bf16.msra.mxu0 %v9738_v9  ;;  %v9755_v26 = vld [vmem:[%s12795_s1 + $0xc8] sm:$0xff]   ;;  %v9759_v31 = vld [vmem:[%s12795_s1 + $0xc0] sm:$0xff]   ;;  %v9763_v47 = vld [vmem:[%s12795_s1 + $0x138] sm:$0xff]  }
   0xc   :  { %8738 = vmatprep.subr.bf16.mxu0 %v9741_v12  ;;  %v9756_v28 = vld [vmem:[%s12795_s1 + $0x88] sm:$0xff]   ;;  %v28_v33 = vld [vmem:[%s12794_s0] sm:$0xff]  ;;  %v9765_v49 = vld [vmem:[%s12795_s1 + $0x1b8] sm:$0xff]  }
   0xd   :  { %8759 = vmatpush3.bf16.msra.mxu1 %v9740_v11  ;;  %v9761_v34 = vld [vmem:[%s12795_s1 + $0x80] sm:$0xff]   ;;  %v1409_v38 = vcombine.high %v28_v33, %v28_v33  ;;  %v1416_v42 = vrot.slane %v28_v33, %v10601_v41  ;;  %v9766_v52 = vld [vmem:[%s12795_s1 + $0x170] sm:$0xff]   ;;  %v9770_v58 = vld [vmem:[%s12795_s1 + $0x168] sm:$0xff]  }
   0xe   :  { %8760 = vmatprep.subr.bf16.mxu1 %v9743_v14  ;;  %v9767_v54 = vld [vmem:[%s12795_s1 + $0x130] sm:$0xff]   ;;  %v9771_v59 = vld [vmem:[%s12795_s1 + $0x128] sm:$0xff]   ;;  %v9774_v62 = vld [vmem:[%s12795_s1 + $0x160] sm:$0xff]  }
   0xf   :  { %8739 = vmatpush3.bf16.msra.mxu0 %v9742_v13  ;;  %v10605_v43 = vrot.slane %v1409_v38, %v10601_v41  ;;  %v1424_v44 = vcombine.high %v1416_v42, %v1416_v42  ;;  %v1432_v45 = vrot.slane %v1416_v42, %v10601_v41  ;;  %v9768_v55 = vld [vmem:[%s12795_s1 + $0x1f0] sm:$0xff]   ;;  %v9772_v60 = vld [vmem:[%s12795_s1 + $0x1e8] sm:$0xff]   ;;  %v9775_v63 = vld [vmem:[%s12795_s1 + $0x120] sm:$0xff]  }
  0x10   :  { %8740 = vmatprep.subr.bf16.mxu0 %v9745_v16  ;;  %v9769_v57 = vld [vmem:[%s12795_s1 + $0x1b0] sm:$0xff]   ;;  %v9773_v61 = vld [vmem:[%s12795_s1 + $0x1a8] sm:$0xff]   ;;  %v9776_v0 = vld [vmem:[%s12795_s1 + $0x1e0] sm:$0xff]  }
  0x11   :  { %8761 = vmatpush3.bf16.msra.mxu1 %v9744_v15  ;;  %v1425_v46 = vcombine.high %v10605_v43, %v10605_v43  ;;  %v1446_v48 = vrot.slane %v1424_v44, %v10601_v41  ;;  %v1454_v51 = vcombine.high %v1432_v45, %v1432_v45  ;;  %v9777_v1 = vld [vmem:[%s12795_s1 + $0x1a0] sm:$0xff]   ;;  %v9778_v2 = vld [vmem:[%s12795_s1 + $0x158] sm:$0xff]   ;;  %v9782_v6 = vld [vmem:[%s12795_s1 + $0x150] sm:$0xff]  }
  0x12   :  { %8762 = vmatprep.subr.bf16.mxu1 %v9747_v18  ;;  %v9779_v3 = vld [vmem:[%s12795_s1 + $0x118] sm:$0xff]   ;;  %v9783_v7 = vld [vmem:[%s12795_s1 + $0x110] sm:$0xff]   ;;  %v9786_v10 = vld [vmem:[%s12795_s1 + $0x148] sm:$0xff]   ;;  %v1439_v18 = vrot.slane %v10605_v43, %v10601_v41 }
  0x13   :  { %8741 = vmatpush3.bf16.msra.mxu0 %v9746_v17  ;;  %v1453_v50 = vrot.slane %v1425_v46, %v10601_v41  ;;  %6114 = vmatprep.mubr.bf16.mxu0 %v1446_v48  ;;  %v1456_v53 = vcombine.high %v1446_v48, %v1446_v48  ;;  %v9780_v4 = vld [vmem:[%s12795_s1 + $0x1d8] sm:$0xff]   ;;  %v9784_v8 = vld [vmem:[%s12795_s1 + $0x1d0] sm:$0xff]   ;;  %v9787_v11 = vld [vmem:[%s12795_s1 + $0x108] sm:$0xff]  }
  0x14   :  { %8742 = vmatprep.subr.bf16.mxu0 %v9749_v20  ;;  %v9781_v5 = vld [vmem:[%s12795_s1 + $0x198] sm:$0xff]   ;;  %v9785_v9 = vld [vmem:[%s12795_s1 + $0x190] sm:$0xff]   ;;  %v9788_v12 = vld [vmem:[%s12795_s1 + $0x1c8] sm:$0xff]  }
  0x15   :  { %8763 = vmatpush3.bf16.msra.mxu1 %v9748_v19  ;;  %v1457_v56 = vcombine.high %v1453_v50, %v1453_v50  ;;  %6154 = vmatprep.mubr.bf16.mxu1 %v1456_v53  ;;  %v9789_v13 = vld [vmem:[%s12795_s1 + $0x188] sm:$0xff]   ;;  %v9790_v14 = vld [vmem:[%s12795_s1 + $0x140] sm:$0xff]   ;;  %v9794_v19 = vld [vmem:[%s12795_s1 + $0x278] sm:$0xff]  }
  0x16   :  { %8764 = vmatprep.subr.bf16.mxu1 %v9751_v22  ;;  %v9791_v15 = vld [vmem:[%s12795_s1 + $0x100] sm:$0xff]   ;;  %v9795_v20 = vld [vmem:[%s12795_s1 + $0x238] sm:$0xff]   ;;  %v9801_v27 = vld [vmem:[%s12795_s1 + $0x2b0] sm:$0xff]  }
  0x17   :  { %8743 = vmatpush3.bf16.msra.mxu0 %v9750_v21  ;;  %v9792_v16 = vld [vmem:[%s12795_s1 + $0x1c0] sm:$0xff]   ;;  %v9796_v21 = vld [vmem:[%s12795_s1 + $0x2f8] sm:$0xff]   ;;  %v9815_v42 = vld [vmem:[%s12795_s1 + $0x210] sm:$0xff]  }
  0x18   :  { %8744 = vmatprep.subr.bf16.mxu0 %v9753_v24  ;;  %v9793_v17 = vld [vmem:[%s12795_s1 + $0x180] sm:$0xff]   ;;  %v9797_v22 = vld [vmem:[%s12795_s1 + $0x2b8] sm:$0xff]   ;;  %v9798_v24 = vld [vmem:[%s12795_s1 + $0x270] sm:$0xff]  }
  0x19   :  { %8765 = vmatpush3.bf16.msra.mxu1 %v9752_v23  ;;  %v1455_v23 = vcombine.high %v1439_v18, %v1439_v18  ;;  %v9806_v32 = vld [vmem:[%s12795_s1 + $0x260] sm:$0xff]   ;;  %v9810_v36 = vld [vmem:[%s12795_s1 + $0x258] sm:$0xff]   ;;  %v9816_v43 = vld [vmem:[%s12795_s1 + $0x2d0] sm:$0xff]  }
  0x1a   :  { %8766 = vmatprep.subr.bf16.mxu1 %v9755_v26  ;;  %v9800_v26 = vld [vmem:[%s12795_s1 + $0x2f0] sm:$0xff]   ;;  %v9807_v33 = vld [vmem:[%s12795_s1 + $0x220] sm:$0xff]   ;;  %v9812_v38 = vld [vmem:[%s12795_s1 + $0x2d8] sm:$0xff]  }
  0x1b   :  { %8745 = vmatpush3.bf16.msra.mxu0 %v9754_v25  ;;  %v9799_v25 = vld [vmem:[%s12795_s1 + $0x230] sm:$0xff]   ;;  %v9809_v35 = vld [vmem:[%s12795_s1 + $0x2a0] sm:$0xff]   ;;  %v9813_v39 = vld [vmem:[%s12795_s1 + $0x298] sm:$0xff]  }
  0x1c   :  { %8746 = vmatprep.subr.bf16.mxu0 %v9757_v29  ;;  %v9803_v29 = vld [vmem:[%s12795_s1 + $0x228] sm:$0xff]   ;;  %v9817_v44 = vld [vmem:[%s12795_s1 + $0x290] sm:$0xff]  }
  0x1d   :  { %8767 = vmatpush3.bf16.msra.mxu1 %v9756_v28  ;;  %v9802_v28 = vld [vmem:[%s12795_s1 + $0x268] sm:$0xff]  }
  0x1e   :  { %8768 = vmatprep.subr.bf16.mxu1 %v9759_v31  ;;  %v9805_v31 = vld [vmem:[%s12795_s1 + $0x2a8] sm:$0xff]  }
  0x1f   :  { %8747 = vmatpush3.bf16.msra.mxu0 %v9758_v30  ;;  %v9804_v30 = vld [vmem:[%s12795_s1 + $0x2e8] sm:$0xff]  }
  0x20   :  { %8776 = vmatprep.subr.bf16.mxu0 %v9762_v37  ;;  %v9811_v37 = vld [vmem:[%s12795_s1 + $0x218] sm:$0xff]   ;;  %v29_v46 = vld [vmem:[%s12794_s0 + $0x8] sm:$0xff] }
  0x21   :  { %8769 = vmatpush3.bf16.msra.mxu1 %v9761_v34  ;;  %v9808_v34 = vld [vmem:[%s12795_s1 + $0x2e0] sm:$0xff]   ;;  %v1465_v48 = vrot.slane %v29_v46, %v10601_v41 }
  0x22   :  { %8798 = vmatprep.subr.bf16.mxu1 %v9764_v40  ;;  %6115 = vmatmul.mubr.bf16.vlgmr.msra.gmra.mxu0 %v1432_v45  ;;  %v9814_v40 = vld [vmem:[%s12795_s1 + $0x250] sm:$0xff]   ;;  %v9818_v45 = vld [vmem:[%s12795_s1 + $0x248] sm:$0xff]  }
  0x23   :  { %8777 = vmatpush3.bf16.msra.mxu0 %v9763_v47  ;;  %6194 = vmatprep.mubr.bf16.mxu0 %v1453_v50  ;;  %v9819_v47 = vld [vmem:[%s12795_s1 + $0x208] sm:$0xff]  }
  0x24   :  { %6155 = vmatmul.mubr.bf16.vlgmr.msra.gmra.mxu1 %v1454_v51  ;;  %8778 = vmatprep.subr.bf16.mxu0 %v9766_v52  ;;  %v9820_v50 = vld [vmem:[%s12795_s1 + $0x2c8] sm:$0xff]   ;;  %v1473_v52 = vcombine.high %v1465_v48, %v1465_v48 }
  0x25   :  { %8799 = vmatpush3.bf16.msra.mxu1 %v9765_v49  ;;  %6234 = vmatprep.mubr.bf16.mxu1 %v1457_v56  ;;  %v1458_v49 = vcombine.high %v29_v46, %v29_v46  ;;  %v9821_v51 = vld [vmem:[%s12795_s1 + $0x288] sm:$0xff]  }
  0x26   :  { %8800 = vmatprep.subr.bf16.mxu1 %v9768_v55  ;;  %v9823_v55 = vld [vmem:[%s12795_s1 + $0x200] sm:$0xff]   ;;  %v1495_v56 = vrot.slane %v1473_v52, %v10601_v41  ;;  %v9869_v46 = vld [vmem:[%s12795_s1 + $0x4e8] sm:$0xff]   ;;  %v9875_v52 = vld [vmem:[%s12795_s1 + $0x458] sm:$0xff]  }
  0x27   :  { %8779 = vmatpush3.bf16.msra.mxu0 %v9767_v54  ;;  %v10793_v53 = vrot.slane %v1458_v49, %v10601_v41  ;;  %v9822_v54 = vld [vmem:[%s12795_s1 + $0x240] sm:$0xff]  }
  0x28   :  { %8780 = vmatprep.subr.bf16.mxu0 %v9770_v58  ;;  %v9824_v58 = vld [vmem:[%s12795_s1 + $0x2c0] sm:$0xff]  }
  0x29   :  { %8801 = vmatpush3.bf16.msra.mxu1 %v9769_v57  ;;  %v1474_v57 = vcombine.high %v10793_v53, %v10793_v53  ;;  %v9872_v49 = vld [vmem:[%s12795_s1 + $0x420] sm:$0xff]  }
  0x2a   :  { %8802 = vmatprep.subr.bf16.mxu1 %v9772_v60  ;;  %v1505_v60 = vcombine.high %v1495_v56, %v1495_v56 }
  0x2b   :  { %8781 = vmatpush3.bf16.msra.mxu0 %v9771_v59  ;;  %v9825_v59 = vld [vmem:[%s12795_s1 + $0x280] sm:$0xff]  }
  0x2c   :  { %8782 = vmatprep.subr.bf16.mxu0 %v9774_v62  ;;  %v9826_v62 = vld [vmem:[%s12795_s1 + $0x378] sm:$0xff]  }
  0x2d   :  { %8803 = vmatpush3.bf16.msra.mxu1 %v9773_v61  ;;  %v1481_v61 = vrot.slane %v1465_v48, %v10601_v41  ;;  %v9871_v48 = vld [vmem:[%s12795_s1 + $0x460] sm:$0xff]  }
  0x2e   :  { %8804 = vmatprep.subr.bf16.mxu1 %v9776_v0  ;;  %v1502_v0 = vrot.slane %v1474_v57, %v10601_v41  ;;  %v9880_v57 = vld [vmem:[%s12795_s1 + $0x410] sm:$0xff]  }
  0x2f   :  { %8783 = vmatpush3.bf16.msra.mxu0 %v9775_v63  ;;  %v9827_v63 = vld [vmem:[%s12795_s1 + $0x338] sm:$0xff]  }
  0x30   :  { %8784 = vmatprep.subr.bf16.mxu0 %v9778_v2  ;;  %v9829_v2 = vld [vmem:[%s12795_s1 + $0x3b8] sm:$0xff]  }
  0x31   :  { %8805 = vmatpush3.bf16.msra.mxu1 %v9777_v1  ;;  %v9828_v1 = vld [vmem:[%s12795_s1 + $0x3f8] sm:$0xff]  }
  0x32   :  { %8806 = vmatprep.subr.bf16.mxu1 %v9780_v4  ;;  %v9830_v4 = vld [vmem:[%s12795_s1 + $0x370] sm:$0xff]  }
  0x33   :  { %8785 = vmatpush3.bf16.msra.mxu0 %v9779_v3  ;;  %v1503_v3 = vcombine.high %v1481_v61, %v1481_v61 }
  0x34   :  { %8786 = vmatprep.subr.bf16.mxu0 %v9782_v6  ;;  %v1506_v6 = vcombine.high %v1502_v0, %v1502_v0 }
  0x35   :  { %8807 = vmatpush3.bf16.msra.mxu1 %v9781_v5  ;;  %v9831_v5 = vld [vmem:[%s12795_s1 + $0x330] sm:$0xff]  }
  0x36   :  { %8808 = vmatprep.subr.bf16.mxu1 %v9784_v8  ;;  %v9833_v8 = vld [vmem:[%s12795_s1 + $0x3b0] sm:$0xff]  }
  0x37   :  { %8787 = vmatpush3.bf16.msra.mxu0 %v9783_v7  ;;  %v9832_v7 = vld [vmem:[%s12795_s1 + $0x3f0] sm:$0xff]  }
  0x38   :  { %8788 = vmatprep.subr.bf16.mxu0 %v9786_v10  ;;  %v9835_v10 = vld [vmem:[%s12795_s1 + $0x328] sm:$0xff]  }
  0x39   :  { %8809 = vmatpush3.bf16.msra.mxu1 %v9785_v9  ;;  %v9834_v9 = vld [vmem:[%s12795_s1 + $0x368] sm:$0xff]  }
  0x3a   :  { %8810 = vmatprep.subr.bf16.mxu1 %v9788_v12  ;;  %v9837_v12 = vld [vmem:[%s12795_s1 + $0x3a8] sm:$0xff]  }
  0x3b   :  { %8789 = vmatpush3.bf16.msra.mxu0 %v9787_v11  ;;  %v9836_v11 = vld [vmem:[%s12795_s1 + $0x3e8] sm:$0xff]  }
  0x3c   :  { %8790 = vmatprep.subr.bf16.mxu0 %v9790_v14  ;;  %v9839_v14 = vld [vmem:[%s12795_s1 + $0x320] sm:$0xff]  }
  0x3d   :  { %8811 = vmatpush3.bf16.msra.mxu1 %v9789_v13  ;;  %v9838_v13 = vld [vmem:[%s12795_s1 + $0x360] sm:$0xff]  }
  0x3e   :  { %8812 = vmatprep.subr.bf16.mxu1 %v9792_v16  ;;  %v9841_v16 = vld [vmem:[%s12795_s1 + $0x3a0] sm:$0xff]  }
  0x3f   :  { %8791 = vmatpush3.bf16.msra.mxu0 %v9791_v15  ;;  %v9840_v15 = vld [vmem:[%s12795_s1 + $0x3e0] sm:$0xff]  }
  0x40   :  { %8820 = vmatprep.subr.bf16.mxu0 %v9794_v19  ;;  %v9844_v19 = vld [vmem:[%s12795_s1 + $0x3d8] sm:$0xff]  }
  0x41   :  { %8813 = vmatpush3.bf16.msra.mxu1 %v9793_v17  ;;  %v9842_v17 = vld [vmem:[%s12795_s1 + $0x358] sm:$0xff]  }
  0x42   :  { %6195 = vmatmul.mubr.bf16.vlgmr.msra.gmra.mxu0 %v1439_v18  ;;  %8842 = vmatprep.subr.bf16.mxu1 %v9796_v21  ;;  %v9843_v18 = vld [vmem:[%s12795_s1 + $0x318] sm:$0xff]   ;;  %v9846_v21 = vld [vmem:[%s12795_s1 + $0x350] sm:$0xff]  }
  0x43   :  { %8821 = vmatpush3.bf16.msra.mxu0 %v9795_v20  ;;  %6274 = vmatprep.mubr.bf16.mxu0 %v1495_v56  ;;  %v9845_v20 = vld [vmem:[%s12795_s1 + $0x398] sm:$0xff]   ;;  %v9879_v56 = vld [vmem:[%s12795_s1 + $0x450] sm:$0xff]  }
  0x44   :  { %6235 = vmatmul.mubr.bf16.vlgmr.msra.gmra.mxu1 %v1455_v23  ;;  %8822 = vmatprep.subr.bf16.mxu0 %v9798_v24  ;;  %v9848_v23 = vld [vmem:[%s12795_s1 + $0x3d0] sm:$0xff]  }
  0x45   :  { %8843 = vmatpush3.bf16.msra.mxu1 %v9797_v22  ;;  %6314 = vmatprep.mubr.bf16.mxu1 %v1505_v60  ;;  %v9847_v22 = vld [vmem:[%s12795_s1 + $0x310] sm:$0xff]   ;;  %v9883_v60 = vld [vmem:[%s12795_s1 + $0x448] sm:$0xff]  }
  0x46   :  { %8844 = vmatprep.subr.bf16.mxu1 %v9800_v26  ;;  %v9849_v24 = vld [vmem:[%s12795_s1 + $0x390] sm:$0xff]   ;;  %v9851_v26 = vld [vmem:[%s12795_s1 + $0x308] sm:$0xff]  }
  0x47   :  { %8823 = vmatpush3.bf16.msra.mxu0 %v9799_v25  ;;  %v9850_v25 = vld [vmem:[%s12795_s1 + $0x348] sm:$0xff]  }
  0x48   :  { %8824 = vmatprep.subr.bf16.mxu0 %v9802_v28  ;;  %v9853_v28 = vld [vmem:[%s12795_s1 + $0x388] sm:$0xff]  }
  0x49   :  { %8845 = vmatpush3.bf16.msra.mxu1 %v9801_v27  ;;  %v9852_v27 = vld [vmem:[%s12795_s1 + $0x3c8] sm:$0xff]  }
  0x4a   :  { %8846 = vmatprep.subr.bf16.mxu1 %v9804_v30  ;;  %v9855_v30 = vld [vmem:[%s12795_s1 + $0x300] sm:$0xff]  }
  0x4b   :  { %8825 = vmatpush3.bf16.msra.mxu0 %v9803_v29  ;;  %v9854_v29 = vld [vmem:[%s12795_s1 + $0x340] sm:$0xff]  }
  0x4c   :  { %8826 = vmatprep.subr.bf16.mxu0 %v9806_v32  ;;  %v9858_v32 = vld [vmem:[%s12795_s1 + $0x380] sm:$0xff]  }
  0x4d   :  { %8847 = vmatpush3.bf16.msra.mxu1 %v9805_v31  ;;  %v9856_v31 = vld [vmem:[%s12795_s1 + $0x3c0] sm:$0xff]  }
  0x4e   :  { %8848 = vmatprep.subr.bf16.mxu1 %v9808_v34  ;;  %v9859_v34 = vld [vmem:[%s12795_s1 + $0x478] sm:$0xff]  }
  0x4f   :  { %8827 = vmatpush3.bf16.msra.mxu0 %v9807_v33  ;;  %v1488_v33 = vrot.slane %v10793_v53, %v10601_v41  ;;  %v9876_v53 = vld [vmem:[%s12795_s1 + $0x418] sm:$0xff]  }
  0x50   :  { %8828 = vmatprep.subr.bf16.mxu0 %v9810_v36  ;;  %v9861_v36 = vld [vmem:[%s12795_s1 + $0x4f8] sm:$0xff]  }
  0x51   :  { %8849 = vmatpush3.bf16.msra.mxu1 %v9809_v35  ;;  %v9860_v35 = vld [vmem:[%s12795_s1 + $0x438] sm:$0xff]  }
  0x52   :  { %8850 = vmatprep.subr.bf16.mxu1 %v9812_v38  ;;  %v1504_v38 = vcombine.high %v1488_v33, %v1488_v33 }
  0x53   :  { %8829 = vmatpush3.bf16.msra.mxu0 %v9811_v37  ;;  %v9862_v37 = vld [vmem:[%s12795_s1 + $0x4b8] sm:$0xff]  }
  0x54   :  { %8830 = vmatprep.subr.bf16.mxu0 %v9814_v40  ;;  %v9864_v40 = vld [vmem:[%s12795_s1 + $0x430] sm:$0xff]  }
  0x55   :  { %8851 = vmatpush3.bf16.msra.mxu1 %v9813_v39  ;;  %v9863_v39 = vld [vmem:[%s12795_s1 + $0x470] sm:$0xff]  }
  0x56   :  { %8852 = vmatprep.subr.bf16.mxu1 %v9816_v43  ;;  %v9866_v43 = vld [vmem:[%s12795_s1 + $0x4b0] sm:$0xff]  }
  0x57   :  { %8831 = vmatpush3.bf16.msra.mxu0 %v9815_v42  ;;  %v9865_v42 = vld [vmem:[%s12795_s1 + $0x4f0] sm:$0xff]  }
  0x58   :  { %8832 = vmatprep.subr.bf16.mxu0 %v9818_v45  ;;  %v9868_v45 = vld [vmem:[%s12795_s1 + $0x428] sm:$0xff]  }
  0x59   :  { %8853 = vmatpush3.bf16.msra.mxu1 %v9817_v44  ;;  %v9867_v44 = vld [vmem:[%s12795_s1 + $0x468] sm:$0xff]  }
  0x5a   :  { %8854 = vmatprep.subr.bf16.mxu1 %v9820_v50  ;;  %v9873_v50 = vld [vmem:[%s12795_s1 + $0x4e0] sm:$0xff]  }
  0x5b   :  { %8833 = vmatpush3.bf16.msra.mxu0 %v9819_v47  ;;  %v9870_v47 = vld [vmem:[%s12795_s1 + $0x4a8] sm:$0xff]  }
  0x5c   :  { %8834 = vmatprep.subr.bf16.mxu0 %v9822_v54  ;;  %v9877_v54 = vld [vmem:[%s12795_s1 + $0x4d8] sm:$0xff]  }
  0x5d   :  { %8855 = vmatpush3.bf16.msra.mxu1 %v9821_v51  ;;  %v9874_v51 = vld [vmem:[%s12795_s1 + $0x4a0] sm:$0xff]  }
  0x5e   :  { %8856 = vmatprep.subr.bf16.mxu1 %v9824_v58  ;;  %v9881_v58 = vld [vmem:[%s12795_s1 + $0x4d0] sm:$0xff]  }
  0x5f   :  { %8835 = vmatpush3.bf16.msra.mxu0 %v9823_v55  ;;  %v9878_v55 = vld [vmem:[%s12795_s1 + $0x498] sm:$0xff]  }
  0x60   :  { %8864 = vmatprep.subr.bf16.mxu0 %v9826_v62  ;;  %v9884_v62 = vld [vmem:[%s12795_s1 + $0x408] sm:$0xff]  }
  0x61   :  { %8857 = vmatpush3.bf16.msra.mxu1 %v9825_v59  ;;  %v9882_v59 = vld [vmem:[%s12795_s1 + $0x490] sm:$0xff]  }
  0x62   :  { %6275 = vmatmul.mubr.bf16.vlgmr.msra.gmra.mxu0 %v1481_v61  ;;  %8886 = vmatprep.subr.bf16.mxu1 %v9828_v1  ;;  %v30_v61 = vld [vmem:[%s12794_s0 + $0x10] sm:$0xff]  ;;  %v9885_v1 = vld [vmem:[%s12795_s1 + $0x4c8] sm:$0xff]  }
  0x63   :  { %8865 = vmatpush3.bf16.msra.mxu0 %v9827_v63  ;;  %6354 = vmatprep.mubr.bf16.mxu0 %v1502_v0  ;;  %v1514_v63 = vrot.slane %v30_v61, %v10601_v41  ;;  %v1507_v0 = vcombine.high %v30_v61, %v30_v61  ;;  %v9934_v61 = vld [vmem:[%s12795_s1 + $0x6e8] sm:$0xff]  }
  0x64   :  { %6315 = vmatmul.mubr.bf16.vlgmr.msra.gmra.mxu1 %v1503_v3  ;;  %8866 = vmatprep.subr.bf16.mxu0 %v9830_v4 }
  0x65   :  { %8887 = vmatpush3.bf16.msra.mxu1 %v9829_v2  ;;  %6394 = vmatprep.mubr.bf16.mxu1 %v1506_v6  ;;  %v9886_v2 = vld [vmem:[%s12795_s1 + $0x488] sm:$0xff]   ;;  %v1522_v3 = vcombine.high %v1514_v63, %v1514_v63  ;;  %v10999_v4 = vrot.slane %v1507_v0, %v10601_v41  ;;  %v9888_v6 = vld [vmem:[%s12795_s1 + $0x400] sm:$0xff]  }
  0x66   :  { %8888 = vmatprep.subr.bf16.mxu1 %v9832_v7  ;;  %v9937_v0 = vld [vmem:[%s12795_s1 + $0x620] sm:$0xff]  }
  0x67   :  { %8867 = vmatpush3.bf16.msra.mxu0 %v9831_v5  ;;  %v9887_v5 = vld [vmem:[%s12795_s1 + $0x440] sm:$0xff]   ;;  %v1544_v7 = vrot.slane %v1522_v3, %v10601_v41  ;;  %v9940_v3 = vld [vmem:[%s12795_s1 + $0x658] sm:$0xff]  }
  0x68   :  { %8868 = vmatprep.subr.bf16.mxu0 %v9834_v9  ;;  %v9889_v9 = vld [vmem:[%s12795_s1 + $0x4c0] sm:$0xff]  }
  0x69   :  { %8889 = vmatpush3.bf16.msra.mxu1 %v9833_v8  ;;  %v1523_v8 = vcombine.high %v10999_v4, %v10999_v4 }
  0x6a   :  { %8890 = vmatprep.subr.bf16.mxu1 %v9836_v11  ;;  %v1554_v11 = vcombine.high %v1544_v7, %v1544_v7 }
  0x6b   :  { %8869 = vmatpush3.bf16.msra.mxu0 %v9835_v10  ;;  %v9890_v10 = vld [vmem:[%s12795_s1 + $0x480] sm:$0xff]  }
  0x6c   :  { %8870 = vmatprep.subr.bf16.mxu0 %v9838_v13  ;;  %v9891_v13 = vld [vmem:[%s12795_s1 + $0x578] sm:$0xff]  }
  0x6d   :  { %8891 = vmatpush3.bf16.msra.mxu1 %v9837_v12  ;;  %v1530_v12 = vrot.slane %v1514_v63, %v10601_v41  ;;  %v9936_v63 = vld [vmem:[%s12795_s1 + $0x660] sm:$0xff]  }
  0x6e   :  { %8892 = vmatprep.subr.bf16.mxu1 %v9840_v15  ;;  %v1551_v15 = vrot.slane %v1523_v8, %v10601_v41  ;;  %v9945_v8 = vld [vmem:[%s12795_s1 + $0x610] sm:$0xff]  }
  0x6f   :  { %8871 = vmatpush3.bf16.msra.mxu0 %v9839_v14  ;;  %v9892_v14 = vld [vmem:[%s12795_s1 + $0x538] sm:$0xff]  }
  0x70   :  { %8872 = vmatprep.subr.bf16.mxu0 %v9842_v17  ;;  %v9894_v17 = vld [vmem:[%s12795_s1 + $0x5b8] sm:$0xff]  }
  0x71   :  { %8893 = vmatpush3.bf16.msra.mxu1 %v9841_v16  ;;  %v9893_v16 = vld [vmem:[%s12795_s1 + $0x5f8] sm:$0xff]  }
  0x72   :  { %8894 = vmatprep.subr.bf16.mxu1 %v9844_v19  ;;  %v9895_v19 = vld [vmem:[%s12795_s1 + $0x570] sm:$0xff]  }
  0x73   :  { %8873 = vmatpush3.bf16.msra.mxu0 %v9843_v18  ;;  %v1552_v18 = vcombine.high %v1530_v12, %v1530_v12 }
  0x74   :  { %8874 = vmatprep.subr.bf16.mxu0 %v9846_v21  ;;  %v1555_v21 = vcombine.high %v1551_v15, %v1551_v15 }
  0x75   :  { %8895 = vmatpush3.bf16.msra.mxu1 %v9845_v20  ;;  %v9896_v20 = vld [vmem:[%s12795_s1 + $0x530] sm:$0xff]  }
  0x76   :  { %8896 = vmatprep.subr.bf16.mxu1 %v9848_v23  ;;  %v9898_v23 = vld [vmem:[%s12795_s1 + $0x5b0] sm:$0xff]  }
  0x77   :  { %8875 = vmatpush3.bf16.msra.mxu0 %v9847_v22  ;;  %v9897_v22 = vld [vmem:[%s12795_s1 + $0x5f0] sm:$0xff]  }
  0x78   :  { %8876 = vmatprep.subr.bf16.mxu0 %v9850_v25  ;;  %v9900_v25 = vld [vmem:[%s12795_s1 + $0x528] sm:$0xff]  }
  0x79   :  { %8897 = vmatpush3.bf16.msra.mxu1 %v9849_v24  ;;  %v9899_v24 = vld [vmem:[%s12795_s1 + $0x568] sm:$0xff]  }
  0x7a   :  { %8898 = vmatprep.subr.bf16.mxu1 %v9852_v27  ;;  %v9902_v27 = vld [vmem:[%s12795_s1 + $0x5a8] sm:$0xff]  }
  0x7b   :  { %8877 = vmatpush3.bf16.msra.mxu0 %v9851_v26  ;;  %v9901_v26 = vld [vmem:[%s12795_s1 + $0x5e8] sm:$0xff]  }
  0x7c   :  { %8878 = vmatprep.subr.bf16.mxu0 %v9854_v29  ;;  %v9904_v29 = vld [vmem:[%s12795_s1 + $0x520] sm:$0xff]  }
  0x7d   :  { %8899 = vmatpush3.bf16.msra.mxu1 %v9853_v28  ;;  %v9903_v28 = vld [vmem:[%s12795_s1 + $0x560] sm:$0xff]  }
  0x7e   :  { %8900 = vmatprep.subr.bf16.mxu1 %v9856_v31  ;;  %v9906_v31 = vld [vmem:[%s12795_s1 + $0x5a0] sm:$0xff]  }
  0x7f   :  { %8879 = vmatpush3.bf16.msra.mxu0 %v9855_v30  ;;  %v9905_v30 = vld [vmem:[%s12795_s1 + $0x5e0] sm:$0xff]  }
  0x80   :  { %8908 = vmatprep.subr.bf16.mxu0 %v9859_v34  ;;  %v9909_v34 = vld [vmem:[%s12795_s1 + $0x5d8] sm:$0xff]  }
  0x81   :  { %8901 = vmatpush3.bf16.msra.mxu1 %v9858_v32  ;;  %v9907_v32 = vld [vmem:[%s12795_s1 + $0x558] sm:$0xff]  }
  0x82   :  { %6355 = vmatmul.mubr.bf16.vlgmr.msra.gmra.mxu0 %v1488_v33  ;;  %8930 = vmatprep.subr.bf16.mxu1 %v9861_v36  ;;  %v9908_v33 = vld [vmem:[%s12795_s1 + $0x518] sm:$0xff]   ;;  %v9911_v36 = vld [vmem:[%s12795_s1 + $0x550] sm:$0xff]  }
  0x83   :  { %8909 = vmatpush3.bf16.msra.mxu0 %v9860_v35  ;;  %6434 = vmatprep.mubr.bf16.mxu0 %v1544_v7  ;;  %v9910_v35 = vld [vmem:[%s12795_s1 + $0x598] sm:$0xff]   ;;  %v9944_v7 = vld [vmem:[%s12795_s1 + $0x650] sm:$0xff]  }
  0x84   :  { %6395 = vmatmul.mubr.bf16.vlgmr.msra.gmra.mxu1 %v1504_v38  ;;  %8910 = vmatprep.subr.bf16.mxu0 %v9863_v39  ;;  %v9913_v38 = vld [vmem:[%s12795_s1 + $0x5d0] sm:$0xff]  }
  0x85   :  { %8931 = vmatpush3.bf16.msra.mxu1 %v9862_v37  ;;  %6474 = vmatprep.mubr.bf16.mxu1 %v1554_v11  ;;  %v9912_v37 = vld [vmem:[%s12795_s1 + $0x510] sm:$0xff]   ;;  %v9948_v11 = vld [vmem:[%s12795_s1 + $0x648] sm:$0xff]  }
  0x86   :  { %8932 = vmatprep.subr.bf16.mxu1 %v9865_v42  ;;  %v9914_v39 = vld [vmem:[%s12795_s1 + $0x590] sm:$0xff]   ;;  %v9916_v42 = vld [vmem:[%s12795_s1 + $0x508] sm:$0xff]  }
  0x87   :  { %8911 = vmatpush3.bf16.msra.mxu0 %v9864_v40  ;;  %v9915_v40 = vld [vmem:[%s12795_s1 + $0x548] sm:$0xff]  }
  0x88   :  { %8912 = vmatprep.subr.bf16.mxu0 %v9867_v44  ;;  %v9918_v44 = vld [vmem:[%s12795_s1 + $0x588] sm:$0xff]  }
  0x89   :  { %8933 = vmatpush3.bf16.msra.mxu1 %v9866_v43  ;;  %v9917_v43 = vld [vmem:[%s12795_s1 + $0x5c8] sm:$0xff]  }
  0x8a   :  { %8934 = vmatprep.subr.bf16.mxu1 %v9869_v46  ;;  %v9920_v46 = vld [vmem:[%s12795_s1 + $0x500] sm:$0xff]  }
  0x8b   :  { %8913 = vmatpush3.bf16.msra.mxu0 %v9868_v45  ;;  %v9919_v45 = vld [vmem:[%s12795_s1 + $0x540] sm:$0xff]  }
  0x8c   :  { %8914 = vmatprep.subr.bf16.mxu0 %v9871_v48  ;;  %v9923_v48 = vld [vmem:[%s12795_s1 + $0x580] sm:$0xff]  }
  0x8d   :  { %8935 = vmatpush3.bf16.msra.mxu1 %v9870_v47  ;;  %v9921_v47 = vld [vmem:[%s12795_s1 + $0x5c0] sm:$0xff]  }
  0x8e   :  { %8936 = vmatprep.subr.bf16.mxu1 %v9873_v50  ;;  %v9924_v50 = vld [vmem:[%s12795_s1 + $0x678] sm:$0xff]  }
  0x8f   :  { %8915 = vmatpush3.bf16.msra.mxu0 %v9872_v49  ;;  %v1537_v49 = vrot.slane %v10999_v4, %v10601_v41  ;;  %v9941_v4 = vld [vmem:[%s12795_s1 + $0x618] sm:$0xff]  }
  0x90   :  { %8916 = vmatprep.subr.bf16.mxu0 %v9875_v52  ;;  %v9926_v52 = vld [vmem:[%s12795_s1 + $0x6f8] sm:$0xff]  }
  0x91   :  { %8937 = vmatpush3.bf16.msra.mxu1 %v9874_v51  ;;  %v9925_v51 = vld [vmem:[%s12795_s1 + $0x638] sm:$0xff]  }
  0x92   :  { %8938 = vmatprep.subr.bf16.mxu1 %v9877_v54  ;;  %v1553_v54 = vcombine.high %v1537_v49, %v1537_v49 }
  0x93   :  { %8917 = vmatpush3.bf16.msra.mxu0 %v9876_v53  ;;  %v9927_v53 = vld [vmem:[%s12795_s1 + $0x6b8] sm:$0xff]  }
  0x94   :  { %8918 = vmatprep.subr.bf16.mxu0 %v9879_v56  ;;  %v9929_v56 = vld [vmem:[%s12795_s1 + $0x630] sm:$0xff]  }
  0x95   :  { %8939 = vmatpush3.bf16.msra.mxu1 %v9878_v55  ;;  %v9928_v55 = vld [vmem:[%s12795_s1 + $0x670] sm:$0xff]  }
  0x96   :  { %8940 = vmatprep.subr.bf16.mxu1 %v9881_v58  ;;  %v9931_v58 = vld [vmem:[%s12795_s1 + $0x6b0] sm:$0xff]  }
  0x97   :  { %8919 = vmatpush3.bf16.msra.mxu0 %v9880_v57  ;;  %v9930_v57 = vld [vmem:[%s12795_s1 + $0x6f0] sm:$0xff]  }
  0x98   :  { %8920 = vmatprep.subr.bf16.mxu0 %v9883_v60  ;;  %v9933_v60 = vld [vmem:[%s12795_s1 + $0x628] sm:$0xff]  }
  0x99   :  { %8941 = vmatpush3.bf16.msra.mxu1 %v9882_v59  ;;  %v9932_v59 = vld [vmem:[%s12795_s1 + $0x668] sm:$0xff]  }
  0x9a   :  { %8942 = vmatprep.subr.bf16.mxu1 %v9885_v1  ;;  %v9938_v1 = vld [vmem:[%s12795_s1 + $0x6e0] sm:$0xff]  }
  0x9b   :  { %8921 = vmatpush3.bf16.msra.mxu0 %v9884_v62  ;;  %v9935_v62 = vld [vmem:[%s12795_s1 + $0x6a8] sm:$0xff]  }
  0x9c   :  { %8922 = vmatprep.subr.bf16.mxu0 %v9887_v5  ;;  %v9942_v5 = vld [vmem:[%s12795_s1 + $0x6d8] sm:$0xff]  }
  0x9d   :  { %8943 = vmatpush3.bf16.msra.mxu1 %v9886_v2  ;;  %v9939_v2 = vld [vmem:[%s12795_s1 + $0x6a0] sm:$0xff]  }
  0x9e   :  { %8944 = vmatprep.subr.bf16.mxu1 %v9889_v9  ;;  %v9946_v9 = vld [vmem:[%s12795_s1 + $0x6d0] sm:$0xff]  }
  0x9f   :  { %8923 = vmatpush3.bf16.msra.mxu0 %v9888_v6  ;;  %v9943_v6 = vld [vmem:[%s12795_s1 + $0x698] sm:$0xff]  }
  0xa0   :  { %8952 = vmatprep.subr.bf16.mxu0 %v9891_v13  ;;  %v9950_v13 = vld [vmem:[%s12795_s1 + $0x6c8] sm:$0xff]  }
  0xa1   :  { %8945 = vmatpush3.bf16.msra.mxu1 %v9890_v10  ;;  %v9947_v10 = vld [vmem:[%s12795_s1 + $0x690] sm:$0xff]  }
  0xa2   :  { %6435 = vmatmul.mubr.bf16.vlgmr.msra.gmra.mxu0 %v1530_v12  ;;  %8974 = vmatprep.subr.bf16.mxu1 %v9893_v16  ;;  %v31_v12 = vld [vmem:[%s12794_s0 + $0x18] sm:$0xff]  ;;  %v9949_v16 = vld [vmem:[%s12795_s1 + $0x608] sm:$0xff]  }
  0xa3   :  { %8953 = vmatpush3.bf16.msra.mxu0 %v9892_v14  ;;  %6514 = vmatprep.mubr.bf16.mxu0 %v1551_v15  ;;  %v1563_v14 = vrot.slane %v31_v12, %v10601_v41  ;;  %v1556_v15 = vcombine.high %v31_v12, %v31_v12  ;;  %v9988_v12 = vld [vmem:[%s12795_s1 + $0x780] sm:$0xff]  }
  0xa4   :  { %6475 = vmatmul.mubr.bf16.vlgmr.msra.gmra.mxu1 %v1552_v18  ;;  %8954 = vmatprep.subr.bf16.mxu0 %v9895_v19  ;;  %v9952_v18 = vld [vmem:[%s12795_s1 + $0x640] sm:$0xff]  }
  0xa5   :  { %8975 = vmatpush3.bf16.msra.mxu1 %v9894_v17  ;;  %6554 = vmatprep.mubr.bf16.mxu1 %v1555_v21  ;;  %v9951_v17 = vld [vmem:[%s12795_s1 + $0x688] sm:$0xff]   ;;  %v1571_v19 = vcombine.high %v1563_v14, %v1563_v14  ;;  %v9953_v21 = vld [vmem:[%s12795_s1 + $0x600] sm:$0xff]  }
  0xa6   :  { %8976 = vmatprep.subr.bf16.mxu1 %v9897_v22  ;;  %v9954_v22 = vld [vmem:[%s12795_s1 + $0x6c0] sm:$0xff]  }
  0xa7   :  { %8955 = vmatpush3.bf16.msra.mxu0 %v9896_v20  ;;  %v11208_v20 = vrot.slane %v1556_v15, %v10601_v41  ;;  %v9990_v15 = vld [vmem:[%s12795_s1 + $0x838] sm:$0xff]  }
  0xa8   :  { %8956 = vmatprep.subr.bf16.mxu0 %v9899_v24 }
  0xa9   :  { %8977 = vmatpush3.bf16.msra.mxu1 %v9898_v23  ;;  %v1593_v23 = vrot.slane %v1571_v19, %v10601_v41  ;;  %v1572_v24 = vcombine.high %v11208_v20, %v11208_v20  ;;  %v9993_v19 = vld [vmem:[%s12795_s1 + $0x870] sm:$0xff]  }
  0xaa   :  { %8978 = vmatprep.subr.bf16.mxu1 %v9901_v26  ;;  %v1579_v26 = vrot.slane %v1563_v14, %v10601_v41  ;;  %v9989_v14 = vld [vmem:[%s12795_s1 + $0x878] sm:$0xff]  }
  0xab   :  { %8957 = vmatpush3.bf16.msra.mxu0 %v9900_v25  ;;  %v9955_v25 = vld [vmem:[%s12795_s1 + $0x680] sm:$0xff]  }
  0xac   :  { %8958 = vmatprep.subr.bf16.mxu0 %v9903_v28  ;;  %v1603_v28 = vcombine.high %v1593_v23, %v1593_v23 }
  0xad   :  { %8979 = vmatpush3.bf16.msra.mxu1 %v9902_v27  ;;  %v9956_v27 = vld [vmem:[%s12795_s1 + $0x778] sm:$0xff]  }
  0xae   :  { %8980 = vmatprep.subr.bf16.mxu1 %v9905_v30  ;;  %v1600_v30 = vrot.slane %v1572_v24, %v10601_v41 }
  0xaf   :  { %8959 = vmatpush3.bf16.msra.mxu0 %v9904_v29  ;;  %v9957_v29 = vld [vmem:[%s12795_s1 + $0x738] sm:$0xff]  }
  0xb0   :  { %8960 = vmatprep.subr.bf16.mxu0 %v9907_v32  ;;  %v9959_v32 = vld [vmem:[%s12795_s1 + $0x7b8] sm:$0xff]  }
  0xb1   :  { %8981 = vmatpush3.bf16.msra.mxu1 %v9906_v31  ;;  %v9958_v31 = vld [vmem:[%s12795_s1 + $0x7f8] sm:$0xff]  }
  0xb2   :  { %8982 = vmatprep.subr.bf16.mxu1 %v9909_v34  ;;  %v9960_v34 = vld [vmem:[%s12795_s1 + $0x770] sm:$0xff]  }
  0xb3   :  { %8961 = vmatpush3.bf16.msra.mxu0 %v9908_v33  ;;  %v1601_v33 = vcombine.high %v1579_v26, %v1579_v26 }
  0xb4   :  { %8962 = vmatprep.subr.bf16.mxu0 %v9911_v36  ;;  %v1604_v36 = vcombine.high %v1600_v30, %v1600_v30 }
  0xb5   :  { %8983 = vmatpush3.bf16.msra.mxu1 %v9910_v35  ;;  %v9961_v35 = vld [vmem:[%s12795_s1 + $0x730] sm:$0xff]  }
  0xb6   :  { %8984 = vmatprep.subr.bf16.mxu1 %v9913_v38  ;;  %v8036_v38 = vld [vmem:[%s12796_s2] ss:$0 sm:$0xff] }
  0xb7   :  { %8963 = vmatpush3.bf16.msra.mxu0 %v9912_v37 }
  0xb8   :  { %8964 = vmatprep.subr.bf16.mxu0 %v9915_v40  ;;  %v9963_v40 = vld [vmem:[%s12795_s1 + $0x7b0] sm:$0xff]  }
  0xb9   :  { %8985 = vmatpush3.bf16.msra.mxu1 %v9914_v39  ;;  %v9962_v39 = vld [vmem:[%s12795_s1 + $0x7f0] sm:$0xff]  }
  0xba   :  { %8986 = vmatprep.subr.bf16.mxu1 %v9917_v43 }
  0xbb   :  { %8965 = vmatpush3.bf16.msra.mxu0 %v9916_v42 }
  0xbc   :  { %8966 = vmatprep.subr.bf16.mxu0 %v9919_v45 }
  0xbd   :  { %8987 = vmatpush3.bf16.msra.mxu1 %v9918_v44  ;;  %v9964_v44 = vld [vmem:[%s12795_s1 + $0x768] sm:$0xff]  }
  0xbe   :  { %8988 = vmatprep.subr.bf16.mxu1 %v9921_v47 }
  0xbf   :  { %8967 = vmatpush3.bf16.msra.mxu0 %v9920_v46  ;;  %v9965_v46 = vld [vmem:[%s12795_s1 + $0x728] sm:$0xff]  }
  0xc0   :  { %8996 = vmatprep.subr.bf16.mxu0 %v9924_v50 }
  0xc1   :  { %8989 = vmatpush3.bf16.msra.mxu1 %v9923_v48 }
  0xc2   :  { %6515 = vmatmul.mubr.bf16.vlgmr.msra.gmra.mxu0 %v1537_v49  ;;  %9018 = vmatprep.subr.bf16.mxu1 %v9926_v52  ;;  %v9966_v49 = vld [vmem:[%s12795_s1 + $0x7e8] sm:$0xff]  }
  0xc3   :  { %8997 = vmatpush3.bf16.msra.mxu0 %v9925_v51  ;;  %6594 = vmatprep.mubr.bf16.mxu0 %v1593_v23  ;;  %v9967_v52 = vld [vmem:[%s12795_s1 + $0x7a8] sm:$0xff]   ;;  %v9996_v23 = vld [vmem:[%s12795_s1 + $0x8b0] sm:$0xff]  }
  0xc4   :  { %6555 = vmatmul.mubr.bf16.vlgmr.msra.gmra.mxu1 %v1553_v54  ;;  %8998 = vmatprep.subr.bf16.mxu0 %v9928_v55  ;;  %v9968_v55 = vld [vmem:[%s12795_s1 + $0x760] sm:$0xff]  }
  0xc5   :  { %9019 = vmatpush3.bf16.msra.mxu1 %v9927_v53  ;;  %6634 = vmatprep.mubr.bf16.mxu1 %v1603_v28  ;;  %v9998_v28 = vld [vmem:[%s12795_s1 + $0x828] sm:$0xff]  }
  0xc6   :  { %9020 = vmatprep.subr.bf16.mxu1 %v9930_v57  ;;  %v9969_v57 = vld [vmem:[%s12795_s1 + $0x720] sm:$0xff]  }
  0xc7   :  { %8999 = vmatpush3.bf16.msra.mxu0 %v9929_v56 }
  0xc8   :  { %9000 = vmatprep.subr.bf16.mxu0 %v9932_v59  ;;  %v9970_v59 = vld [vmem:[%s12795_s1 + $0x7e0] sm:$0xff]  }
  0xc9   :  { %9021 = vmatpush3.bf16.msra.mxu1 %v9931_v58 }
  0xca   :  { %9022 = vmatprep.subr.bf16.mxu1 %v9934_v61  ;;  %v9972_v61 = vld [vmem:[%s12795_s1 + $0x758] sm:$0xff]  }
  0xcb   :  { %9001 = vmatpush3.bf16.msra.mxu0 %v9933_v60  ;;  %v9971_v60 = vld [vmem:[%s12795_s1 + $0x7a0] sm:$0xff]  }
  0xcc   :  { %9002 = vmatprep.subr.bf16.mxu0 %v9936_v63  ;;  %v9974_v63 = vld [vmem:[%s12795_s1 + $0x7d8] sm:$0xff]  }
  0xcd   :  { %9023 = vmatpush3.bf16.msra.mxu1 %v9935_v62  ;;  %v9973_v62 = vld [vmem:[%s12795_s1 + $0x718] sm:$0xff]  }
  0xce   :  { %9024 = vmatprep.subr.bf16.mxu1 %v9938_v1  ;;  %v9976_v1 = vld [vmem:[%s12795_s1 + $0x750] sm:$0xff]  }
  0xcf   :  { %9003 = vmatpush3.bf16.msra.mxu0 %v9937_v0  ;;  %v9975_v0 = vld [vmem:[%s12795_s1 + $0x798] sm:$0xff]  }
  0xd0   :  { %9004 = vmatprep.subr.bf16.mxu0 %v9940_v3  ;;  %v9978_v3 = vld [vmem:[%s12795_s1 + $0x7d0] sm:$0xff]  }
  0xd1   :  { %9025 = vmatpush3.bf16.msra.mxu1 %v9939_v2  ;;  %v9977_v2 = vld [vmem:[%s12795_s1 + $0x710] sm:$0xff]  }
  0xd2   :  { %9026 = vmatprep.subr.bf16.mxu1 %v9942_v5  ;;  %v9980_v5 = vld [vmem:[%s12795_s1 + $0x748] sm:$0xff]  }
  0xd3   :  { %9005 = vmatpush3.bf16.msra.mxu0 %v9941_v4  ;;  %v9979_v4 = vld [vmem:[%s12795_s1 + $0x790] sm:$0xff]  }
  0xd4   :  { %9006 = vmatprep.subr.bf16.mxu0 %v9944_v7  ;;  %v9982_v7 = vld [vmem:[%s12795_s1 + $0x7c8] sm:$0xff]  }
  0xd5   :  { %9027 = vmatpush3.bf16.msra.mxu1 %v9943_v6  ;;  %v9981_v6 = vld [vmem:[%s12795_s1 + $0x708] sm:$0xff]  }
  0xd6   :  { %9028 = vmatprep.subr.bf16.mxu1 %v9946_v9  ;;  %v9984_v9 = vld [vmem:[%s12795_s1 + $0x740] sm:$0xff]  }
  0xd7   :  { %9007 = vmatpush3.bf16.msra.mxu0 %v9945_v8  ;;  %v9983_v8 = vld [vmem:[%s12795_s1 + $0x788] sm:$0xff]  }
  0xd8   :  { %9008 = vmatprep.subr.bf16.mxu0 %v9948_v11  ;;  %v9986_v11 = vld [vmem:[%s12795_s1 + $0x7c0] sm:$0xff]  }
  0xd9   :  { %9029 = vmatpush3.bf16.msra.mxu1 %v9947_v10  ;;  %v9985_v10 = vld [vmem:[%s12795_s1 + $0x700] sm:$0xff]  }
  0xda   :  { %9030 = vmatprep.subr.bf16.mxu1 %v9950_v13  ;;  %v1586_v13 = vrot.slane %v11208_v20, %v10601_v41  ;;  %v9994_v20 = vld [vmem:[%s12795_s1 + $0x830] sm:$0xff]  }
  0xdb   :  { %9009 = vmatpush3.bf16.msra.mxu0 %v9949_v16  ;;  %v9991_v16 = vld [vmem:[%s12795_s1 + $0x8f8] sm:$0xff]  }
  0xdc   :  { %9010 = vmatprep.subr.bf16.mxu0 %v9952_v18  ;;  %v1602_v18 = vcombine.high %v1586_v13, %v1586_v13 }
  0xdd   :  { %9031 = vmatpush3.bf16.msra.mxu1 %v9951_v17  ;;  %v9992_v17 = vld [vmem:[%s12795_s1 + $0x8b8] sm:$0xff]  }
  0xde   :  { %9032 = vmatprep.subr.bf16.mxu1 %v9954_v22  ;;  %v9995_v22 = vld [vmem:[%s12795_s1 + $0x8f0] sm:$0xff]  }
  0xdf   :  { %9011 = vmatpush3.bf16.msra.mxu0 %v9953_v21 }
  0xe0   :  { %9040 = vmatprep.subr.bf16.mxu0 %v9956_v27 }
  0xe1   :  { %9033 = vmatpush3.bf16.msra.mxu1 %v9955_v25 }
  0xe2   :  { %v8748_v37 = vpop.f32.mrf.mxu0  ;;  %6595 = vmatmul.mubr.bf16.vlgmr.msra.gmra.mxu0 %v1579_v26  ;;  %9062 = vmatprep.subr.bf16.mxu1 %v9958_v31  ;;  %v9997_v26 = vld [vmem:[%s12795_s1 + $0x868] sm:$0xff]  }
  0xe3   :  { %9041 = vmatpush3.bf16.msra.mxu0 %v9957_v29  ;;  %6674 = vmatprep.mubr.bf16.mxu0 %v1600_v30  ;;  %v9999_v31 = vld [vmem:[%s12795_s1 + $0x8e8] sm:$0xff]  }
  0xe4   :  { %v8749_v42 = vpop.f32.mrf.mxu0  ;;  %v8770_v43 = vpop.f32.mrf.mxu1  ;;  %6635 = vmatmul.mubr.bf16.vlgmr.msra.gmra.mxu1 %v1601_v33  ;;  %9042 = vmatprep.subr.bf16.mxu0 %v9960_v34  ;;  %v10000_v34 = vld [vmem:[%s12795_s1 + $0x8a8] sm:$0xff]  }
  0xe5   :  { %v8750_v45 = vadd.f32 %v8749_v42, %v8748_v37  ;;  %9063 = vmatpush3.bf16.msra.mxu1 %v9959_v32  ;;  %6714 = vmatprep.mubr.bf16.mxu1 %v1604_v36  ;;  %v10001_v37 = vld [vmem:[%s12795_s1 + $0x860] sm:$0xff]  }
  0xe6   :  { %v8751_v47 = vpop.f32.mrf.mxu0  ;;  %v8771_v48 = vpop.f32.mrf.mxu1  ;;  %9064 = vmatprep.subr.bf16.mxu1 %v9962_v39  ;;  %v10002_v39 = vld [vmem:[%s12795_s1 + $0x820] sm:$0xff]  }
  0xe7   :  { %v6117_v50 = vadd.f32 %v8750_v45, %v8036_v38  ;;  %v8772_v51 = vadd.f32 %v8771_v48, %v8770_v43  ;;  %9043 = vmatpush3.bf16.msra.mxu0 %v9961_v35  ;;  %v10003_v42 = vld [vmem:[%s12795_s1 + $0x8e0] sm:$0xff]   ;;  %v10006_v45 = vld [vmem:[%s12795_s1 + $0x818] sm:$0xff]   ;;  %v10009_v48 = vld [vmem:[%s12795_s1 + $0x850] sm:$0xff]  }
  0xe8   :  { %v8752_v53 = vpop.f32.mrf.mxu0  ;;  %9044 = vmatprep.subr.bf16.mxu0 %v9964_v44  ;;  %v8773_v54 = vpop.f32.mrf.mxu1  ;;  %v10004_v43 = vld [vmem:[%s12795_s1 + $0x8a0] sm:$0xff]   ;;  %v10005_v44 = vld [vmem:[%s12795_s1 + $0x858] sm:$0xff]  }
  0xe9   :  { %v11266_v56 = vadd.f32 %v8772_v51, %v6117_v50  ;;  %9065 = vmatpush3.bf16.msra.mxu1 %v9963_v40  ;;  %v10008_v47 = vld [vmem:[%s12795_s1 + $0x898] sm:$0xff]   ;;  %v10011_v50 = vld [vmem:[%s12795_s1 + $0x8d0] sm:$0xff]   ;;  %v10014_v53 = vld [vmem:[%s12795_s1 + $0x808] sm:$0xff]  }
  0xea   :  { %9066 = vmatprep.subr.bf16.mxu1 %v9966_v49  ;;  %v8774_v58 = vpop.f32.mrf.mxu1  ;;  %v10010_v49 = vld [vmem:[%s12795_s1 + $0x810] sm:$0xff]   ;;  %v32_v54 = vld [vmem:[%s12794_s0 + $0x20] sm:$0xff] }
  0xeb   :  { %9045 = vmatpush3.bf16.msra.mxu0 %v9965_v46  ;;  %v10007_v46 = vld [vmem:[%s12795_s1 + $0x8d8] sm:$0xff]   ;;  %v10012_v51 = vld [vmem:[%s12795_s1 + $0x890] sm:$0xff]   ;;  %v10016_v58 = vld [vmem:[%s12795_s1 + $0x888] sm:$0xff]  }
  0xec   :  { %9046 = vmatprep.subr.bf16.mxu0 %v9968_v55  ;;  %v10015_v55 = vld [vmem:[%s12795_s1 + $0x8c8] sm:$0xff]  }
  0xed   :  { %9067 = vmatpush3.bf16.msra.mxu1 %v9967_v52  ;;  %v10013_v52 = vld [vmem:[%s12795_s1 + $0x848] sm:$0xff]  }
  0xee   :  { %9068 = vmatprep.subr.bf16.mxu1 %v9970_v59  ;;  %v10017_v59 = vld [vmem:[%s12795_s1 + $0x840] sm:$0xff]  }
  0xef   :  { %9047 = vmatpush3.bf16.msra.mxu0 %v9969_v57  ;;  %v1605_v57 = vcombine.high %v32_v54, %v32_v54 }
  0xf0   :  { %9048 = vmatprep.subr.bf16.mxu0 %v9972_v61 }
  0xf1   :  { %9069 = vmatpush3.bf16.msra.mxu1 %v9971_v60  ;;  %v11422_v61 = vrot.slane %v1605_v57, %v10601_v41  ;;  %v10057_v57 = vld [vmem:[%s12795_s1 + $0xab8] sm:$0xff]  }
  0xf2   :  { %9070 = vmatprep.subr.bf16.mxu1 %v9974_v63  ;;  %v10019_v63 = vld [vmem:[%s12795_s1 + $0x8c0] sm:$0xff]  }
  0xf3   :  { %9049 = vmatpush3.bf16.msra.mxu0 %v9973_v62  ;;  %v10018_v62 = vld [vmem:[%s12795_s1 + $0x800] sm:$0xff]  }
  0xf4   :  { %9050 = vmatprep.subr.bf16.mxu0 %v9976_v1  ;;  %v1621_v1 = vcombine.high %v11422_v61, %v11422_v61 }
  0xf5   :  { %9071 = vmatpush3.bf16.msra.mxu1 %v9975_v0 }
  0xf6   :  { %9072 = vmatprep.subr.bf16.mxu1 %v9978_v3 }
  0xf7   :  { %9051 = vmatpush3.bf16.msra.mxu0 %v9977_v2  ;;  %v10020_v2 = vld [vmem:[%s12795_s1 + $0x880] sm:$0xff]  }
  0xf8   :  { %9052 = vmatprep.subr.bf16.mxu0 %v9980_v5 }
  0xf9   :  { %9073 = vmatpush3.bf16.msra.mxu1 %v9979_v4  ;;  %v10021_v4 = vld [vmem:[%s12795_s1 + $0x978] sm:$0xff]  }
  0xfa   :  { %9074 = vmatprep.subr.bf16.mxu1 %v9982_v7  ;;  %v1649_v7 = vrot.slane %v1621_v1, %v10601_v41 }
  0xfb   :  { %9053 = vmatpush3.bf16.msra.mxu0 %v9981_v6  ;;  %v10022_v6 = vld [vmem:[%s12795_s1 + $0x938] sm:$0xff]  }
  0xfc   :  { %9054 = vmatprep.subr.bf16.mxu0 %v9984_v9  ;;  %v10024_v9 = vld [vmem:[%s12795_s1 + $0x9b8] sm:$0xff]  }
  0xfd   :  { %9075 = vmatpush3.bf16.msra.mxu1 %v9983_v8  ;;  %v10023_v8 = vld [vmem:[%s12795_s1 + $0x9f8] sm:$0xff]  }
  0xfe   :  { %9076 = vmatprep.subr.bf16.mxu1 %v9986_v11  ;;  %v10025_v11 = vld [vmem:[%s12795_s1 + $0x970] sm:$0xff]  }
  0xff   :  { %9055 = vmatpush3.bf16.msra.mxu0 %v9985_v10 }
 0x100   :  { %9084 = vmatprep.subr.bf16.mxu0 %v9989_v14 }
 0x101   :  { %9077 = vmatpush3.bf16.msra.mxu1 %v9988_v12  ;;  %v10026_v12 = vld [vmem:[%s12795_s1 + $0x930] sm:$0xff]  }
 0x102   :  { %v8792_v21 = vpop.f32.mrf.mxu0  ;;  %6675 = vmatmul.mubr.bf16.vlgmr.msra.gmra.mxu0 %v1586_v13  ;;  %9106 = vmatprep.subr.bf16.mxu1 %v9991_v16  ;;  %v1653_v13 = vcombine.high %v1649_v7, %v1649_v7  ;;  %v10028_v16 = vld [vmem:[%s12795_s1 + $0x9b0] sm:$0xff]  }
 0x103   :  { %9085 = vmatpush3.bf16.msra.mxu0 %v9990_v15  ;;  %v10027_v15 = vld [vmem:[%s12795_s1 + $0x9f0] sm:$0xff]  }
 0x104   :  { %v8793_v24 = vpop.f32.mrf.mxu0  ;;  %v8814_v25 = vpop.f32.mrf.mxu1  ;;  %6715 = vmatmul.mubr.bf16.vlgmr.msra.gmra.mxu1 %v1602_v18  ;;  %9086 = vmatprep.subr.bf16.mxu0 %v9993_v19  ;;  %v10029_v19 = vld [vmem:[%s12795_s1 + $0x968] sm:$0xff]  }
 0x105   :  { %v8794_v27 = vadd.f32 %v8793_v24, %v8792_v21  ;;  %9107 = vmatpush3.bf16.msra.mxu1 %v9992_v17  ;;  %v10030_v21 = vld [vmem:[%s12795_s1 + $0x928] sm:$0xff]  }
 0x106   :  { %v8795_v29 = vpop.f32.mrf.mxu0  ;;  %v8815_v30 = vpop.f32.mrf.mxu1  ;;  %9108 = vmatprep.subr.bf16.mxu1 %v9995_v22  ;;  %v10031_v24 = vld [vmem:[%s12795_s1 + $0x9e8] sm:$0xff]  }
 0x107   :  { %v6197_v32 = vadd.f32 %v8794_v27, %v11266_v56  ;;  %v8816_v33 = vadd.f32 %v8815_v30, %v8814_v25  ;;  %9087 = vmatpush3.bf16.msra.mxu0 %v9994_v20  ;;  %v1612_v56 = vrot.slane %v32_v54, %v10601_v41  ;;  %v10032_v27 = vld [vmem:[%s12795_s1 + $0x9a8] sm:$0xff]   ;;  %v10033_v30 = vld [vmem:[%s12795_s1 + $0x960] sm:$0xff]   ;;  %v10054_v54 = vld [vmem:[%s12795_s1 + $0xa78] sm:$0xff]  }
 0x108   :  { %v8796_v35 = vpop.f32.mrf.mxu0  ;;  %9088 = vmatprep.subr.bf16.mxu0 %v9997_v26  ;;  %v8817_v36 = vpop.f32.mrf.mxu1 }
 0x109   :  { %v11367_v38 = vadd.f32 %v8816_v33, %v6197_v32  ;;  %9109 = vmatpush3.bf16.msra.mxu1 %v9996_v23  ;;  %v1620_v60 = vcombine.high %v1612_v56, %v1612_v56  ;;  %v1628_v3 = vrot.slane %v1612_v56, %v10601_v41  ;;  %v10034_v32 = vld [vmem:[%s12795_s1 + $0x920] sm:$0xff]   ;;  %v10037_v36 = vld [vmem:[%s12795_s1 + $0x958] sm:$0xff]  }
 0x10a   :  { %9110 = vmatprep.subr.bf16.mxu1 %v9999_v31  ;;  %v8818_v40 = vpop.f32.mrf.mxu1  ;;  %v10036_v35 = vld [vmem:[%s12795_s1 + $0x9a0] sm:$0xff]   ;;  %v10056_v56 = vld [vmem:[%s12795_s1 + $0xaf8] sm:$0xff]  }
 0x10b   :  { %9089 = vmatpush3.bf16.msra.mxu0 %v9998_v28  ;;  %v1642_v0 = vrot.slane %v1620_v60, %v10601_v41  ;;  %v1650_v10 = vcombine.high %v1628_v3, %v1628_v3  ;;  %v10041_v40 = vld [vmem:[%s12795_s1 + $0x950] sm:$0xff]  }
 0x10c   :  { %9090 = vmatprep.subr.bf16.mxu0 %v10001_v37  ;;  %v10038_v37 = vld [vmem:[%s12795_s1 + $0x918] sm:$0xff]   ;;  %v10059_v60 = vld [vmem:[%s12795_s1 + $0xa30] sm:$0xff]  }
 0x10d   :  { %9111 = vmatpush3.bf16.msra.mxu1 %v10000_v34  ;;  %6754 = vmatprep.mubr.bf16.mxu0 %v1642_v0  ;;  %v1652_v5 = vcombine.high %v1642_v0, %v1642_v0  ;;  %v10035_v34 = vld [vmem:[%s12795_s1 + $0x9e0] sm:$0xff]  }
 0x10e   :  { %9112 = vmatprep.subr.bf16.mxu1 %v10003_v42  ;;  %v10042_v42 = vld [vmem:[%s12795_s1 + $0x910] sm:$0xff]  }
 0x10f   :  { %9091 = vmatpush3.bf16.msra.mxu0 %v10002_v39  ;;  %6794 = vmatprep.mubr.bf16.mxu1 %v1652_v5  ;;  %v10040_v39 = vld [vmem:[%s12795_s1 + $0x998] sm:$0xff]  }
 0x110   :  { %9092 = vmatprep.subr.bf16.mxu0 %v10005_v44  ;;  %v10044_v44 = vld [vmem:[%s12795_s1 + $0x990] sm:$0xff]  }
 0x111   :  { %9113 = vmatpush3.bf16.msra.mxu1 %v10004_v43  ;;  %v10043_v43 = vld [vmem:[%s12795_s1 + $0x9d0] sm:$0xff]  }
 0x112   :  { %9114 = vmatprep.subr.bf16.mxu1 %v10007_v46  ;;  %v10046_v46 = vld [vmem:[%s12795_s1 + $0x908] sm:$0xff]  }
 0x113   :  { %9093 = vmatpush3.bf16.msra.mxu0 %v10006_v45  ;;  %v10045_v45 = vld [vmem:[%s12795_s1 + $0x948] sm:$0xff]  }
 0x114   :  { %9094 = vmatprep.subr.bf16.mxu0 %v10009_v48  ;;  %v10048_v48 = vld [vmem:[%s12795_s1 + $0x988] sm:$0xff]  }
 0x115   :  { %9115 = vmatpush3.bf16.msra.mxu1 %v10008_v47  ;;  %v10047_v47 = vld [vmem:[%s12795_s1 + $0x9c8] sm:$0xff]  }
 0x116   :  { %9116 = vmatprep.subr.bf16.mxu1 %v10011_v50  ;;  %v10050_v50 = vld [vmem:[%s12795_s1 + $0x900] sm:$0xff]  }
 0x117   :  { %9095 = vmatpush3.bf16.msra.mxu0 %v10010_v49  ;;  %v10049_v49 = vld [vmem:[%s12795_s1 + $0x940] sm:$0xff]  }
 0x118   :  { %9096 = vmatprep.subr.bf16.mxu0 %v10013_v52  ;;  %v10053_v52 = vld [vmem:[%s12795_s1 + $0x980] sm:$0xff]  }
 0x119   :  { %9117 = vmatpush3.bf16.msra.mxu1 %v10012_v51  ;;  %v10051_v51 = vld [vmem:[%s12795_s1 + $0x9c0] sm:$0xff]  }
 0x11a   :  { %9118 = vmatprep.subr.bf16.mxu1 %v10015_v55  ;;  %v10055_v55 = vld [vmem:[%s12795_s1 + $0xa38] sm:$0xff]  }
 0x11b   :  { %9097 = vmatpush3.bf16.msra.mxu0 %v10014_v53  ;;  %v1635_v53 = vrot.slane %v11422_v61, %v10601_v41 }
 0x11c   :  { %9098 = vmatprep.subr.bf16.mxu0 %v10017_v59  ;;  %v10058_v59 = vld [vmem:[%s12795_s1 + $0xa70] sm:$0xff]  }
 0x11d   :  { %9119 = vmatpush3.bf16.msra.mxu1 %v10016_v58  ;;  %v1651_v58 = vcombine.high %v1635_v53, %v1635_v53 }
 0x11e   :  { %9120 = vmatprep.subr.bf16.mxu1 %v10019_v63  ;;  %v10061_v63 = vld [vmem:[%s12795_s1 + $0xab0] sm:$0xff]  }
 0x11f   :  { %9099 = vmatpush3.bf16.msra.mxu0 %v10018_v62  ;;  %v10060_v62 = vld [vmem:[%s12795_s1 + $0xaf0] sm:$0xff]  }
 0x120   :  { %9128 = vmatprep.subr.bf16.mxu0 %v10021_v4  ;;  %v10063_v4 = vld [vmem:[%s12795_s1 + $0xa28] sm:$0xff]  }
 0x121   :  { %9121 = vmatpush3.bf16.msra.mxu1 %v10020_v2  ;;  %v10062_v2 = vld [vmem:[%s12795_s1 + $0xa68] sm:$0xff]  }
 0x122   :  { %v8836_v14 = vpop.f32.mrf.mxu0  ;;  %6755 = vmatmul.mubr.bf16.vlgmr.msra.gmra.mxu0 %v1628_v3  ;;  %9150 = vmatprep.subr.bf16.mxu1 %v10023_v8 }
 0x123   :  { %9129 = vmatpush3.bf16.msra.mxu0 %v10022_v6  ;;  %6834 = vmatprep.mubr.bf16.mxu0 %v1649_v7  ;;  %v10064_v7 = vld [vmem:[%s12795_s1 + $0xae8] sm:$0xff]  }
 0x124   :  { %v8837_v17 = vpop.f32.mrf.mxu0  ;;  %v8858_v18 = vpop.f32.mrf.mxu1  ;;  %6795 = vmatmul.mubr.bf16.vlgmr.msra.gmra.mxu1 %v1650_v10  ;;  %9130 = vmatprep.subr.bf16.mxu0 %v10025_v11  ;;  %v10065_v10 = vld [vmem:[%s12795_s1 + $0xaa8] sm:$0xff]  }
 0x125   :  { %v8838_v20 = vadd.f32 %v8837_v17, %v8836_v14  ;;  %9151 = vmatpush3.bf16.msra.mxu1 %v10024_v9  ;;  %6874 = vmatprep.mubr.bf16.mxu1 %v1653_v13  ;;  %v10066_v13 = vld [vmem:[%s12795_s1 + $0xa60] sm:$0xff]  }
 0x126   :  { %v8839_v22 = vpop.f32.mrf.mxu0  ;;  %v8859_v23 = vpop.f32.mrf.mxu1  ;;  %9152 = vmatprep.subr.bf16.mxu1 %v10027_v15  ;;  %v10067_v15 = vld [vmem:[%s12795_s1 + $0xa20] sm:$0xff]  }
 0x127   :  { %v6277_v25 = vadd.f32 %v8838_v20, %v11367_v38  ;;  %v8860_v26 = vadd.f32 %v8859_v23, %v8858_v18  ;;  %9131 = vmatpush3.bf16.msra.mxu0 %v10026_v12  ;;  %v10039_v38 = vld [vmem:[%s12795_s1 + $0x9d8] sm:$0xff]   ;;  %v10068_v17 = vld [vmem:[%s12795_s1 + $0xae0] sm:$0xff]   ;;  %v10074_v23 = vld [vmem:[%s12795_s1 + $0xa50] sm:$0xff]  }
 0x128   :  { %v8840_v28 = vpop.f32.mrf.mxu0  ;;  %9132 = vmatprep.subr.bf16.mxu0 %v10029_v19  ;;  %v8861_v29 = vpop.f32.mrf.mxu1  ;;  %v10069_v18 = vld [vmem:[%s12795_s1 + $0xaa0] sm:$0xff]   ;;  %v10070_v19 = vld [vmem:[%s12795_s1 + $0xa58] sm:$0xff]  }
 0x129   :  { %v11478_v31 = vadd.f32 %v8860_v26, %v6277_v25  ;;  %9153 = vmatpush3.bf16.msra.mxu1 %v10028_v16  ;;  %v10071_v20 = vld [vmem:[%s12795_s1 + $0xa18] sm:$0xff]   ;;  %v10076_v25 = vld [vmem:[%s12795_s1 + $0xad0] sm:$0xff]   ;;  %v10079_v28 = vld [vmem:[%s12795_s1 + $0xa08] sm:$0xff]  }
 0x12a   :  { %9154 = vmatprep.subr.bf16.mxu1 %v10031_v24  ;;  %v8862_v33 = vpop.f32.mrf.mxu1  ;;  %v10073_v22 = vld [vmem:[%s12795_s1 + $0xa98] sm:$0xff]   ;;  %v10075_v24 = vld [vmem:[%s12795_s1 + $0xa10] sm:$0xff]   ;;  %v10080_v29 = vld [vmem:[%s12795_s1 + $0xac8] sm:$0xff]  }
 0x12b   :  { %9133 = vmatpush3.bf16.msra.mxu0 %v10030_v21  ;;  %v10072_v21 = vld [vmem:[%s12795_s1 + $0xad8] sm:$0xff]   ;;  %v10077_v26 = vld [vmem:[%s12795_s1 + $0xa90] sm:$0xff]  }
 0x12c   :  { %9134 = vmatprep.subr.bf16.mxu0 %v10033_v30  ;;  %v33_v30 = vld [vmem:[%s12794_s0 + $0x28] sm:$0xff] }
 0x12d   :  { %9155 = vmatpush3.bf16.msra.mxu1 %v10032_v27  ;;  %v10078_v27 = vld [vmem:[%s12795_s1 + $0xa48] sm:$0xff]   ;;  %v1654_v33 = vcombine.high %v33_v30, %v33_v30 }
 0x12e   :  { %9156 = vmatprep.subr.bf16.mxu1 %v10035_v34  ;;  %v10082_v34 = vld [vmem:[%s12795_s1 + $0xa40] sm:$0xff]  }
 0x12f   :  { %9135 = vmatpush3.bf16.msra.mxu0 %v10034_v32  ;;  %v1661_v32 = vrot.slane %v33_v30, %v10601_v41  ;;  %v10120_v30 = vld [vmem:[%s12795_s1 + $0xc38] sm:$0xff]  }
 0x130   :  { %9136 = vmatprep.subr.bf16.mxu0 %v10037_v36 }
 0x131   :  { %9157 = vmatpush3.bf16.msra.mxu1 %v10036_v35  ;;  %v10083_v35 = vld [vmem:[%s12795_s1 + $0xa00] sm:$0xff]   ;;  %v1669_v36 = vcombine.high %v1661_v32, %v1661_v32 }
 0x132   :  { %9158 = vmatprep.subr.bf16.mxu1 %v10039_v38  ;;  %v10084_v38 = vld [vmem:[%s12795_s1 + $0xac0] sm:$0xff]  }
 0x133   :  { %9137 = vmatpush3.bf16.msra.mxu0 %v10038_v37  ;;  %v11637_v37 = vrot.slane %v1654_v33, %v10601_v41 }
 0x134   :  { %9138 = vmatprep.subr.bf16.mxu0 %v10041_v40  ;;  %v10085_v40 = vld [vmem:[%s12795_s1 + $0xa80] sm:$0xff]  }
 0x135   :  { %9159 = vmatpush3.bf16.msra.mxu1 %v10040_v39  ;;  %v1691_v39 = vrot.slane %v1669_v36, %v10601_v41 }
 0x136   :  { %9160 = vmatprep.subr.bf16.mxu1 %v10043_v43  ;;  %v1677_v43 = vrot.slane %v1661_v32, %v10601_v41  ;;  %v10122_v32 = vld [vmem:[%s12795_s1 + $0xcb8] sm:$0xff]  }
 0x137   :  { %9139 = vmatpush3.bf16.msra.mxu0 %v10042_v42  ;;  %v1670_v42 = vcombine.high %v11637_v37, %v11637_v37 }
 0x138   :  { %9140 = vmatprep.subr.bf16.mxu0 %v10045_v45  ;;  %v1701_v45 = vcombine.high %v1691_v39, %v1691_v39 }
 0x139   :  { %9161 = vmatpush3.bf16.msra.mxu1 %v10044_v44  ;;  %v10086_v44 = vld [vmem:[%s12795_s1 + $0xb78] sm:$0xff]  }
 0x13a   :  { %9162 = vmatprep.subr.bf16.mxu1 %v10047_v47  ;;  %v1698_v47 = vrot.slane %v1670_v42, %v10601_v41  ;;  %v10127_v42 = vld [vmem:[%s12795_s1 + $0xc68] sm:$0xff]  }
 0x13b   :  { %9141 = vmatpush3.bf16.msra.mxu0 %v10046_v46  ;;  %v10087_v46 = vld [vmem:[%s12795_s1 + $0xb38] sm:$0xff]  }
 0x13c   :  { %9142 = vmatprep.subr.bf16.mxu0 %v10049_v49  ;;  %v10089_v49 = vld [vmem:[%s12795_s1 + $0xbb8] sm:$0xff]  }
 0x13d   :  { %9163 = vmatpush3.bf16.msra.mxu1 %v10048_v48  ;;  %v10088_v48 = vld [vmem:[%s12795_s1 + $0xbf8] sm:$0xff]  }
 0x13e   :  { %9164 = vmatprep.subr.bf16.mxu1 %v10051_v51  ;;  %v10090_v51 = vld [vmem:[%s12795_s1 + $0xb70] sm:$0xff]  }
 0x13f   :  { %9143 = vmatpush3.bf16.msra.mxu0 %v10050_v50  ;;  %v1699_v50 = vcombine.high %v1677_v43, %v1677_v43 }
 0x140   :  { %9172 = vmatprep.subr.bf16.mxu0 %v10054_v54 }
 0x141   :  { %9165 = vmatpush3.bf16.msra.mxu1 %v10053_v52  ;;  %v10091_v52 = vld [vmem:[%s12795_s1 + $0xb30] sm:$0xff]  }
 0x142   :  { %v8880_v61 = vpop.f32.mrf.mxu0  ;;  %6835 = vmatmul.mubr.bf16.vlgmr.msra.gmra.mxu0 %v1635_v53  ;;  %9194 = vmatprep.subr.bf16.mxu1 %v10056_v56  ;;  %v1702_v53 = vcombine.high %v1698_v47, %v1698_v47  ;;  %v10093_v56 = vld [vmem:[%s12795_s1 + $0xbb0] sm:$0xff]  }
 0x143   :  { %9173 = vmatpush3.bf16.msra.mxu0 %v10055_v55  ;;  %6914 = vmatprep.mubr.bf16.mxu0 %v1691_v39  ;;  %v10092_v55 = vld [vmem:[%s12795_s1 + $0xbf0] sm:$0xff]  }
 0x144   :  { %v8881_v0 = vpop.f32.mrf.mxu0  ;;  %v8902_v1 = vpop.f32.mrf.mxu1  ;;  %6875 = vmatmul.mubr.bf16.vlgmr.msra.gmra.mxu1 %v1651_v58  ;;  %9174 = vmatprep.subr.bf16.mxu0 %v10058_v59  ;;  %v10094_v59 = vld [vmem:[%s12795_s1 + $0xb68] sm:$0xff]  }
 0x145   :  { %v8882_v3 = vadd.f32 %v8881_v0, %v8880_v61  ;;  %9195 = vmatpush3.bf16.msra.mxu1 %v10057_v57  ;;  %6954 = vmatprep.mubr.bf16.mxu1 %v1701_v45  ;;  %v10095_v61 = vld [vmem:[%s12795_s1 + $0xb28] sm:$0xff]  }
 0x146   :  { %v8883_v5 = vpop.f32.mrf.mxu0  ;;  %v8903_v6 = vpop.f32.mrf.mxu1  ;;  %9196 = vmatprep.subr.bf16.mxu1 %v10060_v62  ;;  %v10096_v0 = vld [vmem:[%s12795_s1 + $0xbe8] sm:$0xff]  }
 0x147   :  { %v6357_v8 = vadd.f32 %v8882_v3, %v11478_v31  ;;  %v8904_v9 = vadd.f32 %v8903_v6, %v8902_v1  ;;  %9175 = vmatpush3.bf16.msra.mxu0 %v10059_v60  ;;  %v10081_v31 = vld [vmem:[%s12795_s1 + $0xa88] sm:$0xff]   ;;  %v10098_v6 = vld [vmem:[%s12795_s1 + $0xb60] sm:$0xff]  }
 0x148   :  { %v8884_v11 = vpop.f32.mrf.mxu0  ;;  %9176 = vmatprep.subr.bf16.mxu0 %v10062_v2  ;;  %v8905_v12 = vpop.f32.mrf.mxu1  ;;  %v10097_v3 = vld [vmem:[%s12795_s1 + $0xba8] sm:$0xff]  }
 0x149   :  { %v11579_v14 = vadd.f32 %v8904_v9, %v6357_v8  ;;  %9197 = vmatpush3.bf16.msra.mxu1 %v10061_v63  ;;  %v10099_v8 = vld [vmem:[%s12795_s1 + $0xb20] sm:$0xff]   ;;  %v10102_v12 = vld [vmem:[%s12795_s1 + $0xb58] sm:$0xff]  }
 0x14a   :  { %9198 = vmatprep.subr.bf16.mxu1 %v10064_v7  ;;  %v8906_v16 = vpop.f32.mrf.mxu1  ;;  %v10101_v11 = vld [vmem:[%s12795_s1 + $0xba0] sm:$0xff]  }
 0x14b   :  { %9177 = vmatpush3.bf16.msra.mxu0 %v10063_v4  ;;  %v10106_v16 = vld [vmem:[%s12795_s1 + $0xb50] sm:$0xff]  }
 0x14c   :  { %9178 = vmatprep.subr.bf16.mxu0 %v10066_v13  ;;  %v10103_v13 = vld [vmem:[%s12795_s1 + $0xb18] sm:$0xff]  }
 0x14d   :  { %9199 = vmatpush3.bf16.msra.mxu1 %v10065_v10  ;;  %v10100_v10 = vld [vmem:[%s12795_s1 + $0xbe0] sm:$0xff]  }
 0x14e   :  { %9200 = vmatprep.subr.bf16.mxu1 %v10068_v17  ;;  %v10107_v17 = vld [vmem:[%s12795_s1 + $0xb10] sm:$0xff]  }
 0x14f   :  { %9179 = vmatpush3.bf16.msra.mxu0 %v10067_v15  ;;  %v10105_v15 = vld [vmem:[%s12795_s1 + $0xb98] sm:$0xff]  }
 0x150   :  { %9180 = vmatprep.subr.bf16.mxu0 %v10070_v19  ;;  %v10109_v19 = vld [vmem:[%s12795_s1 + $0xb90] sm:$0xff]  }
 0x151   :  { %9201 = vmatpush3.bf16.msra.mxu1 %v10069_v18  ;;  %v10108_v18 = vld [vmem:[%s12795_s1 + $0xbd0] sm:$0xff]  }
 0x152   :  { %9202 = vmatprep.subr.bf16.mxu1 %v10072_v21  ;;  %v10111_v21 = vld [vmem:[%s12795_s1 + $0xb08] sm:$0xff]  }
 0x153   :  { %9181 = vmatpush3.bf16.msra.mxu0 %v10071_v20  ;;  %v10110_v20 = vld [vmem:[%s12795_s1 + $0xb48] sm:$0xff]  }
 0x154   :  { %9182 = vmatprep.subr.bf16.mxu0 %v10074_v23  ;;  %v10113_v23 = vld [vmem:[%s12795_s1 + $0xb88] sm:$0xff]  }
 0x155   :  { %9203 = vmatpush3.bf16.msra.mxu1 %v10073_v22  ;;  %v10112_v22 = vld [vmem:[%s12795_s1 + $0xbc8] sm:$0xff]  }
 0x156   :  { %9204 = vmatprep.subr.bf16.mxu1 %v10076_v25  ;;  %v10115_v25 = vld [vmem:[%s12795_s1 + $0xb00] sm:$0xff]  }
 0x157   :  { %9183 = vmatpush3.bf16.msra.mxu0 %v10075_v24  ;;  %v10114_v24 = vld [vmem:[%s12795_s1 + $0xb40] sm:$0xff]  }
 0x158   :  { %9184 = vmatprep.subr.bf16.mxu0 %v10078_v27  ;;  %v10118_v27 = vld [vmem:[%s12795_s1 + $0xb80] sm:$0xff]  }
 0x159   :  { %9205 = vmatpush3.bf16.msra.mxu1 %v10077_v26  ;;  %v10116_v26 = vld [vmem:[%s12795_s1 + $0xbc0] sm:$0xff]  }
 0x15a   :  { %9206 = vmatprep.subr.bf16.mxu1 %v10080_v29  ;;  %v10119_v29 = vld [vmem:[%s12795_s1 + $0xc78] sm:$0xff]  }
 0x15b   :  { %9185 = vmatpush3.bf16.msra.mxu0 %v10079_v28  ;;  %v1684_v28 = vrot.slane %v11637_v37, %v10601_v41  ;;  %v10125_v37 = vld [vmem:[%s12795_s1 + $0xcf0] sm:$0xff]  }
 0x15c   :  { %9186 = vmatprep.subr.bf16.mxu0 %v10082_v34  ;;  %v10123_v34 = vld [vmem:[%s12795_s1 + $0xc70] sm:$0xff]  }
 0x15d   :  { %9207 = vmatpush3.bf16.msra.mxu1 %v10081_v31  ;;  %v10121_v31 = vld [vmem:[%s12795_s1 + $0xcf8] sm:$0xff]   ;;  %v1700_v33 = vcombine.high %v1684_v28, %v1684_v28 }
 0x15e   :  { %9208 = vmatprep.subr.bf16.mxu1 %v10084_v38  ;;  %v10126_v38 = vld [vmem:[%s12795_s1 + $0xcb0] sm:$0xff]  }
 0x15f   :  { %9187 = vmatpush3.bf16.msra.mxu0 %v10083_v35  ;;  %v10124_v35 = vld [vmem:[%s12795_s1 + $0xc30] sm:$0xff]  }
 0x160   :  { %9216 = vmatprep.subr.bf16.mxu0 %v10086_v44  ;;  %v10128_v44 = vld [vmem:[%s12795_s1 + $0xc28] sm:$0xff]  }
 0x161   :  { %9209 = vmatpush3.bf16.msra.mxu1 %v10085_v40 }
 0x162   :  { %v8924_v54 = vpop.f32.mrf.mxu0  ;;  %6915 = vmatmul.mubr.bf16.vlgmr.msra.gmra.mxu0 %v1677_v43  ;;  %9238 = vmatprep.subr.bf16.mxu1 %v10088_v48 }
 0x163   :  { %9217 = vmatpush3.bf16.msra.mxu0 %v10087_v46  ;;  %6994 = vmatprep.mubr.bf16.mxu0 %v1698_v47  ;;  %v10129_v47 = vld [vmem:[%s12795_s1 + $0xce8] sm:$0xff]  }
 0x164   :  { %v8925_v57 = vpop.f32.mrf.mxu0  ;;  %v8946_v58 = vpop.f32.mrf.mxu1  ;;  %6955 = vmatmul.mubr.bf16.vlgmr.msra.gmra.mxu1 %v1699_v50  ;;  %9218 = vmatprep.subr.bf16.mxu0 %v10090_v51  ;;  %v10130_v50 = vld [vmem:[%s12795_s1 + $0xca8] sm:$0xff]  }
 0x165   :  { %v8926_v60 = vadd.f32 %v8925_v57, %v8924_v54  ;;  %9239 = vmatpush3.bf16.msra.mxu1 %v10089_v49  ;;  %7034 = vmatprep.mubr.bf16.mxu1 %v1702_v53  ;;  %v10131_v53 = vld [vmem:[%s12795_s1 + $0xc60] sm:$0xff]  }
 0x166   :  { %v8927_v62 = vpop.f32.mrf.mxu0  ;;  %v8947_v63 = vpop.f32.mrf.mxu1  ;;  %9240 = vmatprep.subr.bf16.mxu1 %v10092_v55  ;;  %v10132_v55 = vld [vmem:[%s12795_s1 + $0xc20] sm:$0xff]  }
 0x167   :  { %v6437_v1 = vadd.f32 %v8926_v60, %v11579_v14  ;;  %v8948_v2 = vadd.f32 %v8947_v63, %v8946_v58  ;;  %9219 = vmatpush3.bf16.msra.mxu0 %v10091_v52  ;;  %v10104_v14 = vld [vmem:[%s12795_s1 + $0xbd8] sm:$0xff]   ;;  %v10133_v57 = vld [vmem:[%s12795_s1 + $0xce0] sm:$0xff]   ;;  %v10139_v63 = vld [vmem:[%s12795_s1 + $0xc50] sm:$0xff]  }
 0x168   :  { %v8928_v4 = vpop.f32.mrf.mxu0  ;;  %9220 = vmatprep.subr.bf16.mxu0 %v10094_v59  ;;  %v8949_v5 = vpop.f32.mrf.mxu1  ;;  %v10134_v58 = vld [vmem:[%s12795_s1 + $0xca0] sm:$0xff]   ;;  %v10135_v59 = vld [vmem:[%s12795_s1 + $0xc58] sm:$0xff]  }
 0x169   :  { %v11690_v7 = vadd.f32 %v8948_v2, %v6437_v1  ;;  %9241 = vmatpush3.bf16.msra.mxu1 %v10093_v56  ;;  %v10136_v60 = vld [vmem:[%s12795_s1 + $0xc18] sm:$0xff]   ;;  %v10141_v1 = vld [vmem:[%s12795_s1 + $0xcd0] sm:$0xff]   ;;  %v10144_v4 = vld [vmem:[%s12795_s1 + $0xc08] sm:$0xff]  }
 0x16a   :  { %9242 = vmatprep.subr.bf16.mxu1 %v10096_v0  ;;  %v8950_v9 = vpop.f32.mrf.mxu1  ;;  %v10138_v62 = vld [vmem:[%s12795_s1 + $0xc98] sm:$0xff]   ;;  %v10140_v0 = vld [vmem:[%s12795_s1 + $0xc10] sm:$0xff]   ;;  %v10145_v5 = vld [vmem:[%s12795_s1 + $0xcc8] sm:$0xff]  }
 0x16b   :  { %9221 = vmatpush3.bf16.msra.mxu0 %v10095_v61  ;;  %v10137_v61 = vld [vmem:[%s12795_s1 + $0xcd8] sm:$0xff]   ;;  %v10142_v2 = vld [vmem:[%s12795_s1 + $0xc90] sm:$0xff]  }
 0x16c   :  { %9222 = vmatprep.subr.bf16.mxu0 %v10098_v6  ;;  %v34_v6 = vld [vmem:[%s12794_s0 + $0x30] sm:$0xff] }
 0x16d   :  { %9243 = vmatpush3.bf16.msra.mxu1 %v10097_v3  ;;  %v10143_v3 = vld [vmem:[%s12795_s1 + $0xc48] sm:$0xff]   ;;  %v1703_v9 = vcombine.high %v34_v6, %v34_v6 }
 0x16e   :  { %9244 = vmatprep.subr.bf16.mxu1 %v10100_v10  ;;  %v10147_v10 = vld [vmem:[%s12795_s1 + $0xc40] sm:$0xff]  }
 0x16f   :  { %9223 = vmatpush3.bf16.msra.mxu0 %v10099_v8  ;;  %v1710_v8 = vrot.slane %v34_v6, %v10601_v41  ;;  %v10185_v6 = vld [vmem:[%s12795_s1 + $0xe38] sm:$0xff]  }
 0x170   :  { %9224 = vmatprep.subr.bf16.mxu0 %v10102_v12 }
 0x171   :  { %9245 = vmatpush3.bf16.msra.mxu1 %v10101_v11  ;;  %v10148_v11 = vld [vmem:[%s12795_s1 + $0xc00] sm:$0xff]   ;;  %v1718_v12 = vcombine.high %v1710_v8, %v1710_v8 }
 0x172   :  { %9246 = vmatprep.subr.bf16.mxu1 %v10104_v14  ;;  %v10149_v14 = vld [vmem:[%s12795_s1 + $0xcc0] sm:$0xff]  }
 0x173   :  { %9225 = vmatpush3.bf16.msra.mxu0 %v10103_v13  ;;  %v11849_v13 = vrot.slane %v1703_v9, %v10601_v41 }
 0x174   :  { %9226 = vmatprep.subr.bf16.mxu0 %v10106_v16  ;;  %v10150_v16 = vld [vmem:[%s12795_s1 + $0xc80] sm:$0xff]  }
 0x175   :  { %9247 = vmatpush3.bf16.msra.mxu1 %v10105_v15  ;;  %v1740_v15 = vrot.slane %v1718_v12, %v10601_v41 }
 0x176   :  { %9248 = vmatprep.subr.bf16.mxu1 %v10108_v18  ;;  %v1726_v18 = vrot.slane %v1710_v8, %v10601_v41  ;;  %v10187_v8 = vld [vmem:[%s12795_s1 + $0xeb8] sm:$0xff]  }
 0x177   :  { %9227 = vmatpush3.bf16.msra.mxu0 %v10107_v17  ;;  %v1719_v17 = vcombine.high %v11849_v13, %v11849_v13 }
 0x178   :  { %9228 = vmatprep.subr.bf16.mxu0 %v10110_v20  ;;  %v1750_v20 = vcombine.high %v1740_v15, %v1740_v15 }
 0x179   :  { %9249 = vmatpush3.bf16.msra.mxu1 %v10109_v19  ;;  %v10151_v19 = vld [vmem:[%s12795_s1 + $0xd78] sm:$0xff]  }
 0x17a   :  { %9250 = vmatprep.subr.bf16.mxu1 %v10112_v22  ;;  %v1747_v22 = vrot.slane %v1719_v17, %v10601_v41  ;;  %v10192_v17 = vld [vmem:[%s12795_s1 + $0xe68] sm:$0xff]  }
 0x17b   :  { %9229 = vmatpush3.bf16.msra.mxu0 %v10111_v21  ;;  %v10152_v21 = vld [vmem:[%s12795_s1 + $0xd38] sm:$0xff]  }
 0x17c   :  { %9230 = vmatprep.subr.bf16.mxu0 %v10114_v24  ;;  %v10154_v24 = vld [vmem:[%s12795_s1 + $0xdb8] sm:$0xff]  }
 0x17d   :  { %9251 = vmatpush3.bf16.msra.mxu1 %v10113_v23  ;;  %v10153_v23 = vld [vmem:[%s12795_s1 + $0xdf8] sm:$0xff]  }
 0x17e   :  { %9252 = vmatprep.subr.bf16.mxu1 %v10116_v26  ;;  %v10155_v26 = vld [vmem:[%s12795_s1 + $0xd70] sm:$0xff]  }
 0x17f   :  { %9231 = vmatpush3.bf16.msra.mxu0 %v10115_v25  ;;  %v1748_v25 = vcombine.high %v1726_v18, %v1726_v18 }
 0x180   :  { %9260 = vmatprep.subr.bf16.mxu0 %v10119_v29 }
 0x181   :  { %9253 = vmatpush3.bf16.msra.mxu1 %v10118_v27  ;;  %v10156_v27 = vld [vmem:[%s12795_s1 + $0xd30] sm:$0xff]  }
 0x182   :  { %v8968_v36 = vpop.f32.mrf.mxu0  ;;  %6995 = vmatmul.mubr.bf16.vlgmr.msra.gmra.mxu0 %v1684_v28  ;;  %9282 = vmatprep.subr.bf16.mxu1 %v10121_v31  ;;  %v1751_v28 = vcombine.high %v1747_v22, %v1747_v22  ;;  %v10158_v31 = vld [vmem:[%s12795_s1 + $0xdb0] sm:$0xff]  }
 0x183   :  { %9261 = vmatpush3.bf16.msra.mxu0 %v10120_v30  ;;  %7074 = vmatprep.mubr.bf16.mxu0 %v1740_v15  ;;  %v10157_v30 = vld [vmem:[%s12795_s1 + $0xdf0] sm:$0xff]  }
 0x184   :  { %v8969_v39 = vpop.f32.mrf.mxu0  ;;  %v8990_v40 = vpop.f32.mrf.mxu1  ;;  %7035 = vmatmul.mubr.bf16.vlgmr.msra.gmra.mxu1 %v1700_v33  ;;  %9262 = vmatprep.subr.bf16.mxu0 %v10123_v34  ;;  %v10159_v34 = vld [vmem:[%s12795_s1 + $0xd68] sm:$0xff]  }
 0x185   :  { %v8970_v43 = vadd.f32 %v8969_v39, %v8968_v36  ;;  %9283 = vmatpush3.bf16.msra.mxu1 %v10122_v32  ;;  %7114 = vmatprep.mubr.bf16.mxu1 %v1750_v20  ;;  %v10160_v36 = vld [vmem:[%s12795_s1 + $0xd28] sm:$0xff]  }
 0x186   :  { %v8971_v45 = vpop.f32.mrf.mxu0  ;;  %v8991_v46 = vpop.f32.mrf.mxu1  ;;  %9284 = vmatprep.subr.bf16.mxu1 %v10125_v37  ;;  %v10161_v39 = vld [vmem:[%s12795_s1 + $0xde8] sm:$0xff]  }
 0x187   :  { %v6517_v48 = vadd.f32 %v8970_v43, %v11690_v7  ;;  %v8992_v49 = vadd.f32 %v8991_v46, %v8990_v40  ;;  %9263 = vmatpush3.bf16.msra.mxu0 %v10124_v35  ;;  %v10146_v7 = vld [vmem:[%s12795_s1 + $0xc88] sm:$0xff]   ;;  %v10163_v46 = vld [vmem:[%s12795_s1 + $0xd60] sm:$0xff]  }
 0x188   :  { %v8972_v51 = vpop.f32.mrf.mxu0  ;;  %9264 = vmatprep.subr.bf16.mxu0 %v10127_v42  ;;  %v8993_v52 = vpop.f32.mrf.mxu1  ;;  %v10162_v43 = vld [vmem:[%s12795_s1 + $0xda8] sm:$0xff]  }
 0x189   :  { %v11791_v54 = vadd.f32 %v8992_v49, %v6517_v48  ;;  %9285 = vmatpush3.bf16.msra.mxu1 %v10126_v38  ;;  %v10164_v48 = vld [vmem:[%s12795_s1 + $0xd20] sm:$0xff]   ;;  %v10167_v52 = vld [vmem:[%s12795_s1 + $0xd58] sm:$0xff]  }
 0x18a   :  { %9286 = vmatprep.subr.bf16.mxu1 %v10129_v47  ;;  %v8994_v56 = vpop.f32.mrf.mxu1  ;;  %v10166_v51 = vld [vmem:[%s12795_s1 + $0xda0] sm:$0xff]  }
 0x18b   :  { %9265 = vmatpush3.bf16.msra.mxu0 %v10128_v44  ;;  %v10171_v56 = vld [vmem:[%s12795_s1 + $0xd50] sm:$0xff]  }
 0x18c   :  { %9266 = vmatprep.subr.bf16.mxu0 %v10131_v53  ;;  %v10168_v53 = vld [vmem:[%s12795_s1 + $0xd18] sm:$0xff]  }
 0x18d   :  { %9287 = vmatpush3.bf16.msra.mxu1 %v10130_v50  ;;  %v10165_v50 = vld [vmem:[%s12795_s1 + $0xde0] sm:$0xff]  }
 0x18e   :  { %9288 = vmatprep.subr.bf16.mxu1 %v10133_v57  ;;  %v10172_v57 = vld [vmem:[%s12795_s1 + $0xd10] sm:$0xff]  }
 0x18f   :  { %9267 = vmatpush3.bf16.msra.mxu0 %v10132_v55  ;;  %v10170_v55 = vld [vmem:[%s12795_s1 + $0xd98] sm:$0xff]  }
 0x190   :  { %9268 = vmatprep.subr.bf16.mxu0 %v10135_v59  ;;  %v10174_v59 = vld [vmem:[%s12795_s1 + $0xd90] sm:$0xff]  }
 0x191   :  { %9289 = vmatpush3.bf16.msra.mxu1 %v10134_v58  ;;  %v10173_v58 = vld [vmem:[%s12795_s1 + $0xdd0] sm:$0xff]  }
 0x192   :  { %9290 = vmatprep.subr.bf16.mxu1 %v10137_v61  ;;  %v10176_v61 = vld [vmem:[%s12795_s1 + $0xd08] sm:$0xff]  }
 0x193   :  { %9269 = vmatpush3.bf16.msra.mxu0 %v10136_v60  ;;  %v10175_v60 = vld [vmem:[%s12795_s1 + $0xd48] sm:$0xff]  }
 0x194   :  { %9270 = vmatprep.subr.bf16.mxu0 %v10139_v63  ;;  %v10178_v63 = vld [vmem:[%s12795_s1 + $0xd88] sm:$0xff]  }
 0x195   :  { %9291 = vmatpush3.bf16.msra.mxu1 %v10138_v62  ;;  %v10177_v62 = vld [vmem:[%s12795_s1 + $0xdc8] sm:$0xff]  }
 0x196   :  { %9292 = vmatprep.subr.bf16.mxu1 %v10141_v1  ;;  %v10180_v1 = vld [vmem:[%s12795_s1 + $0xd00] sm:$0xff]  }
 0x197   :  { %9271 = vmatpush3.bf16.msra.mxu0 %v10140_v0  ;;  %v10179_v0 = vld [vmem:[%s12795_s1 + $0xd40] sm:$0xff]  }
 0x198   :  { %9272 = vmatprep.subr.bf16.mxu0 %v10143_v3  ;;  %v10183_v3 = vld [vmem:[%s12795_s1 + $0xd80] sm:$0xff]  }
 0x199   :  { %9293 = vmatpush3.bf16.msra.mxu1 %v10142_v2  ;;  %v10181_v2 = vld [vmem:[%s12795_s1 + $0xdc0] sm:$0xff]  }
 0x19a   :  { %9294 = vmatprep.subr.bf16.mxu1 %v10145_v5  ;;  %v10184_v5 = vld [vmem:[%s12795_s1 + $0xe78] sm:$0xff]  }
 0x19b   :  { %9273 = vmatpush3.bf16.msra.mxu0 %v10144_v4  ;;  %v1733_v4 = vrot.slane %v11849_v13, %v10601_v41  ;;  %v10190_v13 = vld [vmem:[%s12795_s1 + $0xef0] sm:$0xff]  }
 0x19c   :  { %9274 = vmatprep.subr.bf16.mxu0 %v10147_v10  ;;  %v10188_v10 = vld [vmem:[%s12795_s1 + $0xe70] sm:$0xff]  }
 0x19d   :  { %9295 = vmatpush3.bf16.msra.mxu1 %v10146_v7  ;;  %v10186_v7 = vld [vmem:[%s12795_s1 + $0xef8] sm:$0xff]   ;;  %v1749_v9 = vcombine.high %v1733_v4, %v1733_v4 }
 0x19e   :  { %9296 = vmatprep.subr.bf16.mxu1 %v10149_v14  ;;  %v10191_v14 = vld [vmem:[%s12795_s1 + $0xeb0] sm:$0xff]  }
 0x19f   :  { %9275 = vmatpush3.bf16.msra.mxu0 %v10148_v11  ;;  %v10189_v11 = vld [vmem:[%s12795_s1 + $0xe30] sm:$0xff]  }
 0x1a0   :  { %9304 = vmatprep.subr.bf16.mxu0 %v10151_v19  ;;  %v10193_v19 = vld [vmem:[%s12795_s1 + $0xe28] sm:$0xff]  }
 0x1a1   :  { %9297 = vmatpush3.bf16.msra.mxu1 %v10150_v16 }
 0x1a2   :  { %v9012_v29 = vpop.f32.mrf.mxu0  ;;  %7075 = vmatmul.mubr.bf16.vlgmr.msra.gmra.mxu0 %v1726_v18  ;;  %9326 = vmatprep.subr.bf16.mxu1 %v10153_v23 }
 0x1a3   :  { %9305 = vmatpush3.bf16.msra.mxu0 %v10152_v21  ;;  %7154 = vmatprep.mubr.bf16.mxu0 %v1747_v22  ;;  %v10194_v22 = vld [vmem:[%s12795_s1 + $0xee8] sm:$0xff]  }
 0x1a4   :  { %v9013_v32 = vpop.f32.mrf.mxu0  ;;  %v9034_v33 = vpop.f32.mrf.mxu1  ;;  %7115 = vmatmul.mubr.bf16.vlgmr.msra.gmra.mxu1 %v1748_v25  ;;  %9306 = vmatprep.subr.bf16.mxu0 %v10155_v26  ;;  %v10195_v25 = vld [vmem:[%s12795_s1 + $0xea8] sm:$0xff]  }
 0x1a5   :  { %v9014_v35 = vadd.f32 %v9013_v32, %v9012_v29  ;;  %9327 = vmatpush3.bf16.msra.mxu1 %v10154_v24  ;;  %7194 = vmatprep.mubr.bf16.mxu1 %v1751_v28  ;;  %v10196_v28 = vld [vmem:[%s12795_s1 + $0xe60] sm:$0xff]  }
 0x1a6   :  { %v9015_v37 = vpop.f32.mrf.mxu0  ;;  %v9035_v38 = vpop.f32.mrf.mxu1  ;;  %9328 = vmatprep.subr.bf16.mxu1 %v10157_v30  ;;  %v10197_v30 = vld [vmem:[%s12795_s1 + $0xe20] sm:$0xff]  }
 0x1a7   :  { %v6597_v40 = vadd.f32 %v9014_v35, %v11791_v54  ;;  %v9036_v42 = vadd.f32 %v9035_v38, %v9034_v33  ;;  %9307 = vmatpush3.bf16.msra.mxu0 %v10156_v27  ;;  %v10169_v54 = vld [vmem:[%s12795_s1 + $0xdd8] sm:$0xff]   ;;  %v10198_v32 = vld [vmem:[%s12795_s1 + $0xee0] sm:$0xff]   ;;  %v10204_v38 = vld [vmem:[%s12795_s1 + $0xe50] sm:$0xff]  }
 0x1a8   :  { %v9016_v44 = vpop.f32.mrf.mxu0  ;;  %9308 = vmatprep.subr.bf16.mxu0 %v10159_v34  ;;  %v9037_v45 = vpop.f32.mrf.mxu1  ;;  %v10199_v33 = vld [vmem:[%s12795_s1 + $0xea0] sm:$0xff]   ;;  %v10200_v34 = vld [vmem:[%s12795_s1 + $0xe58] sm:$0xff]  }
 0x1a9   :  { %v11902_v47 = vadd.f32 %v9036_v42, %v6597_v40  ;;  %9329 = vmatpush3.bf16.msra.mxu1 %v10158_v31  ;;  %v10201_v35 = vld [vmem:[%s12795_s1 + $0xe18] sm:$0xff]   ;;  %v10206_v40 = vld [vmem:[%s12795_s1 + $0xed0] sm:$0xff]   ;;  %v10209_v44 = vld [vmem:[%s12795_s1 + $0xe08] sm:$0xff]  }
 0x1aa   :  { %9330 = vmatprep.subr.bf16.mxu1 %v10161_v39  ;;  %v9038_v49 = vpop.f32.mrf.mxu1  ;;  %v10203_v37 = vld [vmem:[%s12795_s1 + $0xe98] sm:$0xff]   ;;  %v10205_v39 = vld [vmem:[%s12795_s1 + $0xe10] sm:$0xff]   ;;  %v10210_v45 = vld [vmem:[%s12795_s1 + $0xec8] sm:$0xff]  }
 0x1ab   :  { %9309 = vmatpush3.bf16.msra.mxu0 %v10160_v36  ;;  %v10202_v36 = vld [vmem:[%s12795_s1 + $0xed8] sm:$0xff]   ;;  %v10207_v42 = vld [vmem:[%s12795_s1 + $0xe90] sm:$0xff]  }
 0x1ac   :  { %9310 = vmatprep.subr.bf16.mxu0 %v10163_v46  ;;  %v35_v46 = vld [vmem:[%s12794_s0 + $0x38] sm:$0xff] }
 0x1ad   :  { %9331 = vmatpush3.bf16.msra.mxu1 %v10162_v43  ;;  %v10208_v43 = vld [vmem:[%s12795_s1 + $0xe48] sm:$0xff]   ;;  %v1752_v49 = vcombine.high %v35_v46, %v35_v46 }
 0x1ae   :  { %9332 = vmatprep.subr.bf16.mxu1 %v10165_v50  ;;  %v10212_v50 = vld [vmem:[%s12795_s1 + $0xe40] sm:$0xff]  }
 0x1af   :  { %9311 = vmatpush3.bf16.msra.mxu0 %v10164_v48  ;;  %v1759_v48 = vrot.slane %v35_v46, %v10601_v41  ;;  %v10250_v46 = vld [vmem:[%s12795_s1 + $0x1038] sm:$0xff]  }
 0x1b0   :  { %9312 = vmatprep.subr.bf16.mxu0 %v10167_v52 }
 0x1b1   :  { %9333 = vmatpush3.bf16.msra.mxu1 %v10166_v51  ;;  %v10213_v51 = vld [vmem:[%s12795_s1 + $0xe00] sm:$0xff]   ;;  %v1767_v52 = vcombine.high %v1759_v48, %v1759_v48 }
 0x1b2   :  { %9334 = vmatprep.subr.bf16.mxu1 %v10169_v54  ;;  %v10214_v54 = vld [vmem:[%s12795_s1 + $0xec0] sm:$0xff]  }
 0x1b3   :  { %9313 = vmatpush3.bf16.msra.mxu0 %v10168_v53  ;;  %v12061_v53 = vrot.slane %v1752_v49, %v10601_v41 }
 0x1b4   :  { %9314 = vmatprep.subr.bf16.mxu0 %v10171_v56  ;;  %v10215_v56 = vld [vmem:[%s12795_s1 + $0xe80] sm:$0xff]  }
 0x1b5   :  { %9335 = vmatpush3.bf16.msra.mxu1 %v10170_v55  ;;  %v1789_v55 = vrot.slane %v1767_v52, %v10601_v41 }
 0x1b6   :  { %9336 = vmatprep.subr.bf16.mxu1 %v10173_v58  ;;  %v1775_v58 = vrot.slane %v1759_v48, %v10601_v41  ;;  %v10252_v48 = vld [vmem:[%s12795_s1 + $0x10b8] sm:$0xff]  }
 0x1b7   :  { %9315 = vmatpush3.bf16.msra.mxu0 %v10172_v57  ;;  %v1768_v57 = vcombine.high %v12061_v53, %v12061_v53 }
 0x1b8   :  { %9316 = vmatprep.subr.bf16.mxu0 %v10175_v60  ;;  %v1799_v60 = vcombine.high %v1789_v55, %v1789_v55 }
 0x1b9   :  { %9337 = vmatpush3.bf16.msra.mxu1 %v10174_v59  ;;  %v10216_v59 = vld [vmem:[%s12795_s1 + $0xf78] sm:$0xff]  }
 0x1ba   :  { %9338 = vmatprep.subr.bf16.mxu1 %v10177_v62  ;;  %v1796_v62 = vrot.slane %v1768_v57, %v10601_v41  ;;  %v10257_v57 = vld [vmem:[%s12795_s1 + $0x1068] sm:$0xff]  }
 0x1bb   :  { %9317 = vmatpush3.bf16.msra.mxu0 %v10176_v61  ;;  %v10217_v61 = vld [vmem:[%s12795_s1 + $0xf38] sm:$0xff]  }
 0x1bc   :  { %9318 = vmatprep.subr.bf16.mxu0 %v10179_v0  ;;  %v10219_v0 = vld [vmem:[%s12795_s1 + $0xfb8] sm:$0xff]  }
 0x1bd   :  { %9339 = vmatpush3.bf16.msra.mxu1 %v10178_v63  ;;  %v10218_v63 = vld [vmem:[%s12795_s1 + $0xff8] sm:$0xff]  }
 0x1be   :  { %9340 = vmatprep.subr.bf16.mxu1 %v10181_v2  ;;  %v10220_v2 = vld [vmem:[%s12795_s1 + $0xf70] sm:$0xff]  }
 0x1bf   :  { %9319 = vmatpush3.bf16.msra.mxu0 %v10180_v1  ;;  %v1797_v1 = vcombine.high %v1775_v58, %v1775_v58 }
 0x1c0   :  { %9348 = vmatprep.subr.bf16.mxu0 %v10184_v5 }
 0x1c1   :  { %9341 = vmatpush3.bf16.msra.mxu1 %v10183_v3  ;;  %v10221_v3 = vld [vmem:[%s12795_s1 + $0xf30] sm:$0xff]  }
 0x1c2   :  { %v9056_v12 = vpop.f32.mrf.mxu0  ;;  %7155 = vmatmul.mubr.bf16.vlgmr.msra.gmra.mxu0 %v1733_v4  ;;  %9370 = vmatprep.subr.bf16.mxu1 %v10186_v7  ;;  %v1800_v4 = vcombine.high %v1796_v62, %v1796_v62  ;;  %v10223_v7 = vld [vmem:[%s12795_s1 + $0xfb0] sm:$0xff]  }
 0x1c3   :  { %9349 = vmatpush3.bf16.msra.mxu0 %v10185_v6  ;;  %7234 = vmatprep.mubr.bf16.mxu0 %v1789_v55  ;;  %v10222_v6 = vld [vmem:[%s12795_s1 + $0xff0] sm:$0xff]  }
 0x1c4   :  { %v9057_v15 = vpop.f32.mrf.mxu0  ;;  %v9078_v16 = vpop.f32.mrf.mxu1  ;;  %7195 = vmatmul.mubr.bf16.vlgmr.msra.gmra.mxu1 %v1749_v9  ;;  %9350 = vmatprep.subr.bf16.mxu0 %v10188_v10  ;;  %v10224_v10 = vld [vmem:[%s12795_s1 + $0xf68] sm:$0xff]  }
 0x1c5   :  { %v9058_v18 = vadd.f32 %v9057_v15, %v9056_v12  ;;  %9371 = vmatpush3.bf16.msra.mxu1 %v10187_v8  ;;  %7274 = vmatprep.mubr.bf16.mxu1 %v1799_v60  ;;  %v10225_v12 = vld [vmem:[%s12795_s1 + $0xf28] sm:$0xff]  }
 0x1c6   :  { %v9059_v20 = vpop.f32.mrf.mxu0  ;;  %v9079_v21 = vpop.f32.mrf.mxu1  ;;  %9372 = vmatprep.subr.bf16.mxu1 %v10190_v13  ;;  %v10226_v15 = vld [vmem:[%s12795_s1 + $0xfe8] sm:$0xff]  }
 0x1c7   :  { %v6677_v23 = vadd.f32 %v9058_v18, %v11902_v47  ;;  %v9080_v24 = vadd.f32 %v9079_v21, %v9078_v16  ;;  %9351 = vmatpush3.bf16.msra.mxu0 %v10189_v11  ;;  %v10211_v47 = vld [vmem:[%s12795_s1 + $0xe88] sm:$0xff]   ;;  %v10228_v21 = vld [vmem:[%s12795_s1 + $0xf60] sm:$0xff]  }
 0x1c8   :  { %v9060_v26 = vpop.f32.mrf.mxu0  ;;  %9352 = vmatprep.subr.bf16.mxu0 %v10192_v17  ;;  %v9081_v27 = vpop.f32.mrf.mxu1  ;;  %v10227_v18 = vld [vmem:[%s12795_s1 + $0xfa8] sm:$0xff]  }
 0x1c9   :  { %v12003_v29 = vadd.f32 %v9080_v24, %v6677_v23  ;;  %9373 = vmatpush3.bf16.msra.mxu1 %v10191_v14  ;;  %v10229_v23 = vld [vmem:[%s12795_s1 + $0xf20] sm:$0xff]   ;;  %v10232_v27 = vld [vmem:[%s12795_s1 + $0xf58] sm:$0xff]  }
 0x1ca   :  { %9374 = vmatprep.subr.bf16.mxu1 %v10194_v22  ;;  %v9082_v31 = vpop.f32.mrf.mxu1  ;;  %v10231_v26 = vld [vmem:[%s12795_s1 + $0xfa0] sm:$0xff]  }
 0x1cb   :  { %9353 = vmatpush3.bf16.msra.mxu0 %v10193_v19  ;;  %v10236_v31 = vld [vmem:[%s12795_s1 + $0xf50] sm:$0xff]  }
 0x1cc   :  { %9354 = vmatprep.subr.bf16.mxu0 %v10196_v28  ;;  %v10233_v28 = vld [vmem:[%s12795_s1 + $0xf18] sm:$0xff]  }
 0x1cd   :  { %9375 = vmatpush3.bf16.msra.mxu1 %v10195_v25  ;;  %v10230_v25 = vld [vmem:[%s12795_s1 + $0xfe0] sm:$0xff]  }
 0x1ce   :  { %9376 = vmatprep.subr.bf16.mxu1 %v10198_v32  ;;  %v10237_v32 = vld [vmem:[%s12795_s1 + $0xf10] sm:$0xff]  }
 0x1cf   :  { %9355 = vmatpush3.bf16.msra.mxu0 %v10197_v30  ;;  %v10235_v30 = vld [vmem:[%s12795_s1 + $0xf98] sm:$0xff]  }
 0x1d0   :  { %9356 = vmatprep.subr.bf16.mxu0 %v10200_v34  ;;  %v10239_v34 = vld [vmem:[%s12795_s1 + $0xf90] sm:$0xff]  }
 0x1d1   :  { %9377 = vmatpush3.bf16.msra.mxu1 %v10199_v33  ;;  %v10238_v33 = vld [vmem:[%s12795_s1 + $0xfd0] sm:$0xff]  }
 0x1d2   :  { %9378 = vmatprep.subr.bf16.mxu1 %v10202_v36  ;;  %v10241_v36 = vld [vmem:[%s12795_s1 + $0xf08] sm:$0xff]  }
 0x1d3   :  { %9357 = vmatpush3.bf16.msra.mxu0 %v10201_v35  ;;  %v10240_v35 = vld [vmem:[%s12795_s1 + $0xf48] sm:$0xff]  }
 0x1d4   :  { %9358 = vmatprep.subr.bf16.mxu0 %v10204_v38  ;;  %v10243_v38 = vld [vmem:[%s12795_s1 + $0xf88] sm:$0xff]  }
 0x1d5   :  { %9379 = vmatpush3.bf16.msra.mxu1 %v10203_v37  ;;  %v10242_v37 = vld [vmem:[%s12795_s1 + $0xfc8] sm:$0xff]  }
 0x1d6   :  { %9380 = vmatprep.subr.bf16.mxu1 %v10206_v40  ;;  %v10245_v40 = vld [vmem:[%s12795_s1 + $0xf00] sm:$0xff]  }
 0x1d7   :  { %9359 = vmatpush3.bf16.msra.mxu0 %v10205_v39  ;;  %v10244_v39 = vld [vmem:[%s12795_s1 + $0xf40] sm:$0xff]  }
 0x1d8   :  { %9360 = vmatprep.subr.bf16.mxu0 %v10208_v43  ;;  %v10248_v43 = vld [vmem:[%s12795_s1 + $0xf80] sm:$0xff]  }
 0x1d9   :  { %9381 = vmatpush3.bf16.msra.mxu1 %v10207_v42  ;;  %v10246_v42 = vld [vmem:[%s12795_s1 + $0xfc0] sm:$0xff]  }
 0x1da   :  { %9382 = vmatprep.subr.bf16.mxu1 %v10210_v45  ;;  %v10249_v45 = vld [vmem:[%s12795_s1 + $0x1078] sm:$0xff]  }
 0x1db   :  { %9361 = vmatpush3.bf16.msra.mxu0 %v10209_v44  ;;  %v1782_v44 = vrot.slane %v12061_v53, %v10601_v41  ;;  %v10255_v53 = vld [vmem:[%s12795_s1 + $0x10f0] sm:$0xff]  }
 0x1dc   :  { %9362 = vmatprep.subr.bf16.mxu0 %v10212_v50  ;;  %v10253_v50 = vld [vmem:[%s12795_s1 + $0x1070] sm:$0xff]  }
 0x1dd   :  { %9383 = vmatpush3.bf16.msra.mxu1 %v10211_v47  ;;  %v10251_v47 = vld [vmem:[%s12795_s1 + $0x10f8] sm:$0xff]   ;;  %v1798_v49 = vcombine.high %v1782_v44, %v1782_v44 }
 0x1de   :  { %9384 = vmatprep.subr.bf16.mxu1 %v10214_v54  ;;  %v10256_v54 = vld [vmem:[%s12795_s1 + $0x10b0] sm:$0xff]  }
 0x1df   :  { %9363 = vmatpush3.bf16.msra.mxu0 %v10213_v51  ;;  %v10254_v51 = vld [vmem:[%s12795_s1 + $0x1030] sm:$0xff]  }
 0x1e0   :  { %9392 = vmatprep.subr.bf16.mxu0 %v10216_v59  ;;  %v10258_v59 = vld [vmem:[%s12795_s1 + $0x1028] sm:$0xff]  }
 0x1e1   :  { %9385 = vmatpush3.bf16.msra.mxu1 %v10215_v56 }
 0x1e2   :  { %v9100_v5 = vpop.f32.mrf.mxu0  ;;  %7235 = vmatmul.mubr.bf16.vlgmr.msra.gmra.mxu0 %v1775_v58  ;;  %9414 = vmatprep.subr.bf16.mxu1 %v10218_v63 }
 0x1e3   :  { %9393 = vmatpush3.bf16.msra.mxu0 %v10217_v61  ;;  %7314 = vmatprep.mubr.bf16.mxu0 %v1796_v62  ;;  %v10259_v62 = vld [vmem:[%s12795_s1 + $0x10e8] sm:$0xff]  }
 0x1e4   :  { %v9101_v8 = vpop.f32.mrf.mxu0  ;;  %v9122_v9 = vpop.f32.mrf.mxu1  ;;  %7275 = vmatmul.mubr.bf16.vlgmr.msra.gmra.mxu1 %v1797_v1  ;;  %9394 = vmatprep.subr.bf16.mxu0 %v10220_v2  ;;  %v10260_v1 = vld [vmem:[%s12795_s1 + $0x10a8] sm:$0xff]  }
 0x1e5   :  { %v9102_v11 = vadd.f32 %v9101_v8, %v9100_v5  ;;  %9415 = vmatpush3.bf16.msra.mxu1 %v10219_v0  ;;  %7354 = vmatprep.mubr.bf16.mxu1 %v1800_v4  ;;  %v10261_v4 = vld [vmem:[%s12795_s1 + $0x1060] sm:$0xff]  }
 0x1e6   :  { %v9103_v13 = vpop.f32.mrf.mxu0  ;;  %v9123_v14 = vpop.f32.mrf.mxu1  ;;  %9416 = vmatprep.subr.bf16.mxu1 %v10222_v6  ;;  %v10262_v6 = vld [vmem:[%s12795_s1 + $0x1020] sm:$0xff]  }
 0x1e7   :  { %v6757_v16 = vadd.f32 %v9102_v11, %v12003_v29  ;;  %v9124_v17 = vadd.f32 %v9123_v14, %v9122_v9  ;;  %9395 = vmatpush3.bf16.msra.mxu0 %v10221_v3  ;;  %v10234_v29 = vld [vmem:[%s12795_s1 + $0xfd8] sm:$0xff]   ;;  %v10263_v8 = vld [vmem:[%s12795_s1 + $0x10e0] sm:$0xff]   ;;  %v10269_v14 = vld [vmem:[%s12795_s1 + $0x1050] sm:$0xff]  }
 0x1e8   :  { %v9104_v19 = vpop.f32.mrf.mxu0  ;;  %9396 = vmatprep.subr.bf16.mxu0 %v10224_v10  ;;  %v9125_v20 = vpop.f32.mrf.mxu1  ;;  %v10264_v9 = vld [vmem:[%s12795_s1 + $0x10a0] sm:$0xff]   ;;  %v10265_v10 = vld [vmem:[%s12795_s1 + $0x1058] sm:$0xff]  }
 0x1e9   :  { %v12114_v22 = vadd.f32 %v9124_v17, %v6757_v16  ;;  %9417 = vmatpush3.bf16.msra.mxu1 %v10223_v7  ;;  %v10266_v11 = vld [vmem:[%s12795_s1 + $0x1018] sm:$0xff]   ;;  %v10271_v16 = vld [vmem:[%s12795_s1 + $0x10d0] sm:$0xff]   ;;  %v10274_v19 = vld [vmem:[%s12795_s1 + $0x1008] sm:$0xff]  }
 0x1ea   :  { %9418 = vmatprep.subr.bf16.mxu1 %v10226_v15  ;;  %v9126_v24 = vpop.f32.mrf.mxu1  ;;  %v10268_v13 = vld [vmem:[%s12795_s1 + $0x1098] sm:$0xff]   ;;  %v10270_v15 = vld [vmem:[%s12795_s1 + $0x1010] sm:$0xff]   ;;  %v10275_v20 = vld [vmem:[%s12795_s1 + $0x10c8] sm:$0xff]  }
 0x1eb   :  { %9397 = vmatpush3.bf16.msra.mxu0 %v10225_v12  ;;  %v10267_v12 = vld [vmem:[%s12795_s1 + $0x10d8] sm:$0xff]   ;;  %v10272_v17 = vld [vmem:[%s12795_s1 + $0x1090] sm:$0xff]  }
 0x1ec   :  { %9398 = vmatprep.subr.bf16.mxu0 %v10228_v21  ;;  %v36_v21 = vld [vmem:[%s12794_s0 + $0x40] sm:$0xff] }
 0x1ed   :  { %9419 = vmatpush3.bf16.msra.mxu1 %v10227_v18  ;;  %v10273_v18 = vld [vmem:[%s12795_s1 + $0x1048] sm:$0xff]   ;;  %v1801_v24 = vcombine.high %v36_v21, %v36_v21 }
 0x1ee   :  { %9420 = vmatprep.subr.bf16.mxu1 %v10230_v25  ;;  %v10276_v25 = vld [vmem:[%s12795_s1 + $0x1088] sm:$0xff]  }
 0x1ef   :  { %9399 = vmatpush3.bf16.msra.mxu0 %v10229_v23  ;;  %v1808_v23 = vrot.slane %v36_v21, %v10601_v41  ;;  %v10316_v21 = vld [vmem:[%s12795_s1 + $0x12f8] sm:$0xff]  }
 0x1f0   :  { %9400 = vmatprep.subr.bf16.mxu0 %v10232_v27 }
 0x1f1   :  { %9421 = vmatpush3.bf16.msra.mxu1 %v10231_v26  ;;  %v10279_v26 = vld [vmem:[%s12795_s1 + $0x10c0] sm:$0xff]   ;;  %v1816_v27 = vcombine.high %v1808_v23, %v1808_v23 }
 0x1f2   :  { %9422 = vmatprep.subr.bf16.mxu1 %v10234_v29  ;;  %v10278_v29 = vld [vmem:[%s12795_s1 + $0x1000] sm:$0xff]  }
 0x1f3   :  { %9401 = vmatpush3.bf16.msra.mxu0 %v10233_v28  ;;  %v12273_v28 = vrot.slane %v1801_v24, %v10601_v41  ;;  %v10318_v24 = vld [vmem:[%s12795_s1 + $0x1270] sm:$0xff]  }
 0x1f4   :  { %9402 = vmatprep.subr.bf16.mxu0 %v10236_v31  ;;  %v1824_v31 = vrot.slane %v1808_v23, %v10601_v41 }
 0x1f5   :  { %9423 = vmatpush3.bf16.msra.mxu1 %v10235_v30  ;;  %v1838_v30 = vrot.slane %v1816_v27, %v10601_v41  ;;  %v10320_v27 = vld [vmem:[%s12795_s1 + $0x12f0] sm:$0xff]  }
 0x1f6   :  { %9424 = vmatprep.subr.bf16.mxu1 %v10238_v33  ;;  %v1817_v33 = vcombine.high %v12273_v28, %v12273_v28 }
 0x1f7   :  { %9403 = vmatpush3.bf16.msra.mxu0 %v10237_v32  ;;  %v10281_v32 = vld [vmem:[%s12795_s1 + $0x1178] sm:$0xff]  }
 0x1f8   :  { %9404 = vmatprep.subr.bf16.mxu0 %v10240_v35  ;;  %v1848_v35 = vcombine.high %v1838_v30, %v1838_v30 }
 0x1f9   :  { %9425 = vmatpush3.bf16.msra.mxu1 %v10239_v34  ;;  %v10280_v34 = vld [vmem:[%s12795_s1 + $0x1080] sm:$0xff]  }
 0x1fa   :  { %9426 = vmatprep.subr.bf16.mxu1 %v10242_v37  ;;  %v1845_v37 = vrot.slane %v1817_v33, %v10601_v41  ;;  %v10321_v33 = vld [vmem:[%s12795_s1 + $0x12b0] sm:$0xff]  }
 0x1fb   :  { %9405 = vmatpush3.bf16.msra.mxu0 %v10241_v36  ;;  %v10283_v36 = vld [vmem:[%s12795_s1 + $0x11f8] sm:$0xff]  }
 0x1fc   :  { %9406 = vmatprep.subr.bf16.mxu0 %v10244_v39  ;;  %v1846_v39 = vcombine.high %v1824_v31, %v1824_v31 }
 0x1fd   :  { %9427 = vmatpush3.bf16.msra.mxu1 %v10243_v38  ;;  %v10282_v38 = vld [vmem:[%s12795_s1 + $0x1138] sm:$0xff]  }
 0x1fe   :  { %9428 = vmatprep.subr.bf16.mxu1 %v10246_v42  ;;  %v10284_v42 = vld [vmem:[%s12795_s1 + $0x11b8] sm:$0xff]  }
 0x1ff   :  { %9407 = vmatpush3.bf16.msra.mxu0 %v10245_v40  ;;  %v10285_v40 = vld [vmem:[%s12795_s1 + $0x1170] sm:$0xff]  }
 0x200   :  { %9436 = vmatprep.subr.bf16.mxu0 %v10249_v45  ;;  %v10287_v45 = vld [vmem:[%s12795_s1 + $0x11f0] sm:$0xff]  }
 0x201   :  { %9429 = vmatpush3.bf16.msra.mxu1 %v10248_v43  ;;  %v1849_v43 = vcombine.high %v1845_v37, %v1845_v37 }
 0x202   :  { %v9144_v52 = vpop.f32.mrf.mxu0  ;;  %7315 = vmatmul.mubr.bf16.vlgmr.msra.gmra.mxu0 %v1782_v44  ;;  %9458 = vmatprep.subr.bf16.mxu1 %v10251_v47 }
 0x203   :  { %9437 = vmatpush3.bf16.msra.mxu0 %v10250_v46  ;;  %7394 = vmatprep.mubr.bf16.mxu0 %v1838_v30  ;;  %v10286_v46 = vld [vmem:[%s12795_s1 + $0x1130] sm:$0xff]  }
 0x204   :  { %v9145_v55 = vpop.f32.mrf.mxu0  ;;  %v9166_v56 = vpop.f32.mrf.mxu1  ;;  %7355 = vmatmul.mubr.bf16.vlgmr.msra.gmra.mxu1 %v1798_v49  ;;  %9438 = vmatprep.subr.bf16.mxu0 %v10253_v50  ;;  %v10289_v49 = vld [vmem:[%s12795_s1 + $0x1168] sm:$0xff]  }
 0x205   :  { %v9146_v58 = vadd.f32 %v9145_v55, %v9144_v52  ;;  %9459 = vmatpush3.bf16.msra.mxu1 %v10252_v48  ;;  %7434 = vmatprep.mubr.bf16.mxu1 %v1848_v35 }
 0x206   :  { %v9147_v60 = vpop.f32.mrf.mxu0  ;;  %v9167_v61 = vpop.f32.mrf.mxu1  ;;  %9460 = vmatprep.subr.bf16.mxu1 %v10255_v53 }
 0x207   :  { %v6837_v63 = vadd.f32 %v9146_v58, %v12114_v22  ;;  %v9168_v0 = vadd.f32 %v9167_v61, %v9166_v56  ;;  %9439 = vmatpush3.bf16.msra.mxu0 %v10254_v51  ;;  %v10277_v22 = vld [vmem:[%s12795_s1 + $0x1040] sm:$0xff]   ;;  %v10288_v51 = vld [vmem:[%s12795_s1 + $0x11b0] sm:$0xff]  }
 0x208   :  { %v9148_v2 = vpop.f32.mrf.mxu0  ;;  %9440 = vmatprep.subr.bf16.mxu0 %v10257_v57  ;;  %v9169_v3 = vpop.f32.mrf.mxu1  ;;  %v10290_v57 = vld [vmem:[%s12795_s1 + $0x1128] sm:$0xff]   ;;  %v10293_v60 = vld [vmem:[%s12795_s1 + $0x1160] sm:$0xff]  }
 0x209   :  { %v12215_v5 = vadd.f32 %v9168_v0, %v6837_v63  ;;  %9461 = vmatpush3.bf16.msra.mxu1 %v10256_v54  ;;  %v10291_v54 = vld [vmem:[%s12795_s1 + $0x11e8] sm:$0xff]   ;;  %v10295_v0 = vld [vmem:[%s12795_s1 + $0x11e0] sm:$0xff]   ;;  %v10297_v2 = vld [vmem:[%s12795_s1 + $0x1158] sm:$0xff]  }
 0x20a   :  { %9462 = vmatprep.subr.bf16.mxu1 %v10259_v62  ;;  %v9170_v7 = vpop.f32.mrf.mxu1  ;;  %v10292_v62 = vld [vmem:[%s12795_s1 + $0x11a8] sm:$0xff]   ;;  %v10296_v3 = vld [vmem:[%s12795_s1 + $0x11a0] sm:$0xff]  }
 0x20b   :  { %9441 = vmatpush3.bf16.msra.mxu0 %v10258_v59  ;;  %v10300_v7 = vld [vmem:[%s12795_s1 + $0x1198] sm:$0xff]  }
 0x20c   :  { %9442 = vmatprep.subr.bf16.mxu0 %v10261_v4  ;;  %v10299_v4 = vld [vmem:[%s12795_s1 + $0x11d8] sm:$0xff]  }
 0x20d   :  { %9463 = vmatpush3.bf16.msra.mxu1 %v10260_v1  ;;  %v10294_v1 = vld [vmem:[%s12795_s1 + $0x1120] sm:$0xff]  }
 0x20e   :  { %9464 = vmatprep.subr.bf16.mxu1 %v10263_v8  ;;  %v10303_v8 = vld [vmem:[%s12795_s1 + $0x11d0] sm:$0xff]  }
 0x20f   :  { %9443 = vmatpush3.bf16.msra.mxu0 %v10262_v6  ;;  %v10301_v6 = vld [vmem:[%s12795_s1 + $0x1150] sm:$0xff]  }
 0x210   :  { %9444 = vmatprep.subr.bf16.mxu0 %v10265_v10  ;;  %v10305_v10 = vld [vmem:[%s12795_s1 + $0x1148] sm:$0xff]  }
 0x211   :  { %9465 = vmatpush3.bf16.msra.mxu1 %v10264_v9  ;;  %v10302_v9 = vld [vmem:[%s12795_s1 + $0x1110] sm:$0xff]  }
 0x212   :  { %9466 = vmatprep.subr.bf16.mxu1 %v10267_v12  ;;  %v10307_v12 = vld [vmem:[%s12795_s1 + $0x11c8] sm:$0xff]  }
 0x213   :  { %9445 = vmatpush3.bf16.msra.mxu0 %v10266_v11  ;;  %v10304_v11 = vld [vmem:[%s12795_s1 + $0x1190] sm:$0xff]  }
 0x214   :  { %9446 = vmatprep.subr.bf16.mxu0 %v10269_v14  ;;  %v10309_v14 = vld [vmem:[%s12795_s1 + $0x1140] sm:$0xff]  }
 0x215   :  { %9467 = vmatpush3.bf16.msra.mxu1 %v10268_v13  ;;  %v10306_v13 = vld [vmem:[%s12795_s1 + $0x1108] sm:$0xff]  }
 0x216   :  { %9468 = vmatprep.subr.bf16.mxu1 %v10271_v16  ;;  %v10311_v16 = vld [vmem:[%s12795_s1 + $0x11c0] sm:$0xff]  }
 0x217   :  { %9447 = vmatpush3.bf16.msra.mxu0 %v10270_v15  ;;  %v10308_v15 = vld [vmem:[%s12795_s1 + $0x1188] sm:$0xff]  }
 0x218   :  { %9448 = vmatprep.subr.bf16.mxu0 %v10273_v18  ;;  %v1831_v18 = vrot.slane %v12273_v28, %v10601_v41  ;;  %v10319_v28 = vld [vmem:[%s12795_s1 + $0x1230] sm:$0xff]  }
 0x219   :  { %9469 = vmatpush3.bf16.msra.mxu1 %v10272_v17  ;;  %v10310_v17 = vld [vmem:[%s12795_s1 + $0x1100] sm:$0xff]  }
 0x21a   :  { %9470 = vmatprep.subr.bf16.mxu1 %v10275_v20  ;;  %v10313_v20 = vld [vmem:[%s12795_s1 + $0x1180] sm:$0xff]   ;;  %v1847_v23 = vcombine.high %v1831_v18, %v1831_v18 }
 0x21b   :  { %9449 = vmatpush3.bf16.msra.mxu0 %v10274_v19  ;;  %v10314_v19 = vld [vmem:[%s12795_s1 + $0x1278] sm:$0xff]  }
 0x21c   :  { %9450 = vmatprep.subr.bf16.mxu0 %v10277_v22  ;;  %v10315_v22 = vld [vmem:[%s12795_s1 + $0x1238] sm:$0xff]  }
 0x21d   :  { %9471 = vmatpush3.bf16.msra.mxu1 %v10276_v25  ;;  %v10317_v25 = vld [vmem:[%s12795_s1 + $0x12b8] sm:$0xff]  }
 0x21e   :  { %9472 = vmatprep.subr.bf16.mxu1 %v10279_v26 }
 0x21f   :  { %9451 = vmatpush3.bf16.msra.mxu0 %v10278_v29 }
 0x220   :  { %9480 = vmatprep.subr.bf16.mxu0 %v10281_v32 }
 0x221   :  { %9473 = vmatpush3.bf16.msra.mxu1 %v10280_v34 }
 0x222   :  { %v9188_v44 = vpop.f32.mrf.mxu0  ;;  %7395 = vmatmul.mubr.bf16.vlgmr.msra.gmra.mxu0 %v1824_v31  ;;  %9502 = vmatprep.subr.bf16.mxu1 %v10283_v36  ;;  %v10322_v31 = vld [vmem:[%s12795_s1 + $0x1268] sm:$0xff]  }
 0x223   :  { %9481 = vmatpush3.bf16.msra.mxu0 %v10282_v38  ;;  %7474 = vmatprep.mubr.bf16.mxu0 %v1845_v37  ;;  %v10324_v36 = vld [vmem:[%s12795_s1 + $0x12e8] sm:$0xff]  }
 0x224   :  { %v9189_v47 = vpop.f32.mrf.mxu0  ;;  %v9210_v48 = vpop.f32.mrf.mxu1  ;;  %7435 = vmatmul.mubr.bf16.vlgmr.msra.gmra.mxu1 %v1846_v39  ;;  %9482 = vmatprep.subr.bf16.mxu0 %v10285_v40  ;;  %v10323_v39 = vld [vmem:[%s12795_s1 + $0x1228] sm:$0xff]  }
 0x225   :  { %v9190_v50 = vadd.f32 %v9189_v47, %v9188_v44  ;;  %9503 = vmatpush3.bf16.msra.mxu1 %v10284_v42  ;;  %7514 = vmatprep.mubr.bf16.mxu1 %v1849_v43  ;;  %v10326_v43 = vld [vmem:[%s12795_s1 + $0x1260] sm:$0xff]  }
 0x226   :  { %v9191_v52 = vpop.f32.mrf.mxu0  ;;  %v9211_v53 = vpop.f32.mrf.mxu1  ;;  %9504 = vmatprep.subr.bf16.mxu1 %v10287_v45  ;;  %v10325_v45 = vld [vmem:[%s12795_s1 + $0x12a8] sm:$0xff]   ;;  %v10328_v47 = vld [vmem:[%s12795_s1 + $0x12e0] sm:$0xff]  }
 0x227   :  { %v6917_v55 = vadd.f32 %v9190_v50, %v12215_v5  ;;  %v9212_v56 = vadd.f32 %v9211_v53, %v9210_v48  ;;  %9483 = vmatpush3.bf16.msra.mxu0 %v10286_v46  ;;  %v10298_v5 = vld [vmem:[%s12795_s1 + $0x1118] sm:$0xff]   ;;  %v10327_v48 = vld [vmem:[%s12795_s1 + $0x1220] sm:$0xff]   ;;  %v10334_v53 = vld [vmem:[%s12795_s1 + $0x1250] sm:$0xff]  }
 0x228   :  { %v9192_v58 = vpop.f32.mrf.mxu0  ;;  %9484 = vmatprep.subr.bf16.mxu0 %v10289_v49  ;;  %v9213_v59 = vpop.f32.mrf.mxu1  ;;  %v10330_v49 = vld [vmem:[%s12795_s1 + $0x1258] sm:$0xff]   ;;  %v10329_v50 = vld [vmem:[%s12795_s1 + $0x12a0] sm:$0xff]  }
 0x229   :  { %v12323_v61 = vadd.f32 %v9212_v56, %v6917_v55  ;;  %9505 = vmatpush3.bf16.msra.mxu1 %v10288_v51  ;;  %v10332_v51 = vld [vmem:[%s12795_s1 + $0x12d8] sm:$0xff]   ;;  %v10336_v55 = vld [vmem:[%s12795_s1 + $0x12d0] sm:$0xff]   ;;  %v10340_v59 = vld [vmem:[%s12795_s1 + $0x12c8] sm:$0xff]  }
 0x22a   :  { %9506 = vmatprep.subr.bf16.mxu1 %v10291_v54  ;;  %v9214_v63 = vpop.f32.mrf.mxu1  ;;  %v10331_v52 = vld [vmem:[%s12795_s1 + $0x1218] sm:$0xff]   ;;  %v10335_v56 = vld [vmem:[%s12795_s1 + $0x1210] sm:$0xff]  }
 0x22b   :  { %9485 = vmatpush3.bf16.msra.mxu0 %v10290_v57  ;;  %v10333_v54 = vld [vmem:[%s12795_s1 + $0x1298] sm:$0xff]   ;;  %v10338_v57 = vld [vmem:[%s12795_s1 + $0x1248] sm:$0xff]   ;;  %v10337_v58 = vld [vmem:[%s12795_s1 + $0x1290] sm:$0xff]  }
 0x22c   :  { %9486 = vmatprep.subr.bf16.mxu0 %v10293_v60  ;;  %v10339_v60 = vld [vmem:[%s12795_s1 + $0x1208] sm:$0xff]  }
 0x22d   :  { %9507 = vmatpush3.bf16.msra.mxu1 %v10292_v62  ;;  %v10342_v62 = vld [vmem:[%s12795_s1 + $0x1240] sm:$0xff]  }
 0x22e   :  { %9508 = vmatprep.subr.bf16.mxu1 %v10295_v0 }
 0x22f   :  { %9487 = vmatpush3.bf16.msra.mxu0 %v10294_v1  ;;  %v10341_v1 = vld [vmem:[%s12795_s1 + $0x1288] sm:$0xff]  }
 0x230   :  { %9488 = vmatprep.subr.bf16.mxu0 %v10297_v2  ;;  %v10344_v2 = vld [vmem:[%s12795_s1 + $0x12c0] sm:$0xff]  }
 0x231   :  { %9509 = vmatpush3.bf16.msra.mxu1 %v10296_v3 }
 0x232   :  { %9510 = vmatprep.subr.bf16.mxu1 %v10299_v4 }
 0x233   :  { %9489 = vmatpush3.bf16.msra.mxu0 %v10298_v5  ;;  %v10343_v5 = vld [vmem:[%s12795_s1 + $0x1200] sm:$0xff]  }
 0x234   :  { %9490 = vmatprep.subr.bf16.mxu0 %v10301_v6 }
 0x235   :  { %9511 = vmatpush3.bf16.msra.mxu1 %v10300_v7 }
 0x236   :  { %9512 = vmatprep.subr.bf16.mxu1 %v10303_v8  ;;  %v10346_v8 = vld [vmem:[%s12795_s1 + $0x1378] sm:$0xff]  }
 0x237   :  { %9491 = vmatpush3.bf16.msra.mxu0 %v10302_v9 }
 0x238   :  { %9492 = vmatprep.subr.bf16.mxu0 %v10305_v10  ;;  %v10345_v10 = vld [vmem:[%s12795_s1 + $0x1280] sm:$0xff]  }
 0x239   :  { %9513 = vmatpush3.bf16.msra.mxu1 %v10304_v11 }
 0x23a   :  { %9514 = vmatprep.subr.bf16.mxu1 %v10307_v12  ;;  %v10348_v12 = vld [vmem:[%s12795_s1 + $0x13f8] sm:$0xff]  }
 0x23b   :  { %9493 = vmatpush3.bf16.msra.mxu0 %v10306_v13 }
 0x23c   :  { %9494 = vmatprep.subr.bf16.mxu0 %v10309_v14  ;;  %v10347_v14 = vld [vmem:[%s12795_s1 + $0x1338] sm:$0xff]  }
 0x23d   :  { %9515 = vmatpush3.bf16.msra.mxu1 %v10308_v15 }
 0x23e   :  { %9516 = vmatprep.subr.bf16.mxu1 %v10311_v16  ;;  %v10350_v16 = vld [vmem:[%s12795_s1 + $0x1370] sm:$0xff]  }
 0x23f   :  { %9495 = vmatpush3.bf16.msra.mxu0 %v10310_v17  ;;  %v10349_v17 = vld [vmem:[%s12795_s1 + $0x13b8] sm:$0xff]  }
 0x240   :  { %9524 = vmatprep.subr.bf16.mxu0 %v10314_v19 }
 0x241   :  { %9517 = vmatpush3.bf16.msra.mxu1 %v10313_v20  ;;  %v10352_v20 = vld [vmem:[%s12795_s1 + $0x13f0] sm:$0xff]  }
 0x242   :  { %v9232_v26 = vpop.f32.mrf.mxu0  ;;  %7475 = vmatmul.mubr.bf16.vlgmr.msra.gmra.mxu0 %v1831_v18  ;;  %9546 = vmatprep.subr.bf16.mxu1 %v10316_v21  ;;  %v10351_v21 = vld [vmem:[%s12795_s1 + $0x1330] sm:$0xff]  }
 0x243   :  { %9525 = vmatpush3.bf16.msra.mxu0 %v10315_v22 }
 0x244   :  { %v9233_v29 = vpop.f32.mrf.mxu0  ;;  %v9254_v30 = vpop.f32.mrf.mxu1  ;;  %7515 = vmatmul.mubr.bf16.vlgmr.msra.gmra.mxu1 %v1847_v23  ;;  %9526 = vmatprep.subr.bf16.mxu0 %v10318_v24  ;;  %v10354_v24 = vld [vmem:[%s12795_s1 + $0x1368] sm:$0xff]  }
 0x245   :  { %v9234_v32 = vadd.f32 %v9233_v29, %v9232_v26  ;;  %9547 = vmatpush3.bf16.msra.mxu1 %v10317_v25  ;;  %v10353_v26 = vld [vmem:[%s12795_s1 + $0x13b0] sm:$0xff]   ;;  %v10356_v29 = vld [vmem:[%s12795_s1 + $0x13e8] sm:$0xff]  }
 0x246   :  { %v9235_v34 = vpop.f32.mrf.mxu0  ;;  %v9255_v35 = vpop.f32.mrf.mxu1  ;;  %9548 = vmatprep.subr.bf16.mxu1 %v10320_v27 }
 0x247   :  { %v6997_v37 = vadd.f32 %v9234_v32, %v12323_v61  ;;  %v9256_v38 = vadd.f32 %v9255_v35, %v9254_v30  ;;  %9527 = vmatpush3.bf16.msra.mxu0 %v10319_v28  ;;  %v37_v61 = vld [vmem:[%s12794_s0 + $0x48] sm:$0xff]  ;;  %v10358_v35 = vld [vmem:[%s12795_s1 + $0x1360] sm:$0xff]  }
 0x248   :  { %v9236_v40 = vpop.f32.mrf.mxu0  ;;  %9528 = vmatprep.subr.bf16.mxu0 %v10322_v31  ;;  %v9257_v42 = vpop.f32.mrf.mxu1  ;;  %v1857_v63 = vrot.slane %v37_v61, %v10601_v41  ;;  %v1850_v0 = vcombine.high %v37_v61, %v37_v61  ;;  %v10355_v32 = vld [vmem:[%s12795_s1 + $0x1328] sm:$0xff]   ;;  %v10381_v61 = vld [vmem:[%s12795_s1 + $0x14f8] sm:$0xff]  }
 0x249   :  { %v12424_v44 = vadd.f32 %v9256_v38, %v6997_v37  ;;  %9549 = vmatpush3.bf16.msra.mxu1 %v10321_v33  ;;  %v10357_v37 = vld [vmem:[%s12795_s1 + $0x13a8] sm:$0xff]   ;;  %v10359_v40 = vld [vmem:[%s12795_s1 + $0x1320] sm:$0xff]   ;;  %v10362_v42 = vld [vmem:[%s12795_s1 + $0x1358] sm:$0xff]  }
 0x24a   :  { %9550 = vmatprep.subr.bf16.mxu1 %v10324_v36  ;;  %v9258_v46 = vpop.f32.mrf.mxu1  ;;  %v1865_v3 = vcombine.high %v1857_v63, %v1857_v63  ;;  %v12485_v4 = vrot.slane %v1850_v0, %v10601_v41  ;;  %v1873_v7 = vrot.slane %v1857_v63, %v10601_v41  ;;  %v10383_v0 = vld [vmem:[%s12795_s1 + $0x1470] sm:$0xff]  }
 0x24b   :  { %9529 = vmatpush3.bf16.msra.mxu0 %v10323_v39  ;;  %v10360_v39 = vld [vmem:[%s12795_s1 + $0x13e0] sm:$0xff]   ;;  %v10366_v46 = vld [vmem:[%s12795_s1 + $0x1350] sm:$0xff]  }
 0x24c   :  { %9530 = vmatprep.subr.bf16.mxu0 %v10326_v43  ;;  %v1887_v6 = vrot.slane %v1865_v3, %v10601_v41  ;;  %v1866_v9 = vcombine.high %v12485_v4, %v12485_v4  ;;  %v1895_v15 = vcombine.high %v1873_v7, %v1873_v7  ;;  %v10361_v43 = vld [vmem:[%s12795_s1 + $0x13a0] sm:$0xff]   ;;  %v10385_v3 = vld [vmem:[%s12795_s1 + $0x14f0] sm:$0xff]  }
 0x24d   :  { %9551 = vmatpush3.bf16.msra.mxu1 %v10325_v45  ;;  %v10363_v45 = vld [vmem:[%s12795_s1 + $0x1318] sm:$0xff]  }
 0x24e   :  { %9552 = vmatprep.subr.bf16.mxu1 %v10328_v47  ;;  %7554 = vmatprep.mubr.bf16.mxu0 %v1887_v6  ;;  %v1897_v11 = vcombine.high %v1887_v6, %v1887_v6  ;;  %v1894_v13 = vrot.slane %v1866_v9, %v10601_v41  ;;  %v10365_v47 = vld [vmem:[%s12795_s1 + $0x1398] sm:$0xff]   ;;  %v10386_v9 = vld [vmem:[%s12795_s1 + $0x14b0] sm:$0xff]  }
 0x24f   :  { %9531 = vmatpush3.bf16.msra.mxu0 %v10327_v48  ;;  %v10368_v48 = vld [vmem:[%s12795_s1 + $0x13d0] sm:$0xff]  }
 0x250   :  { %9532 = vmatprep.subr.bf16.mxu0 %v10330_v49  ;;  %7594 = vmatprep.mubr.bf16.mxu1 %v1897_v11  ;;  %v1898_v18 = vcombine.high %v1894_v13, %v1894_v13  ;;  %v10367_v49 = vld [vmem:[%s12795_s1 + $0x1310] sm:$0xff]  }
 0x251   :  { %9553 = vmatpush3.bf16.msra.mxu1 %v10329_v50  ;;  %v10370_v50 = vld [vmem:[%s12795_s1 + $0x1348] sm:$0xff]  }
 0x252   :  { %9554 = vmatprep.subr.bf16.mxu1 %v10332_v51  ;;  %v10369_v51 = vld [vmem:[%s12795_s1 + $0x1390] sm:$0xff]  }
 0x253   :  { %9533 = vmatpush3.bf16.msra.mxu0 %v10331_v52  ;;  %v10372_v52 = vld [vmem:[%s12795_s1 + $0x13c8] sm:$0xff]  }
 0x254   :  { %9534 = vmatprep.subr.bf16.mxu0 %v10334_v53  ;;  %v10371_v53 = vld [vmem:[%s12795_s1 + $0x1308] sm:$0xff]  }
 0x255   :  { %9555 = vmatpush3.bf16.msra.mxu1 %v10333_v54  ;;  %v10374_v54 = vld [vmem:[%s12795_s1 + $0x1340] sm:$0xff]  }
 0x256   :  { %9556 = vmatprep.subr.bf16.mxu1 %v10336_v55  ;;  %v10373_v55 = vld [vmem:[%s12795_s1 + $0x1388] sm:$0xff]  }
 0x257   :  { %9535 = vmatpush3.bf16.msra.mxu0 %v10335_v56  ;;  %v10376_v56 = vld [vmem:[%s12795_s1 + $0x13c0] sm:$0xff]  }
 0x258   :  { %9536 = vmatprep.subr.bf16.mxu0 %v10338_v57  ;;  %v10375_v57 = vld [vmem:[%s12795_s1 + $0x1300] sm:$0xff]  }
 0x259   :  { %9557 = vmatpush3.bf16.msra.mxu1 %v10337_v58  ;;  %v1880_v58 = vrot.slane %v12485_v4, %v10601_v41  ;;  %v10384_v4 = vld [vmem:[%s12795_s1 + $0x1430] sm:$0xff]  }
 0x25a   :  { %9558 = vmatprep.subr.bf16.mxu1 %v10340_v59  ;;  %v10379_v59 = vld [vmem:[%s12795_s1 + $0x1478] sm:$0xff]  }
 0x25b   :  { %9537 = vmatpush3.bf16.msra.mxu0 %v10339_v60  ;;  %v10378_v60 = vld [vmem:[%s12795_s1 + $0x1380] sm:$0xff]   ;;  %v1896_v63 = vcombine.high %v1880_v58, %v1880_v58 }
 0x25c   :  { %9538 = vmatprep.subr.bf16.mxu0 %v10342_v62  ;;  %v10380_v62 = vld [vmem:[%s12795_s1 + $0x1438] sm:$0xff]  }
 0x25d   :  { %9559 = vmatpush3.bf16.msra.mxu1 %v10341_v1  ;;  %v10382_v1 = vld [vmem:[%s12795_s1 + $0x14b8] sm:$0xff]  }
 0x25e   :  { %9560 = vmatprep.subr.bf16.mxu1 %v10344_v2 }
 0x25f   :  { %9539 = vmatpush3.bf16.msra.mxu0 %v10343_v5 }
 0x260   :  { %9568 = vmatprep.subr.bf16.mxu0 %v10346_v8 }
 0x261   :  { %9561 = vmatpush3.bf16.msra.mxu1 %v10345_v10 }
 0x262   :  { %v9276_v19 = vpop.f32.mrf.mxu0  ;;  %7555 = vmatmul.mubr.bf16.vlgmr.msra.gmra.mxu0 %v1873_v7  ;;  %9590 = vmatprep.subr.bf16.mxu1 %v10348_v12  ;;  %v10387_v7 = vld [vmem:[%s12795_s1 + $0x1468] sm:$0xff]  }
 0x263   :  { %9569 = vmatpush3.bf16.msra.mxu0 %v10347_v14  ;;  %7634 = vmatprep.mubr.bf16.mxu0 %v1894_v13  ;;  %v10389_v12 = vld [vmem:[%s12795_s1 + $0x14e8] sm:$0xff]  }
 0x264   :  { %v9277_v22 = vpop.f32.mrf.mxu0  ;;  %v9298_v23 = vpop.f32.mrf.mxu1  ;;  %7595 = vmatmul.mubr.bf16.vlgmr.msra.gmra.mxu1 %v1895_v15  ;;  %9570 = vmatprep.subr.bf16.mxu0 %v10350_v16  ;;  %v10388_v15 = vld [vmem:[%s12795_s1 + $0x1428] sm:$0xff]  }
 0x265   :  { %v9278_v25 = vadd.f32 %v9277_v22, %v9276_v19  ;;  %9591 = vmatpush3.bf16.msra.mxu1 %v10349_v17  ;;  %7674 = vmatprep.mubr.bf16.mxu1 %v1898_v18  ;;  %v10391_v18 = vld [vmem:[%s12795_s1 + $0x1460] sm:$0xff]  }
 0x266   :  { %v9279_v27 = vpop.f32.mrf.mxu0  ;;  %v9299_v28 = vpop.f32.mrf.mxu1  ;;  %9592 = vmatprep.subr.bf16.mxu1 %v10352_v20  ;;  %v10390_v20 = vld [vmem:[%s12795_s1 + $0x14a8] sm:$0xff]   ;;  %v10393_v22 = vld [vmem:[%s12795_s1 + $0x14e0] sm:$0xff]  }
 0x267   :  { %v7077_v30 = vadd.f32 %v9278_v25, %v12424_v44  ;;  %v9300_v31 = vadd.f32 %v9299_v28, %v9298_v23  ;;  %9571 = vmatpush3.bf16.msra.mxu0 %v10351_v21  ;;  %v10364_v44 = vld [vmem:[%s12795_s1 + $0x13d8] sm:$0xff]   ;;  %v10392_v23 = vld [vmem:[%s12795_s1 + $0x1420] sm:$0xff]   ;;  %v10399_v28 = vld [vmem:[%s12795_s1 + $0x1450] sm:$0xff]  }
 0x268   :  { %v9280_v33 = vpop.f32.mrf.mxu0  ;;  %9572 = vmatprep.subr.bf16.mxu0 %v10354_v24  ;;  %v9301_v34 = vpop.f32.mrf.mxu1  ;;  %v10395_v24 = vld [vmem:[%s12795_s1 + $0x1458] sm:$0xff]   ;;  %v10394_v25 = vld [vmem:[%s12795_s1 + $0x14a0] sm:$0xff]  }
 0x269   :  { %v12535_v36 = vadd.f32 %v9300_v31, %v7077_v30  ;;  %9593 = vmatpush3.bf16.msra.mxu1 %v10353_v26  ;;  %v10397_v26 = vld [vmem:[%s12795_s1 + $0x14d8] sm:$0xff]   ;;  %v10401_v30 = vld [vmem:[%s12795_s1 + $0x14d0] sm:$0xff]   ;;  %v10405_v34 = vld [vmem:[%s12795_s1 + $0x14c8] sm:$0xff]  }
 0x26a   :  { %9594 = vmatprep.subr.bf16.mxu1 %v10356_v29  ;;  %v9302_v38 = vpop.f32.mrf.mxu1  ;;  %v10396_v27 = vld [vmem:[%s12795_s1 + $0x1418] sm:$0xff]   ;;  %v10400_v31 = vld [vmem:[%s12795_s1 + $0x1410] sm:$0xff]  }
 0x26b   :  { %9573 = vmatpush3.bf16.msra.mxu0 %v10355_v32  ;;  %v10398_v29 = vld [vmem:[%s12795_s1 + $0x1498] sm:$0xff]   ;;  %v10403_v32 = vld [vmem:[%s12795_s1 + $0x1448] sm:$0xff]   ;;  %v10402_v33 = vld [vmem:[%s12795_s1 + $0x1490] sm:$0xff]  }
 0x26c   :  { %9574 = vmatprep.subr.bf16.mxu0 %v10358_v35  ;;  %v10404_v35 = vld [vmem:[%s12795_s1 + $0x1408] sm:$0xff]  }
 0x26d   :  { %9595 = vmatpush3.bf16.msra.mxu1 %v10357_v37  ;;  %v10407_v37 = vld [vmem:[%s12795_s1 + $0x1440] sm:$0xff]  }
 0x26e   :  { %9596 = vmatprep.subr.bf16.mxu1 %v10360_v39  ;;  %v10406_v39 = vld [vmem:[%s12795_s1 + $0x1488] sm:$0xff]  }
 0x26f   :  { %9575 = vmatpush3.bf16.msra.mxu0 %v10359_v40  ;;  %v10409_v40 = vld [vmem:[%s12795_s1 + $0x14c0] sm:$0xff]  }
 0x270   :  { %9576 = vmatprep.subr.bf16.mxu0 %v10362_v42 }
 0x271   :  { %9597 = vmatpush3.bf16.msra.mxu1 %v10361_v43  ;;  %v10408_v43 = vld [vmem:[%s12795_s1 + $0x1400] sm:$0xff]  }
 0x272   :  { %9598 = vmatprep.subr.bf16.mxu1 %v10364_v44 }
 0x273   :  { %9577 = vmatpush3.bf16.msra.mxu0 %v10363_v45  ;;  %v10411_v45 = vld [vmem:[%s12795_s1 + $0x1480] sm:$0xff]  }
 0x274   :  { %9578 = vmatprep.subr.bf16.mxu0 %v10366_v46 }
 0x275   :  { %9599 = vmatpush3.bf16.msra.mxu1 %v10365_v47  ;;  %v10412_v47 = vld [vmem:[%s12795_s1 + $0x1518] sm:$0xff]  }
 0x276   :  { %9600 = vmatprep.subr.bf16.mxu1 %v10368_v48 }
 0x277   :  { %9579 = vmatpush3.bf16.msra.mxu0 %v10367_v49  ;;  %v10453_v49 = vmov 0.0  }
 0x278   :  { %9580 = vmatprep.subr.bf16.mxu0 %v10370_v50 }
 0x279   :  { %9601 = vmatpush3.bf16.msra.mxu1 %v10369_v51  ;;  %v10413_v51 = vld [vmem:[%s12795_s1 + $0x1510] sm:$0xff]  }
 0x27a   :  { %9602 = vmatprep.subr.bf16.mxu1 %v10372_v52 }
 0x27b   :  { %9581 = vmatpush3.bf16.msra.mxu0 %v10371_v53 }
 0x27c   :  { %9582 = vmatprep.subr.bf16.mxu0 %v10374_v54 }
 0x27d   :  { %9603 = vmatpush3.bf16.msra.mxu1 %v10373_v55 }
 0x27e   :  { %9604 = vmatprep.subr.bf16.mxu1 %v10376_v56 }
 0x27f   :  { %9583 = vmatpush3.bf16.msra.mxu0 %v10375_v57 }
 0x280   :  { %9612 = vmatprep.subr.bf16.mxu0 %v10379_v59 }
 0x281   :  { %9605 = vmatpush3.bf16.msra.mxu1 %v10378_v60 }
 0x282   :  { %v9320_v2 = vpop.f32.mrf.mxu0  ;;  %7635 = vmatmul.mubr.bf16.vlgmr.msra.gmra.mxu0 %v1880_v58  ;;  %9634 = vmatprep.subr.bf16.mxu1 %v10381_v61 }
 0x283   :  { %9613 = vmatpush3.bf16.msra.mxu0 %v10380_v62 }
 0x284   :  { %v9321_v5 = vpop.f32.mrf.mxu0  ;;  %v9342_v6 = vpop.f32.mrf.mxu1  ;;  %7675 = vmatmul.mubr.bf16.vlgmr.msra.gmra.mxu1 %v1896_v63  ;;  %9614 = vmatprep.subr.bf16.mxu0 %v10383_v0 }
 0x285   :  { %v9322_v8 = vadd.f32 %v9321_v5, %v9320_v2  ;;  %9635 = vmatpush3.bf16.msra.mxu1 %v10382_v1 }
 0x286   :  { %v9323_v10 = vpop.f32.mrf.mxu0  ;;  %v9343_v11 = vpop.f32.mrf.mxu1  ;;  %9636 = vmatprep.subr.bf16.mxu1 %v10385_v3 }
 0x287   :  { %v7157_v13 = vadd.f32 %v9322_v8, %v12535_v36  ;;  %v9344_v14 = vadd.f32 %v9343_v11, %v9342_v6  ;;  %9615 = vmatpush3.bf16.msra.mxu0 %v10384_v4  ;;  %v38_v36 = vld [vmem:[%s12794_s0 + $0x50] sm:$0x1f] }
 0x288   :  { %v9324_v16 = vpop.f32.mrf.mxu0  ;;  %9616 = vmatprep.subr.bf16.mxu0 %v10387_v7  ;;  %v9345_v17 = vpop.f32.mrf.mxu1  ;;  %v1906_v38 = vrot.slane %v38_v36, %v10601_v41 }
 0x289   :  { %v12636_v19 = vadd.f32 %v9344_v14, %v7157_v13  ;;  %9637 = vmatpush3.bf16.msra.mxu1 %v10386_v9 }
 0x28a   :  { %9638 = vmatprep.subr.bf16.mxu1 %v10389_v12  ;;  %v9346_v21 = vpop.f32.mrf.mxu1  ;;  %v1914_v42 = vcombine.high %v1906_v38, %v1906_v38  ;;  %v1921_v46 = vrot.slane %v1906_v38, %v10601_v41 }
 0x28b   :  { %9617 = vmatpush3.bf16.msra.mxu0 %v10388_v15 }
 0x28c   :  { %9618 = vmatprep.subr.bf16.mxu0 %v10391_v18  ;;  %v1935_v44 = vrot.slane %v1914_v42, %v10601_v41  ;;  %v1936_v50 = vcombine.high %v1921_v46, %v1921_v46 }
 0x28d   :  { %9639 = vmatpush3.bf16.msra.mxu1 %v10390_v20 }
 0x28e   :  { %9640 = vmatprep.subr.bf16.mxu1 %v10393_v22  ;;  %7714 = vmatprep.mubr.bf16.mxu0 %v1935_v44  ;;  %v1937_v48 = vcombine.high %v1935_v44, %v1935_v44 }
 0x28f   :  { %9619 = vmatpush3.bf16.msra.mxu0 %v10392_v23 }
 0x290   :  { %9620 = vmatprep.subr.bf16.mxu0 %v10395_v24  ;;  %7754 = vmatprep.mubr.bf16.mxu1 %v1937_v48 }
 0x291   :  { %9641 = vmatpush3.bf16.msra.mxu1 %v10394_v25 }
 0x292   :  { %9642 = vmatprep.subr.bf16.mxu1 %v10397_v26 }
 0x293   :  { %9621 = vmatpush3.bf16.msra.mxu0 %v10396_v27 }
 0x294   :  { %9622 = vmatprep.subr.bf16.mxu0 %v10399_v28 }
 0x295   :  { %9643 = vmatpush3.bf16.msra.mxu1 %v10398_v29 }
 0x296   :  { %9644 = vmatprep.subr.bf16.mxu1 %v10401_v30 }
 0x297   :  { %9623 = vmatpush3.bf16.msra.mxu0 %v10400_v31 }
 0x298   :  { %9624 = vmatprep.subr.bf16.mxu0 %v10403_v32 }
 0x299   :  { %9645 = vmatpush3.bf16.msra.mxu1 %v10402_v33 }
 0x29a   :  { %9646 = vmatprep.subr.bf16.mxu1 %v10405_v34 }
 0x29b   :  { %9625 = vmatpush3.bf16.msra.mxu0 %v10404_v35 }
 0x29c   :  { %9626 = vmatprep.subr.bf16.mxu0 %v10407_v37 }
 0x29d   :  { %9647 = vmatpush3.bf16.msra.mxu1 %v10406_v39 }
 0x29e   :  { %9648 = vmatprep.subr.bf16.mxu1 %v10409_v40 }
 0x29f   :  { %9627 = vmatpush3.bf16.msra.mxu0 %v10408_v43 }
 0x2a0   :  { %9677 = vmatprep.subr.bf16.mxu0 %v10453_v49 }
 0x2a1   :  { %9649 = vmatpush3.bf16.msra.mxu1 %v10411_v45 }
 0x2a2   :  { %v9364_v52 = vpop.f32.mrf.mxu0  ;;  %7715 = vmatmul.mubr.bf16.vlgmr.msra.gmra.mxu0 %v1921_v46  ;;  %9689 = vmatprep.subr.bf16.mxu1 %v10453_v49 }
 0x2a3   :  { %9678 = vmatpush3.bf16.msra.mxu0 %v10412_v47  ;;  %9685 = vmatprep.mubr.msk.bf16.mxu0 %vm10454_vm0, %v10453_v49 }
 0x2a4   :  { %v9365_v53 = vpop.f32.mrf.mxu0  ;;  %v9386_v54 = vpop.f32.mrf.mxu1  ;;  %7755 = vmatmul.mubr.bf16.vlgmr.msra.gmra.mxu1 %v1936_v50  ;;  %9679 = vmatprep.subr.bf16.mxu0 %v10453_v49 }
 0x2a5   :  { %v9366_v55 = vadd.f32 %v9365_v53, %v9364_v52  ;;  %9705 = vmatprep.mubr.msk.bf16.mxu1 %vm10454_vm0, %v10453_v49 }
 0x2a6   :  { %12 = vsyncpa [#allocation3], 0  ;;  %v1899_v56 = vcombine.high %v38_v36, %v38_v36  ;;  %v9367_v57 = vpop.f32.mrf.mxu0  ;;  %v9387_v58 = vpop.f32.mrf.mxu1  ;;  %v10414_v61 = vld [vmem:[%s12795_s1 + $0x1508] sm:$0xff]   ;;  %v10415_v3 = vld [vmem:[%s12795_s1 + $0x1500] sm:$0xff]   ;;  %vm6078_vm1 = vcmask 523264   ;;  %vm7875_vm2 = vcmask 1043456  }
 0x2a7   :  { %v7237_v59 = vadd.f32 %v9366_v55, %v12636_v19  ;;  %v9388_v60 = vadd.f32 %v9387_v58, %v9386_v54  ;;  %9680 = vmatpush3.bf16.msra.mxu0 %v10413_v51  ;;  %v10416_v16 = vld [vmem:[%s12797_s3 + $0x38] ss:$0 sps:$4 sm:$0xff]   ;;  %v10417_v18 = vld [vmem:[%s12797_s3 + $0x30] sm:$0xff]   ;;  %v10418_v19 = vld [vmem:[%s12797_s3 + $0x28] sm:$0xff]   ;;  %vm7976_vm3 = vcmask 1041408   ;;  %vm7871_vm4 = vcmask 982016  }
 0x2a8   :  { %v9368_v62 = vpop.f32.mrf.mxu0  ;;  %9681 = vmatprep.subr.bf16.mxu0 %v10453_v49  ;;  %v9389_v63 = vpop.f32.mrf.mxu1  ;;  %v1913_v1 = vrot.slane %v1899_v56, %v10601_v41  ;;  %v7877_v17 = vsel %vm7875_vm2, %v10416_v16, 0  ;;  %v10419_v23 = vld [vmem:[%s12797_s3 + $0x20] sm:$0xff]   ;;  %v10420_v31 = vld [vmem:[%s12797_s3 + $0x18] sm:$0xff]   ;;  %v10421_v34 = vld [vmem:[%s12797_s3 + $0x10] sm:$0xff]   ;;  %vm7972_vm5 = vcmask 687104   ;;  %s10455_s8 = smov [#allocation2]  }
 0x2a9   :  { %v7277_v0 = vadd.f32 %v9388_v60, %v7237_v59  ;;  %9690 = vmatpush3.bf16.msra.mxu1 %v7877_v17  ;;  %v10422_v35 = vld [vmem:[%s12797_s3 + $0x8] sm:$0xff]   ;;  %v10423_v36 = vld [vmem:[%s12797_s3] sm:$0xff]   ;;  %v10426_v40 = vld [vmem:[%s12799_s5 + $0x18] sm:$0xff]   ;;  %vm8020_vm6 = vcmask 164864  }
 0x2aa   :  { %v9390_v2 = vpop.f32.mrf.mxu1  ;;  %v1928_v4 = vrot.slane %v1913_v1, %v10601_v41  ;;  %9691 = vmatprep.subr.bf16.mxu1 %v10453_v49  ;;  %v10424_v37 = vld [vmem:[%s12799_s5 + $0x28] ss:$0 sps:$4 sm:$0x33]   ;;  %v10425_v39 = vld [vmem:[%s12799_s5 + $0x20] sm:$0xff]   ;;  %v10427_v45 = vld [vmem:[%s12799_s5 + $0x10] sm:$0xff]  }
 0x2ab   :  { %9682 = vmatpush3.bf16.msra.mxu0 %v10414_v61  ;;  %v7978_v38 = vsel %vm7976_vm3, %v10424_v37, 0 }
 0x2ac   :  { %9683 = vmatprep.subr.bf16.mxu0 %v10453_v49 }
 0x2ad   :  { %9692 = vmatpush3.bf16.msra.mxu1 %v10417_v18 }
 0x2ae   :  { %9693 = vmatprep.subr.bf16.mxu1 %v10453_v49 }
 0x2af   :  { %9684 = vmatpush3.bf16.msra.mxu0 %v10415_v3 }
 0x2b0   :  { %9709 = vmatprep.subr.bf16.mxu0 %v10453_v49 }
 0x2b1   :  { %9694 = vmatpush3.bf16.msra.mxu1 %v10418_v19 }
 0x2b2   :  { %9686 = vmatmul.mubr.msk.bf16.vlgmr.msra.gmra.mxu0 %vm6078_vm1, %v1928_v4  ;;  %9695 = vmatprep.subr.bf16.mxu1 %v10453_v49 }
 0x2b3   :  { %9721 = vmatprep.mubr.msk.bf16.mxu0 %vm10454_vm0, %v10453_v49  ;;  %9710 = vmatpush3.bf16.msra.mxu0 %v7978_v38 }
 0x2b4   :  { %9711 = vmatprep.subr.bf16.mxu0 %v10453_v49 }
 0x2b5   :  { %9696 = vmatpush3.bf16.msra.mxu1 %v10419_v23 }
 0x2b6   :  { %9697 = vmatprep.subr.bf16.mxu1 %v10453_v49 }
 0x2b7   :  { %9712 = vmatpush3.bf16.msra.mxu0 %v10425_v39 }
 0x2b8   :  { %9713 = vmatprep.subr.bf16.mxu0 %v10453_v49 }
 0x2b9   :  { %9698 = vmatpush3.bf16.msra.mxu1 %v10420_v31 }
 0x2ba   :  { %9699 = vmatprep.subr.bf16.mxu1 %v10453_v49 }
 0x2bb   :  { %9714 = vmatpush3.bf16.msra.mxu0 %v10426_v40 }
 0x2bc   :  { %9715 = vmatprep.subr.bf16.mxu0 %v10453_v49 }
 0x2bd   :  { %9700 = vmatpush3.bf16.msra.mxu1 %v10421_v34  ;;  %v10428_v34 = vld [vmem:[%s12799_s5 + $0x8] sm:$0xff]  }
 0x2be   :  { %9701 = vmatprep.subr.bf16.mxu1 %v10453_v49 }
 0x2bf   :  { %9716 = vmatpush3.bf16.msra.mxu0 %v10427_v45 }
 0x2c0   :  { %9717 = vmatprep.subr.bf16.mxu0 %v10453_v49 }
 0x2c1   :  { %9702 = vmatpush3.bf16.msra.mxu1 %v10422_v35  ;;  %v10429_v35 = vld [vmem:[%s12799_s5] sm:$0xff]   ;;  %s8028_s5 = sshll.u32 %s10455_s8, 4  ;;  %s8029_s5 = int_to_ptr.vmem [resolvable:$true] %s8028_s5 }
 0x2c2   :  { %v9408_v5 = vpop.f32.mrf.mxu0  ;;  %9703 = vmatprep.subr.bf16.mxu1 %v10453_v49  ;;  %p10435_p1 = scmp.lt.s32.totalorder %s8029_s5, %s8029_s5 }
 0x2c3   :  { %9718 = vmatpush3.bf16.msra.mxu0 %v10428_v34 }
 0x2c4   :  { %v9409_v6 = vpop.f32.mrf.mxu0  ;;  %v9430_v7 = vpop.f32.mrf.mxu1  ;;  %9719 = vmatprep.subr.bf16.mxu0 %v10453_v49  ;;  %v8724_v49 = vld [vmem:[%s12800_s6] ss:$0 sm:$0xff] }
 0x2c5   :  { %v9410_v8 = vadd.f32 %v9409_v6, %v9408_v5  ;;  %9704 = vmatpush3.bf16.msra.mxu1 %v10423_v36  ;;  %v8714_v36 = vld [vmem:[%s12798_s4] ss:$0 sm:$0xff]  ;;  %s10430_s4 = scalar_lea.vmem %s8029_s5, 32 }
 0x2c6   :  { %v9411_v9 = vpop.f32.mrf.mxu0  ;;  %v9431_v10 = vpop.f32.mrf.mxu1  ;;  %p10431_p0 = scmp.ne.s32.totalorder %s8029_s5, %s10430_s4  ;;  %p10436_p2 = scmp.lt.s32.totalorder %s10430_s4, %s10430_s4 }
 0x2c7   :  { %v7317_v11 = vadd.f32 %v9410_v8, %v7277_v0  ;;  %v9432_v12 = vadd.f32 %v9431_v10, %v9430_v7  ;;  %9720 = vmatpush3.bf16.msra.mxu0 %v10429_v35 }
 0x2c8   :  { %v9412_v13 = vpop.f32.mrf.mxu0  ;;  %v9433_v14 = vpop.f32.mrf.mxu1  ;;  %p10437_p3 = por %p10436_p2, %p10435_p1 }
 0x2c9   :  { %v7357_v15 = vadd.f32 %v9432_v12, %v7317_v11 }
 0x2ca   :  { %v9434_v41 = vpop.f32.mrf.mxu1  ;;  %p10438_p4 = pnand %p10437_p3, %p10431_p0 }
 0x2e2   :  { %v9452_v20 = vpop.f32.mrf.mxu0 }
 0x2e4   :  { %v9453_v21 = vpop.f32.mrf.mxu0  ;;  %v9474_v22 = vpop.f32.mrf.mxu1 }
 0x2e5   :  { %v9454_v24 = vadd.f32 %v9453_v21, %v9452_v20 }
 0x2e6   :  { %v9455_v25 = vpop.f32.mrf.mxu0  ;;  %v9475_v26 = vpop.f32.mrf.mxu1 }
 0x2e7   :  { %v7397_v27 = vadd.f32 %v9454_v24, %v7357_v15  ;;  %v9476_v28 = vadd.f32 %v9475_v26, %v9474_v22 }
 0x2e8   :  { %v9456_v29 = vpop.f32.mrf.mxu0  ;;  %v9477_v30 = vpop.f32.mrf.mxu1 }
 0x2e9   :  { %v7437_v32 = vadd.f32 %v9476_v28, %v7397_v27 }
 0x2ea   :  { %v9478_v33 = vpop.f32.mrf.mxu1 }
 0x302   :  { %v9496_v42 = vpop.f32.mrf.mxu0 }
 0x304   :  { %v9497_v43 = vpop.f32.mrf.mxu0  ;;  %v9518_v44 = vpop.f32.mrf.mxu1 }
 0x305   :  { %v9498_v46 = vadd.f32 %v9497_v43, %v9496_v42 }
 0x306   :  { %v9499_v47 = vpop.f32.mrf.mxu0  ;;  %v9519_v48 = vpop.f32.mrf.mxu1 }
 0x307   :  { %v7477_v50 = vadd.f32 %v9498_v46, %v7437_v32  ;;  %v9520_v51 = vadd.f32 %v9519_v48, %v9518_v44 }
 0x308   :  { %v9500_v52 = vpop.f32.mrf.mxu0  ;;  %v9521_v53 = vpop.f32.mrf.mxu1 }
 0x309   :  { %v7517_v54 = vadd.f32 %v9520_v51, %v7477_v50 }
 0x30a   :  { %v9522_v55 = vpop.f32.mrf.mxu1 }
 0x322   :  { %v9540_v56 = vpop.f32.mrf.mxu0 }
 0x324   :  { %v9541_v57 = vpop.f32.mrf.mxu0  ;;  %v9562_v58 = vpop.f32.mrf.mxu1 }
 0x325   :  { %v9542_v59 = vadd.f32 %v9541_v57, %v9540_v56 }
 0x326   :  { %v9543_v60 = vpop.f32.mrf.mxu0  ;;  %v9563_v61 = vpop.f32.mrf.mxu1 }
 0x327   :  { %v7557_v62 = vadd.f32 %v9542_v59, %v7517_v54  ;;  %v9564_v63 = vadd.f32 %v9563_v61, %v9562_v58 }
 0x328   :  { %v9544_v0 = vpop.f32.mrf.mxu0  ;;  %v9565_v1 = vpop.f32.mrf.mxu1 }
 0x329   :  { %v7597_v2 = vadd.f32 %v9564_v63, %v7557_v62 }
 0x32a   :  { %v9566_v3 = vpop.f32.mrf.mxu1 }
 0x342   :  { %v9584_v4 = vpop.f32.mrf.mxu0 }
 0x344   :  { %v9585_v5 = vpop.f32.mrf.mxu0  ;;  %v9606_v6 = vpop.f32.mrf.mxu1 }
 0x345   :  { %v9586_v13 = vadd.f32 %v9585_v5, %v9584_v4 }
 0x346   :  { %v9587_v7 = vpop.f32.mrf.mxu0  ;;  %v9607_v8 = vpop.f32.mrf.mxu1 }
 0x347   :  { %v7637_v17 = vadd.f32 %v9586_v13, %v7597_v2  ;;  %v9608_v18 = vadd.f32 %v9607_v8, %v9606_v6 }
 0x348   :  { %v9588_v9 = vpop.f32.mrf.mxu0  ;;  %v9609_v10 = vpop.f32.mrf.mxu1 }
 0x349   :  { %v7677_v23 = vadd.f32 %v9608_v18, %v7637_v17 }
 0x34a   :  { %v9610_v11 = vpop.f32.mrf.mxu1 }
 0x362   :  { %v9628_v12 = vpop.f32.mrf.mxu0 }
 0x364   :  { %v9629_v14 = vpop.f32.mrf.mxu0  ;;  %v9650_v15 = vpop.f32.mrf.mxu1 }
 0x365   :  { %v9630_v21 = vadd.f32 %v9629_v14, %v9628_v12 }
 0x366   :  { %v9631_v41 = vpop.f32.mrf.mxu0  ;;  %v9651_v16 = vpop.f32.mrf.mxu1 }
 0x367   :  { %v7717_v24 = vadd.f32 %v9630_v21, %v7677_v23  ;;  %v9652_v25 = vadd.f32 %v9651_v16, %v9650_v15 }
 0x368   :  { %v9632_v19 = vpop.f32.mrf.mxu0  ;;  %v9653_v20 = vpop.f32.mrf.mxu1 }
 0x369   :  { %v7757_v26 = vadd.f32 %v9652_v25, %v7717_v24 }
 0x36a   :  { %v9654_v22 = vpop.f32.mrf.mxu1 }
 0x372   :  { %v7796_v27 = vpop.f32.mrf.mxu0 }
 0x373   :  { %v7797_v28 = vadd.f32 %v7796_v27, %v7757_v26 }
 0x374   :  { %v9687_v29 = vpop.f32.mrf.mxu0 }
 0x375   :  { %v7802_v30 = vmax.f32 %v7797_v28, 0.0 }
 0x376   :  { %v7799_v31 = vpop.f32.mrf.mxu0 }
 0x377   :  { %v7803_v32 = vpack.c.bf16 %v7802_v30, %v7802_v30 }
 0x378   :  { %v9688_v33 = vpop.f32.mrf.mxu0 }
 0x379   :  { %9706 = vmatmul.mubr.msk.bf16.vlgmr.msra.gmra.mxu1 %vm7871_vm4, %v7803_v32 }
 0x439   :  { %v7913_v37 = vpop.f32.mrf.mxu1 }
 0x43a   :  { %v7914_v38 = vadd.f32 %v8714_v36, %v7913_v37 }
 0x43b   :  { %v9707_v39 = vpop.f32.mrf.mxu1 }
 0x43c   :  { %v7919_v40 = vmax.f32 %v7914_v38, 0.0 }
 0x43d   :  { %v7916_v42 = vpop.f32.mrf.mxu1 }
 0x43e   :  { %v7920_v43 = vpack.c.bf16 %v7919_v40, %v7919_v40 }
 0x43f   :  { %v9708_v44 = vpop.f32.mrf.mxu1 }
 0x440   :  { %9722 = vmatmul.mubr.msk.bf16.vlgmr.msra.gmra.mxu0 %vm7972_vm5, %v7920_v43 }
 0x500   :  { %v8014_v45 = vpop.f32.mrf.mxu0 }
 0x501   :  { %v8015_v46 = vadd.f32 %v8724_v49, %v8014_v45 }
 0x502   :  { %v9723_v47 = vpop.f32.mrf.mxu0 }
 0x503   :  { %8021 = vst.msk [vmem:[#allocation2] sm:$0x3] %vm8020_vm6, %v8015_v46 }
 0x504   :  { %v8017_v48 = vpop.f32.mrf.mxu0 }
 0x505   :  { %10441 = shalt.err (!%p10438_p4)
}
 0x506   :  { %8031 = dma.vmem_to_hbm [thread:$0]  %s8029_s5, 32, %s12801_s7, [#allocation3]   ;;  %v9724_v50 = vpop.f32.mrf.mxu0 }
 0x507   :  { %10450 = dma.done.wait [#allocation3], 32  }
 0x508   :  { %10451 = vsyncadd [#allocation3], 4294967264 }
 0x509   :  { %8035 = vsyncpa [#allocation3], 1 }

</bundles_post_ra>
